<compile_context>
chip_gen: v5e
topology: v5e:2x2
jax: 0.10.0
libtpu: 0.0.40
codegen_flags: <defaults>
</compile_context>

<pallas_src>
import functools

import jax
import jax.numpy as jnp
import numpy as np
from jax.experimental import pallas as pl
from jax.experimental.pallas import tpu as pltpu

EPS = 1e-5  # torch.nn.InstanceNorm2d default


def _down_kernel(x_ref, w1_ref, w2_ref, gamma_ref, beta_ref, out_ref,
                 pad_ref, pool_ref, *, H, W, Cp):
    """One batch element: conv3x3 -> IN -> ReLU -> conv3x3 -> IN -> ReLU -> maxpool2."""
    HW = H * W
    inv_hw = 1.0 / float(HW)
    gamma = gamma_ref[...]                    # (1, Cp) f32
    beta = beta_ref[...]                      # (1, Cp) f32
    taps = [(dy, dx) for dy in range(3) for dx in range(3)]

    def inorm_relu(y):                        # y: (HW, Cp) f32; per-(instance, channel) stats
        mean = jnp.sum(y, axis=0, keepdims=True) * inv_hw
        ex2 = jnp.sum(y * y, axis=0, keepdims=True) * inv_hw
        var = ex2 - mean * mean               # one-pass biased variance (E[x^2] - mean^2)
        y = (y - mean) * jax.lax.rsqrt(var + EPS)
        return jnp.maximum(y * gamma + beta, 0.0)

    def conv3x3(read_tap, w_ref):             # 9 per-tap MXU dots, f32 accumulation, no im2col
        acc = None
        for t, (dy, dx) in enumerate(taps):
            d = jnp.dot(read_tap(dy, dx), w_ref[t],
                        preferred_element_type=jnp.float32)       # (HW, Cp) f32
            acc = d if acc is None else acc + d
        return acc

    # ---- conv1: input block is spatially pre-padded bf16 ----
    y1 = inorm_relu(conv3x3(
        lambda dy, dx: x_ref[0, pl.ds(dy, H), pl.ds(dx, W), :].reshape(HW, Cp),
        w1_ref))

    # ---- stage y1 (bf16) with a zero 1-px halo for conv2 ----
    # NOTE: the halo is re-zeroed every grid step on purpose -- scratch is per-core and
    # the batch axis is "parallel", so hoisting this under pl.when(program_id==0) would
    # leave the second core's halo uninitialized.
    zrow = jnp.zeros((1, W + 2, Cp), jnp.bfloat16)
    zcol = jnp.zeros((H + 2, 1, Cp), jnp.bfloat16)
    pad_ref[pl.ds(0, 1), :, :] = zrow
    pad_ref[pl.ds(H + 1, 1), :, :] = zrow
    pad_ref[:, pl.ds(0, 1), :] = zcol
    pad_ref[:, pl.ds(W + 1, 1), :] = zcol
    pad_ref[pl.ds(1, H), pl.ds(1, W), :] = y1.astype(jnp.bfloat16).reshape(H, W, Cp)

    # ---- conv2: 9 per-tap MXU dots from the bf16 staged buffer ----
    y2 = inorm_relu(conv3x3(
        lambda dy, dx: pad_ref[pl.ds(dy, H), pl.ds(dx, W), :].reshape(HW, Cp),
        w2_ref)).reshape(H, W, Cp)

    # ---- MaxPool2d(2): H direction in vregs, W direction via two stride-2 loads ----
    ha = jnp.max(y2.reshape(H // 2, 2, W, Cp), axis=1)             # (H/2, W, Cp) f32
    pool_ref[...] = ha                                             # dedicated pool scratch
    even = pool_ref[:, pl.ds(0, W // 2, 2), :]                     # (H/2, W/2, Cp)
    odd = pool_ref[:, pl.ds(1, W // 2, 2), :]
    out_ref[0, :, :, :] = jnp.maximum(even, odd).astype(out_ref.dtype)  # dense bf16 store


def _round_up(x, m):
    return (x + m - 1) // m * m


def down_forward(x_nchw, w1_hwio, w2_hwio, gamma, beta):
    """Pallas implementation of Down.forward. x_nchw: (N, Cin, H, W) -> (N, Cout, H/2, W/2)."""
    N, Cin, H, W = x_nchw.shape
    KH, KW, _, Cout = w1_hwio.shape
    assert (KH, KW) == (3, 3) and H % 2 == 0 and W % 2 == 0

    Cp = _round_up(max(Cin, Cout), 128)       # lane-dense channel count, shared by both convs
    HW = H * W

    # NHWC, spatial zero-pad (pad=1), channel zero-pad to Cp; bf16 activations for the MXU
    x = jnp.transpose(x_nchw, (0, 2, 3, 1)).astype(jnp.float32)
    xp = jnp.pad(x, ((0, 0), (1, 1), (1, 1), (0, Cp - Cin))).astype(jnp.bfloat16)

    # weights: (3,3,Ci,Co) -> zero-pad channels -> (9, Cp, Cp) per-tap matrices, bf16
    w1p = jnp.pad(w1_hwio.astype(jnp.float32),
                  ((0, 0), (0, 0), (0, Cp - Cin), (0, Cp - Cout)))
    w1p = w1p.reshape(9, Cp, Cp).astype(jnp.bfloat16)
    w2p = jnp.pad(w2_hwio.astype(jnp.float32),
                  ((0, 0), (0, 0), (0, Cp - Cout), (0, Cp - Cout)))
    w2p = w2p.reshape(9, Cp, Cp).astype(jnp.bfloat16)

    # shared InstanceNorm affine params (padded channels get gamma=beta=0 -> stay zero)
    g = jnp.pad(gamma.astype(jnp.float32), (0, Cp - Cout)).reshape(1, Cp)
    b = jnp.pad(beta.astype(jnp.float32), (0, Cp - Cout)).reshape(1, Cp)

    kernel = functools.partial(_down_kernel, H=H, W=W, Cp=Cp)

    # real (unpadded) flops; one rsqrt per (instance, channel, norm)
    cost = pl.CostEstimate(
        flops=int(2 * N * HW * 9 * (Cin * Cout + Cout * Cout)),
        transcendentals=int(2 * N * Cout),
        bytes_accessed=int(xp.size * 2 + (w1p.size + w2p.size) * 2
                           + (g.size + b.size) * 4
                           + N * (H // 2) * (W // 2) * Cp * 2))

    # per-step VMEM footprint (double-buffered pipeline blocks + scratch + accumulator
    # headroom), 2x margin, clamped well under v7x's 64 MiB per-core VMEM
    in_blk = 2 * (H + 2) * (W + 2) * Cp * 2
    w_blk = 2 * 2 * 9 * Cp * Cp * 2
    affine = 2 * 2 * 8 * Cp * 4
    out_blk = 2 * (H // 2) * (W // 2) * Cp * 2
    scratch = (H + 2) * (W + 2) * Cp * 2 + (H // 2) * W * Cp * 4
    acc_headroom = 2 * HW * Cp * 4
    vmem_bytes = int(min(48 * 1024 * 1024,
                         max(16 * 1024 * 1024,
                             2 * (in_blk + w_blk + affine + out_blk
                                  + scratch + acc_headroom))))

    out_nhwc = pl.pallas_call(
        kernel,
        out_shape=jax.ShapeDtypeStruct((N, H // 2, W // 2, Cp), jnp.bfloat16),
        grid_spec=pltpu.PrefetchScalarGridSpec(
            num_scalar_prefetch=0,
            grid=(N,),
            in_specs=[
                pl.BlockSpec((1, H + 2, W + 2, Cp), lambda n: (n, 0, 0, 0)),
                pl.BlockSpec((9, Cp, Cp), lambda n: (0, 0, 0)),
                pl.BlockSpec((9, Cp, Cp), lambda n: (0, 0, 0)),
                pl.BlockSpec((1, Cp), lambda n: (0, 0)),
                pl.BlockSpec((1, Cp), lambda n: (0, 0)),
            ],
            out_specs=pl.BlockSpec((1, H // 2, W // 2, Cp), lambda n: (n, 0, 0, 0)),
            scratch_shapes=[
                pltpu.VMEM((H + 2, W + 2, Cp), jnp.bfloat16),   # conv2 halo staging (bf16)
                pltpu.VMEM((H // 2, W, Cp), jnp.float32),       # max-pool scratch
            ],
        ),
        compiler_params=pltpu.CompilerParams(
            dimension_semantics=("parallel",),                  # batch axis across cores
            vmem_limit_bytes=vmem_bytes),
        cost_estimate=cost,
    )(xp, w1p, w2p, g, b)

    # slice real channels from the lane-padded bf16 output, then NCHW + f32 (module dtype)
    return jnp.transpose(out_nhwc[..., :Cout], (0, 3, 1, 2)).astype(jnp.float32)


def down_reference(x_nchw, w1_hwio, w2_hwio, gamma, beta):
    """Pure-JAX reference for the PyTorch module. Conv inputs/weights are cast to bf16
    (f32 accumulation) to mirror the kernel's single-pass MXU numerics."""
    x = jnp.transpose(x_nchw, (0, 2, 3, 1))

    def conv(y, w):
        return jax.lax.conv_general_dilated(
            y.astype(jnp.bfloat16), w.astype(jnp.bfloat16),
            window_strides=(1, 1), padding="SAME",
            dimension_numbers=("NHWC", "HWIO", "NHWC"),
            preferred_element_type=jnp.float32)

    def inorm_relu(y):
        mean = jnp.mean(y, axis=(1, 2), keepdims=True)
        var = jnp.mean((y - mean) ** 2, axis=(1, 2), keepdims=True)
        y = (y - mean) * jax.lax.rsqrt(var + EPS)
        y = y * gamma.reshape(1, 1, 1, -1) + beta.reshape(1, 1, 1, -1)
        return jnp.maximum(y, 0.0)

    y = inorm_relu(conv(x, w1_hwio))
    y = inorm_relu(conv(y, w2_hwio))
    Nb, Hh, Ww, C = y.shape
    y = y.reshape(Nb, Hh // 2, 2, Ww // 2, 2, C).max(axis=(2, 4))
    return jnp.transpose(y, (0, 3, 1, 2))


if __name__ == "__main__":
    N, Cin, Cout, H, W = 2, 4, 8, 16, 16
    key = jax.random.PRNGKey(0)
    k1, k2, k3, k4, k5 = jax.random.split(key, 5)

    # deterministic synthetic parameters (shapes from the module __init__)
    x = jax.random.normal(k1, (N, Cin, H, W), jnp.float32)
    w1 = 0.2 * jax.random.normal(k2, (3, 3, Cin, Cout), jnp.float32)   # conv1 (HWIO)
    w2 = 0.2 * jax.random.normal(k3, (3, 3, Cout, Cout), jnp.float32)  # conv2 (HWIO)
    gamma = 1.0 + 0.1 * jax.random.normal(k4, (Cout,), jnp.float32)    # INorm weight
    beta = 0.1 * jax.random.normal(k5, (Cout,), jnp.float32)           # INorm bias

    out = jax.block_until_ready(down_forward(x, w1, w2, gamma, beta))
    ref = jax.block_until_ready(down_reference(x, w1, w2, gamma, beta))

    assert out.shape == (N, Cout, H // 2, W // 2), out.shape
    # kernel emits bf16 (perf feedback), so tolerance covers bf16 output rounding
    np.testing.assert_allclose(np.asarray(out), np.asarray(ref),
                               rtol=2e-2, atol=2e-2)
    print("KERNEL_OK")
</pallas_src>

<mosaic_0001>
module attributes {stable_mosaic.version = 11 : i64} {
  func.func @_down_kernel(%arg0: i32, %arg1: memref<1x18x18x128xbf16, #tpu.memory_space<vmem>>, %arg2: memref<9x128x128xbf16, #tpu.memory_space<vmem>>, %arg3: memref<9x128x128xbf16, #tpu.memory_space<vmem>>, %arg4: memref<1x128xf32, #tpu.memory_space<vmem>>, %arg5: memref<1x128xf32, #tpu.memory_space<vmem>>, %arg6: memref<1x8x8x128xbf16, #tpu.memory_space<vmem>>, %arg7: memref<18x18x128xbf16, #tpu.memory_space<vmem>>, %arg8: memref<8x16x128xf32, #tpu.memory_space<vmem>>) attributes {dimension_semantics = [#tpu.dimension_semantics<parallel>], iteration_bounds = array<i64: 2>, scalar_prefetch = 0 : i64, scratch_operands = 2 : i64, tpu.core_type = #tpu.core_type<tc>, window_params = [{transform_indices = @transform_0, window_bounds = array<i64: 1, 18, 18, 128>}, {pipeline_mode = #tpu.pipeline_mode<synchronous>, transform_indices = @transform_1, window_bounds = array<i64: 9, 128, 128>}, {pipeline_mode = #tpu.pipeline_mode<synchronous>, transform_indices = @transform_2, window_bounds = array<i64: 9, 128, 128>}, {pipeline_mode = #tpu.pipeline_mode<synchronous>, transform_indices = @transform_3, window_bounds = array<i64: 1, 128>}, {pipeline_mode = #tpu.pipeline_mode<synchronous>, transform_indices = @transform_4, window_bounds = array<i64: 1, 128>}, {transform_indices = @transform_5, window_bounds = array<i64: 1, 8, 8, 128>}]} {
    %c0 = arith.constant 0 : index
    %c0_0 = arith.constant 0 : index
    %0 = vector.load %arg4[%c0, %c0_0] : memref<1x128xf32, #tpu.memory_space<vmem>>, vector<1x128xf32>
    %c0_1 = arith.constant 0 : index
    %c0_2 = arith.constant 0 : index
    %1 = vector.load %arg5[%c0_1, %c0_2] : memref<1x128xf32, #tpu.memory_space<vmem>>, vector<1x128xf32>
    %c0_3 = arith.constant 0 : index
    %c0_4 = arith.constant 0 : index
    %c0_5 = arith.constant 0 : index
    %c0_6 = arith.constant 0 : index
    %2 = vector.load %arg1[%c0_3, %c0_4, %c0_5, %c0_6] : memref<1x18x18x128xbf16, #tpu.memory_space<vmem>>, vector<1x16x16x128xbf16>
    %3 = vector.shape_cast %2 : vector<1x16x16x128xbf16> to vector<16x16x128xbf16>
    %4 = vector.shape_cast %3 : vector<16x16x128xbf16> to vector<256x128xbf16>
    %c0_7 = arith.constant 0 : index
    %c0_8 = arith.constant 0 : index
    %c0_9 = arith.constant 0 : index
    %5 = vector.load %arg2[%c0_7, %c0_8, %c0_9] : memref<9x128x128xbf16, #tpu.memory_space<vmem>>, vector<1x128x128xbf16>
    %6 = vector.shape_cast %5 : vector<1x128x128xbf16> to vector<128x128xbf16>
    %cst = arith.constant dense<0.000000e+00> : vector<256x128xf32>
    %7 = tpu.matmul %4, %6, %cst {dimension_numbers = #tpu.dot_dimension_numbers<[1], [0], [0], [1], [0, 0, 1, 1], [], []>} : vector<256x128xbf16>, vector<128x128xbf16>, vector<256x128xf32> -> vector<256x128xf32>
    %c0_10 = arith.constant 0 : index
    %c0_11 = arith.constant 0 : index
    %c1 = arith.constant 1 : index
    %c0_12 = arith.constant 0 : index
    %8 = vector.load %arg1[%c0_10, %c0_11, %c1, %c0_12] : memref<1x18x18x128xbf16, #tpu.memory_space<vmem>>, vector<1x16x16x128xbf16>
    %9 = vector.shape_cast %8 : vector<1x16x16x128xbf16> to vector<16x16x128xbf16>
    %10 = vector.shape_cast %9 : vector<16x16x128xbf16> to vector<256x128xbf16>
    %c1_13 = arith.constant 1 : index
    %c0_14 = arith.constant 0 : index
    %c0_15 = arith.constant 0 : index
    %11 = vector.load %arg2[%c1_13, %c0_14, %c0_15] : memref<9x128x128xbf16, #tpu.memory_space<vmem>>, vector<1x128x128xbf16>
    %12 = vector.shape_cast %11 : vector<1x128x128xbf16> to vector<128x128xbf16>
    %cst_16 = arith.constant dense<0.000000e+00> : vector<256x128xf32>
    %13 = tpu.matmul %10, %12, %cst_16 {dimension_numbers = #tpu.dot_dimension_numbers<[1], [0], [0], [1], [0, 0, 1, 1], [], []>} : vector<256x128xbf16>, vector<128x128xbf16>, vector<256x128xf32> -> vector<256x128xf32>
    %14 = arith.addf %7, %13 : vector<256x128xf32>
    %c0_17 = arith.constant 0 : index
    %c0_18 = arith.constant 0 : index
    %c2 = arith.constant 2 : index
    %c0_19 = arith.constant 0 : index
    %15 = vector.load %arg1[%c0_17, %c0_18, %c2, %c0_19] : memref<1x18x18x128xbf16, #tpu.memory_space<vmem>>, vector<1x16x16x128xbf16>
    %16 = vector.shape_cast %15 : vector<1x16x16x128xbf16> to vector<16x16x128xbf16>
    %17 = vector.shape_cast %16 : vector<16x16x128xbf16> to vector<256x128xbf16>
    %c2_20 = arith.constant 2 : index
    %c0_21 = arith.constant 0 : index
    %c0_22 = arith.constant 0 : index
    %18 = vector.load %arg2[%c2_20, %c0_21, %c0_22] : memref<9x128x128xbf16, #tpu.memory_space<vmem>>, vector<1x128x128xbf16>
    %19 = vector.shape_cast %18 : vector<1x128x128xbf16> to vector<128x128xbf16>
    %cst_23 = arith.constant dense<0.000000e+00> : vector<256x128xf32>
    %20 = tpu.matmul %17, %19, %cst_23 {dimension_numbers = #tpu.dot_dimension_numbers<[1], [0], [0], [1], [0, 0, 1, 1], [], []>} : vector<256x128xbf16>, vector<128x128xbf16>, vector<256x128xf32> -> vector<256x128xf32>
    %21 = arith.addf %14, %20 : vector<256x128xf32>
    %c0_24 = arith.constant 0 : index
    %c1_25 = arith.constant 1 : index
    %c0_26 = arith.constant 0 : index
    %c0_27 = arith.constant 0 : index
    %22 = vector.load %arg1[%c0_24, %c1_25, %c0_26, %c0_27] : memref<1x18x18x128xbf16, #tpu.memory_space<vmem>>, vector<1x16x16x128xbf16>
    %23 = vector.shape_cast %22 : vector<1x16x16x128xbf16> to vector<16x16x128xbf16>
    %24 = vector.shape_cast %23 : vector<16x16x128xbf16> to vector<256x128xbf16>
    %c3 = arith.constant 3 : index
    %c0_28 = arith.constant 0 : index
    %c0_29 = arith.constant 0 : index
    %25 = vector.load %arg2[%c3, %c0_28, %c0_29] : memref<9x128x128xbf16, #tpu.memory_space<vmem>>, vector<1x128x128xbf16>
    %26 = vector.shape_cast %25 : vector<1x128x128xbf16> to vector<128x128xbf16>
    %cst_30 = arith.constant dense<0.000000e+00> : vector<256x128xf32>
    %27 = tpu.matmul %24, %26, %cst_30 {dimension_numbers = #tpu.dot_dimension_numbers<[1], [0], [0], [1], [0, 0, 1, 1], [], []>} : vector<256x128xbf16>, vector<128x128xbf16>, vector<256x128xf32> -> vector<256x128xf32>
    %28 = arith.addf %21, %27 : vector<256x128xf32>
    %c0_31 = arith.constant 0 : index
    %c1_32 = arith.constant 1 : index
    %c1_33 = arith.constant 1 : index
    %c0_34 = arith.constant 0 : index
    %29 = vector.load %arg1[%c0_31, %c1_32, %c1_33, %c0_34] : memref<1x18x18x128xbf16, #tpu.memory_space<vmem>>, vector<1x16x16x128xbf16>
    %30 = vector.shape_cast %29 : vector<1x16x16x128xbf16> to vector<16x16x128xbf16>
    %31 = vector.shape_cast %30 : vector<16x16x128xbf16> to vector<256x128xbf16>
    %c4 = arith.constant 4 : index
    %c0_35 = arith.constant 0 : index
    %c0_36 = arith.constant 0 : index
    %32 = vector.load %arg2[%c4, %c0_35, %c0_36] : memref<9x128x128xbf16, #tpu.memory_space<vmem>>, vector<1x128x128xbf16>
    %33 = vector.shape_cast %32 : vector<1x128x128xbf16> to vector<128x128xbf16>
    %cst_37 = arith.constant dense<0.000000e+00> : vector<256x128xf32>
    %34 = tpu.matmul %31, %33, %cst_37 {dimension_numbers = #tpu.dot_dimension_numbers<[1], [0], [0], [1], [0, 0, 1, 1], [], []>} : vector<256x128xbf16>, vector<128x128xbf16>, vector<256x128xf32> -> vector<256x128xf32>
    %35 = arith.addf %28, %34 : vector<256x128xf32>
    %c0_38 = arith.constant 0 : index
    %c1_39 = arith.constant 1 : index
    %c2_40 = arith.constant 2 : index
    %c0_41 = arith.constant 0 : index
    %36 = vector.load %arg1[%c0_38, %c1_39, %c2_40, %c0_41] : memref<1x18x18x128xbf16, #tpu.memory_space<vmem>>, vector<1x16x16x128xbf16>
    %37 = vector.shape_cast %36 : vector<1x16x16x128xbf16> to vector<16x16x128xbf16>
    %38 = vector.shape_cast %37 : vector<16x16x128xbf16> to vector<256x128xbf16>
    %c5 = arith.constant 5 : index
    %c0_42 = arith.constant 0 : index
    %c0_43 = arith.constant 0 : index
    %39 = vector.load %arg2[%c5, %c0_42, %c0_43] : memref<9x128x128xbf16, #tpu.memory_space<vmem>>, vector<1x128x128xbf16>
    %40 = vector.shape_cast %39 : vector<1x128x128xbf16> to vector<128x128xbf16>
    %cst_44 = arith.constant dense<0.000000e+00> : vector<256x128xf32>
    %41 = tpu.matmul %38, %40, %cst_44 {dimension_numbers = #tpu.dot_dimension_numbers<[1], [0], [0], [1], [0, 0, 1, 1], [], []>} : vector<256x128xbf16>, vector<128x128xbf16>, vector<256x128xf32> -> vector<256x128xf32>
    %42 = arith.addf %35, %41 : vector<256x128xf32>
    %c0_45 = arith.constant 0 : index
    %c2_46 = arith.constant 2 : index
    %c0_47 = arith.constant 0 : index
    %c0_48 = arith.constant 0 : index
    %43 = vector.load %arg1[%c0_45, %c2_46, %c0_47, %c0_48] : memref<1x18x18x128xbf16, #tpu.memory_space<vmem>>, vector<1x16x16x128xbf16>
    %44 = vector.shape_cast %43 : vector<1x16x16x128xbf16> to vector<16x16x128xbf16>
    %45 = vector.shape_cast %44 : vector<16x16x128xbf16> to vector<256x128xbf16>
    %c6 = arith.constant 6 : index
    %c0_49 = arith.constant 0 : index
    %c0_50 = arith.constant 0 : index
    %46 = vector.load %arg2[%c6, %c0_49, %c0_50] : memref<9x128x128xbf16, #tpu.memory_space<vmem>>, vector<1x128x128xbf16>
    %47 = vector.shape_cast %46 : vector<1x128x128xbf16> to vector<128x128xbf16>
    %cst_51 = arith.constant dense<0.000000e+00> : vector<256x128xf32>
    %48 = tpu.matmul %45, %47, %cst_51 {dimension_numbers = #tpu.dot_dimension_numbers<[1], [0], [0], [1], [0, 0, 1, 1], [], []>} : vector<256x128xbf16>, vector<128x128xbf16>, vector<256x128xf32> -> vector<256x128xf32>
    %49 = arith.addf %42, %48 : vector<256x128xf32>
    %c0_52 = arith.constant 0 : index
    %c2_53 = arith.constant 2 : index
    %c1_54 = arith.constant 1 : index
    %c0_55 = arith.constant 0 : index
    %50 = vector.load %arg1[%c0_52, %c2_53, %c1_54, %c0_55] : memref<1x18x18x128xbf16, #tpu.memory_space<vmem>>, vector<1x16x16x128xbf16>
    %51 = vector.shape_cast %50 : vector<1x16x16x128xbf16> to vector<16x16x128xbf16>
    %52 = vector.shape_cast %51 : vector<16x16x128xbf16> to vector<256x128xbf16>
    %c7 = arith.constant 7 : index
    %c0_56 = arith.constant 0 : index
    %c0_57 = arith.constant 0 : index
    %53 = vector.load %arg2[%c7, %c0_56, %c0_57] : memref<9x128x128xbf16, #tpu.memory_space<vmem>>, vector<1x128x128xbf16>
    %54 = vector.shape_cast %53 : vector<1x128x128xbf16> to vector<128x128xbf16>
    %cst_58 = arith.constant dense<0.000000e+00> : vector<256x128xf32>
    %55 = tpu.matmul %52, %54, %cst_58 {dimension_numbers = #tpu.dot_dimension_numbers<[1], [0], [0], [1], [0, 0, 1, 1], [], []>} : vector<256x128xbf16>, vector<128x128xbf16>, vector<256x128xf32> -> vector<256x128xf32>
    %56 = arith.addf %49, %55 : vector<256x128xf32>
    %c0_59 = arith.constant 0 : index
    %c2_60 = arith.constant 2 : index
    %c2_61 = arith.constant 2 : index
    %c0_62 = arith.constant 0 : index
    %57 = vector.load %arg1[%c0_59, %c2_60, %c2_61, %c0_62] : memref<1x18x18x128xbf16, #tpu.memory_space<vmem>>, vector<1x16x16x128xbf16>
    %58 = vector.shape_cast %57 : vector<1x16x16x128xbf16> to vector<16x16x128xbf16>
    %59 = vector.shape_cast %58 : vector<16x16x128xbf16> to vector<256x128xbf16>
    %c8 = arith.constant 8 : index
    %c0_63 = arith.constant 0 : index
    %c0_64 = arith.constant 0 : index
    %60 = vector.load %arg2[%c8, %c0_63, %c0_64] : memref<9x128x128xbf16, #tpu.memory_space<vmem>>, vector<1x128x128xbf16>
    %61 = vector.shape_cast %60 : vector<1x128x128xbf16> to vector<128x128xbf16>
    %cst_65 = arith.constant dense<0.000000e+00> : vector<256x128xf32>
    %62 = tpu.matmul %59, %61, %cst_65 {dimension_numbers = #tpu.dot_dimension_numbers<[1], [0], [0], [1], [0, 0, 1, 1], [], []>} : vector<256x128xbf16>, vector<128x128xbf16>, vector<256x128xf32> -> vector<256x128xf32>
    %63 = arith.addf %56, %62 : vector<256x128xf32>
    %cst_66 = arith.constant dense<0.000000e+00> : vector<128xf32>
    %64 = vector.multi_reduction <add>, %63, %cst_66 [0] : vector<256x128xf32> to vector<128xf32>
    %65 = vector.shape_cast %64 : vector<128xf32> to vector<1x128xf32>
    %cst_67 = arith.constant 3.906250e-03 : f32
    %66 = vector.broadcast %cst_67 : f32 to vector<1x128xf32>
    %67 = arith.mulf %65, %66 : vector<1x128xf32>
    %68 = arith.mulf %63, %63 : vector<256x128xf32>
    %cst_68 = arith.constant dense<0.000000e+00> : vector<128xf32>
    %69 = vector.multi_reduction <add>, %68, %cst_68 [0] : vector<256x128xf32> to vector<128xf32>
    %70 = vector.shape_cast %69 : vector<128xf32> to vector<1x128xf32>
    %cst_69 = arith.constant 3.906250e-03 : f32
    %71 = vector.broadcast %cst_69 : f32 to vector<1x128xf32>
    %72 = arith.mulf %70, %71 : vector<1x128xf32>
    %73 = arith.mulf %67, %67 : vector<1x128xf32>
    %74 = arith.subf %72, %73 : vector<1x128xf32>
    %75 = vector.broadcast %67 : vector<1x128xf32> to vector<256x128xf32>
    %76 = arith.subf %63, %75 : vector<256x128xf32>
    %cst_70 = arith.constant 9.99999974E-6 : f32
    %77 = vector.broadcast %cst_70 : f32 to vector<1x128xf32>
    %78 = arith.addf %74, %77 : vector<1x128xf32>
    %79 = math.rsqrt %78 : vector<1x128xf32>
    %80 = vector.broadcast %79 : vector<1x128xf32> to vector<256x128xf32>
    %81 = arith.mulf %76, %80 : vector<256x128xf32>
    %82 = vector.broadcast %0 : vector<1x128xf32> to vector<256x128xf32>
    %83 = arith.mulf %81, %82 : vector<256x128xf32>
    %84 = vector.broadcast %1 : vector<1x128xf32> to vector<256x128xf32>
    %85 = arith.addf %83, %84 : vector<256x128xf32>
    %cst_71 = arith.constant 0.000000e+00 : f32
    %86 = vector.broadcast %cst_71 : f32 to vector<256x128xf32>
    %87 = arith.maximumf %85, %86 : vector<256x128xf32>
    %cst_72 = arith.constant 0.000000e+00 : bf16
    %88 = vector.broadcast %cst_72 : bf16 to vector<1x18x128xbf16>
    %cst_73 = arith.constant 0.000000e+00 : bf16
    %89 = vector.broadcast %cst_73 : bf16 to vector<18x1x128xbf16>
    %c0_74 = arith.constant 0 : index
    %c0_75 = arith.constant 0 : index
    %c0_76 = arith.constant 0 : index
    %90 = vector.load %arg7[%c0_74, %c0_75, %c0_76] : memref<18x18x128xbf16, #tpu.memory_space<vmem>>, vector<1x18x128xbf16>
    tpu.vector_store %arg7[%c0_74, %c0_75, %c0_76], %88 {strides = array<i32>} : memref<18x18x128xbf16, #tpu.memory_space<vmem>>, vector<1x18x128xbf16>,
    %c17 = arith.constant 17 : index
    %c0_77 = arith.constant 0 : index
    %c0_78 = arith.constant 0 : index
    %91 = vector.load %arg7[%c17, %c0_77, %c0_78] : memref<18x18x128xbf16, #tpu.memory_space<vmem>>, vector<1x18x128xbf16>
    tpu.vector_store %arg7[%c17, %c0_77, %c0_78], %88 {strides = array<i32>} : memref<18x18x128xbf16, #tpu.memory_space<vmem>>, vector<1x18x128xbf16>,
    %c0_79 = arith.constant 0 : index
    %c0_80 = arith.constant 0 : index
    %c0_81 = arith.constant 0 : index
    %92 = vector.load %arg7[%c0_79, %c0_80, %c0_81] : memref<18x18x128xbf16, #tpu.memory_space<vmem>>, vector<18x1x128xbf16>
    tpu.vector_store %arg7[%c0_79, %c0_80, %c0_81], %89 {strides = array<i32>} : memref<18x18x128xbf16, #tpu.memory_space<vmem>>, vector<18x1x128xbf16>,
    %c0_82 = arith.constant 0 : index
    %c17_83 = arith.constant 17 : index
    %c0_84 = arith.constant 0 : index
    %93 = vector.load %arg7[%c0_82, %c17_83, %c0_84] : memref<18x18x128xbf16, #tpu.memory_space<vmem>>, vector<18x1x128xbf16>
    tpu.vector_store %arg7[%c0_82, %c17_83, %c0_84], %89 {strides = array<i32>} : memref<18x18x128xbf16, #tpu.memory_space<vmem>>, vector<18x1x128xbf16>,
    %94 = arith.truncf %87 : vector<256x128xf32> to vector<256x128xbf16>
    %95 = vector.shape_cast %94 : vector<256x128xbf16> to vector<16x16x128xbf16>
    %c1_85 = arith.constant 1 : index
    %c1_86 = arith.constant 1 : index
    %c0_87 = arith.constant 0 : index
    %96 = vector.load %arg7[%c1_85, %c1_86, %c0_87] : memref<18x18x128xbf16, #tpu.memory_space<vmem>>, vector<16x16x128xbf16>
    tpu.vector_store %arg7[%c1_85, %c1_86, %c0_87], %95 {strides = array<i32>} : memref<18x18x128xbf16, #tpu.memory_space<vmem>>, vector<16x16x128xbf16>,
    %c0_88 = arith.constant 0 : index
    %c0_89 = arith.constant 0 : index
    %c0_90 = arith.constant 0 : index
    %97 = vector.load %arg7[%c0_88, %c0_89, %c0_90] : memref<18x18x128xbf16, #tpu.memory_space<vmem>>, vector<16x16x128xbf16>
    %98 = vector.shape_cast %97 : vector<16x16x128xbf16> to vector<256x128xbf16>
    %c0_91 = arith.constant 0 : index
    %c0_92 = arith.constant 0 : index
    %c0_93 = arith.constant 0 : index
    %99 = vector.load %arg3[%c0_91, %c0_92, %c0_93] : memref<9x128x128xbf16, #tpu.memory_space<vmem>>, vector<1x128x128xbf16>
    %100 = vector.shape_cast %99 : vector<1x128x128xbf16> to vector<128x128xbf16>
    %cst_94 = arith.constant dense<0.000000e+00> : vector<256x128xf32>
    %101 = tpu.matmul %98, %100, %cst_94 {dimension_numbers = #tpu.dot_dimension_numbers<[1], [0], [0], [1], [0, 0, 1, 1], [], []>} : vector<256x128xbf16>, vector<128x128xbf16>, vector<256x128xf32> -> vector<256x128xf32>
    %c0_95 = arith.constant 0 : index
    %c1_96 = arith.constant 1 : index
    %c0_97 = arith.constant 0 : index
    %102 = vector.load %arg7[%c0_95, %c1_96, %c0_97] : memref<18x18x128xbf16, #tpu.memory_space<vmem>>, vector<16x16x128xbf16>
    %103 = vector.shape_cast %102 : vector<16x16x128xbf16> to vector<256x128xbf16>
    %c1_98 = arith.constant 1 : index
    %c0_99 = arith.constant 0 : index
    %c0_100 = arith.constant 0 : index
    %104 = vector.load %arg3[%c1_98, %c0_99, %c0_100] : memref<9x128x128xbf16, #tpu.memory_space<vmem>>, vector<1x128x128xbf16>
    %105 = vector.shape_cast %104 : vector<1x128x128xbf16> to vector<128x128xbf16>
    %cst_101 = arith.constant dense<0.000000e+00> : vector<256x128xf32>
    %106 = tpu.matmul %103, %105, %cst_101 {dimension_numbers = #tpu.dot_dimension_numbers<[1], [0], [0], [1], [0, 0, 1, 1], [], []>} : vector<256x128xbf16>, vector<128x128xbf16>, vector<256x128xf32> -> vector<256x128xf32>
    %107 = arith.addf %101, %106 : vector<256x128xf32>
    %c0_102 = arith.constant 0 : index
    %c2_103 = arith.constant 2 : index
    %c0_104 = arith.constant 0 : index
    %108 = vector.load %arg7[%c0_102, %c2_103, %c0_104] : memref<18x18x128xbf16, #tpu.memory_space<vmem>>, vector<16x16x128xbf16>
    %109 = vector.shape_cast %108 : vector<16x16x128xbf16> to vector<256x128xbf16>
    %c2_105 = arith.constant 2 : index
    %c0_106 = arith.constant 0 : index
    %c0_107 = arith.constant 0 : index
    %110 = vector.load %arg3[%c2_105, %c0_106, %c0_107] : memref<9x128x128xbf16, #tpu.memory_space<vmem>>, vector<1x128x128xbf16>
    %111 = vector.shape_cast %110 : vector<1x128x128xbf16> to vector<128x128xbf16>
    %cst_108 = arith.constant dense<0.000000e+00> : vector<256x128xf32>
    %112 = tpu.matmul %109, %111, %cst_108 {dimension_numbers = #tpu.dot_dimension_numbers<[1], [0], [0], [1], [0, 0, 1, 1], [], []>} : vector<256x128xbf16>, vector<128x128xbf16>, vector<256x128xf32> -> vector<256x128xf32>
    %113 = arith.addf %107, %112 : vector<256x128xf32>
    %c1_109 = arith.constant 1 : index
    %c0_110 = arith.constant 0 : index
    %c0_111 = arith.constant 0 : index
    %114 = vector.load %arg7[%c1_109, %c0_110, %c0_111] : memref<18x18x128xbf16, #tpu.memory_space<vmem>>, vector<16x16x128xbf16>
    %115 = vector.shape_cast %114 : vector<16x16x128xbf16> to vector<256x128xbf16>
    %c3_112 = arith.constant 3 : index
    %c0_113 = arith.constant 0 : index
    %c0_114 = arith.constant 0 : index
    %116 = vector.load %arg3[%c3_112, %c0_113, %c0_114] : memref<9x128x128xbf16, #tpu.memory_space<vmem>>, vector<1x128x128xbf16>
    %117 = vector.shape_cast %116 : vector<1x128x128xbf16> to vector<128x128xbf16>
    %cst_115 = arith.constant dense<0.000000e+00> : vector<256x128xf32>
    %118 = tpu.matmul %115, %117, %cst_115 {dimension_numbers = #tpu.dot_dimension_numbers<[1], [0], [0], [1], [0, 0, 1, 1], [], []>} : vector<256x128xbf16>, vector<128x128xbf16>, vector<256x128xf32> -> vector<256x128xf32>
    %119 = arith.addf %113, %118 : vector<256x128xf32>
    %c1_116 = arith.constant 1 : index
    %c1_117 = arith.constant 1 : index
    %c0_118 = arith.constant 0 : index
    %120 = vector.load %arg7[%c1_116, %c1_117, %c0_118] : memref<18x18x128xbf16, #tpu.memory_space<vmem>>, vector<16x16x128xbf16>
    %121 = vector.shape_cast %120 : vector<16x16x128xbf16> to vector<256x128xbf16>
    %c4_119 = arith.constant 4 : index
    %c0_120 = arith.constant 0 : index
    %c0_121 = arith.constant 0 : index
    %122 = vector.load %arg3[%c4_119, %c0_120, %c0_121] : memref<9x128x128xbf16, #tpu.memory_space<vmem>>, vector<1x128x128xbf16>
    %123 = vector.shape_cast %122 : vector<1x128x128xbf16> to vector<128x128xbf16>
    %cst_122 = arith.constant dense<0.000000e+00> : vector<256x128xf32>
    %124 = tpu.matmul %121, %123, %cst_122 {dimension_numbers = #tpu.dot_dimension_numbers<[1], [0], [0], [1], [0, 0, 1, 1], [], []>} : vector<256x128xbf16>, vector<128x128xbf16>, vector<256x128xf32> -> vector<256x128xf32>
    %125 = arith.addf %119, %124 : vector<256x128xf32>
    %c1_123 = arith.constant 1 : index
    %c2_124 = arith.constant 2 : index
    %c0_125 = arith.constant 0 : index
    %126 = vector.load %arg7[%c1_123, %c2_124, %c0_125] : memref<18x18x128xbf16, #tpu.memory_space<vmem>>, vector<16x16x128xbf16>
    %127 = vector.shape_cast %126 : vector<16x16x128xbf16> to vector<256x128xbf16>
    %c5_126 = arith.constant 5 : index
    %c0_127 = arith.constant 0 : index
    %c0_128 = arith.constant 0 : index
    %128 = vector.load %arg3[%c5_126, %c0_127, %c0_128] : memref<9x128x128xbf16, #tpu.memory_space<vmem>>, vector<1x128x128xbf16>
    %129 = vector.shape_cast %128 : vector<1x128x128xbf16> to vector<128x128xbf16>
    %cst_129 = arith.constant dense<0.000000e+00> : vector<256x128xf32>
    %130 = tpu.matmul %127, %129, %cst_129 {dimension_numbers = #tpu.dot_dimension_numbers<[1], [0], [0], [1], [0, 0, 1, 1], [], []>} : vector<256x128xbf16>, vector<128x128xbf16>, vector<256x128xf32> -> vector<256x128xf32>
    %131 = arith.addf %125, %130 : vector<256x128xf32>
    %c2_130 = arith.constant 2 : index
    %c0_131 = arith.constant 0 : index
    %c0_132 = arith.constant 0 : index
    %132 = vector.load %arg7[%c2_130, %c0_131, %c0_132] : memref<18x18x128xbf16, #tpu.memory_space<vmem>>, vector<16x16x128xbf16>
    %133 = vector.shape_cast %132 : vector<16x16x128xbf16> to vector<256x128xbf16>
    %c6_133 = arith.constant 6 : index
    %c0_134 = arith.constant 0 : index
    %c0_135 = arith.constant 0 : index
    %134 = vector.load %arg3[%c6_133, %c0_134, %c0_135] : memref<9x128x128xbf16, #tpu.memory_space<vmem>>, vector<1x128x128xbf16>
    %135 = vector.shape_cast %134 : vector<1x128x128xbf16> to vector<128x128xbf16>
    %cst_136 = arith.constant dense<0.000000e+00> : vector<256x128xf32>
    %136 = tpu.matmul %133, %135, %cst_136 {dimension_numbers = #tpu.dot_dimension_numbers<[1], [0], [0], [1], [0, 0, 1, 1], [], []>} : vector<256x128xbf16>, vector<128x128xbf16>, vector<256x128xf32> -> vector<256x128xf32>
    %137 = arith.addf %131, %136 : vector<256x128xf32>
    %c2_137 = arith.constant 2 : index
    %c1_138 = arith.constant 1 : index
    %c0_139 = arith.constant 0 : index
    %138 = vector.load %arg7[%c2_137, %c1_138, %c0_139] : memref<18x18x128xbf16, #tpu.memory_space<vmem>>, vector<16x16x128xbf16>
    %139 = vector.shape_cast %138 : vector<16x16x128xbf16> to vector<256x128xbf16>
    %c7_140 = arith.constant 7 : index
    %c0_141 = arith.constant 0 : index
    %c0_142 = arith.constant 0 : index
    %140 = vector.load %arg3[%c7_140, %c0_141, %c0_142] : memref<9x128x128xbf16, #tpu.memory_space<vmem>>, vector<1x128x128xbf16>
    %141 = vector.shape_cast %140 : vector<1x128x128xbf16> to vector<128x128xbf16>
    %cst_143 = arith.constant dense<0.000000e+00> : vector<256x128xf32>
    %142 = tpu.matmul %139, %141, %cst_143 {dimension_numbers = #tpu.dot_dimension_numbers<[1], [0], [0], [1], [0, 0, 1, 1], [], []>} : vector<256x128xbf16>, vector<128x128xbf16>, vector<256x128xf32> -> vector<256x128xf32>
    %143 = arith.addf %137, %142 : vector<256x128xf32>
    %c2_144 = arith.constant 2 : index
    %c2_145 = arith.constant 2 : index
    %c0_146 = arith.constant 0 : index
    %144 = vector.load %arg7[%c2_144, %c2_145, %c0_146] : memref<18x18x128xbf16, #tpu.memory_space<vmem>>, vector<16x16x128xbf16>
    %145 = vector.shape_cast %144 : vector<16x16x128xbf16> to vector<256x128xbf16>
    %c8_147 = arith.constant 8 : index
    %c0_148 = arith.constant 0 : index
    %c0_149 = arith.constant 0 : index
    %146 = vector.load %arg3[%c8_147, %c0_148, %c0_149] : memref<9x128x128xbf16, #tpu.memory_space<vmem>>, vector<1x128x128xbf16>
    %147 = vector.shape_cast %146 : vector<1x128x128xbf16> to vector<128x128xbf16>
    %cst_150 = arith.constant dense<0.000000e+00> : vector<256x128xf32>
    %148 = tpu.matmul %145, %147, %cst_150 {dimension_numbers = #tpu.dot_dimension_numbers<[1], [0], [0], [1], [0, 0, 1, 1], [], []>} : vector<256x128xbf16>, vector<128x128xbf16>, vector<256x128xf32> -> vector<256x128xf32>
    %149 = arith.addf %143, %148 : vector<256x128xf32>
    %cst_151 = arith.constant dense<0.000000e+00> : vector<128xf32>
    %150 = vector.multi_reduction <add>, %149, %cst_151 [0] : vector<256x128xf32> to vector<128xf32>
    %151 = vector.shape_cast %150 : vector<128xf32> to vector<1x128xf32>
    %cst_152 = arith.constant 3.906250e-03 : f32
    %152 = vector.broadcast %cst_152 : f32 to vector<1x128xf32>
    %153 = arith.mulf %151, %152 : vector<1x128xf32>
    %154 = arith.mulf %149, %149 : vector<256x128xf32>
    %cst_153 = arith.constant dense<0.000000e+00> : vector<128xf32>
    %155 = vector.multi_reduction <add>, %154, %cst_153 [0] : vector<256x128xf32> to vector<128xf32>
    %156 = vector.shape_cast %155 : vector<128xf32> to vector<1x128xf32>
    %cst_154 = arith.constant 3.906250e-03 : f32
    %157 = vector.broadcast %cst_154 : f32 to vector<1x128xf32>
    %158 = arith.mulf %156, %157 : vector<1x128xf32>
    %159 = arith.mulf %153, %153 : vector<1x128xf32>
    %160 = arith.subf %158, %159 : vector<1x128xf32>
    %161 = vector.broadcast %153 : vector<1x128xf32> to vector<256x128xf32>
    %162 = arith.subf %149, %161 : vector<256x128xf32>
    %cst_155 = arith.constant 9.99999974E-6 : f32
    %163 = vector.broadcast %cst_155 : f32 to vector<1x128xf32>
    %164 = arith.addf %160, %163 : vector<1x128xf32>
    %165 = math.rsqrt %164 : vector<1x128xf32>
    %166 = vector.broadcast %165 : vector<1x128xf32> to vector<256x128xf32>
    %167 = arith.mulf %162, %166 : vector<256x128xf32>
    %168 = vector.broadcast %0 : vector<1x128xf32> to vector<256x128xf32>
    %169 = arith.mulf %167, %168 : vector<256x128xf32>
    %170 = vector.broadcast %1 : vector<1x128xf32> to vector<256x128xf32>
    %171 = arith.addf %169, %170 : vector<256x128xf32>
    %cst_156 = arith.constant 0.000000e+00 : f32
    %172 = vector.broadcast %cst_156 : f32 to vector<256x128xf32>
    %173 = arith.maximumf %171, %172 : vector<256x128xf32>
    %174 = vector.shape_cast %173 : vector<256x128xf32> to vector<16x16x128xf32>
    %175 = vector.shape_cast %174 : vector<16x16x128xf32> to vector<8x2x16x128xf32>
    %cst_157 = arith.constant dense<0xFF800000> : vector<8x16x128xf32>
    %176 = vector.multi_reduction <maximumf>, %175, %cst_157 [1] : vector<8x2x16x128xf32> to vector<8x16x128xf32>
    %c0_158 = arith.constant 0 : index
    %c0_159 = arith.constant 0 : index
    %c0_160 = arith.constant 0 : index
    %177 = vector.load %arg8[%c0_158, %c0_159, %c0_160] : memref<8x16x128xf32, #tpu.memory_space<vmem>>, vector<8x16x128xf32>
    tpu.vector_store %arg8[%c0_158, %c0_159, %c0_160], %176 {strides = array<i32>} : memref<8x16x128xf32, #tpu.memory_space<vmem>>, vector<8x16x128xf32>,
    %c0_161 = arith.constant 0 : index
    %c0_162 = arith.constant 0 : index
    %c0_163 = arith.constant 0 : index
    %178 = tpu.strided_load %arg8[%c0_161, %c0_162, %c0_163] {strides = array<i32: 1, 2, 1>} : memref<8x16x128xf32, #tpu.memory_space<vmem>>, vector<8x8x128xf32>
    %c0_164 = arith.constant 0 : index
    %c1_165 = arith.constant 1 : index
    %c0_166 = arith.constant 0 : index
    %179 = tpu.strided_load %arg8[%c0_164, %c1_165, %c0_166] {strides = array<i32: 1, 2, 1>} : memref<8x16x128xf32, #tpu.memory_space<vmem>>, vector<8x8x128xf32>
    %180 = arith.maximumf %178, %179 : vector<8x8x128xf32>
    %181 = arith.truncf %180 : vector<8x8x128xf32> to vector<8x8x128xbf16>
    %c0_167 = arith.constant 0 : index
    %c0_168 = arith.constant 0 : index
    %c0_169 = arith.constant 0 : index
    %c0_170 = arith.constant 0 : index
    %182 = vector.load %arg6[%c0_167, %c0_168, %c0_169, %c0_170] : memref<1x8x8x128xbf16, #tpu.memory_space<vmem>>, vector<1x8x8x128xbf16>
    %183 = vector.shape_cast %182 : vector<1x8x8x128xbf16> to vector<8x8x128xbf16>
    %184 = vector.shape_cast %181 : vector<8x8x128xbf16> to vector<1x8x8x128xbf16>
    tpu.vector_store %arg6[%c0_167, %c0_168, %c0_169, %c0_170], %184 {strides = array<i32>} : memref<1x8x8x128xbf16, #tpu.memory_space<vmem>>, vector<1x8x8x128xbf16>,
    return
  }
  func.func @transform_0(%arg0: i32) -> (i32, i32, i32, i32) {
    %c0_i32 = arith.constant 0 : i32
    %c0_i32_0 = arith.constant 0 : i32
    %c0_i32_1 = arith.constant 0 : i32
    %c0_i32_2 = arith.constant 0 : i32
    return %arg0, %c0_i32, %c0_i32_0, %c0_i32_1 : i32, i32, i32, i32
  }
  func.func @transform_1(%arg0: i32) -> (i32, i32, i32) {
    %c0_i32 = arith.constant 0 : i32
    %c0_i32_0 = arith.constant 0 : i32
    %c0_i32_1 = arith.constant 0 : i32
    %c0_i32_2 = arith.constant 0 : i32
    return %c0_i32, %c0_i32_0, %c0_i32_1 : i32, i32, i32
  }
  func.func @transform_2(%arg0: i32) -> (i32, i32, i32) {
    %c0_i32 = arith.constant 0 : i32
    %c0_i32_0 = arith.constant 0 : i32
    %c0_i32_1 = arith.constant 0 : i32
    %c0_i32_2 = arith.constant 0 : i32
    return %c0_i32, %c0_i32_0, %c0_i32_1 : i32, i32, i32
  }
  func.func @transform_3(%arg0: i32) -> (i32, i32) {
    %c0_i32 = arith.constant 0 : i32
    %c0_i32_0 = arith.constant 0 : i32
    %c0_i32_1 = arith.constant 0 : i32
    return %c0_i32, %c0_i32_0 : i32, i32
  }
  func.func @transform_4(%arg0: i32) -> (i32, i32) {
    %c0_i32 = arith.constant 0 : i32
    %c0_i32_0 = arith.constant 0 : i32
    %c0_i32_1 = arith.constant 0 : i32
    return %c0_i32, %c0_i32_0 : i32, i32
  }
  func.func @transform_5(%arg0: i32) -> (i32, i32, i32, i32) {
    %c0_i32 = arith.constant 0 : i32
    %c0_i32_0 = arith.constant 0 : i32
    %c0_i32_1 = arith.constant 0 : i32
    %c0_i32_2 = arith.constant 0 : i32
    return %arg0, %c0_i32, %c0_i32_0, %c0_i32_1 : i32, i32, i32, i32
  }
}

</mosaic_0001>

<bundles_post_ra>
// kernel: tpu_custom_call.1
= control target key start
LH: loop header
LB: loop body
LE: loop exit
PB: predicated region body
PF: predicated region fallthrough
CT: control target
= control target key end

     0   :  { %10 = vsyncpa [#allocation5], 0  ;;  %s15588_s0 = inlined_call_operand.vmem [shape: bf16[2,18,18,128], index: 0, kind: input, shape index: {}]   ;;  %s15589_s1 = inlined_call_operand.vmem [shape: bf16[9,128,128], index: 1, kind: input, shape index: {}]   ;;  %s15590_s2 = inlined_call_operand.hbm [shape: bf16[9,128,128], index: 2, kind: input, shape index: {}]   ;;  %s15591_s3 = inlined_call_operand.vmem [shape: f32[1,128], index: 3, kind: input, shape index: {}]   ;;  %s15592_s4 = inlined_call_operand.vmem [shape: f32[1,128], index: 4, kind: input, shape index: {}]   ;;  %s15593_s5 = inlined_call_operand.hbm [shape: bf16[2,8,8,128], index: 5, kind: output, shape index: {}]  }
   0x1   :  { %11 = vsyncpa [#allocation6], 0 }
   0x2   :  { %13 = vsyncpa [#allocation6 + $0x1], 0  ;;  %s11803_s18 = smov 0   ;;  %s11805_s19 = smov 0  }
   0x3   :  { %s11807_s20 = smov 0   ;;  %s11809_s21 = smov 0  }
   0x4 LB: > { %s11824_s22 = sadd.s32 4294967295, %s11765_s21   ;;  %s9892_s23 = sadd.s32 4294967294, %s11765_s21   ;;  %s11765_s21 = sphi %s11809_s21, %s15721_s21   ;;  %s11761_s20 = sphi %s11807_s20, %s15720_s20   ;;  %s11757_s19 = sphi %s11805_s19, %s15719_s19   ;;  %s11753_s18 = sphi %s11803_s18, %s15718_s18  }
   0x5   : > { %s11828_s24 = sadd.s32 1, %s11765_s21   ;;  %s136_s25 = sadd.s32 1, %s11761_s20 }
   0x6   : > { %s133_s26 = ssub.s32 %s11765_s21, %s11828_s24  ;;  %p146_p0 = scmp.ne.s32.totalorder %s11761_s20, %s11757_s19 }
   0x7   : > { %p134_p1 = scmp.eq.s32.totalorder %s133_s26, 0  ;;  %p147_p2 = scmp.eq.s32.totalorder %s11824_s22, 1 }
   0x8   : > { %p152_p3 = scmp.ne.s32.totalorder %s11757_s19, %s11753_s18  ;;  %p153_p4 = scmp.eq.s32.totalorder %s9892_s23, 1 }
   0x9   : > { %s11839_s27 = scalar_select %p134_p1, %s11761_s20, %s136_s25  }
   0xa   : > { %p11841_p5 = por %p147_p2, %p146_p0  ;;  %p11845_p6 = por %p153_p4, %p152_p3 }
   0xb   : > { %p9893_p7 = scmp.ge.s32.totalorder %s11765_s21, 1  ;;  %p160_p8 = scmp.lt.s32.totalorder %s11765_s21, 3 }
   0xc   : > { %p11576_p9 = scmp.eq.s32.totalorder %s11824_s22, 0  ;;  %s174_s7 = sshll.u32 %s15590_s2, 4  ;;  %s175_s7 = int_to_ptr.hbm [resolvable:$true] %s174_s7 }
   0xd   : > { %p161_p10 = pnand %p9893_p7, %p160_p8  ;;  %s11767_s8 = smov [#allocation4]  }
   0xe   : > { %s176_s9 = sshll.u32 %s11767_s8, 4  ;;  %s11768_s10 = smov 64   ;;  %s177_s9 = int_to_ptr.vmem [resolvable:$true] %s176_s9 }
   0xf   : > { %p11568_p11 = pneg %p161_p10  ;;  %s11769_s11 = smov 4  }
  0x10   : > { %206 = sbr.rel (%p161_p10) target bundleno = 1999 (0x7cf), region = 40 }
  0x11   : > { %p11569_p12 = pnand %p11576_p9, %p11568_p11 }
  0x13   : > { %11571 = dma.hbm_to_vmem [thread:$0]  (!%p11569_p12), %s175_s7, 9216, %s177_s9, [#allocation5], %s11768_s10, %s11768_s10, %s11769_s11  }
  0x15   : > { %11744 = dma.done.wait (%p11576_p9), [#allocation5], 9216  }
  0x16   : > { %11746 = vsyncadd (%p11576_p9), [#allocation5], 4294958080  ;;  %p235_p13 = scmp.lt.s32.totalorder %s11824_s22, 1  ;;  %v11312_v0 = vld [vmem:[%s15589_s1 + $0x78] sm:$0xff]  ;;  %v11311_v2 = vld [vmem:[%s15589_s1 + $0x70] sm:$0xff]  ;;  %v15609_v39 = vmov 0 }
  0x17   : > { %v11304_v1 = vld [vmem:[%s15589_s1 + $0x38] sm:$0xff]  ;;  %11545 = vmatpush.bf16.msra.mxu2 %v11312_v0  ;;  %v11303_v3 = vld [vmem:[%s15589_s1 + $0x30] sm:$0xff]  ;;  %823 = vmatpush.bf16.msra.mxu0 %v11312_v0  ;;  %v11310_v6 = vld [vmem:[%s15589_s1 + $0x68] sm:$0xff]  ;;  %vm307_vm0 = vsmask.f32 3328  ;;  %vm1193_vm3 = vcmask 1042432  }
  0x18   : > { %s236_s12 = scalar_select %p235_p13, %s11824_s22, 1  ;;  %11553 = vmatpush.bf16.msra.mxu3 %v11304_v1  ;;  %1056 = vmatpush.bf16.msra.mxu1 %v11304_v1  ;;  %v11302_v7 = vld [vmem:[%s15589_s1 + $0x28] sm:$0xff]  ;;  %v11309_v22 = vld [vmem:[%s15589_s1 + $0x60] sm:$0xff]  ;;  %v11308_v33 = vld [vmem:[%s15589_s1 + $0x58] sm:$0xff]  ;;  %vm308_vm1 = vsmask.f32 7440 }
  0x19   : > { %v11301_v23 = vld [vmem:[%s15589_s1 + $0x20] sm:$0xff]  ;;  %v11300_v34 = vld [vmem:[%s15589_s1 + $0x18] sm:$0xff]  ;;  %vm11917_vm2 = vmor %vm307_vm0, %vm308_vm1  ;;  %vm1194_vm4 = vcmask 1046532   ;;  %vm4698_vm6 = vcmask 1040384   ;;  %vm4699_vm7 = vsmask.f32 256 }
  0x1a   : > { %s11561_s13 = smul.u32 216, %s236_s12  ;;  %v15610_v39 = vsel %vm11917_vm2, 4294967295, %v15609_v39  ;;  %v11307_v43 = vld [vmem:[%s15589_s1 + $0x50] sm:$0xff]  ;;  %v11306_v57 = vld [vmem:[%s15589_s1 + $0x48] sm:$0xff]  ;;  %vm12233_vm5 = vmor %vm1193_vm3, %vm1194_vm4  ;;  %vm4755_vm9 = vsmask.f32 7938 }
  0x1b   : > { %11546 = vmatpush.bf16.msra.mxu2 %v11311_v2  ;;  %824 = vmatpush.bf16.msra.mxu0 %v11311_v2  ;;  %15611 = vst [vmem:[#allocation10_spill] sm:$0xff] %v15610_v39  ;;  %v11299_v44 = vld [vmem:[%s15589_s1 + $0x10] sm:$0xff]  ;;  %v11298_v58 = vld [vmem:[%s15589_s1 + $0x8] sm:$0xff]  ;;  %vm12996_vm8 = vmand %vm4698_vm6, %vm4699_vm7  ;;  %vm4843_vm14 = vsmask.f32 4368  ;;  %vm5166_vm0 = vcmask 1043456  }
  0x1c   : > { %s11878_s8 = scalar_lea.vmem %s15588_s0, %s11561_s13  ;;  %11554 = vmatpush.bf16.msra.mxu3 %v11303_v3  ;;  %1057 = vmatpush.bf16.msra.mxu1 %v11303_v3  ;;  %vm13020_vm10 = vmand %vm4698_vm6, %vm4755_vm9  ;;  %s232_s17 = sand.u32 1, %s11757_s19  }
  0x1d   : > { %v259_v4 = vld [vmem:[%s11878_s8 + $0x60] sm:$0xf]  ;;  %v260_v5 = vld [vmem:[%s11878_s8 + $0x64] sm:$0xf]  ;;  %v299_v17 = vld [vmem:[%s11878_s8 + $0x68] sm:$0x1] }
  0x1e   : > { %v503_v8 = vshrl.u32 %v259_v4, 16  ;;  %v506_v9 = vshll.u32 %v259_v4, 16  ;;  %v512_v10 = vshll.u32 %v260_v5, 16  ;;  %v516_v11 = vshrl.u32 %v260_v5, 16  ;;  %v243_v12 = vld [vmem:[%s11878_s8] sm:$0xf]  ;;  %vm13606_vm15 = vmor %vm4699_vm7, %vm4843_vm14 }
  0x1f   : > { %v11892_v16 = vld [vmem:[%s11878_s8 + $0x4] sm:$0xf]  ;;  %v311_v19 = vshrl.u32 %v243_v12, 16  ;;  %v314_v20 = vshll.u32 %v243_v12, 16  ;;  %11547 = vmatpush.bf16.msra.mxu2 %v11310_v6  ;;  %825 = vmatpush.bf16.msra.mxu0 %v11310_v6  ;;  %v522_v28 = vshll.u32 %v299_v17, 16  ;;  %v11320_v17 = vld [vmem:[%s15589_s1 + $0xb8] sm:$0xff]  ;;  %vm13938_vm1 = vmand %vm5166_vm0, %vm4755_vm9 }
  0x20   : > { %v505_v13 = vrot.slane %v503_v8, 4  ;;  %v508_v14 = vrot.slane %v506_v9, 5  ;;  %v11889_v15 = vrot.slane %v512_v10, 5  ;;  %v518_v18 = vrot.slane %v516_v11, 4  ;;  %11555 = vmatpush.bf16.msra.mxu3 %v11302_v7  ;;  %1058 = vmatpush.bf16.msra.mxu1 %v11302_v7  ;;  %v11906_v29 = vld [vmem:[%s11878_s8 + $0x8] sm:$0x1] }
  0x21   : > { %v320_v21 = vshll.u32 %v11892_v16, 16  ;;  %v324_v24 = vshrl.u32 %v11892_v16, 16  ;;  %v313_v25 = vrot.slane %v311_v19, 4  ;;  %v316_v26 = vrot.slane %v314_v20, 5  ;;  %v261_v42 = vld [vmem:[%s11878_s8 + $0x6c] sm:$0xf] }
  0x22   : > { %v509_v31 = vor.u32 %v508_v14, %v505_v13  ;;  %v519_v32 = vor.u32 %v518_v18, %v11889_v15  ;;  %v330_v37 = vshll.u32 %v11906_v29, 16  ;;  %v524_v38 = vrot.slane %v522_v28, 5  ;;  %v262_v45 = vld [vmem:[%s11878_s8 + $0x70] sm:$0xf]  ;;  %v245_v49 = vld [vmem:[%s11878_s8 + $0xc] sm:$0xf] }
  0x23   : > { %v11903_v27 = vrot.slane %v320_v21, 5  ;;  %v326_v30 = vrot.slane %v324_v24, 4  ;;  %11548 = vmatpush.bf16.msra.mxu2 %v11309_v22  ;;  %826 = vmatpush.bf16.msra.mxu0 %v11309_v22  ;;  %v317_v35 = vor.u32 %v316_v26, %v313_v25  ;;  %v527_v50 = vshrl.u32 %v261_v42, 16  ;;  %v11931_v52 = vld [vmem:[%s11878_s8 + $0x10] sm:$0xf]  ;;  %v11305_v8 = vld [vmem:[%s15589_s1 + $0x40] sm:$0xff] }
  0x24   : > { %11556 = vmatpush.bf16.msra.mxu3 %v11301_v23  ;;  %1059 = vmatpush.bf16.msra.mxu1 %v11301_v23  ;;  %v510_v40 = vrot.slane %v509_v31, 4  ;;  %v520_v41 = vrot.slane %v519_v32, 4  ;;  %v332_v48 = vrot.slane %v330_v37, 5  ;;  %v530_v51 = vshll.u32 %v261_v42, 16  ;;  %v300_v3 = vld [vmem:[%s11878_s8 + $0x74] sm:$0x1] }
  0x25   : > { %v327_v36 = vor.u32 %v326_v30, %v11903_v27  ;;  %v318_v46 = vrot.slane %v317_v35, 4  ;;  %v536_v55 = vshll.u32 %v262_v45, 16  ;;  %v540_v56 = vshrl.u32 %v262_v45, 16  ;;  %v11297_v9 = vld [vmem:[%s15589_s1] sm:$0xff]  ;;  %v11344_v18 = vld [vmem:[%s15589_s1 + $0xf8] sm:$0xff]  ;;  %v11319_v35 = vld [vmem:[%s15589_s1 + $0xb0] sm:$0xff] }
  0x26   : > { %v515_v53 = vsel %vm11917_vm2, %v510_v40, %v11889_v15  ;;  %v525_v54 = vsel %vm11917_vm2, %v520_v41, %v524_v38  ;;  %v335_v59 = vshrl.u32 %v245_v49, 16  ;;  %v338_v60 = vshll.u32 %v245_v49, 16  ;;  %v11969_v20 = vld [vmem:[%s11878_s8 + $0x14] sm:$0x1]  ;;  %v11289_v22 = vld [vmem:[%s11878_s8 + $0x60] sm:$0xff]  ;;  %v11352_v30 = vld [vmem:[%s15589_s1 + $0x138] sm:$0xff] }
  0x27   : > { %11549 = vmatpush.bf16.msra.mxu2 %v11308_v33  ;;  %827 = vmatpush.bf16.msra.mxu0 %v11308_v33  ;;  %v328_v47 = vrot.slane %v327_v36, 4  ;;  %v323_v61 = vsel %vm11917_vm2, %v318_v46, %v11903_v27  ;;  %v344_v63 = vshll.u32 %v11931_v52, 16  ;;  %v348_v0 = vshrl.u32 %v11931_v52, 16  ;;  %v11281_v26 = vld [vmem:[%s11878_s8] sm:$0xff]  ;;  %v263_v28 = vld [vmem:[%s11878_s8 + $0x78] sm:$0xf] }
  0x28   : > { %11557 = vmatpush.bf16.msra.mxu3 %v11300_v34  ;;  %1060 = vmatpush.bf16.msra.mxu1 %v11300_v34  ;;  %v727_v1 = vunpack.c.l.b16 %v515_v53  ;;  %v728_v2 = vunpack.c.l.b16 %v525_v54  ;;  %v529_v4 = vrot.slane %v527_v50, 4  ;;  %v532_v5 = vrot.slane %v530_v51, 5  ;;  %v264_v33 = vld [vmem:[%s11878_s8 + $0x7c] sm:$0xf]  ;;  %v11343_v36 = vld [vmem:[%s15589_s1 + $0xf0] sm:$0xff]  ;;  %v11318_v49 = vld [vmem:[%s15589_s1 + $0xa8] sm:$0xff] }
  0x29   : > { %v333_v62 = vsel %vm11917_vm2, %v328_v47, %v332_v48  ;;  %v11952_v6 = vrot.slane %v536_v55, 5  ;;  %v542_v7 = vrot.slane %v540_v56, 4  ;;  %v711_v10 = vunpack.c.l.b16 %v323_v61  ;;  %v11351_v47 = vld [vmem:[%s15589_s1 + $0x130] sm:$0xff]  ;;  %v247_v48 = vld [vmem:[%s11878_s8 + $0x18] sm:$0xf]  ;;  %v11342_v51 = vld [vmem:[%s15589_s1 + $0xe8] sm:$0xff] }
  0x2a   : > { %v712_v11 = vunpack.c.l.b16 %v333_v62  ;;  %v337_v12 = vrot.slane %v335_v59, 4  ;;  %v340_v13 = vrot.slane %v338_v60, 5  ;;  %v11960_v14 = vrot.slane %v344_v63, 5  ;;  %v11995_v50 = vld [vmem:[%s11878_s8 + $0x1c] sm:$0xf]  ;;  %s9898_s23 = sshll.u32 %s232_s17, 5 }
  0x2b   : > { %11550 = vmatpush.bf16.msra.mxu2 %v11307_v43  ;;  %828 = vmatpush.bf16.msra.mxu0 %v11307_v43  ;;  %v350_v15 = vrot.slane %v348_v0, 4  ;;  %v546_v19 = vshll.u32 %v300_v3, 16  ;;  %v751_v21 = vpack.c.b16 %v728_v2, %v727_v1  ;;  %v533_v23 = vor.u32 %v532_v5, %v529_v4  ;;  %v11350_v2 = vld [vmem:[%s15589_s1 + $0x128] sm:$0xff]  ;;  %s11521_s25 = sshll.u32 %s11824_s22, 5  ;;  %s234_s26 = scalar_lea.vmem [#allocation7], %s9898_s23 }
  0x2c   : > { %11558 = vmatpush.bf16.msra.mxu3 %v11299_v44  ;;  %1061 = vmatpush.bf16.msra.mxu1 %v11299_v44  ;;  %v543_v24 = vor.u32 %v542_v7, %v11952_v6  ;;  %v743_v25 = vpack.c.b16 %v712_v11, %v711_v10  ;;  %v341_v27 = vor.u32 %v340_v13, %v337_v12  ;;  %v354_v32 = vshll.u32 %v11969_v20, 16  ;;  %s9814_s7 = scalar_lea.hbm %s15593_s5, %s11521_s25  ;;  %s9815_s9 = sshll.u32 %s234_s26, 4  ;;  %s9816_s9 = int_to_ptr.vmem [resolvable:$true] %s9815_s9 }
  0x2d   : > { %v351_v31 = vor.u32 %v350_v15, %v11960_v14  ;;  %v548_v34 = vrot.slane %v546_v19, 5  ;;  %v534_v37 = vrot.slane %v533_v23, 4  ;;  %v551_v40 = vshrl.u32 %v263_v28, 16  ;;  %v11282_v19 = vld [vmem:[%s11878_s8 + $0xc] sm:$0xff]  ;;  %s9817_s22 = sshll.u32 %s9814_s7, 4  ;;  %s11719_s14 = scalar_lea.hbm %s15593_s5, 64  ;;  %s9818_s22 = int_to_ptr.hbm [resolvable:$true] %s9817_s22 }
  0x2e   : > { %v544_v38 = vrot.slane %v543_v24, 4  ;;  %v554_v41 = vshll.u32 %v263_v28, 16  ;;  %v342_v42 = vrot.slane %v341_v27, 4  ;;  %v560_v43 = vshll.u32 %v264_v33, 16  ;;  %v265_v27 = vld [vmem:[%s11878_s8 + $0x84] sm:$0xf] }
  0x2f   : > { %11551 = vmatpush.bf16.msra.mxu2 %v11306_v57  ;;  %829 = vmatpush.bf16.msra.mxu0 %v11306_v57  ;;  %v564_v44 = vshrl.u32 %v264_v33, 16  ;;  %v352_v45 = vrot.slane %v351_v31, 4  ;;  %v356_v46 = vrot.slane %v354_v32, 5  ;;  %v539_v53 = vsel %vm11917_vm2, %v534_v37, %v11952_v6  ;;  %v266_v28 = vld [vmem:[%s11878_s8 + $0x88] sm:$0xf]  ;;  %s11713_s10 = sshra.s32 %s9818_s22, 4  ;;  %s11714_s10 = int_to_ptr.hbm [resolvable:$true] %s11713_s10 }
  0x30   : > { %11559 = vmatpush.bf16.msra.mxu3 %v11298_v58  ;;  %1062 = vmatpush.bf16.msra.mxu1 %v11298_v58  ;;  %v549_v54 = vsel %vm11917_vm2, %v544_v38, %v548_v34  ;;  %v553_v55 = vrot.slane %v551_v40, 4  ;;  %v556_v56 = vrot.slane %v554_v41, 5  ;;  %v347_v57 = vsel %vm11917_vm2, %v342_v42, %v11960_v14  ;;  %v301_v58 = vld [vmem:[%s11878_s8 + $0x80] sm:$0x1]  ;;  %v249_v31 = vld [vmem:[%s11878_s8 + $0x24] sm:$0xf]  ;;  %p11720_p3 = scmp.lt.s32.totalorder %s11714_s10, %s15593_s5 }
  0x31   : > { %v562_v59 = vrot.slane %v560_v43, 5  ;;  %v566_v60 = vrot.slane %v564_v44, 4  ;;  %v359_v61 = vshrl.u32 %v247_v48, 16  ;;  %v357_v62 = vsel %vm11917_vm2, %v352_v45, %v356_v46  ;;  %v12017_v14 = vld [vmem:[%s11878_s8 + $0x20] sm:$0x1]  ;;  %s11715_s11 = scalar_lea.hbm %s11714_s10, 32 }
  0x32   : > { %v362_v63 = vshll.u32 %v247_v48, 16  ;;  %v368_v0 = vshll.u32 %v11995_v50, 16  ;;  %v372_v1 = vshrl.u32 %v11995_v50, 16  ;;  %v729_v3 = vunpack.c.l.b16 %v539_v53  ;;  %v12031_v33 = vld [vmem:[%s11878_s8 + $0x28] sm:$0xf]  ;;  %v11341_v34 = vld [vmem:[%s15589_s1 + $0xe0] sm:$0xff]  ;;  %p11716_p0 = scmp.ne.s32.totalorder %s11714_s10, %s11715_s11  ;;  %p11721_p4 = scmp.lt.s32.totalorder %s11719_s14, %s11715_s11 }
  0x33   : > { %11552 = vmatpush.bf16.msra.mxu2 %v11305_v8  ;;  %830 = vmatpush.bf16.msra.mxu0 %v11305_v8  ;;  %v730_v4 = vunpack.c.l.b16 %v549_v54  ;;  %v570_v5 = vshll.u32 %v301_v58, 16  ;;  %v713_v6 = vunpack.c.l.b16 %v347_v57  ;;  %v714_v7 = vunpack.c.l.b16 %v357_v62 }
  0x34   : > { %11560 = vmatpush.bf16.msra.mxu3 %v11297_v9  ;;  %1063 = vmatpush.bf16.msra.mxu1 %v11297_v9  ;;  %v557_v8 = vor.u32 %v556_v56, %v553_v55  ;;  %v361_v9 = vrot.slane %v359_v61, 4  ;;  %v567_v10 = vor.u32 %v566_v60, %v562_v59  ;;  %v364_v11 = vrot.slane %v362_v63, 5  ;;  %p11717_p1 = pnand %p11716_p0, %p11841_p5  ;;  %p11722_p7 = por %p11721_p4, %p11720_p3 }
  0x35   : > { %v370_v12 = vrot.slane %v368_v0, 5  ;;  %v374_v13 = vrot.slane %v372_v1, 4  ;;  %v752_v15 = vpack.c.b16 %v730_v4, %v729_v3  ;;  %v575_v41 = vshrl.u32 %v265_v27, 16 }
  0x36   : > { %871 = vmatmul.bf16.vlgmr.msra.gmra.mxu2 %v751_v21  ;;  %831 = vmatmul.bf16.vlgmr.msra.gmra.mxu0 %v743_v25  ;;  %v558_v21 = vrot.slane %v557_v8, 4  ;;  %v568_v23 = vrot.slane %v567_v10, 4  ;;  %v365_v24 = vor.u32 %v364_v11, %v361_v9  ;;  %v578_v42 = vshll.u32 %v265_v27, 16  ;;  %p11718_p2 = pneg %p11717_p1 }
  0x37   : > { %1437 = vmatpush.bf16.msrb.mxu2 %v11320_v17  ;;  %1104 = vmatmul.bf16.vlgmr.msra.gmra.mxu3 %v11289_v22  ;;  %v11290_v17 = vld [vmem:[%s11878_s8 + $0x6c] sm:$0xff]  ;;  %v572_v22 = vrot.slane %v570_v5, 5  ;;  %v375_v25 = vor.u32 %v374_v13, %v370_v12  ;;  %v584_v43 = vshll.u32 %v266_v28, 16  ;;  %v588_v44 = vshrl.u32 %v266_v28, 16 }
  0x38   : > { %1752 = vmatpush.bf16.msrb.mxu3 %v11344_v18  ;;  %1064 = vmatmul.bf16.vlgmr.msra.gmra.mxu1 %v11281_v26  ;;  %v744_v18 = vpack.c.b16 %v714_v7, %v713_v6  ;;  %v378_v26 = vshll.u32 %v12017_v14, 16  ;;  %v563_v32 = vsel %vm11917_vm2, %v558_v21, %v562_v59  ;;  %v366_v37 = vrot.slane %v365_v24, 4  ;;  %v302_v59 = vld [vmem:[%s11878_s8 + $0x8c] sm:$0x1]  ;;  %v11291_v6 = vld [vmem:[%s11878_s8 + $0x78] sm:$0xff]  ;;  %p11723_p8 = pnand %p11722_p7, %p11718_p2 }
  0x39   : > { %2434 = vmatpush.bf16.msrb.mxu0 %v11352_v30  ;;  %v11317_v30 = vld [vmem:[%s15589_s1 + $0xa0] sm:$0xff]  ;;  %v376_v38 = vrot.slane %v375_v25, 4  ;;  %v383_v45 = vshrl.u32 %v249_v31, 16  ;;  %v386_v46 = vshll.u32 %v249_v31, 16  ;;  %v396_v48 = vshrl.u32 %v12031_v33, 16  ;;  %v11316_v24 = vld [vmem:[%s15589_s1 + $0x98] sm:$0xff] }
  0x3a   : > { %v380_v40 = vrot.slane %v378_v26, 5  ;;  %v371_v53 = vsel %vm11917_vm2, %v366_v37, %v370_v12  ;;  %v577_v55 = vrot.slane %v575_v41, 4  ;;  %v580_v56 = vrot.slane %v578_v42, 5  ;;  %v11283_v12 = vld [vmem:[%s11878_s8 + $0x18] sm:$0xff]  ;;  %v267_v13 = vld [vmem:[%s11878_s8 + $0x90] sm:$0xf] }
  0x3b   : > { %1438 = vmatpush.bf16.msrb.mxu2 %v11319_v35  ;;  %v11349_v35 = vld [vmem:[%s15589_s1 + $0x120] sm:$0xff]  ;;  %v586_v57 = vrot.slane %v584_v43, 5  ;;  %v590_v58 = vrot.slane %v588_v44, 4  ;;  %v385_v60 = vrot.slane %v383_v45, 4  ;;  %v388_v61 = vrot.slane %v386_v46, 5  ;;  %v11348_v31 = vld [vmem:[%s15589_s1 + $0x118] sm:$0xff] }
  0x3c   : > { %1753 = vmatpush.bf16.msrb.mxu3 %v11343_v36  ;;  %v573_v36 = vsel %vm11917_vm2, %v568_v23, %v572_v22  ;;  %v381_v54 = vsel %vm11917_vm2, %v376_v38, %v380_v40  ;;  %v398_v63 = vrot.slane %v396_v48, 4  ;;  %v715_v0 = vunpack.c.l.b16 %v371_v53  ;;  %v303_v44 = vld [vmem:[%s11878_s8 + $0x98] sm:$0x1] }
  0x3d   : > { %2435 = vmatpush.bf16.msrb.mxu0 %v11351_v47  ;;  %v392_v47 = vshll.u32 %v12031_v33, 16  ;;  %v716_v1 = vunpack.c.l.b16 %v381_v54  ;;  %v581_v4 = vor.u32 %v580_v56, %v577_v55  ;;  %v594_v5 = vshll.u32 %v302_v59, 16 }
  0x3e   : > { %v591_v7 = vor.u32 %v590_v58, %v586_v57  ;;  %v389_v8 = vor.u32 %v388_v61, %v385_v60  ;;  %v599_v25 = vshrl.u32 %v267_v13, 16  ;;  %v602_v26 = vshll.u32 %v267_v13, 16  ;;  %v253_v13 = vld [vmem:[%s11878_s8 + $0x3c] sm:$0xf] }
  0x3f   : > { %1439 = vmatpush.bf16.msrb.mxu2 %v11318_v49  ;;  %v731_v49 = vunpack.c.l.b16 %v563_v32  ;;  %v394_v62 = vrot.slane %v392_v47, 5  ;;  %v745_v11 = vpack.c.b16 %v716_v1, %v715_v0  ;;  %v251_v32 = vld [vmem:[%s11878_s8 + $0x30] sm:$0xf]  ;;  %v11292_v0 = vld [vmem:[%s11878_s8 + $0x84] sm:$0xff] }
  0x40   : > { %1754 = vmatpush.bf16.msrb.mxu3 %v11342_v51  ;;  %v732_v51 = vunpack.c.l.b16 %v573_v36  ;;  %v390_v21 = vrot.slane %v389_v8, 4  ;;  %v601_v40 = vrot.slane %v599_v25, 4  ;;  %v604_v41 = vrot.slane %v602_v26, 5 }
  0x41   : > { %2436 = vmatpush.bf16.msrb.mxu0 %v11350_v2  ;;  %v12049_v2 = vld [vmem:[%s11878_s8 + $0x2c] sm:$0x1]  ;;  %v399_v9 = vor.u32 %v398_v63, %v394_v62  ;;  %v407_v45 = vshrl.u32 %v251_v32, 16  ;;  %v410_v46 = vshll.u32 %v251_v32, 16 }
  0x42   : > { %v753_v3 = vpack.c.b16 %v732_v51, %v731_v49  ;;  %v402_v10 = vshll.u32 %v12049_v2, 16  ;;  %v395_v37 = vsel %vm11917_vm2, %v390_v21, %v394_v62  ;;  %v605_v55 = vor.u32 %v604_v41, %v601_v40  ;;  %v12081_v62 = vld [vmem:[%s11878_s8 + $0x38] sm:$0x1] }
  0x43   : > { %1440 = vmatpush.bf16.msrb.mxu2 %v11317_v30  ;;  %v400_v22 = vrot.slane %v399_v9, 4  ;;  %v11340_v30 = vld [vmem:[%s15589_s1 + $0xd8] sm:$0xff]  ;;  %v717_v53 = vunpack.c.l.b16 %v395_v37  ;;  %v409_v58 = vrot.slane %v407_v45, 4  ;;  %v412_v59 = vrot.slane %v410_v46, 5  ;;  %v304_v45 = vld [vmem:[%s11878_s8 + $0xa4] sm:$0x1] }
  0x44   : > { %1755 = vmatpush.bf16.msrb.mxu3 %v11341_v34  ;;  %v404_v23 = vrot.slane %v402_v10, 5  ;;  %v12067_v34 = vld [vmem:[%s11878_s8 + $0x34] sm:$0xf]  ;;  %v426_v9 = vshll.u32 %v12081_v62, 16  ;;  %v269_v10 = vld [vmem:[%s11878_s8 + $0x9c] sm:$0xf] }
  0x45   : > { %2437 = vmatpush.bf16.msrb.mxu0 %v11349_v35  ;;  %v416_v47 = vshll.u32 %v12067_v34, 16  ;;  %v420_v48 = vshrl.u32 %v12067_v34, 16  ;;  %v623_v25 = vshrl.u32 %v269_v10, 16  ;;  %v626_v26 = vshll.u32 %v269_v10, 16 }
  0x46   : > { %876 = vmatmul.bf16.gmra.mxu2 %v752_v15  ;;  %836 = vmatmul.bf16.gmra.mxu0 %v744_v18  ;;  %v268_v15 = vld [vmem:[%s11878_s8 + $0x94] sm:$0xf]  ;;  %v596_v18 = vrot.slane %v594_v5, 5  ;;  %v405_v38 = vsel %vm11917_vm2, %v400_v22, %v404_v23 }
  0x47   : > { %1109 = vmatmul.bf16.gmra.mxu3 %v11290_v17  ;;  %v582_v17 = vrot.slane %v581_v4, 4  ;;  %v608_v27 = vshll.u32 %v268_v15, 16  ;;  %v612_v28 = vshrl.u32 %v268_v15, 16  ;;  %1441 = vmatpush.bf16.msrb.mxu2 %v11316_v24  ;;  %v718_v54 = vunpack.c.l.b16 %v405_v38 }
  0x48   : > { %1069 = vmatmul.bf16.gmra.mxu1 %v11282_v19  ;;  %v592_v19 = vrot.slane %v591_v7, 4  ;;  %1756 = vmatpush.bf16.msrb.mxu3 %v11340_v30  ;;  %v418_v60 = vrot.slane %v416_v47, 5  ;;  %v422_v61 = vrot.slane %v420_v48, 4  ;;  %v606_v4 = vrot.slane %v605_v55, 4 }
  0x49   : > { %2438 = vmatpush.bf16.msrb.mxu0 %v11348_v31  ;;  %v587_v35 = vsel %vm11917_vm2, %v582_v17, %v586_v57  ;;  %v610_v42 = vrot.slane %v608_v27, 5  ;;  %v614_v43 = vrot.slane %v612_v28, 4  ;;  %v618_v57 = vshll.u32 %v303_v44, 16  ;;  %v12095_v17 = vld [vmem:[%s11878_s8 + $0x40] sm:$0xf] }
  0x4a   : > { %v597_v36 = vsel %vm11917_vm2, %v592_v19, %v596_v18  ;;  %v733_v49 = vunpack.c.l.b16 %v587_v35  ;;  %v746_v1 = vpack.c.b16 %v718_v54, %v717_v53  ;;  %v413_v7 = vor.u32 %v412_v59, %v409_v58  ;;  %v11339_v18 = vld [vmem:[%s15589_s1 + $0xd0] sm:$0xff]  ;;  %v12113_v54 = vld [vmem:[%s11878_s8 + $0x44] sm:$0x1] }
  0x4b   : > { %v734_v51 = vunpack.c.l.b16 %v597_v36  ;;  %v615_v56 = vor.u32 %v614_v43, %v610_v42  ;;  %v620_v5 = vrot.slane %v618_v57, 5  ;;  %v423_v8 = vor.u32 %v422_v61, %v418_v60  ;;  %v11347_v19 = vld [vmem:[%s15589_s1 + $0x110] sm:$0xff] }
  0x4c   : > { %v611_v15 = vsel %vm11917_vm2, %v606_v4, %v610_v42  ;;  %v414_v22 = vrot.slane %v413_v7, 4  ;;  %v428_v24 = vrot.slane %v426_v9, 5  ;;  %1757 = vmatpush.bf16.msrb.mxu3 %v11339_v18  ;;  %v431_v30 = vshrl.u32 %v253_v13, 16  ;;  %v11293_v59 = vld [vmem:[%s11878_s8 + $0x90] sm:$0xff]  ;;  %v272_v4 = vld [vmem:[%s11878_s8 + $0xac] sm:$0xf] }
  0x4d   : > { %v754_v63 = vpack.c.b16 %v734_v51, %v733_v49  ;;  %v424_v23 = vrot.slane %v423_v8, 4  ;;  %2439 = vmatpush.bf16.msrb.mxu0 %v11347_v19  ;;  %v434_v31 = vshll.u32 %v253_v13, 16  ;;  %v440_v32 = vshll.u32 %v12095_v17, 16  ;;  %v11338_v19 = vld [vmem:[%s15589_s1 + $0xc8] sm:$0xff] }
  0x4e   : > { %v444_v35 = vshrl.u32 %v12095_v17, 16  ;;  %v735_v36 = vunpack.c.l.b16 %v611_v15  ;;  %v419_v38 = vsel %vm11917_vm2, %v414_v22, %v418_v60  ;;  %v625_v41 = vrot.slane %v623_v25, 4  ;;  %v11360_v22 = vld [vmem:[%s15589_s1 + $0x178] sm:$0xff] }
  0x4f   : > { %v429_v40 = vsel %vm11917_vm2, %v424_v23, %v428_v24  ;;  %v628_v42 = vrot.slane %v626_v26, 5  ;;  %v433_v46 = vrot.slane %v431_v30, 4  ;;  %v436_v47 = vrot.slane %v434_v31, 5  ;;  %v255_v23 = vld [vmem:[%s11878_s8 + $0x48] sm:$0xf]  ;;  %2860 = vmatpush.bf16.msrb.mxu1 %v11360_v22  ;;  %v11345_v22 = vld [vmem:[%s15589_s1 + $0x100] sm:$0xff] }
  0x50   : > { %v442_v48 = vrot.slane %v440_v32, 5  ;;  %v446_v49 = vrot.slane %v444_v35, 4  ;;  %v719_v51 = vunpack.c.l.b16 %v419_v38  ;;  %v720_v53 = vunpack.c.l.b16 %v429_v40  ;;  %v12134_v24 = vld [vmem:[%s11878_s8 + $0x4c] sm:$0xf]  ;;  %1758 = vmatpush.bf16.msrb.mxu3 %v11338_v19 }
  0x51   : > { %v629_v55 = vor.u32 %v628_v42, %v625_v41  ;;  %v642_v57 = vshll.u32 %v304_v45, 16  ;;  %v437_v60 = vor.u32 %v436_v47, %v433_v46  ;;  %v656_v15 = vshll.u32 %v272_v4, 16 }
  0x52   : > { %v447_v61 = vor.u32 %v446_v49, %v442_v48  ;;  %v660_v18 = vshrl.u32 %v272_v4, 16  ;;  %v458_v38 = vshll.u32 %v255_v23, 16  ;;  %v464_v40 = vshll.u32 %v12134_v24, 16 }
  0x53   : > { %v644_v7 = vrot.slane %v642_v57, 5  ;;  %v438_v8 = vrot.slane %v437_v60, 4  ;;  %v658_v32 = vrot.slane %v656_v15, 5  ;;  %v468_v41 = vshrl.u32 %v12134_v24, 16  ;;  %v11286_v60 = vld [vmem:[%s11878_s8 + $0x3c] sm:$0xff] }
  0x54   : > { %v448_v9 = vrot.slane %v447_v61, 4  ;;  %v662_v35 = vrot.slane %v660_v18, 4 }
  0x56   : > { %881 = vmatmul.bf16.gmra.mxu2 %v753_v3  ;;  %841 = vmatmul.bf16.gmra.mxu0 %v745_v11  ;;  %v11284_v3 = vld [vmem:[%s11878_s8 + $0x24] sm:$0xff]  ;;  %v270_v11 = vld [vmem:[%s11878_s8 + $0xa0] sm:$0xf]  ;;  %v663_v47 = vor.u32 %v662_v35, %v658_v32 }
  0x57   : > { %1114 = vmatmul.bf16.gmra.mxu3 %v11291_v6  ;;  %v616_v6 = vrot.slane %v615_v56, 4  ;;  %v632_v27 = vshll.u32 %v270_v11, 16  ;;  %v636_v28 = vshrl.u32 %v270_v11, 16 }
  0x58   : > { %1074 = vmatmul.bf16.gmra.mxu1 %v11283_v12  ;;  %v11315_v12 = vld [vmem:[%s15589_s1 + $0x90] sm:$0xff] }
  0x59   : > { %v621_v21 = vsel %vm11917_vm2, %v616_v6, %v620_v5  ;;  %1442 = vmatpush.bf16.msrb.mxu2 %v11315_v12  ;;  %v634_v43 = vrot.slane %v632_v27, 5  ;;  %v638_v44 = vrot.slane %v636_v28, 4  ;;  %v630_v5 = vrot.slane %v629_v55, 4  ;;  %v11314_v12 = vld [vmem:[%s15589_s1 + $0x88] sm:$0xff] }
  0x5a   : > { %v736_v37 = vunpack.c.l.b16 %v621_v21  ;;  %v11346_v21 = vld [vmem:[%s15589_s1 + $0x108] sm:$0xff]  ;;  %v443_v27 = vsel %vm11917_vm2, %v438_v8, %v442_v48  ;;  %v470_v55 = vrot.slane %v468_v41, 4  ;;  %v11313_v8 = vld [vmem:[%s15589_s1 + $0x80] sm:$0xff] }
  0x5b   : > { %v639_v56 = vor.u32 %v638_v44, %v634_v43  ;;  %2440 = vmatpush.bf16.msrb.mxu0 %v11346_v21  ;;  %v635_v25 = vsel %vm11917_vm2, %v630_v5, %v634_v43  ;;  %v721_v44 = vunpack.c.l.b16 %v443_v27  ;;  %v11359_v5 = vld [vmem:[%s15589_s1 + $0x170] sm:$0xff]  ;;  %v11358_v21 = vld [vmem:[%s15589_s1 + $0x168] sm:$0xff] }
  0x5c   : > { %v755_v58 = vpack.c.b16 %v736_v37, %v735_v36  ;;  %v305_v36 = vld [vmem:[%s11878_s8 + $0xb0] sm:$0x1]  ;;  %v455_v37 = vshrl.u32 %v255_v23, 16  ;;  %v737_v42 = vunpack.c.l.b16 %v635_v25  ;;  %2861 = vmatpush.bf16.msrb.mxu1 %v11359_v5  ;;  %v11287_v5 = vld [vmem:[%s11878_s8 + $0x48] sm:$0xff] }
  0x5d   : > { %v640_v6 = vrot.slane %v639_v56, 4  ;;  %1443 = vmatpush.bf16.msrb.mxu2 %v11314_v12  ;;  %v666_v48 = vshll.u32 %v305_v36, 16  ;;  %v12148_v56 = vld [vmem:[%s11878_s8 + $0x50] sm:$0x1]  ;;  %v11337_v12 = vld [vmem:[%s15589_s1 + $0xc0] sm:$0xff] }
  0x5e   : > { %v457_v49 = vrot.slane %v455_v37, 4  ;;  %v474_v4 = vshll.u32 %v12148_v56, 16  ;;  %1759 = vmatpush.bf16.msrb.mxu3 %v11337_v12 }
  0x5f   : > { %v645_v26 = vsel %vm11917_vm2, %v640_v6, %v644_v7  ;;  %v273_v6 = vld [vmem:[%s11878_s8 + $0xb4] sm:$0xf]  ;;  %v274_v7 = vld [vmem:[%s11878_s8 + $0xb8] sm:$0xf]  ;;  %2441 = vmatpush.bf16.msrb.mxu0 %v11345_v22 }
  0x60   : > { %v738_v43 = vunpack.c.l.b16 %v645_v26  ;;  %v476_v19 = vrot.slane %v474_v4, 5  ;;  %v671_v23 = vshrl.u32 %v273_v6, 16  ;;  %v674_v25 = vshll.u32 %v273_v6, 16  ;;  %2862 = vmatpush.bf16.msrb.mxu1 %v11358_v21  ;;  %v11354_v21 = vld [vmem:[%s15589_s1 + $0x148] sm:$0xff] }
  0x61   : > { %1444 = vmatpush.bf16.msrb.mxu2 %v11313_v8  ;;  %v680_v26 = vshll.u32 %v274_v7, 16  ;;  %v684_v27 = vshrl.u32 %v274_v7, 16  ;;  %v11355_v8 = vld [vmem:[%s15589_s1 + $0x150] sm:$0xff] }
  0x62   : > { %v756_v57 = vpack.c.b16 %v738_v43, %v737_v42  ;;  %v673_v41 = vrot.slane %v671_v23, 4  ;;  %v676_v42 = vrot.slane %v674_v25, 5 }
  0x63   : > { %v682_v43 = vrot.slane %v680_v26, 5 }
  0x66   : > { %886 = vmatmul.bf16.gmra.mxu2 %v754_v63  ;;  %846 = vmatmul.bf16.gmra.mxu0 %v746_v1  ;;  %v450_v63 = vshll.u32 %v12113_v54, 16  ;;  %v11285_v1 = vld [vmem:[%s11878_s8 + $0x30] sm:$0xff] }
  0x67   : > { %1119 = vmatmul.bf16.gmra.mxu3 %v11292_v0  ;;  %v747_v0 = vpack.c.b16 %v720_v53, %v719_v51  ;;  %v460_v51 = vrot.slane %v458_v38, 5  ;;  %v466_v53 = vrot.slane %v464_v40, 5  ;;  %v11357_v40 = vld [vmem:[%s15589_s1 + $0x160] sm:$0xff] }
  0x68   : > { %1079 = vmatmul.bf16.gmra.mxu1 %v11284_v3  ;;  %v271_v3 = vld [vmem:[%s11878_s8 + $0xa8] sm:$0xf]  ;;  %v452_v10 = vrot.slane %v450_v63, 5  ;;  %v668_v63 = vrot.slane %v666_v48, 5 }
  0x69   : > { %v647_v11 = vshrl.u32 %v271_v3, 16  ;;  %v650_v13 = vshll.u32 %v271_v3, 16  ;;  %v471_v3 = vor.u32 %v470_v55, %v466_v53  ;;  %v12185_v55 = vld [vmem:[%s11878_s8 + $0x5c] sm:$0x1]  ;;  %2863 = vmatpush.bf16.msrb.mxu1 %v11357_v40 }
  0x6a   : > { %v453_v28 = vsel %vm11917_vm2, %v448_v9, %v452_v10  ;;  %v257_v10 = vld [vmem:[%s11878_s8 + $0x54] sm:$0xf] }
  0x6b   : > { %v649_v30 = vrot.slane %v647_v11, 4  ;;  %v652_v31 = vrot.slane %v650_v13, 5  ;;  %v722_v45 = vunpack.c.l.b16 %v453_v28  ;;  %v258_v11 = vld [vmem:[%s11878_s8 + $0x58] sm:$0xf]  ;;  %v472_v18 = vrot.slane %v471_v3, 4 }
  0x6c   : > { %v479_v28 = vshrl.u32 %v257_v10, 16  ;;  %v498_v3 = vshll.u32 %v12185_v55, 16 }
  0x6d   : > { %v653_v46 = vor.u32 %v652_v31, %v649_v30  ;;  %v482_v30 = vshll.u32 %v257_v10, 16  ;;  %v488_v31 = vshll.u32 %v258_v11, 16  ;;  %v477_v38 = vsel %vm11917_vm2, %v472_v18, %v476_v19  ;;  %v10252_v18 = vld [vmem:[%s11878_s8 + $0xc] sm:$0xf]  ;;  %v12204_v19 = vld [vmem:[%s11878_s8 + $0x10] sm:$0xf] }
  0x6e   : > { %v500_v12 = vrot.slane %v498_v3, 5 }
  0x6f   : > { %v654_v61 = vrot.slane %v653_v46, 4  ;;  %v481_v46 = vrot.slane %v479_v28, 4  ;;  %v490_v48 = vrot.slane %v488_v31, 5  ;;  %v1925_v28 = vshll.u32 %v10252_v18, 16 }
  0x70   : > { %v1935_v31 = vshrl.u32 %v12204_v19, 16 }
  0x71   : > { %v659_v9 = vsel %vm11917_vm2, %v654_v61, %v658_v32  ;;  %v492_v32 = vshrl.u32 %v258_v11, 16  ;;  %v11295_v61 = vld [vmem:[%s11878_s8 + $0xa8] sm:$0xff] }
  0x72   : > { %v739_v35 = vunpack.c.l.b16 %v659_v9 }
  0x76   : > { %891 = vmatmul.bf16.gmra.mxu2 %v755_v58  ;;  %851 = vmatmul.bf16.gmra.mxu0 %v747_v0  ;;  %v11294_v58 = vld [vmem:[%s11878_s8 + $0x9c] sm:$0xff]  ;;  %v664_v0 = vrot.slane %v663_v47, 4  ;;  %v484_v47 = vrot.slane %v482_v30, 5  ;;  %v1931_v30 = vshll.u32 %v12204_v19, 16 }
  0x77   : > { %1124 = vmatmul.bf16.gmra.mxu3 %v11293_v59  ;;  %v748_v59 = vpack.c.b16 %v722_v45, %v721_v44  ;;  %v686_v44 = vrot.slane %v684_v27, 4  ;;  %v306_v45 = vld [vmem:[%s11878_s8 + $0xbc] sm:$0x1]  ;;  %v1922_v27 = vshrl.u32 %v10252_v18, 16 }
  0x78   : > { %1084 = vmatmul.bf16.gmra.mxu1 %v11285_v1  ;;  %v461_v1 = vor.u32 %v460_v51, %v457_v49  ;;  %v669_v13 = vsel %vm11917_vm2, %v664_v0, %v668_v63  ;;  %v494_v49 = vrot.slane %v492_v32, 4  ;;  %v485_v0 = vor.u32 %v484_v47, %v481_v46  ;;  %v11353_v32 = vld [vmem:[%s15589_s1 + $0x140] sm:$0xff]  ;;  %v10254_v46 = vld [vmem:[%s11878_s8 + $0x14] sm:$0x1] }
  0x79   : > { %v740_v36 = vunpack.c.l.b16 %v669_v13  ;;  %v687_v63 = vor.u32 %v686_v44, %v682_v43  ;;  %v11384_v13 = vld [vmem:[%s15589_s1 + $0x1b8] sm:$0xff]  ;;  %v1937_v44 = vrot.slane %v1935_v31, 4 }
  0x7a   : > { %v462_v15 = vrot.slane %v461_v1, 4  ;;  %v495_v1 = vor.u32 %v494_v49, %v490_v48  ;;  %v486_v10 = vrot.slane %v485_v0, 4  ;;  %3175 = vmatpush.bf16.msra.mxu2 %v11384_v13  ;;  %v10348_v0 = vld [vmem:[%s11878_s8 + $0xc] sm:$0xe] }
  0x7b   : > { %v688_v9 = vrot.slane %v687_v63, 4 }
  0x7c   : > { %v467_v37 = vsel %vm11917_vm2, %v462_v15, %v466_v53  ;;  %v724_v53 = vunpack.c.l.b16 %v477_v38  ;;  %v496_v11 = vrot.slane %v495_v1, 4  ;;  %v11392_v15 = vld [vmem:[%s15589_s1 + $0x1f8] sm:$0xff]  ;;  %v491_v25 = vsel %vm11917_vm2, %v486_v10, %v490_v48 }
  0x7d   : > { %v723_v51 = vunpack.c.l.b16 %v467_v37  ;;  %3857 = vmatpush.bf16.msra.mxu3 %v11392_v15  ;;  %v725_v38 = vunpack.c.l.b16 %v491_v25  ;;  %v11296_v48 = vld [vmem:[%s11878_s8 + $0xb4] sm:$0xff]  ;;  %v15612_v1 = vmov 0  ;;  %v2624_v10 = vrot.slane %v10254_v46, 5 }
  0x7e   : > { %v501_v26 = vsel %vm11917_vm2, %v496_v11, %v500_v12  ;;  %v15613_v1 = vsel %vm12233_vm5, 4294967295, %v15612_v1 }
  0x7f   : > { %v749_v4 = vpack.c.b16 %v724_v53, %v723_v51  ;;  %v726_v40 = vunpack.c.l.b16 %v501_v26  ;;  %v1145_v51 = vld [vmem:[%s11878_s8] sm:$0xe]  ;;  %v11288_v53 = vld [vmem:[%s11878_s8 + $0x54] sm:$0xff]  ;;  %15614 = vst [vmem:[#allocation11_spill] sm:$0xff] %v15613_v1 }
  0x81   : > { %v750_v49 = vpack.c.b16 %v726_v40, %v725_v38  ;;  %v10257_v38 = vld [vmem:[%s11878_s8 + $0x20] sm:$0x1]  ;;  %v1205_v40 = vrot.slane %v11931_v52, 5  ;;  %v1208_v52 = vrot.slane %v11969_v20, 5  ;;  %v12272_v20 = vld [vmem:[%s11878_s8 + $0x28] sm:$0xf] }
  0x86   : > { %896 = vmatmul.bf16.gmra.mxu2 %v756_v57  ;;  %856 = vmatmul.bf16.gmra.mxu0 %v748_v59  ;;  %v11356_v57 = vld [vmem:[%s15589_s1 + $0x158] sm:$0xff]  ;;  %v677_v59 = vor.u32 %v676_v42, %v673_v41  ;;  %v1924_v41 = vrot.slane %v1922_v27, 4  ;;  %v1927_v42 = vrot.slane %v1925_v28, 5 }
  0x87   : > { %1129 = vmatmul.bf16.gmra.mxu3 %v11294_v58  ;;  %v757_v58 = vpack.c.b16 %v740_v36, %v739_v35  ;;  %2864 = vmatpush.bf16.msrb.mxu1 %v11356_v57  ;;  %v11400_v35 = vld [vmem:[%s15589_s1 + $0x238] sm:$0xff] }
  0x88   : > { %1089 = vmatmul.bf16.gmra.mxu1 %v11286_v60  ;;  %v690_v60 = vshll.u32 %v306_v45, 16  ;;  %v678_v6 = vrot.slane %v677_v59, 4  ;;  %4283 = vmatpush.bf16.msra.mxu0 %v11400_v35  ;;  %v1198_v45 = vrot.slane %v11892_v16, 5  ;;  %v1928_v57 = vor.u32 %v1927_v42, %v1924_v41  ;;  %v11321_v42 = vld [vmem:[%s11878_s8 + $0xc] sm:$0xff] }
  0x89   : > { %v1941_v59 = vshll.u32 %v10254_v46, 16  ;;  %v1201_v16 = vrot.slane %v11906_v29, 5  ;;  %v1965_v46 = vshll.u32 %v10257_v38, 16 }
  0x8a   : > { %v692_v7 = vrot.slane %v690_v60, 5  ;;  %v683_v22 = vsel %vm11917_vm2, %v678_v6, %v682_v43  ;;  %v1933_v43 = vrot.slane %v1931_v30, 5  ;;  %v2621_v60 = vrot.slane %v12204_v19, 5  ;;  %v12239_v6 = vld [vmem:[%s11878_s8 + $0x1c] sm:$0xf] }
  0x8b   : > { %2865 = vmatpush.bf16.msrb.mxu1 %v11355_v8  ;;  %v741_v36 = vunpack.c.l.b16 %v683_v22  ;;  %v1200_v63 = vrot.slane %v1198_v45, 4  ;;  %v1929_v3 = vrot.slane %v1928_v57, 4  ;;  %v10364_v8 = vrot.slane %v10348_v0, 9  ;;  %v11383_v0 = vld [vmem:[%s15589_s1 + $0x1b0] sm:$0xff] }
  0x8c   : > { %v693_v23 = vsel %vm11917_vm2, %v688_v9, %v692_v7  ;;  %v1943_v7 = vrot.slane %v1941_v59, 5  ;;  %v2623_v9 = vrot.slane %v2621_v60, 4  ;;  %v1955_v15 = vshll.u32 %v12239_v6, 16  ;;  %3176 = vmatpush.bf16.msra.mxu2 %v11383_v0 }
  0x8d   : > { %v742_v37 = vunpack.c.l.b16 %v693_v23  ;;  %v1202_v11 = vsel %vm12233_vm5, %v1200_v63, %v1201_v16  ;;  %v1959_v18 = vshrl.u32 %v12239_v6, 16  ;;  %v1934_v19 = vsel %vm11917_vm2, %v1929_v3, %v1933_v43 }
  0x8e   : > { %v2622_v22 = vsel %vm12233_vm5, %v10364_v8, %v2621_v60  ;;  %v2625_v23 = vsel %vm12233_vm5, %v2623_v9, %v2624_v10  ;;  %v1326_v26 = vunpack.c.l.b16 %v1202_v11  ;;  %v1957_v30 = vrot.slane %v1955_v15, 5 }
  0x8f   : > { %2866 = vmatpush.bf16.msrb.mxu1 %v11354_v21  ;;  %v758_v47 = vpack.c.b16 %v742_v37, %v741_v36  ;;  %v1961_v31 = vrot.slane %v1959_v18, 4  ;;  %v2748_v36 = vunpack.c.l.b16 %v2622_v22  ;;  %v2749_v37 = vunpack.c.l.b16 %v2625_v23 }
  0x90   : > { %v2628_v57 = vrot.slane %v12239_v6, 5  ;;  %v1207_v60 = vrot.slane %v1205_v40, 4  ;;  %v1967_v16 = vrot.slane %v1965_v46, 5  ;;  %v1983_v22 = vshrl.u32 %v12272_v20, 16 }
  0x92   : > { %v2630_v6 = vrot.slane %v2628_v57, 4 }
  0x93   : > { %2867 = vmatpush.bf16.msrb.mxu1 %v11353_v32  ;;  %v2322_v32 = vunpack.c.l.b16 %v1934_v19 }
  0x96   : > { %901 = vmatmul.bf16.gmra.mxu2 %v757_v58  ;;  %861 = vmatmul.bf16.gmra.mxu0 %v749_v4  ;;  %v1938_v58 = vor.u32 %v1937_v44, %v1933_v43  ;;  %v1146_v43 = vld [vmem:[%s11878_s8 + $0xc] sm:$0xe] }
  0x97   : > { %1134 = vmatmul.bf16.gmra.mxu3 %v11295_v61  ;;  %v10044_v61 = vrot.slane %v1145_v51, 9  ;;  %v10045_v59 = vrot.slane %v1146_v43, 9  ;;  %v10260_v43 = vld [vmem:[%s11878_s8 + $0x2c] sm:$0x1] }
  0x98   : > { %1094 = vmatmul.bf16.gmra.mxu1 %v11287_v5  ;;  %v1939_v4 = vrot.slane %v1938_v58, 4  ;;  %v10255_v5 = vld [vmem:[%s11878_s8 + $0x18] sm:$0xf] }
  0x99   : > { %v1199_v29 = vsel %vm12233_vm5, %v10044_v61, %v1198_v45  ;;  %v1946_v12 = vshrl.u32 %v10255_v5, 16  ;;  %v1949_v13 = vshll.u32 %v10255_v5, 16  ;;  %v1962_v45 = vor.u32 %v1961_v31, %v1957_v30  ;;  %v11391_v5 = vld [vmem:[%s15589_s1 + $0x1f0] sm:$0xff] }
  0x9a   : > { %v1944_v21 = vsel %vm11917_vm2, %v1939_v4, %v1943_v7  ;;  %v1325_v25 = vunpack.c.l.b16 %v1199_v29  ;;  %v10258_v4 = vld [vmem:[%s11878_s8 + $0x24] sm:$0xf]  ;;  %v2631_v7 = vrot.slane %v10257_v38, 5  ;;  %v1206_v10 = vsel %vm12233_vm5, %v10045_v59, %v1205_v40  ;;  %3858 = vmatpush.bf16.msra.mxu3 %v11391_v5  ;;  %v11399_v31 = vld [vmem:[%s15589_s1 + $0x230] sm:$0xff] }
  0x9b   : > { %v1948_v27 = vrot.slane %v1946_v12, 4  ;;  %v1951_v28 = vrot.slane %v1949_v13, 5  ;;  %v2323_v35 = vunpack.c.l.b16 %v1944_v21  ;;  %v1963_v63 = vrot.slane %v1962_v45, 4  ;;  %4284 = vmatpush.bf16.msra.mxu0 %v11399_v31 }
  0x9c   : > { %v1357_v41 = vpack.c.b16 %v1326_v26, %v1325_v25  ;;  %v1209_v29 = vsel %vm12233_vm5, %v1207_v60, %v1208_v52  ;;  %v1970_v15 = vshrl.u32 %v10258_v4, 16  ;;  %v1973_v19 = vshll.u32 %v10258_v4, 16 }
  0x9d   : > { %v1952_v44 = vor.u32 %v1951_v28, %v1948_v27  ;;  %v1968_v13 = vsel %vm11917_vm2, %v1963_v63, %v1967_v16  ;;  %v1979_v21 = vshll.u32 %v12272_v20, 16  ;;  %v2632_v26 = vsel %vm12233_vm5, %v2630_v6, %v2631_v7 }
  0x9e   : > { %v1327_v28 = vunpack.c.l.b16 %v1206_v10  ;;  %v2751_v38 = vunpack.c.l.b16 %v2632_v26  ;;  %v1975_v40 = vrot.slane %v1973_v19, 5  ;;  %v1989_v52 = vshll.u32 %v10260_v43, 16 }
  0x9f   : > { %v1953_v61 = vrot.slane %v1952_v44, 4  ;;  %v2635_v16 = vrot.slane %v12272_v20, 5  ;;  %v10261_v20 = vld [vmem:[%s11878_s8 + $0x30] sm:$0xf] }
  0xa1   : > { %v1958_v12 = vsel %vm11917_vm2, %v1953_v61, %v1957_v30  ;;  %v1328_v30 = vunpack.c.l.b16 %v1209_v29  ;;  %v2637_v10 = vrot.slane %v2635_v16, 4  ;;  %v2638_v29 = vrot.slane %v10260_v43, 5 }
  0xa3   : > { %v2639_v31 = vsel %vm12233_vm5, %v2637_v10, %v2638_v29 }
  0xa4   : > { %v2753_v43 = vunpack.c.l.b16 %v2639_v31 }
  0xa6   : > { %906 = vmatmul.bf16.gmra.mxu2 %v758_v47  ;;  %866 = vmatmul.bf16.gmra.mxu0 %v750_v49  ;;  %v2354_v47 = vpack.c.b16 %v2323_v35, %v2322_v32  ;;  %v2324_v32 = vunpack.c.l.b16 %v1958_v12  ;;  %v2325_v35 = vunpack.c.l.b16 %v1968_v13 }
  0xa7   : > { %1139 = vmatmul.bf16.gmra.mxu3 %v11296_v48  ;;  %v2780_v48 = vpack.c.b16 %v2749_v37, %v2748_v36  ;;  %v1972_v37 = vrot.slane %v1970_v15, 4  ;;  %v12308_v15 = vld [vmem:[%s11878_s8 + $0x34] sm:$0xf] }
  0xa8   : > { %1099 = vmatmul.bf16.gmra.mxu1 %v11288_v53  ;;  %v10349_v53 = vld [vmem:[%s11878_s8 + $0x18] sm:$0xe] }
  0xa9   : > { %v10365_v3 = vrot.slane %v10349_v53, 9  ;;  %v1976_v59 = vor.u32 %v1975_v40, %v1972_v37 }
  0xab   : > { %v2629_v18 = vsel %vm12233_vm5, %v10365_v3, %v2628_v57  ;;  %v1147_v57 = vld [vmem:[%s11878_s8 + $0x18] sm:$0xe]  ;;  %v10350_v3 = vld [vmem:[%s11878_s8 + $0x24] sm:$0xe]  ;;  %v1977_v6 = vrot.slane %v1976_v59, 4 }
  0xac   : > { %v2750_v36 = vunpack.c.l.b16 %v2629_v18  ;;  %v10046_v4 = vrot.slane %v1147_v57, 9 }
  0xae   : > { %v2781_v53 = vpack.c.b16 %v2751_v38, %v2750_v36 }
  0xb3   : > { %v832_v49 = vpop.f32.mrf.mxu0 }
  0xb5   : > { %v1065_v51 = vpop.f32.mrf.mxu1 }
  0xb6   : > { %v12261_v58 = vadd.f32 %v1065_v51, %v832_v49  ;;  %1445 = vmatmul.bf16.vlgmr.msrb.gmra.mxu2 %v1357_v41  ;;  %2442 = vmatmul.bf16.vlgmr.msrb.gmra.mxu0 %v2354_v47  ;;  %v1981_v41 = vrot.slane %v1979_v21, 5  ;;  %v1358_v47 = vpack.c.b16 %v1328_v30, %v1327_v28  ;;  %v2355_v49 = vpack.c.b16 %v2325_v35, %v2324_v32 }
  0xb7   : > { %1760 = vmatmul.bf16.vlgmr.msrb.gmra.mxu3 %v11321_v42  ;;  %v1985_v42 = vrot.slane %v1983_v22, 4  ;;  %v1212_v51 = vrot.slane %v11995_v50, 5  ;;  %v1215_v50 = vrot.slane %v12017_v14, 5  ;;  %v2003_v32 = vshll.u32 %v12308_v15, 16 }
  0xb8   : > { %2868 = vmatmul.bf16.vlgmr.msrb.gmra.mxu1 %v2780_v48  ;;  %v11322_v48 = vld [vmem:[%s11878_s8 + $0x18] sm:$0xff]  ;;  %v1982_v21 = vsel %vm11917_vm2, %v1977_v6, %v1981_v41  ;;  %v2007_v35 = vshrl.u32 %v12308_v15, 16 }
  0xb9   : > { %v872_v8 = vpop.f32.mrf.mxu2  ;;  %v1986_v60 = vor.u32 %v1985_v42, %v1981_v41  ;;  %v1214_v5 = vrot.slane %v1212_v51, 4  ;;  %v1213_v19 = vsel %vm12233_vm5, %v10046_v4, %v1212_v51  ;;  %v2326_v40 = vunpack.c.l.b16 %v1982_v21 }
  0xba   : > { %v1105_v9 = vpop.f32.mrf.mxu3  ;;  %v1329_v37 = vunpack.c.l.b16 %v1213_v19 }
  0xbb   : > { %v12278_v11 = vadd.f32 %v1105_v9, %v872_v8  ;;  %v834_v23 = vpop.f32.mrf.mxu0  ;;  %v1987_v7 = vrot.slane %v1986_v60, 4  ;;  %v1991_v8 = vrot.slane %v1989_v52, 5  ;;  %v10366_v9 = vrot.slane %v10350_v3, 9  ;;  %v11323_v60 = vld [vmem:[%s11878_s8 + $0x24] sm:$0xff] }
  0xbc   : > { %v1216_v14 = vsel %vm12233_vm5, %v1214_v5, %v1215_v50  ;;  %v1219_v52 = vrot.slane %v12031_v33, 5  ;;  %v11382_v33 = vld [vmem:[%s15589_s1 + $0x1a8] sm:$0xff] }
  0xbd   : > { %v1067_v25 = vpop.f32.mrf.mxu1  ;;  %v1992_v22 = vsel %vm11917_vm2, %v1987_v7, %v1991_v8  ;;  %v2636_v30 = vsel %vm12233_vm5, %v10366_v9, %v2635_v16  ;;  %v1330_v38 = vunpack.c.l.b16 %v1216_v14  ;;  %v1148_v16 = vld [vmem:[%s11878_s8 + $0x24] sm:$0xe]  ;;  %v2642_v7 = vrot.slane %v12308_v15, 5  ;;  %v10351_v9 = vld [vmem:[%s11878_s8 + $0x30] sm:$0xe]  ;;  %v11390_v15 = vld [vmem:[%s15589_s1 + $0x1e8] sm:$0xff]  ;;  %3177 = vmatpush.bf16.msra.mxu2 %v11382_v33 }
  0xbe   : > { %v12290_v27 = vadd.f32 %v1067_v25, %v834_v23  ;;  %v1994_v23 = vshrl.u32 %v10261_v20, 16  ;;  %v1997_v25 = vshll.u32 %v10261_v20, 16  ;;  %v2327_v41 = vunpack.c.l.b16 %v1992_v22  ;;  %v10264_v20 = vld [vmem:[%s11878_s8 + $0x3c] sm:$0xf]  ;;  %v12344_v14 = vld [vmem:[%s11878_s8 + $0x40] sm:$0xf]  ;;  %3859 = vmatpush.bf16.msra.mxu3 %v11390_v15 }
  0xbf   : > { %v2752_v42 = vunpack.c.l.b16 %v2636_v30  ;;  %v1359_v59 = vpack.c.b16 %v1330_v38, %v1329_v37  ;;  %v10047_v10 = vrot.slane %v1148_v16, 9  ;;  %v1221_v29 = vrot.slane %v1219_v52, 4  ;;  %v11324_v33 = vld [vmem:[%s11878_s8 + $0x30] sm:$0xff] }
  0xc0   : > { %v10367_v22 = vrot.slane %v10351_v9, 9  ;;  %v2018_v30 = vshrl.u32 %v10264_v20, 16  ;;  %v2021_v31 = vshll.u32 %v10264_v20, 16  ;;  %v2649_v15 = vrot.slane %v12344_v14, 5 }
  0xc1   : > { %v874_v44 = vpop.f32.mrf.mxu2  ;;  %v1220_v37 = vsel %vm12233_vm5, %v10047_v10, %v1219_v52 }
  0xc2   : > { %v1107_v45 = vpop.f32.mrf.mxu3 }
  0xc3   : > { %v12296_v46 = vadd.f32 %v1107_v45, %v874_v44  ;;  %v837_v61 = vpop.f32.mrf.mxu0  ;;  %v1996_v44 = vrot.slane %v1994_v23, 4  ;;  %v1999_v45 = vrot.slane %v1997_v25, 5  ;;  %v2644_v23 = vrot.slane %v2642_v7, 4 }
  0xc5   : > { %v1070_v63 = vpop.f32.mrf.mxu1  ;;  %v2000_v3 = vor.u32 %v1999_v45, %v1996_v44  ;;  %v2643_v44 = vsel %vm12233_vm5, %v10367_v22, %v2642_v7  ;;  %v1226_v7 = vrot.slane %v12067_v34, 5 }
  0xc6   : > { %v12302_v0 = vadd.f32 %v1070_v63, %v837_v61  ;;  %1450 = vmatmul.bf16.gmra.mxu2 %v1358_v47  ;;  %2447 = vmatmul.bf16.gmra.mxu0 %v2355_v49  ;;  %v10263_v47 = vld [vmem:[%s11878_s8 + $0x38] sm:$0x1]  ;;  %v2009_v49 = vrot.slane %v2007_v35, 4  ;;  %v2356_v61 = vpack.c.b16 %v2327_v41, %v2326_v40  ;;  %v2782_v63 = vpack.c.b16 %v2753_v43, %v2752_v42 }
  0xc7   : > { %1765 = vmatmul.bf16.gmra.mxu3 %v11322_v48  ;;  %v2005_v48 = vrot.slane %v2003_v32, 5  ;;  %v2013_v4 = vshll.u32 %v10263_v47, 16  ;;  %v2645_v25 = vrot.slane %v10263_v47, 5  ;;  %v2031_v35 = vshrl.u32 %v12344_v14, 16 }
  0xc8   : > { %2873 = vmatmul.bf16.gmra.mxu1 %v2781_v53  ;;  %v2754_v16 = vunpack.c.l.b16 %v2643_v44  ;;  %v1228_v34 = vrot.slane %v1226_v7, 4 }
  0xc9   : > { %v877_v12 = vpop.f32.mrf.mxu2  ;;  %v2010_v6 = vor.u32 %v2009_v49, %v2005_v48  ;;  %v2015_v19 = vrot.slane %v2013_v4, 5  ;;  %v2646_v45 = vsel %vm12233_vm5, %v2644_v23, %v2645_v25  ;;  %v2020_v49 = vrot.slane %v2018_v30, 4  ;;  %v10266_v4 = vld [vmem:[%s11878_s8 + $0x44] sm:$0x1]  ;;  %v10352_v25 = vld [vmem:[%s11878_s8 + $0x3c] sm:$0xe] }
  0xca   : > { %v1110_v13 = vpop.f32.mrf.mxu3  ;;  %v2033_v52 = vrot.slane %v2031_v35, 4  ;;  %v10368_v35 = vrot.slane %v10352_v25, 9  ;;  %v1233_v25 = vrot.slane %v12095_v17, 5  ;;  %v1236_v17 = vrot.slane %v12113_v54, 5 }
  0xcb   : > { %v12310_v18 = vadd.f32 %v1110_v13, %v877_v12  ;;  %v839_v26 = vpop.f32.mrf.mxu0  ;;  %v1222_v12 = vrot.slane %v12049_v2, 5  ;;  %v2001_v13 = vrot.slane %v2000_v3, 4  ;;  %v2011_v21 = vrot.slane %v2010_v6, 4  ;;  %v1149_v6 = vld [vmem:[%s11878_s8 + $0x30] sm:$0xe] }
  0xcc   : > { %v2027_v2 = vshll.u32 %v12344_v14, 16  ;;  %v2755_v3 = vunpack.c.l.b16 %v2646_v45  ;;  %v10048_v23 = vrot.slane %v1149_v6, 9  ;;  %v2651_v14 = vrot.slane %v2649_v15, 4 }
  0xcd   : > { %v1072_v28 = vpop.f32.mrf.mxu1  ;;  %v1223_v38 = vsel %vm12233_vm5, %v1221_v29, %v1222_v12  ;;  %v2006_v42 = vsel %vm11917_vm2, %v2001_v13, %v2005_v48  ;;  %v2016_v43 = vsel %vm11917_vm2, %v2011_v21, %v2015_v19  ;;  %v1331_v48 = vunpack.c.l.b16 %v1220_v37 }
  0xce   : > { %v12326_v36 = vadd.f32 %v1072_v28, %v839_v26  ;;  %v2037_v12 = vshll.u32 %v10266_v4, 16  ;;  %v2783_v19 = vpack.c.b16 %v2755_v3, %v2754_v16  ;;  %v2652_v37 = vrot.slane %v10266_v4, 5 }
  0xd1   : > { %v879_v51 = vpop.f32.mrf.mxu2 }
  0xd2   : > { %v1112_v53 = vpop.f32.mrf.mxu3 }
  0xd3   : > { %v12329_v57 = vadd.f32 %v1112_v53, %v879_v51  ;;  %v842_v5 = vpop.f32.mrf.mxu0  ;;  %v2023_v51 = vrot.slane %v2021_v31, 5  ;;  %v11398_v53 = vld [vmem:[%s15589_s1 + $0x228] sm:$0xff] }
  0xd4   : > { %4285 = vmatpush.bf16.msra.mxu0 %v11398_v53 }
  0xd5   : > { %v1075_v50 = vpop.f32.mrf.mxu1  ;;  %v2024_v9 = vor.u32 %v2023_v51, %v2020_v49 }
  0xd6   : > { %v12335_v8 = vadd.f32 %v1075_v50, %v842_v5  ;;  %1455 = vmatmul.bf16.gmra.mxu2 %v1359_v59  ;;  %2452 = vmatmul.bf16.gmra.mxu0 %v2356_v61  ;;  %v1332_v59 = vunpack.c.l.b16 %v1223_v38  ;;  %v2328_v61 = vunpack.c.l.b16 %v2006_v42  ;;  %v10267_v38 = vld [vmem:[%s11878_s8 + $0x48] sm:$0xf] }
  0xd7   : > { %1770 = vmatmul.bf16.gmra.mxu3 %v11323_v60  ;;  %v2029_v60 = vrot.slane %v2027_v2, 5  ;;  %v2025_v30 = vrot.slane %v2024_v9, 4  ;;  %v2039_v2 = vrot.slane %v2037_v12, 5  ;;  %v2042_v51 = vshrl.u32 %v10267_v38, 16  ;;  %v10269_v12 = vld [vmem:[%s11878_s8 + $0x50] sm:$0x1] }
  0xd8   : > { %2878 = vmatmul.bf16.gmra.mxu1 %v2782_v63  ;;  %v2329_v63 = vunpack.c.l.b16 %v2016_v43  ;;  %v1360_v29 = vpack.c.b16 %v1332_v59, %v1331_v48  ;;  %v1227_v43 = vsel %vm12233_vm5, %v10048_v23, %v1226_v7  ;;  %v2045_v53 = vshll.u32 %v10267_v38, 16 }
  0xd9   : > { %v882_v26 = vpop.f32.mrf.mxu2  ;;  %v2034_v20 = vor.u32 %v2033_v52, %v2029_v60  ;;  %v2030_v44 = vsel %vm11917_vm2, %v2025_v30, %v2029_v60  ;;  %v2650_v48 = vsel %vm12233_vm5, %v10368_v35, %v2649_v15  ;;  %v2653_v59 = vsel %vm12233_vm5, %v2651_v14, %v2652_v37 }
  0xda   : > { %v1115_v28 = vpop.f32.mrf.mxu3  ;;  %v2357_v13 = vpack.c.b16 %v2329_v63, %v2328_v61  ;;  %v1333_v3 = vunpack.c.l.b16 %v1227_v43  ;;  %v2756_v6 = vunpack.c.l.b16 %v2650_v48  ;;  %v2757_v7 = vunpack.c.l.b16 %v2653_v59 }
  0xdb   : > { %v12349_v32 = vadd.f32 %v1115_v28, %v882_v26  ;;  %v844_v40 = vpop.f32.mrf.mxu0  ;;  %v1229_v28 = vrot.slane %v12081_v62, 5  ;;  %v2035_v31 = vrot.slane %v2034_v20, 4  ;;  %v2044_v9 = vrot.slane %v2042_v51, 4  ;;  %v11389_v51 = vld [vmem:[%s15589_s1 + $0x1e0] sm:$0xff] }
  0xdc   : > { %v1235_v43 = vrot.slane %v1233_v25, 4  ;;  %v2659_v59 = vrot.slane %v10269_v12, 5  ;;  %3860 = vmatpush.bf16.msra.mxu3 %v11389_v51  ;;  %v1240_v51 = vrot.slane %v12134_v24, 5  ;;  %v1243_v24 = vrot.slane %v12148_v56, 5 }
  0xdd   : > { %v1077_v41 = vpop.f32.mrf.mxu1  ;;  %v1230_v62 = vsel %vm12233_vm5, %v1228_v34, %v1229_v28  ;;  %v2040_v49 = vsel %vm11917_vm2, %v2035_v31, %v2039_v2  ;;  %v2784_v34 = vpack.c.b16 %v2757_v7, %v2756_v6  ;;  %v1150_v28 = vld [vmem:[%s11878_s8 + $0x3c] sm:$0xe]  ;;  %v2061_v2 = vshll.u32 %v10269_v12, 16 }
  0xde   : > { %v12365_v47 = vadd.f32 %v1077_v41, %v844_v40  ;;  %v12383_v40 = vld [vmem:[%s11878_s8 + $0x4c] sm:$0xf]  ;;  %v1334_v4 = vunpack.c.l.b16 %v1230_v62  ;;  %v11381_v62 = vld [vmem:[%s15589_s1 + $0x1a0] sm:$0xff] }
  0xdf   : > { %v2051_v52 = vshll.u32 %v12383_v40, 16  ;;  %v2055_v61 = vshrl.u32 %v12383_v40, 16  ;;  %v2656_v37 = vrot.slane %v12383_v40, 5  ;;  %v2063_v40 = vrot.slane %v2061_v2, 5  ;;  %3178 = vmatpush.bf16.msra.mxu2 %v11381_v62  ;;  %v11326_v62 = vld [vmem:[%s11878_s8 + $0x48] sm:$0xff] }
  0xe1   : > { %v884_v5 = vpop.f32.mrf.mxu2  ;;  %v2057_v20 = vrot.slane %v2055_v61, 4  ;;  %v2658_v48 = vrot.slane %v2656_v37, 4 }
  0xe2   : > { %v1117_v50 = vpop.f32.mrf.mxu3 }
  0xe3   : > { %v12373_v10 = vadd.f32 %v1117_v50, %v884_v5  ;;  %v847_v21 = vpop.f32.mrf.mxu0  ;;  %v2330_v5 = vunpack.c.l.b16 %v2030_v44  ;;  %v2331_v50 = vunpack.c.l.b16 %v2040_v49  ;;  %v2660_v12 = vsel %vm12233_vm5, %v2658_v48, %v2659_v59 }
  0xe5   : > { %v1080_v22 = vpop.f32.mrf.mxu1  ;;  %v2358_v23 = vpack.c.b16 %v2331_v50, %v2330_v5 }
  0xe6   : > { %v12378_v26 = vadd.f32 %v1080_v22, %v847_v21  ;;  %1460 = vmatmul.bf16.gmra.mxu2 %v1360_v29  ;;  %2457 = vmatmul.bf16.gmra.mxu0 %v2357_v13  ;;  %v2047_v29 = vrot.slane %v2045_v53, 5  ;;  %v1361_v21 = vpack.c.b16 %v1334_v4, %v1333_v3  ;;  %v11325_v22 = vld [vmem:[%s11878_s8 + $0x3c] sm:$0xff]  ;;  %v1237_v4 = vsel %vm12233_vm5, %v1235_v43, %v1236_v17 }
  0xe7   : > { %1775 = vmatmul.bf16.gmra.mxu3 %v11324_v33  ;;  %v2053_v33 = vrot.slane %v2051_v52, 5  ;;  %v10270_v52 = vld [vmem:[%s11878_s8 + $0x54] sm:$0xf] }
  0xe8   : > { %2883 = vmatmul.bf16.gmra.mxu1 %v2783_v19  ;;  %v2048_v30 = vor.u32 %v2047_v29, %v2044_v9  ;;  %v2066_v6 = vshrl.u32 %v10270_v52, 16  ;;  %v2069_v7 = vshll.u32 %v10270_v52, 16 }
  0xe9   : > { %v887_v41 = vpop.f32.mrf.mxu2  ;;  %v2058_v31 = vor.u32 %v2057_v20, %v2053_v33 }
  0xea   : > { %v1120_v42 = vpop.f32.mrf.mxu3  ;;  %v2049_v44 = vrot.slane %v2048_v30, 4  ;;  %v2759_v30 = vunpack.c.l.b16 %v2660_v12  ;;  %v2071_v2 = vrot.slane %v2069_v7, 5 }
  0xeb   : > { %v12391_v45 = vadd.f32 %v1120_v42, %v887_v41  ;;  %v849_v63 = vpop.f32.mrf.mxu0  ;;  %v10353_v41 = vld [vmem:[%s11878_s8 + $0x48] sm:$0xe]  ;;  %v10049_v42 = vrot.slane %v1150_v28, 9  ;;  %v2059_v49 = vrot.slane %v2058_v31, 4  ;;  %v2068_v31 = vrot.slane %v2066_v6, 4 }
  0xec   : > { %v10369_v53 = vrot.slane %v10353_v41, 9  ;;  %v2054_v5 = vsel %vm11917_vm2, %v2049_v44, %v2053_v33  ;;  %v11397_v33 = vld [vmem:[%s15589_s1 + $0x220] sm:$0xff]  ;;  %v1242_v6 = vrot.slane %v1240_v51, 4 }
  0xed   : > { %v1082_v60 = vpop.f32.mrf.mxu1  ;;  %v1234_v3 = vsel %vm12233_vm5, %v10049_v42, %v1233_v25  ;;  %v2064_v50 = vsel %vm11917_vm2, %v2059_v49, %v2063_v40  ;;  %v2332_v25 = vunpack.c.l.b16 %v2054_v5  ;;  %4286 = vmatpush.bf16.msra.mxu0 %v11397_v33  ;;  %v1151_v40 = vld [vmem:[%s11878_s8 + $0x48] sm:$0xe] }
  0xee   : > { %v12401_v16 = vadd.f32 %v1082_v60, %v849_v63  ;;  %v12422_v63 = vld [vmem:[%s11878_s8 + $0x58] sm:$0xf]  ;;  %v2657_v20 = vsel %vm12233_vm5, %v10369_v53, %v2656_v37  ;;  %v2072_v53 = vor.u32 %v2071_v2, %v2068_v31  ;;  %v10050_v5 = vrot.slane %v1151_v40, 9 }
  0xef   : > { %v2758_v28 = vunpack.c.l.b16 %v2657_v20 }
  0xf0   : > { %v2073_v7 = vrot.slane %v2072_v53, 4  ;;  %v1241_v56 = vsel %vm12233_vm5, %v10050_v5, %v1240_v51  ;;  %v1152_v5 = vld [vmem:[%s11878_s8 + $0x54] sm:$0xe] }
  0xf1   : > { %v889_v13 = vpop.f32.mrf.mxu2  ;;  %v2785_v49 = vpack.c.b16 %v2759_v30, %v2758_v28  ;;  %v1244_v30 = vsel %vm12233_vm5, %v1242_v6, %v1243_v24 }
  0xf2   : > { %v1122_v19 = vpop.f32.mrf.mxu3  ;;  %v1338_v40 = vunpack.c.l.b16 %v1244_v30 }
  0xf3   : > { %v12404_v15 = vadd.f32 %v1122_v19, %v889_v13  ;;  %v852_v35 = vpop.f32.mrf.mxu0  ;;  %v2075_v13 = vshll.u32 %v12422_v63, 16  ;;  %v2079_v19 = vshrl.u32 %v12422_v63, 16 }
  0xf5   : > { %v1085_v14 = vpop.f32.mrf.mxu1  ;;  %v2081_v37 = vrot.slane %v2079_v19, 4 }
  0xf6   : > { %v12410_v38 = vadd.f32 %v1085_v14, %v852_v35  ;;  %1465 = vmatmul.bf16.gmra.mxu2 %v1361_v21  ;;  %2462 = vmatmul.bf16.gmra.mxu0 %v2358_v23  ;;  %v1336_v23 = vunpack.c.l.b16 %v1237_v4  ;;  %v10272_v35 = vld [vmem:[%s11878_s8 + $0x5c] sm:$0x1]  ;;  %v2077_v14 = vrot.slane %v2075_v13, 5  ;;  %v10354_v4 = vld [vmem:[%s11878_s8 + $0x54] sm:$0xe] }
  0xf7   : > { %1780 = vmatmul.bf16.gmra.mxu3 %v11325_v22  ;;  %v1335_v22 = vunpack.c.l.b16 %v1234_v3  ;;  %v2085_v48 = vshll.u32 %v10272_v35, 16  ;;  %v10370_v12 = vrot.slane %v10354_v4, 9 }
  0xf8   : > { %2888 = vmatmul.bf16.gmra.mxu1 %v2784_v34  ;;  %v2333_v34 = vunpack.c.l.b16 %v2064_v50  ;;  %v10273_v50 = vld [vmem:[%s11878_s8 + $0x60] sm:$0xf] }
  0xf9   : > { %v892_v61 = vpop.f32.mrf.mxu2  ;;  %v1362_v17 = vpack.c.b16 %v1336_v23, %v1335_v22  ;;  %v2090_v22 = vshrl.u32 %v10273_v50, 16  ;;  %v2093_v23 = vshll.u32 %v10273_v50, 16  ;;  %v11623_v50 = vld [vmem:[%s11878_s8 + $0x58] sm:$0xf] }
  0xfa   : > { %v1125_v54 = vpop.f32.mrf.mxu3  ;;  %v2359_v44 = vpack.c.b16 %v2333_v34, %v2332_v25  ;;  %v1247_v6 = vrot.slane %v11623_v50, 5 }
  0xfb   : > { %v12424_v60 = vadd.f32 %v1125_v54, %v892_v61  ;;  %v854_v9 = vpop.f32.mrf.mxu0  ;;  %v2082_v61 = vor.u32 %v2081_v37, %v2077_v14  ;;  %v2663_v54 = vrot.slane %v12422_v63, 5  ;;  %v2666_v63 = vrot.slane %v10272_v35, 5 }
  0xfc   : > { %v2078_v35 = vsel %vm11917_vm2, %v2073_v7, %v2077_v14  ;;  %v1249_v30 = vrot.slane %v1247_v6, 4 }
  0xfd   : > { %v1087_v29 = vpop.f32.mrf.mxu1  ;;  %v2083_v20 = vrot.slane %v2082_v61, 4  ;;  %v2665_v13 = vrot.slane %v2663_v54, 4  ;;  %v2334_v53 = vunpack.c.l.b16 %v2078_v35  ;;  %v10275_v61 = vld [vmem:[%s11878_s8 + $0x68] sm:$0x1] }
  0xfe   : > { %v12440_v21 = vadd.f32 %v1087_v29, %v854_v9  ;;  %v2087_v9 = vrot.slane %v2085_v48, 5  ;;  %v12458_v29 = vld [vmem:[%s11878_s8 + $0x64] sm:$0xf] }
  0xff   : > { %v2099_v34 = vshll.u32 %v12458_v29, 16  ;;  %v2103_v28 = vshrl.u32 %v12458_v29, 16 }
 0x100   : > { %v2088_v37 = vsel %vm11917_vm2, %v2083_v20, %v2087_v9  ;;  %v11327_v20 = vld [vmem:[%s11878_s8 + $0x54] sm:$0xff] }
 0x101   : > { %v894_v41 = vpop.f32.mrf.mxu2  ;;  %v2101_v51 = vrot.slane %v2099_v34, 5  ;;  %v2105_v14 = vrot.slane %v2103_v28, 4  ;;  %v2335_v48 = vunpack.c.l.b16 %v2088_v37  ;;  %v10051_v34 = vrot.slane %v1152_v5, 9  ;;  %v10355_v28 = vld [vmem:[%s11878_s8 + $0x60] sm:$0xe] }
 0x102   : > { %v1127_v42 = vpop.f32.mrf.mxu3 }
 0x103   : > { %v12446_v43 = vadd.f32 %v1127_v42, %v894_v41  ;;  %v857_v59 = vpop.f32.mrf.mxu0  ;;  %v2664_v41 = vsel %vm12233_vm5, %v10370_v12, %v2663_v54  ;;  %v2667_v42 = vsel %vm12233_vm5, %v2665_v13, %v2666_v63  ;;  %v2106_v12 = vor.u32 %v2105_v14, %v2101_v51 }
 0x104   : > { %v2109_v13 = vshll.u32 %v10275_v61, 16  ;;  %v2360_v63 = vpack.c.b16 %v2335_v48, %v2334_v53  ;;  %v1248_v53 = vsel %vm12233_vm5, %v10051_v34, %v1247_v6 }
 0x105   : > { %v1090_v52 = vpop.f32.mrf.mxu1  ;;  %v2107_v35 = vrot.slane %v2106_v12, 4  ;;  %v1339_v12 = vunpack.c.l.b16 %v1248_v53 }
 0x106   : > { %v12452_v3 = vadd.f32 %v1090_v52, %v857_v59  ;;  %1470 = vmatmul.bf16.gmra.mxu2 %v1362_v17  ;;  %2467 = vmatmul.bf16.gmra.mxu0 %v2359_v44  ;;  %v2095_v44 = vrot.slane %v2093_v23, 5  ;;  %v2760_v59 = vunpack.c.l.b16 %v2664_v41  ;;  %v2761_v52 = vunpack.c.l.b16 %v2667_v42 }
 0x107   : > { %1785 = vmatmul.bf16.gmra.mxu3 %v11326_v62  ;;  %v2092_v62 = vrot.slane %v2090_v22, 4  ;;  %v2111_v37 = vrot.slane %v2109_v13, 5  ;;  %v10371_v41 = vrot.slane %v10355_v28, 9 }
 0x108   : > { %2893 = vmatmul.bf16.gmra.mxu1 %v2785_v49  ;;  %v1337_v49 = vunpack.c.l.b16 %v1241_v56 }
 0x109   : > { %v897_v19 = vpop.f32.mrf.mxu2  ;;  %v2096_v24 = vor.u32 %v2095_v44, %v2092_v62  ;;  %v2673_v62 = vrot.slane %v10275_v61, 5  ;;  %v10276_v44 = vld [vmem:[%s11878_s8 + $0x6c] sm:$0xf]  ;;  %v2112_v61 = vsel %vm11917_vm2, %v2107_v35, %v2111_v37 }
 0x10a   : > { %v1130_v33 = vpop.f32.mrf.mxu3  ;;  %v1363_v9 = vpack.c.b16 %v1338_v40, %v1337_v49  ;;  %v11388_v49 = vld [vmem:[%s15589_s1 + $0x1d8] sm:$0xff] }
 0x10b   : > { %v12460_v25 = vadd.f32 %v1130_v33, %v897_v19  ;;  %v859_v31 = vpop.f32.mrf.mxu0  ;;  %v2786_v19 = vpack.c.b16 %v2761_v52, %v2760_v59  ;;  %v2670_v33 = vrot.slane %v12458_v29, 5  ;;  %v11380_v29 = vld [vmem:[%s15589_s1 + $0x198] sm:$0xff]  ;;  %3861 = vmatpush.bf16.msra.mxu3 %v11388_v49  ;;  %v11624_v49 = vld [vmem:[%s11878_s8 + $0x64] sm:$0xf] }
 0x10c   : > { %3179 = vmatpush.bf16.msra.mxu2 %v11380_v29 }
 0x10d   : > { %v1092_v2 = vpop.f32.mrf.mxu1  ;;  %v2672_v42 = vrot.slane %v2670_v33, 4  ;;  %v2671_v5 = vsel %vm12233_vm5, %v10371_v41, %v2670_v33 }
 0x10e   : > { %v12476_v17 = vadd.f32 %v1092_v2, %v859_v31  ;;  %v1250_v31 = vrot.slane %v12185_v55, 5  ;;  %v2097_v2 = vrot.slane %v2096_v24, 4  ;;  %v12497_v55 = vld [vmem:[%s11878_s8 + $0x70] sm:$0xf]  ;;  %v2762_v33 = vunpack.c.l.b16 %v2671_v5 }
 0x10f   : > { %v2674_v50 = vsel %vm12233_vm5, %v2672_v42, %v2673_v62  ;;  %v2123_v6 = vshll.u32 %v12497_v55, 16  ;;  %v2127_v24 = vshrl.u32 %v12497_v55, 16  ;;  %v11328_v42 = vld [vmem:[%s11878_s8 + $0x60] sm:$0xff] }
 0x110   : > { %v1251_v48 = vsel %vm12233_vm5, %v1249_v30, %v1250_v31  ;;  %v2102_v59 = vsel %vm11917_vm2, %v2097_v2, %v2101_v51  ;;  %v10278_v31 = vld [vmem:[%s11878_s8 + $0x74] sm:$0x1]  ;;  %v11396_v2 = vld [vmem:[%s15589_s1 + $0x218] sm:$0xff] }
 0x111   : > { %v899_v54 = vpop.f32.mrf.mxu2  ;;  %v1340_v13 = vunpack.c.l.b16 %v1251_v48  ;;  %v2125_v28 = vrot.slane %v2123_v6, 5  ;;  %v2129_v30 = vrot.slane %v2127_v24, 4  ;;  %4287 = vmatpush.bf16.msra.mxu0 %v11396_v2  ;;  %v10356_v6 = vld [vmem:[%s11878_s8 + $0x6c] sm:$0xe] }
 0x112   : > { %v1132_v4 = vpop.f32.mrf.mxu3 }
 0x113   : > { %v12481_v7 = vadd.f32 %v1132_v4, %v899_v54  ;;  %v862_v22 = vpop.f32.mrf.mxu0  ;;  %v2114_v54 = vshrl.u32 %v10276_v44, 16  ;;  %v2117_v4 = vshll.u32 %v10276_v44, 16  ;;  %v1364_v41 = vpack.c.b16 %v1340_v13, %v1339_v12  ;;  %v1153_v44 = vld [vmem:[%s11878_s8 + $0x60] sm:$0xe] }
 0x114   : > { %v2130_v48 = vor.u32 %v2129_v30, %v2125_v28 }
 0x115   : > { %v1095_v23 = vpop.f32.mrf.mxu1  ;;  %v2119_v34 = vrot.slane %v2117_v4, 5  ;;  %v2677_v4 = vrot.slane %v12497_v55, 5  ;;  %v12533_v55 = vld [vmem:[%s11878_s8 + $0x7c] sm:$0xf] }
 0x116   : > { %v12486_v56 = vadd.f32 %v1095_v23, %v862_v22  ;;  %1475 = vmatmul.bf16.gmra.mxu2 %v1363_v9  ;;  %2472 = vmatmul.bf16.gmra.mxu0 %v2360_v63  ;;  %v2336_v63 = vunpack.c.l.b16 %v2102_v59  ;;  %v2763_v22 = vunpack.c.l.b16 %v2674_v50  ;;  %v2116_v23 = vrot.slane %v2114_v54, 4 }
 0x117   : > { %1790 = vmatmul.bf16.gmra.mxu3 %v11327_v20  ;;  %v2133_v59 = vshll.u32 %v10278_v31, 16  ;;  %v10052_v50 = vrot.slane %v1153_v44, 9  ;;  %v2131_v13 = vrot.slane %v2130_v48, 4  ;;  %v2147_v44 = vshll.u32 %v12533_v55, 16 }
 0x118   : > { %2898 = vmatmul.bf16.gmra.mxu1 %v2786_v19  ;;  %v2337_v19 = vunpack.c.l.b16 %v2112_v61  ;;  %v2120_v53 = vor.u32 %v2119_v34, %v2116_v23  ;;  %v2680_v23 = vrot.slane %v10278_v31, 5 }
 0x119   : > { %v902_v40 = vpop.f32.mrf.mxu2 }
 0x11a   : > { %v1135_v14 = vpop.f32.mrf.mxu3  ;;  %v2361_v62 = vpack.c.b16 %v2337_v19, %v2336_v63  ;;  %v2121_v12 = vrot.slane %v2120_v53, 4  ;;  %v2135_v63 = vrot.slane %v2133_v59, 5  ;;  %v10279_v19 = vld [vmem:[%s11878_s8 + $0x78] sm:$0xf] }
 0x11b   : > { %v12505_v52 = vadd.f32 %v1135_v14, %v902_v40  ;;  %v864_v51 = vpop.f32.mrf.mxu0  ;;  %v1254_v40 = vrot.slane %v11624_v49, 5  ;;  %v2787_v14 = vpack.c.b16 %v2763_v22, %v2762_v33  ;;  %v10372_v33 = vrot.slane %v10356_v6, 9 }
 0x11c   : > { %v2679_v22 = vrot.slane %v2677_v4, 4  ;;  %v2136_v31 = vsel %vm11917_vm2, %v2131_v13, %v2135_v63  ;;  %v2151_v49 = vshrl.u32 %v12533_v55, 16  ;;  %v10281_v63 = vld [vmem:[%s11878_s8 + $0x80] sm:$0x1] }
 0x11d   : > { %v1097_v9 = vpop.f32.mrf.mxu1  ;;  %v1256_v24 = vrot.slane %v1254_v40, 4  ;;  %v1255_v2 = vsel %vm12233_vm5, %v10052_v50, %v1254_v40  ;;  %v2678_v53 = vsel %vm12233_vm5, %v10372_v33, %v2677_v4  ;;  %v2339_v50 = vunpack.c.l.b16 %v2136_v31  ;;  %v11626_v33 = vld [vmem:[%s11878_s8 + $0x70] sm:$0xf] }
 0x11e   : > { %v12515_v20 = vadd.f32 %v1097_v9, %v864_v51  ;;  %v11625_v51 = vld [vmem:[%s11878_s8 + $0x68] sm:$0x1]  ;;  %v2681_v48 = vsel %vm12233_vm5, %v2679_v22, %v2680_v23  ;;  %v2153_v13 = vrot.slane %v2151_v49, 4  ;;  %v1261_v22 = vrot.slane %v11626_v33, 5 }
 0x11f   : > { %v1257_v9 = vrot.slane %v11625_v51, 5  ;;  %v2764_v51 = vunpack.c.l.b16 %v2678_v53  ;;  %v2157_v31 = vshll.u32 %v10281_v63, 16  ;;  %v2684_v49 = vrot.slane %v12533_v55, 5 }
 0x120   : > { %v1263_v53 = vrot.slane %v1261_v22, 4 }
 0x121   : > { %v904_v35 = vpop.f32.mrf.mxu2  ;;  %v2686_v55 = vrot.slane %v2684_v49, 4 }
 0x122   : > { %v1137_v37 = vpop.f32.mrf.mxu3 }
 0x123   : > { %v12521_v29 = vadd.f32 %v1137_v37, %v904_v35  ;;  %v867_v61 = vpop.f32.mrf.mxu0  ;;  %v1258_v37 = vsel %vm12233_vm5, %v1256_v24, %v1257_v9  ;;  %v2765_v9 = vunpack.c.l.b16 %v2681_v48  ;;  %v11627_v48 = vld [vmem:[%s11878_s8 + $0x74] sm:$0x1] }
 0x125   : > { %v1100_v54 = vpop.f32.mrf.mxu1 }
 0x126   : > { %v12527_v5 = vadd.f32 %v1100_v54, %v867_v61  ;;  %1480 = vmatmul.bf16.gmra.mxu2 %v1364_v41  ;;  %2477 = vmatmul.bf16.gmra.mxu0 %v2361_v62  ;;  %v2138_v41 = vshrl.u32 %v10279_v19, 16  ;;  %v2126_v62 = vsel %vm11917_vm2, %v2121_v12, %v2125_v28  ;;  %v1341_v28 = vunpack.c.l.b16 %v1255_v2  ;;  %v1154_v2 = vld [vmem:[%s11878_s8 + $0x6c] sm:$0xe] }
 0x127   : > { %1795 = vmatmul.bf16.gmra.mxu3 %v11328_v42  ;;  %v2141_v42 = vshll.u32 %v10279_v19, 16  ;;  %v1342_v61 = vunpack.c.l.b16 %v1258_v37  ;;  %v2338_v54 = vunpack.c.l.b16 %v2126_v62  ;;  %v2149_v12 = vrot.slane %v2147_v44, 5 }
 0x128   : > { %2903 = vmatmul.bf16.gmra.mxu1 %v2787_v14  ;;  %v2140_v6 = vrot.slane %v2138_v41, 4  ;;  %v2788_v41 = vpack.c.b16 %v2765_v9, %v2764_v51  ;;  %v2687_v51 = vrot.slane %v10281_v63, 5  ;;  %v12567_v9 = vld [vmem:[%s11878_s8 + $0x88] sm:$0xf] }
 0x129   : > { %v907_v34 = vpop.f32.mrf.mxu2  ;;  %v2143_v24 = vrot.slane %v2141_v42, 5  ;;  %v2362_v62 = vpack.c.b16 %v2339_v50, %v2338_v54  ;;  %v2154_v42 = vor.u32 %v2153_v13, %v2149_v12  ;;  %v2159_v50 = vrot.slane %v2157_v31, 5  ;;  %v11387_v13 = vld [vmem:[%s15589_s1 + $0x1d0] sm:$0xff] }
 0x12a   : > { %v1140_v30 = vpop.f32.mrf.mxu3  ;;  %3862 = vmatpush.bf16.msra.mxu3 %v11387_v13  ;;  %v2171_v31 = vshll.u32 %v12567_v9, 16 }
 0x12b   : > { %v12537_v35 = vadd.f32 %v1140_v30, %v907_v34  ;;  %v869_v14 = vpop.f32.mrf.mxu0  ;;  %v1365_v34 = vpack.c.b16 %v1342_v61, %v1341_v28  ;;  %v11329_v30 = vld [vmem:[%s11878_s8 + $0x6c] sm:$0xff]  ;;  %v2144_v37 = vor.u32 %v2143_v24, %v2140_v6  ;;  %v2155_v54 = vrot.slane %v2154_v42, 4  ;;  %v10282_v6 = vld [vmem:[%s11878_s8 + $0x84] sm:$0xf] }
 0x12c   : > { %v11379_v61 = vld [vmem:[%s15589_s1 + $0x190] sm:$0xff] }
 0x12d   : > { %15615 = vst [vmem:[#allocation12_spill] sm:$0xff] %v12537_v35  ;;  %v1102_v40 = vpop.f32.mrf.mxu1  ;;  %v2145_v28 = vrot.slane %v2144_v37, 4  ;;  %3180 = vmatpush.bf16.msra.mxu2 %v11379_v61  ;;  %v2160_v42 = vsel %vm11917_vm2, %v2155_v54, %v2159_v50 }
 0x12e   : > { %v12551_v59 = vadd.f32 %v1102_v40, %v869_v14  ;;  %v10053_v40 = vrot.slane %v1154_v2, 9  ;;  %v2341_v54 = vunpack.c.l.b16 %v2160_v42 }
 0x12f   : > { %v2150_v63 = vsel %vm11917_vm2, %v2145_v28, %v2149_v12  ;;  %v2688_v12 = vsel %vm12233_vm5, %v2686_v55, %v2687_v51 }
 0x130   : > { %v2340_v28 = vunpack.c.l.b16 %v2150_v63 }
 0x131   : > { %v909_v4 = vpop.f32.mrf.mxu2 }
 0x132   : > { %v1142_v19 = vpop.f32.mrf.mxu3 }
 0x133   : > { %v12555_v23 = vadd.f32 %v1142_v19, %v909_v4  ;;  %v2443_v14 = vpop.f32.mrf.mxu0  ;;  %v1264_v4 = vrot.slane %v11627_v48, 5  ;;  %v10357_v19 = vld [vmem:[%s11878_s8 + $0x78] sm:$0xe]  ;;  %v2175_v48 = vshrl.u32 %v12567_v9, 16 }
 0x134   : > { %v10373_v24 = vrot.slane %v10357_v19, 9 }
 0x135   : > { %15616 = vst [vmem:[#allocation13_spill] sm:$0xff] %v12555_v23  ;;  %v2869_v44 = vpop.f32.mrf.mxu1  ;;  %v1265_v2 = vsel %vm12233_vm5, %v1263_v53, %v1264_v4 }
 0x136   : > { %1485 = vmatmul.bf16.gmra.mxu2 %v1365_v34  ;;  %2482 = vmatmul.bf16.gmra.mxu0 %v2362_v62  ;;  %v2162_v62 = vshrl.u32 %v10282_v6, 16  ;;  %v1344_v4 = vunpack.c.l.b16 %v1265_v2 }
 0x137   : > { %1800 = vmatmul.bf16.gmra.mxu3 %v11329_v30  ;;  %v1262_v30 = vsel %vm12233_vm5, %v10053_v40, %v1261_v22 }
 0x138   : > { %2908 = vmatmul.bf16.gmra.mxu1 %v2788_v41  ;;  %v2165_v41 = vshll.u32 %v10282_v6, 16  ;;  %v1343_v53 = vunpack.c.l.b16 %v1262_v30  ;;  %v2164_v50 = vrot.slane %v2162_v62, 4  ;;  %v11628_v30 = vld [vmem:[%s11878_s8 + $0x7c] sm:$0xf] }
 0x139   : > { %v1446_v33 = vpop.f32.mrf.mxu2  ;;  %v11330_v62 = vld [vmem:[%s11878_s8 + $0x78] sm:$0xff] }
 0x13a   : > { %v1761_v34 = vpop.f32.mrf.mxu3  ;;  %v1526_v37 = vadd.f32 %v1446_v33, %v12261_v58  ;;  %v2685_v58 = vsel %vm12233_vm5, %v10373_v24, %v2684_v49  ;;  %v2167_v6 = vrot.slane %v2165_v41, 5  ;;  %v2767_v33 = vunpack.c.l.b16 %v2688_v12  ;;  %v10284_v49 = vld [vmem:[%s11878_s8 + $0x8c] sm:$0x1]  ;;  %v11395_v24 = vld [vmem:[%s15589_s1 + $0x210] sm:$0xff]  ;;  %v1155_v41 = vld [vmem:[%s11878_s8 + $0x78] sm:$0xe] }
 0x13b   : > { %v2445_v22 = vpop.f32.mrf.mxu0  ;;  %v2766_v13 = vunpack.c.l.b16 %v2685_v58  ;;  %v1366_v63 = vpack.c.b16 %v1344_v4, %v1343_v53  ;;  %4288 = vmatpush.bf16.msra.mxu0 %v11395_v24  ;;  %v10358_v4 = vld [vmem:[%s11878_s8 + $0x84] sm:$0xe] }
 0x13c   : > { %v1841_v19 = vadd.f32 %v1761_v34, %v1526_v37  ;;  %v2173_v34 = vrot.slane %v2171_v31, 5  ;;  %v2177_v37 = vrot.slane %v2175_v48, 4  ;;  %v2168_v42 = vor.u32 %v2167_v6, %v2164_v50 }
 0x13d   : > { %v2871_v40 = vpop.f32.mrf.mxu1  ;;  %v2789_v31 = vpack.c.b16 %v2767_v33, %v2766_v13  ;;  %v10285_v13 = vld [vmem:[%s11878_s8 + $0x90] sm:$0xf] }
 0x13e   : > { %v2523_v61 = vadd.f32 %v2443_v14, %v1841_v19  ;;  %v1268_v14 = vrot.slane %v11628_v30, 5  ;;  %v2178_v48 = vor.u32 %v2177_v37, %v2173_v34  ;;  %v2181_v19 = vshll.u32 %v10284_v49, 16 }
 0x13f   : > { %v10054_v30 = vrot.slane %v1155_v41, 9  ;;  %v2169_v6 = vrot.slane %v2168_v42, 4  ;;  %v10374_v37 = vrot.slane %v10358_v4, 9  ;;  %v2189_v42 = vshll.u32 %v10285_v13, 16 }
 0x140   : > { %v12587_v23 = vadd.f32 %v2869_v44, %v2523_v61  ;;  %v2363_v44 = vpack.c.b16 %v2341_v54, %v2340_v28  ;;  %v1270_v35 = vrot.slane %v1268_v14, 4  ;;  %v2179_v28 = vrot.slane %v2178_v48, 4 }
 0x141   : > { %v1448_v55 = vpop.f32.mrf.mxu2  ;;  %v2183_v54 = vrot.slane %v2181_v19, 5  ;;  %v2174_v41 = vsel %vm11917_vm2, %v2169_v6, %v2173_v34 }
 0x142   : > { %15617 = vst [vmem:[#allocation14_spill] sm:$0xff] %v12587_v23  ;;  %v1763_v51 = vpop.f32.mrf.mxu3  ;;  %v1527_v2 = vadd.f32 %v1448_v55, %v12290_v27  ;;  %v2691_v23 = vrot.slane %v12567_v9, 5  ;;  %v11629_v27 = vld [vmem:[%s11878_s8 + $0x80] sm:$0x1]  ;;  %v2694_v9 = vrot.slane %v10284_v49, 5 }
 0x143   : > { %v2448_v12 = vpop.f32.mrf.mxu0  ;;  %v1271_v53 = vrot.slane %v11629_v27, 5  ;;  %v12604_v55 = vld [vmem:[%s11878_s8 + $0x94] sm:$0xf]  ;;  %v2184_v49 = vsel %vm11917_vm2, %v2179_v28, %v2183_v54 }
 0x144   : > { %v1842_v58 = vadd.f32 %v1763_v51, %v1527_v2  ;;  %v2693_v24 = vrot.slane %v2691_v23, 4 }
 0x145   : > { %v2874_v61 = vpop.f32.mrf.mxu1 }
 0x146   : > { %1490 = vmatmul.bf16.gmra.mxu2 %v1366_v63  ;;  %v2524_v50 = vadd.f32 %v2445_v22, %v1842_v58  ;;  %2487 = vmatmul.bf16.gmra.mxu0 %v2363_v44  ;;  %v1269_v63 = vsel %vm12233_vm5, %v10054_v30, %v1268_v14  ;;  %v1272_v22 = vsel %vm12233_vm5, %v1270_v35, %v1271_v53  ;;  %v2195_v44 = vshll.u32 %v12604_v55, 16 }
 0x147   : > { %1805 = vmatmul.bf16.gmra.mxu3 %v11330_v62  ;;  %v2692_v35 = vsel %vm12233_vm5, %v10374_v37, %v2691_v23  ;;  %v1345_v34 = vunpack.c.l.b16 %v1269_v63  ;;  %v1346_v58 = vunpack.c.l.b16 %v1272_v22  ;;  %v2342_v30 = vunpack.c.l.b16 %v2174_v41  ;;  %v10287_v23 = vld [vmem:[%s11878_s8 + $0x98] sm:$0x1]  ;;  %v11331_v22 = vld [vmem:[%s11878_s8 + $0x84] sm:$0xff] }
 0x148   : > { %2913 = vmatmul.bf16.gmra.mxu1 %v2789_v31  ;;  %v12601_v33 = vadd.f32 %v2871_v40, %v2524_v50  ;;  %v2186_v40 = vshrl.u32 %v10285_v13, 16  ;;  %v2199_v31 = vshrl.u32 %v12604_v55, 16  ;;  %v2343_v53 = vunpack.c.l.b16 %v2184_v49 }
 0x149   : > { %v1451_v51 = vpop.f32.mrf.mxu2  ;;  %v2191_v50 = vrot.slane %v2189_v42, 5  ;;  %v2768_v6 = vunpack.c.l.b16 %v2692_v35  ;;  %v2197_v54 = vrot.slane %v2195_v44, 5  ;;  %v2205_v44 = vshll.u32 %v10287_v23, 16 }
 0x14a   : > { %v1766_v2 = vpop.f32.mrf.mxu3  ;;  %v1528_v62 = vadd.f32 %v1451_v51, %v12302_v0  ;;  %v2695_v0 = vsel %vm12233_vm5, %v2693_v24, %v2694_v9  ;;  %v2188_v4 = vrot.slane %v2186_v40, 4  ;;  %v2201_v13 = vrot.slane %v2199_v31, 4  ;;  %v11630_v24 = vld [vmem:[%s11878_s8 + $0x88] sm:$0xf] }
 0x14b   : > { %v2450_v19 = vpop.f32.mrf.mxu0  ;;  %v2769_v28 = vunpack.c.l.b16 %v2695_v0  ;;  %v1275_v9 = vrot.slane %v11630_v24, 5  ;;  %v2364_v40 = vpack.c.b16 %v2343_v53, %v2342_v30  ;;  %v2698_v35 = vrot.slane %v12604_v55, 5  ;;  %v11631_v24 = vld [vmem:[%s11878_s8 + $0x8c] sm:$0x1] }
 0x14c   : > { %v1843_v48 = vadd.f32 %v1766_v2, %v1528_v62  ;;  %v1156_v62 = vld [vmem:[%s11878_s8 + $0x84] sm:$0xe]  ;;  %v2192_v41 = vor.u32 %v2191_v50, %v2188_v4  ;;  %v2202_v49 = vor.u32 %v2201_v13, %v2197_v54  ;;  %v11378_v30 = vld [vmem:[%s15589_s1 + $0x188] sm:$0xff]  ;;  %v2207_v4 = vrot.slane %v2205_v44, 5  ;;  %v10288_v50 = vld [vmem:[%s11878_s8 + $0x9c] sm:$0xf] }
 0x14d   : > { %v2876_v14 = vpop.f32.mrf.mxu1  ;;  %v2790_v42 = vpack.c.b16 %v2769_v28, %v2768_v6  ;;  %v10055_v0 = vrot.slane %v1156_v62, 9  ;;  %v2700_v28 = vrot.slane %v2698_v35, 4  ;;  %v2701_v13 = vrot.slane %v10287_v23, 5  ;;  %3181 = vmatpush.bf16.msra.mxu2 %v11378_v30 }
 0x14e   : > { %v2525_v27 = vadd.f32 %v2448_v12, %v1843_v48  ;;  %v1367_v12 = vpack.c.b16 %v1346_v58, %v1345_v34  ;;  %v2193_v58 = vrot.slane %v2192_v41, 4  ;;  %v2203_v53 = vrot.slane %v2202_v49, 4 }
 0x14f   : > { %v2210_v62 = vshrl.u32 %v10288_v50, 16  ;;  %v2213_v41 = vshll.u32 %v10288_v50, 16 }
 0x150   : > { %v12621_v51 = vadd.f32 %v2874_v61, %v2525_v27  ;;  %v1277_v27 = vrot.slane %v1275_v9, 4  ;;  %v2198_v23 = vsel %vm11917_vm2, %v2193_v58, %v2197_v54  ;;  %v2702_v54 = vsel %vm12233_vm5, %v2700_v28, %v2701_v13 }
 0x151   : > { %v1453_v37 = vpop.f32.mrf.mxu2  ;;  %v2215_v58 = vrot.slane %v2213_v41, 5 }
 0x152   : > { %15618 = vst [vmem:[#allocation15_spill] sm:$0xff] %v12621_v51  ;;  %v1768_v2 = vpop.f32.mrf.mxu3  ;;  %v1529_v63 = vadd.f32 %v1453_v37, %v12326_v36  ;;  %v1278_v51 = vrot.slane %v11631_v24, 5  ;;  %v10359_v36 = vld [vmem:[%s11878_s8 + $0x90] sm:$0xe]  ;;  %v12638_v37 = vld [vmem:[%s11878_s8 + $0xa0] sm:$0xf] }
 0x153   : > { %v2453_v61 = vpop.f32.mrf.mxu0  ;;  %v10375_v6 = vrot.slane %v10359_v36, 9  ;;  %v2223_v49 = vshrl.u32 %v12638_v37, 16 }
 0x154   : > { %v1844_v31 = vadd.f32 %v1768_v2, %v1529_v63 }
 0x155   : > { %v2879_v48 = vpop.f32.mrf.mxu1  ;;  %v2225_v50 = vrot.slane %v2223_v49, 4 }
 0x156   : > { %1495 = vmatmul.bf16.gmra.mxu2 %v1367_v12  ;;  %v2526_v34 = vadd.f32 %v2450_v19, %v1844_v31  ;;  %2492 = vmatmul.bf16.gmra.mxu0 %v2364_v40  ;;  %v11386_v19 = vld [vmem:[%s15589_s1 + $0x1c8] sm:$0xff]  ;;  %v1276_v12 = vsel %vm12233_vm5, %v10055_v0, %v1275_v9  ;;  %v2208_v40 = vsel %vm11917_vm2, %v2203_v53, %v2207_v4  ;;  %v2771_v53 = vunpack.c.l.b16 %v2702_v54 }
 0x157   : > { %1810 = vmatmul.bf16.gmra.mxu3 %v11331_v22  ;;  %v1279_v22 = vsel %vm12233_vm5, %v1277_v27, %v1278_v51  ;;  %v1347_v51 = vunpack.c.l.b16 %v1276_v12  ;;  %v2344_v27 = vunpack.c.l.b16 %v2198_v23  ;;  %v2345_v36 = vunpack.c.l.b16 %v2208_v40 }
 0x158   : > { %2918 = vmatmul.bf16.gmra.mxu1 %v2790_v42  ;;  %v12635_v55 = vadd.f32 %v2876_v14, %v2526_v34  ;;  %3863 = vmatpush.bf16.msra.mxu3 %v11386_v19  ;;  %v2219_v42 = vshll.u32 %v12638_v37, 16  ;;  %v1348_v0 = vunpack.c.l.b16 %v1279_v22  ;;  %v2212_v34 = vrot.slane %v2210_v62, 4  ;;  %v11332_v22 = vld [vmem:[%s11878_s8 + $0x90] sm:$0xff] }
 0x159   : > { %v1456_v2 = vpop.f32.mrf.mxu2 }
 0x15a   : > { %v1771_v63 = vpop.f32.mrf.mxu3  ;;  %v1530_v14 = vadd.f32 %v1456_v2, %v12335_v8  ;;  %v2699_v8 = vsel %vm12233_vm5, %v10375_v6, %v2698_v35  ;;  %v2221_v4 = vrot.slane %v2219_v42, 5  ;;  %v10290_v35 = vld [vmem:[%s11878_s8 + $0xa4] sm:$0x1]  ;;  %v11394_v6 = vld [vmem:[%s15589_s1 + $0x208] sm:$0xff]  ;;  %v11632_v2 = vld [vmem:[%s11878_s8 + $0x94] sm:$0xf]  ;;  %v1368_v12 = vpack.c.b16 %v1348_v0, %v1347_v51 }
 0x15b   : > { %v2455_v9 = vpop.f32.mrf.mxu0  ;;  %v2770_v30 = vunpack.c.l.b16 %v2699_v8  ;;  %v2216_v23 = vor.u32 %v2215_v58, %v2212_v34  ;;  %4289 = vmatpush.bf16.msra.mxu0 %v11394_v6  ;;  %v2229_v40 = vshll.u32 %v10290_v35, 16  ;;  %v2705_v8 = vrot.slane %v12638_v37, 5  ;;  %v10360_v0 = vld [vmem:[%s11878_s8 + $0x9c] sm:$0xe] }
 0x15c   : > { %v1845_v44 = vadd.f32 %v1771_v63, %v1530_v14  ;;  %v1157_v14 = vld [vmem:[%s11878_s8 + $0x90] sm:$0xe]  ;;  %v2226_v41 = vor.u32 %v2225_v50, %v2221_v4  ;;  %v10376_v50 = vrot.slane %v10360_v0, 9  ;;  %v2708_v37 = vrot.slane %v10290_v35, 5 }
 0x15d   : > { %v2881_v31 = vpop.f32.mrf.mxu1  ;;  %v2791_v62 = vpack.c.b16 %v2771_v53, %v2770_v30  ;;  %v10056_v54 = vrot.slane %v1157_v14, 9  ;;  %v2217_v58 = vrot.slane %v2216_v23, 4  ;;  %v10291_v30 = vld [vmem:[%s11878_s8 + $0xa8] sm:$0xf]  ;;  %v2707_v6 = vrot.slane %v2705_v8, 4 }
 0x15e   : > { %v2527_v24 = vadd.f32 %v2453_v61, %v1845_v44  ;;  %v1282_v61 = vrot.slane %v11632_v2, 5  ;;  %v2237_v14 = vshll.u32 %v10291_v30, 16 }
 0x160   : > { %v12658_v19 = vadd.f32 %v2879_v48, %v2527_v24  ;;  %v2365_v48 = vpack.c.b16 %v2345_v36, %v2344_v27  ;;  %v1284_v24 = vrot.slane %v1282_v61, 4  ;;  %v2227_v27 = vrot.slane %v2226_v41, 4 }
 0x161   : > { %v1458_v28 = vpop.f32.mrf.mxu2  ;;  %v2231_v36 = vrot.slane %v2229_v40, 5  ;;  %v2706_v40 = vsel %vm12233_vm5, %v10376_v50, %v2705_v8  ;;  %v2239_v0 = vrot.slane %v2237_v14, 5  ;;  %v10293_v8 = vld [vmem:[%s11878_s8 + $0xb0] sm:$0x1] }
 0x162   : > { %v1773_v13 = vpop.f32.mrf.mxu3  ;;  %v1531_v63 = vadd.f32 %v1458_v28, %v12365_v47  ;;  %v11633_v47 = vld [vmem:[%s11878_s8 + $0x98] sm:$0x1]  ;;  %v12675_v28 = vld [vmem:[%s11878_s8 + $0xac] sm:$0xf] }
 0x163   : > { %v2458_v49 = vpop.f32.mrf.mxu0  ;;  %v1285_v51 = vrot.slane %v11633_v47, 5  ;;  %v2232_v35 = vsel %vm11917_vm2, %v2227_v27, %v2231_v36  ;;  %v2243_v23 = vshll.u32 %v12675_v28, 16 }
 0x164   : > { %v1846_v42 = vadd.f32 %v1773_v13, %v1531_v63  ;;  %v1283_v63 = vsel %vm12233_vm5, %v10056_v54, %v1282_v61  ;;  %v2347_v47 = vunpack.c.l.b16 %v2232_v35  ;;  %v2253_v35 = vshll.u32 %v10293_v8, 16 }
 0x165   : > { %v2884_v44 = vpop.f32.mrf.mxu1  ;;  %v2245_v27 = vrot.slane %v2243_v23, 5 }
 0x166   : > { %1500 = vmatmul.bf16.gmra.mxu2 %v1368_v12  ;;  %v2528_v34 = vadd.f32 %v2455_v9, %v1846_v42  ;;  %2497 = vmatmul.bf16.gmra.mxu0 %v2365_v48  ;;  %v1286_v9 = vsel %vm12233_vm5, %v1284_v24, %v1285_v51  ;;  %v2247_v48 = vshrl.u32 %v12675_v28, 16 }
 0x167   : > { %1815 = vmatmul.bf16.gmra.mxu3 %v11332_v22  ;;  %v2222_v22 = vsel %vm11917_vm2, %v2217_v58, %v2221_v4  ;;  %v1349_v4 = vunpack.c.l.b16 %v1283_v63  ;;  %v1350_v42 = vunpack.c.l.b16 %v1286_v9  ;;  %v11333_v63 = vld [vmem:[%s11878_s8 + $0x9c] sm:$0xff] }
 0x168   : > { %2923 = vmatmul.bf16.gmra.mxu1 %v2791_v62  ;;  %v12672_v53 = vadd.f32 %v2881_v31, %v2528_v34  ;;  %v2234_v31 = vshrl.u32 %v10291_v30, 16  ;;  %v2346_v54 = vunpack.c.l.b16 %v2222_v22  ;;  %v2772_v34 = vunpack.c.l.b16 %v2706_v40  ;;  %v1158_v9 = vld [vmem:[%s11878_s8 + $0x9c] sm:$0xe] }
 0x169   : > { %v1461_v13 = vpop.f32.mrf.mxu2  ;;  %v2249_v36 = vrot.slane %v2247_v48, 4  ;;  %v10057_v40 = vrot.slane %v1158_v9, 9 }
 0x16a   : > { %v1776_v2 = vpop.f32.mrf.mxu3  ;;  %v1532_v12 = vadd.f32 %v1461_v13, %v12378_v26  ;;  %v2709_v26 = vsel %vm12233_vm5, %v2707_v6, %v2708_v37  ;;  %v2236_v51 = vrot.slane %v2234_v31, 4  ;;  %v11634_v6 = vld [vmem:[%s11878_s8 + $0xa0] sm:$0xf]  ;;  %v2366_v22 = vpack.c.b16 %v2347_v47, %v2346_v54 }
 0x16b   : > { %v2460_v41 = vpop.f32.mrf.mxu0  ;;  %v2773_v58 = vunpack.c.l.b16 %v2709_v26  ;;  %v1289_v37 = vrot.slane %v11634_v6, 5  ;;  %v2250_v14 = vor.u32 %v2249_v36, %v2245_v27  ;;  %v11377_v54 = vld [vmem:[%s15589_s1 + $0x180] sm:$0xff]  ;;  %v2715_v36 = vrot.slane %v10293_v8, 5 }
 0x16c   : > { %v1847_v62 = vadd.f32 %v1776_v2, %v1532_v12  ;;  %v2240_v12 = vor.u32 %v2239_v0, %v2236_v51  ;;  %v2255_v51 = vrot.slane %v2253_v35, 5  ;;  %v10294_v0 = vld [vmem:[%s11878_s8 + $0xb4] sm:$0xf]  ;;  %3182 = vmatpush.bf16.msra.mxu2 %v11377_v54 }
 0x16d   : > { %v2886_v61 = vpop.f32.mrf.mxu1  ;;  %v2792_v31 = vpack.c.b16 %v2773_v58, %v2772_v34  ;;  %v1291_v26 = vrot.slane %v1289_v37, 4  ;;  %v2251_v47 = vrot.slane %v2250_v14, 4  ;;  %v2258_v9 = vshrl.u32 %v10294_v0, 16 }
 0x16e   : > { %v2529_v24 = vadd.f32 %v2458_v49, %v1847_v62  ;;  %v1369_v49 = vpack.c.b16 %v1350_v42, %v1349_v4  ;;  %v2712_v62 = vrot.slane %v12675_v28, 5  ;;  %v2241_v42 = vrot.slane %v2240_v12, 4 }
 0x16f   : > { %v2261_v12 = vshll.u32 %v10294_v0, 16 }
 0x170   : > { %v12692_v30 = vadd.f32 %v2884_v44, %v2529_v24  ;;  %v11635_v24 = vld [vmem:[%s11878_s8 + $0xa4] sm:$0x1]  ;;  %v2714_v58 = vrot.slane %v2712_v62, 4  ;;  %v2246_v8 = vsel %vm11917_vm2, %v2241_v42, %v2245_v27 }
 0x171   : > { %v1463_v50 = vpop.f32.mrf.mxu2  ;;  %v1292_v6 = vrot.slane %v11635_v24, 5  ;;  %v2348_v24 = vunpack.c.l.b16 %v2246_v8  ;;  %v2263_v42 = vrot.slane %v2261_v12, 5 }
 0x172   : > { %v1778_v13 = vpop.f32.mrf.mxu3  ;;  %v1533_v2 = vadd.f32 %v1463_v50, %v12401_v16  ;;  %v10361_v16 = vld [vmem:[%s11878_s8 + $0xa8] sm:$0xe]  ;;  %v12709_v50 = vld [vmem:[%s11878_s8 + $0xb8] sm:$0xf]  ;;  %v2716_v27 = vsel %vm12233_vm5, %v2714_v58, %v2715_v36 }
 0x173   : > { %v2463_v44 = vpop.f32.mrf.mxu0  ;;  %v10377_v34 = vrot.slane %v10361_v16, 9  ;;  %v2271_v14 = vshrl.u32 %v12709_v50, 16 }
 0x174   : > { %v1848_v23 = vadd.f32 %v1778_v13, %v1533_v2 }
 0x175   : > { %v2889_v48 = vpop.f32.mrf.mxu1  ;;  %v2273_v0 = vrot.slane %v2271_v14, 4 }
 0x176   : > { %1505 = vmatmul.bf16.gmra.mxu2 %v1369_v49  ;;  %v2530_v4 = vadd.f32 %v2460_v41, %v1848_v23  ;;  %2502 = vmatmul.bf16.gmra.mxu0 %v2366_v22  ;;  %v11385_v41 = vld [vmem:[%s15589_s1 + $0x1c0] sm:$0xff]  ;;  %v1290_v49 = vsel %vm12233_vm5, %v10057_v40, %v1289_v37  ;;  %v2256_v22 = vsel %vm11917_vm2, %v2251_v47, %v2255_v51  ;;  %v2775_v47 = vunpack.c.l.b16 %v2716_v27  ;;  %v10362_v27 = vld [vmem:[%s11878_s8 + $0xb4] sm:$0xe] }
 0x177   : > { %1820 = vmatmul.bf16.gmra.mxu3 %v11333_v63  ;;  %v1293_v63 = vsel %vm12233_vm5, %v1291_v26, %v1292_v6  ;;  %v1351_v40 = vunpack.c.l.b16 %v1290_v49  ;;  %v2349_v16 = vunpack.c.l.b16 %v2256_v22  ;;  %v1159_v49 = vld [vmem:[%s11878_s8 + $0xa8] sm:$0xe] }
 0x178   : > { %2928 = vmatmul.bf16.gmra.mxu1 %v2792_v31  ;;  %v12706_v28 = vadd.f32 %v2886_v61, %v2530_v4  ;;  %3864 = vmatpush.bf16.msra.mxu3 %v11385_v41  ;;  %v2267_v31 = vshll.u32 %v12709_v50, 16  ;;  %v1352_v26 = vunpack.c.l.b16 %v1293_v63  ;;  %v2260_v4 = vrot.slane %v2258_v9, 4  ;;  %v11636_v63 = vld [vmem:[%s11878_s8 + $0xac] sm:$0xf] }
 0x179   : > { %v1466_v13 = vpop.f32.mrf.mxu2 }
 0x17a   : > { %v1781_v2 = vpop.f32.mrf.mxu3  ;;  %v1534_v61 = vadd.f32 %v1466_v13, %v12410_v38  ;;  %v2713_v38 = vsel %vm12233_vm5, %v10377_v34, %v2712_v62  ;;  %v2269_v51 = vrot.slane %v2267_v31, 5  ;;  %v10296_v62 = vld [vmem:[%s11878_s8 + $0xbc] sm:$0x1]  ;;  %v11393_v34 = vld [vmem:[%s15589_s1 + $0x200] sm:$0xff]  ;;  %v1370_v13 = vpack.c.b16 %v1352_v26, %v1351_v40 }
 0x17b   : > { %v2465_v37 = vpop.f32.mrf.mxu0  ;;  %v2774_v54 = vunpack.c.l.b16 %v2713_v38  ;;  %v2264_v8 = vor.u32 %v2263_v42, %v2260_v4  ;;  %4290 = vmatpush.bf16.msra.mxu0 %v11393_v34  ;;  %v2277_v22 = vshll.u32 %v10296_v62, 16  ;;  %v2719_v38 = vrot.slane %v12709_v50, 5  ;;  %v12748_v50 = vld [vmem:[%s11878_s8 + $0xc4] sm:$0xf] }
 0x17c   : > { %v1849_v35 = vadd.f32 %v1781_v2, %v1534_v61  ;;  %v11334_v2 = vld [vmem:[%s11878_s8 + $0xa8] sm:$0xff]  ;;  %v1296_v61 = vrot.slane %v11636_v63, 5  ;;  %v2274_v12 = vor.u32 %v2273_v0, %v2269_v51  ;;  %v2722_v34 = vrot.slane %v10296_v62, 5 }
 0x17d   : > { %v12725_v23 = vpop.f32.mrf.mxu1  ;;  %v2793_v9 = vpack.c.b16 %v2775_v47, %v2774_v54  ;;  %v2279_v42 = vrot.slane %v2277_v22, 5  ;;  %v10297_v54 = vld [vmem:[%s11878_s8 + $0xc0] sm:$0xf]  ;;  %v10378_v47 = vrot.slane %v10362_v27, 9  ;;  %v2721_v0 = vrot.slane %v2719_v38, 4 }
 0x17e   : > { %v2531_v6 = vadd.f32 %v2463_v44, %v1849_v35  ;;  %v1298_v26 = vrot.slane %v1296_v61, 4  ;;  %v2282_v63 = vshrl.u32 %v10297_v54, 16  ;;  %v2285_v62 = vshll.u32 %v10297_v54, 16 }
 0x180   : > { %v12731_v41 = vadd.f32 %v2889_v48, %v2531_v6  ;;  %v2367_v48 = vpack.c.b16 %v2349_v16, %v2348_v24  ;;  %v11637_v6 = vld [vmem:[%s11878_s8 + $0xb0] sm:$0x1]  ;;  %v2265_v24 = vrot.slane %v2264_v8, 4  ;;  %v2275_v16 = vrot.slane %v2274_v12, 4 }
 0x181   : > { %v1468_v58 = vpop.f32.mrf.mxu2  ;;  %v1299_v4 = vrot.slane %v11637_v6, 5  ;;  %v2291_v8 = vshll.u32 %v12748_v50, 16  ;;  %v2723_v12 = vsel %vm12233_vm5, %v2721_v0, %v2722_v34 }
 0x182   : > { %v1783_v36 = vpop.f32.mrf.mxu3  ;;  %v1535_v44 = vadd.f32 %v1468_v58, %v12440_v21  ;;  %v10058_v21 = vrot.slane %v1159_v49, 9  ;;  %v2280_v49 = vsel %vm11917_vm2, %v2275_v16, %v2279_v42  ;;  %v2287_v16 = vrot.slane %v2285_v62, 5 }
 0x183   : > { %v2468_v14 = vpop.f32.mrf.mxu0  ;;  %v2293_v54 = vrot.slane %v2291_v8, 5 }
 0x184   : > { %v1850_v31 = vadd.f32 %v1783_v36, %v1535_v44 }
 0x185   : > { %v2894_v35 = vpop.f32.mrf.mxu1 }
 0x186   : > { %1510 = vmatmul.bf16.gmra.mxu2 %v1370_v13  ;;  %v12743_v40 = vadd.f32 %v2465_v37, %v1850_v31  ;;  %2507 = vmatmul.bf16.gmra.mxu0 %v2367_v48  ;;  %v1297_v37 = vsel %vm12233_vm5, %v10058_v21, %v1296_v61  ;;  %v1300_v13 = vsel %vm12233_vm5, %v1298_v26, %v1299_v4  ;;  %v2351_v26 = vunpack.c.l.b16 %v2280_v49 }
 0x187   : > { %1825 = vmatmul.bf16.gmra.mxu3 %v11334_v2  ;;  %v2270_v2 = vsel %vm11917_vm2, %v2265_v24, %v2269_v51  ;;  %v2720_v61 = vsel %vm12233_vm5, %v10378_v47, %v2719_v38  ;;  %v2295_v51 = vshrl.u32 %v12748_v50, 16  ;;  %v1353_v22 = vunpack.c.l.b16 %v1297_v37  ;;  %v10299_v38 = vld [vmem:[%s11878_s8 + $0xc8] sm:$0x1] }
 0x188   : > { %2933 = vmatmul.bf16.gmra.mxu1 %v2793_v9  ;;  %v1354_v21 = vunpack.c.l.b16 %v1300_v13  ;;  %v2350_v27 = vunpack.c.l.b16 %v2270_v2  ;;  %v2776_v6 = vunpack.c.l.b16 %v2720_v61  ;;  %v2777_v4 = vunpack.c.l.b16 %v2723_v12  ;;  %v1160_v13 = vld [vmem:[%s11878_s8 + $0xb4] sm:$0xe]  ;;  %v11638_v2 = vld [vmem:[%s11878_s8 + $0xb8] sm:$0xf] }
 0x189   : > { %v1471_v58 = vpop.f32.mrf.mxu2  ;;  %v2284_v24 = vrot.slane %v2282_v63, 4  ;;  %v2297_v47 = vrot.slane %v2295_v51, 4  ;;  %v1303_v49 = vrot.slane %v11638_v2, 5  ;;  %v2726_v12 = vrot.slane %v12748_v50, 5  ;;  %v10363_v51 = vld [vmem:[%s11878_s8 + $0xc0] sm:$0xe] }
 0x18a   : > { %v1786_v36 = vpop.f32.mrf.mxu3  ;;  %v1536_v44 = vadd.f32 %v1471_v58, %v12452_v3  ;;  %v1371_v58 = vpack.c.b16 %v1354_v21, %v1353_v22  ;;  %v2794_v37 = vpack.c.b16 %v2777_v4, %v2776_v6  ;;  %v10059_v22 = vrot.slane %v1160_v13, 9  ;;  %v12780_v21 = vld [vmem:[%s11878_s8 + $0x1c] sm:$0xf] }
 0x18b   : > { %v2470_v9 = vpop.f32.mrf.mxu0  ;;  %v2288_v63 = vor.u32 %v2287_v16, %v2284_v24  ;;  %v2298_v61 = vor.u32 %v2297_v47, %v2293_v54  ;;  %v10379_v47 = vrot.slane %v10363_v51, 9  ;;  %v2729_v50 = vrot.slane %v10299_v38, 5 }
 0x18c   : > { %v1851_v48 = vadd.f32 %v1786_v36, %v1536_v44  ;;  %v11335_v36 = vld [vmem:[%s11878_s8 + $0xb4] sm:$0xff]  ;;  %v2368_v44 = vpack.c.b16 %v2351_v26, %v2350_v27  ;;  %v1305_v27 = vrot.slane %v1303_v49, 4  ;;  %v11639_v26 = vld [vmem:[%s11878_s8 + $0xbc] sm:$0x1]  ;;  %v3358_v13 = vshrl.u32 %v12780_v21, 16 }
 0x18d   : > { %v12760_v3 = vpop.f32.mrf.mxu1  ;;  %v1306_v6 = vrot.slane %v11639_v26, 5  ;;  %v2289_v4 = vrot.slane %v2288_v63, 4  ;;  %v2299_v16 = vrot.slane %v2298_v61, 4 }
 0x18e   : > { %v2533_v31 = vadd.f32 %v2468_v14, %v1851_v48 }
 0x18f   : > { %v1307_v2 = vsel %vm12233_vm5, %v1305_v27, %v1306_v6  ;;  %v3360_v27 = vrot.slane %v3358_v13, 4 }
 0x190   : > { %v12767_v42 = vadd.f32 %v2894_v35, %v2533_v31  ;;  %v2301_v35 = vshll.u32 %v10299_v38, 16  ;;  %v10572_v31 = vld [vmem:[%s11878_s8 + $0x18] sm:$0xf]  ;;  %v2294_v38 = vsel %vm11917_vm2, %v2289_v4, %v2293_v54  ;;  %v1356_v6 = vunpack.c.l.b16 %v1307_v2  ;;  %v10574_v4 = vld [vmem:[%s11878_s8 + $0x20] sm:$0x1] }
 0x191   : > { %v1473_v0 = vpop.f32.mrf.mxu2  ;;  %v10668_v2 = vld [vmem:[%s11878_s8 + $0x18] sm:$0xe] }
 0x192   : > { %v1788_v34 = vpop.f32.mrf.mxu3  ;;  %v1537_v14 = vadd.f32 %v1473_v0, %v12476_v17  ;;  %v2303_v24 = vrot.slane %v2301_v35, 5  ;;  %v2728_v0 = vrot.slane %v2726_v12, 4 }
 0x193   : > { %v2473_v8 = vpop.f32.mrf.mxu0 }
 0x194   : > { %v1852_v62 = vadd.f32 %v1788_v34, %v1537_v14  ;;  %v2304_v61 = vsel %vm11917_vm2, %v2299_v16, %v2303_v24 }
 0x195   : > { %v2899_v48 = vpop.f32.mrf.mxu1 }
 0x196   : > { %1515 = vmatmul.bf16.gmra.mxu2 %v1371_v58  ;;  %v12776_v17 = vadd.f32 %v2470_v9, %v1852_v62  ;;  %2512 = vmatmul.bf16.gmra.mxu0 %v2368_v44  ;;  %v3345_v58 = vshrl.u32 %v10572_v31, 16  ;;  %v3348_v9 = vshll.u32 %v10572_v31, 16 }
 0x197   : > { %1830 = vmatmul.bf16.gmra.mxu3 %v11335_v36  ;;  %v3354_v36 = vshll.u32 %v12780_v21, 16 }
 0x198   : > { %2938 = vmatmul.bf16.gmra.mxu1 %v2794_v37  ;;  %v1304_v37 = vsel %vm12233_vm5, %v10059_v22, %v1303_v49  ;;  %v2730_v49 = vsel %vm12233_vm5, %v2728_v0, %v2729_v50  ;;  %v3347_v51 = vrot.slane %v3345_v58, 4  ;;  %v3350_v22 = vrot.slane %v3348_v9, 5 }
 0x199   : > { %v1476_v34 = vpop.f32.mrf.mxu2  ;;  %v3356_v31 = vrot.slane %v3354_v36, 5  ;;  %v1355_v54 = vunpack.c.l.b16 %v1304_v37  ;;  %v2779_v24 = vunpack.c.l.b16 %v2730_v49  ;;  %v3364_v50 = vshll.u32 %v10574_v4, 16 }
 0x19a   : > { %v1791_v14 = vpop.f32.mrf.mxu3  ;;  %v1538_v44 = vadd.f32 %v1476_v34, %v12486_v56  ;;  %v2727_v56 = vsel %vm12233_vm5, %v10379_v47, %v2726_v12  ;;  %v2352_v34 = vunpack.c.l.b16 %v2294_v38  ;;  %v4044_v36 = vrot.slane %v12780_v21, 5  ;;  %v10575_v21 = vld [vmem:[%s11878_s8 + $0x24] sm:$0xf] }
 0x19b   : > { %v2475_v35 = vpop.f32.mrf.mxu0  ;;  %v3361_v0 = vor.u32 %v3360_v27, %v3356_v31  ;;  %v1372_v9 = vpack.c.b16 %v1356_v6, %v1355_v54  ;;  %v3366_v49 = vrot.slane %v3364_v50, 5  ;;  %v4047_v27 = vrot.slane %v10574_v4, 5 }
 0x19c   : > { %v1853_v63 = vadd.f32 %v1791_v14, %v1538_v44  ;;  %v2353_v14 = vunpack.c.l.b16 %v2304_v61  ;;  %v2778_v44 = vunpack.c.l.b16 %v2727_v56 }
 0x19d   : > { %v12792_v62 = vpop.f32.mrf.mxu1  ;;  %v3362_v56 = vrot.slane %v3361_v0, 4 }
 0x19e   : > { %15619 = vst [vmem:[#allocation16_spill] sm:$0xff] %v12792_v62  ;;  %v2535_v26 = vadd.f32 %v2473_v8, %v1853_v63  ;;  %v3351_v62 = vor.u32 %v3350_v22, %v3347_v51  ;;  %v11336_v8 = vld [vmem:[%s11878_s8 + $0xc0] sm:$0xff]  ;;  %v2369_v13 = vpack.c.b16 %v2353_v14, %v2352_v34  ;;  %v2795_v37 = vpack.c.b16 %v2779_v24, %v2778_v44 }
 0x19f   : > { %v4046_v22 = vrot.slane %v4044_v36, 4  ;;  %v3367_v14 = vsel %vm11917_vm2, %v3362_v56, %v3366_v49  ;;  %v3369_v44 = vshrl.u32 %v10575_v21, 16  ;;  %v3372_v24 = vshll.u32 %v10575_v21, 16  ;;  %v10577_v56 = vld [vmem:[%s11878_s8 + $0x2c] sm:$0x1] }
 0x1a0   : > { %v12801_v16 = vadd.f32 %v2899_v48, %v2535_v26  ;;  %v3352_v61 = vrot.slane %v3351_v62, 4  ;;  %v12811_v26 = vld [vmem:[%s11878_s8 + $0x28] sm:$0xf] }
 0x1a1   : > { %v1478_v12 = vpop.f32.mrf.mxu2  ;;  %v4048_v4 = vsel %vm12233_vm5, %v4046_v22, %v4047_v27  ;;  %v11361_v27 = vld [vmem:[%s11878_s8 + $0x18] sm:$0xff] }
 0x1a2   : > { %v1793_v47 = vpop.f32.mrf.mxu3  ;;  %v1539_v58 = vadd.f32 %v1478_v12, %v12515_v20  ;;  %v10684_v20 = vrot.slane %v10668_v2, 9  ;;  %v3357_v34 = vsel %vm11917_vm2, %v3352_v61, %v3356_v31  ;;  %v3378_v12 = vshll.u32 %v12811_v26, 16 }
 0x1a3   : > { %v2478_v63 = vpop.f32.mrf.mxu0  ;;  %v3745_v50 = vunpack.c.l.b16 %v3357_v34  ;;  %v3388_v34 = vshll.u32 %v10577_v56, 16 }
 0x1a4   : > { %v1854_v38 = vadd.f32 %v1793_v47, %v1539_v58  ;;  %v3382_v47 = vshrl.u32 %v12811_v26, 16  ;;  %v3380_v2 = vrot.slane %v3378_v12, 5  ;;  %v12837_v12 = vld [vmem:[%s11878_s8 + $0x34] sm:$0xf] }
 0x1a5   : > { %v2904_v48 = vpop.f32.mrf.mxu1 }
 0x1a6   : > { %1520 = vmatmul.bf16.gmra.mxu2 %v1372_v9  ;;  %v12807_v51 = vadd.f32 %v2475_v35, %v1854_v38  ;;  %2517 = vmatmul.bf16.gmra.mxu0 %v2369_v13  ;;  %v4045_v35 = vsel %vm12233_vm5, %v10684_v20, %v4044_v36  ;;  %v3746_v9 = vunpack.c.l.b16 %v3367_v14  ;;  %v4172_v36 = vunpack.c.l.b16 %v4048_v4 }
 0x1a7   : > { %1835 = vmatmul.bf16.gmra.mxu3 %v11336_v8  ;;  %v4171_v8 = vunpack.c.l.b16 %v4045_v35  ;;  %v3371_v13 = vrot.slane %v3369_v44, 4  ;;  %v3384_v38 = vrot.slane %v3382_v47, 4  ;;  %v4051_v4 = vrot.slane %v12811_v26, 5 }
 0x1a8   : > { %2943 = vmatmul.bf16.gmra.mxu1 %v2795_v37  ;;  %v3374_v37 = vrot.slane %v3372_v24, 5  ;;  %v3777_v21 = vpack.c.b16 %v3746_v9, %v3745_v50  ;;  %v10578_v24 = vld [vmem:[%s11878_s8 + $0x30] sm:$0xf]  ;;  %v4054_v9 = vrot.slane %v10577_v56, 5  ;;  %v3402_v26 = vshll.u32 %v12837_v12, 16 }
 0x1a9   : > { %v1481_v54 = vpop.f32.mrf.mxu2 }
 0x1aa   : > { %v1796_v6 = vpop.f32.mrf.mxu3  ;;  %v1540_v62 = vadd.f32 %v1481_v54, %v12527_v5  ;;  %v3375_v54 = vor.u32 %v3374_v37, %v3371_v13  ;;  %v3393_v13 = vshrl.u32 %v10578_v24, 16  ;;  %v3396_v37 = vshll.u32 %v10578_v24, 16  ;;  %v10580_v24 = vld [vmem:[%s11878_s8 + $0x38] sm:$0x1] }
 0x1ab   : > { %v2480_v31 = vpop.f32.mrf.mxu0 }
 0x1ac   : > { %v1855_v0 = vadd.f32 %v1796_v6, %v1540_v62  ;;  %v3385_v6 = vor.u32 %v3384_v38, %v3380_v2  ;;  %v3406_v38 = vshrl.u32 %v12837_v12, 16 }
 0x1ad   : > { %v12824_v5 = vpop.f32.mrf.mxu1 }
 0x1ae   : > { %v2537_v58 = vadd.f32 %v2478_v63, %v1855_v0  ;;  %v4203_v63 = vpack.c.b16 %v4172_v36, %v4171_v8  ;;  %v3386_v47 = vrot.slane %v3385_v6, 4  ;;  %v3390_v0 = vrot.slane %v3388_v34, 5 }
 0x1af   : > { %v3404_v6 = vrot.slane %v3402_v26, 5  ;;  %v3408_v34 = vrot.slane %v3406_v38, 4  ;;  %v10670_v38 = vld [vmem:[%s11878_s8 + $0x30] sm:$0xe] }
 0x1b0   : > { %v12826_v61 = vadd.f32 %v2904_v48, %v2537_v58  ;;  %v10669_v48 = vld [vmem:[%s11878_s8 + $0x24] sm:$0xe]  ;;  %v4053_v58 = vrot.slane %v4051_v4, 4 }
 0x1b1   : > { %v1483_v49 = vpop.f32.mrf.mxu2  ;;  %v10685_v50 = vrot.slane %v10669_v48, 9 }
 0x1b2   : > { %v1798_v20 = vpop.f32.mrf.mxu3  ;;  %v1541_v22 = vadd.f32 %v1483_v49, %v12551_v59  ;;  %v3376_v59 = vrot.slane %v3375_v54, 4  ;;  %v3398_v54 = vrot.slane %v3396_v37, 5 }
 0x1b3   : > { %v2483_v14 = vpop.f32.mrf.mxu0  ;;  %v4052_v56 = vsel %vm12233_vm5, %v10685_v50, %v4051_v4 }
 0x1b4   : > { %v1856_v62 = vadd.f32 %v1798_v20, %v1541_v22  ;;  %v3381_v49 = vsel %vm11917_vm2, %v3376_v59, %v3380_v2  ;;  %v3391_v20 = vsel %vm11917_vm2, %v3386_v47, %v3390_v0  ;;  %v4173_v59 = vunpack.c.l.b16 %v4052_v56 }
 0x1b5   : > { %v2909_v35 = vpop.f32.mrf.mxu1  ;;  %v3748_v48 = vunpack.c.l.b16 %v3391_v20 }
 0x1b6   : > { %3183 = vmatmul.bf16.vlgmr.msra.gmra.mxu2 %v11361_v27  ;;  %v12833_v44 = vadd.f32 %v2480_v31, %v1856_v62  ;;  %4291 = vmatmul.bf16.vlgmr.msra.gmra.mxu0 %v4203_v63  ;;  %v3395_v63 = vrot.slane %v3393_v13, 4  ;;  %v3747_v62 = vunpack.c.l.b16 %v3381_v49  ;;  %v11362_v13 = vld [vmem:[%s11878_s8 + $0x24] sm:$0xff] }
 0x1b7   : > { %3865 = vmatmul.bf16.vlgmr.msra.gmra.mxu3 %v3777_v21  ;;  %v4055_v21 = vsel %vm12233_vm5, %v4053_v58, %v4054_v9  ;;  %v3409_v58 = vor.u32 %v3408_v34, %v3404_v6  ;;  %v3412_v9 = vshll.u32 %v10580_v24, 16  ;;  %v10581_v34 = vld [vmem:[%s11878_s8 + $0x3c] sm:$0xf] }
 0x1b8   : > { %v4174_v47 = vunpack.c.l.b16 %v4055_v21  ;;  %v3778_v37 = vpack.c.b16 %v3748_v48, %v3747_v62  ;;  %v10686_v21 = vrot.slane %v10670_v38, 9 }
 0x1b9   : > { %v1486_v8 = vpop.f32.mrf.mxu2 }
 0x1ba   : > { %v1801_v36 = vpop.f32.mrf.mxu3  ;;  %v1542_v31 = vadd.f32 %v1486_v8, %v12278_v11  ;;  %v3399_v8 = vor.u32 %v3398_v54, %v3395_v63  ;;  %v4204_v26 = vpack.c.b16 %v4174_v47, %v4173_v59 }
 0x1bb   : > { %v2485_v27 = vpop.f32.mrf.mxu0 }
 0x1bc   : > { %v1857_v22 = vadd.f32 %v1801_v36, %v1542_v31  ;;  %v3400_v20 = vrot.slane %v3399_v8, 4 }
 0x1bd   : > { %v12850_v2 = vpop.f32.mrf.mxu1 }
 0x1be   : > { %v2539_v11 = vadd.f32 %v2483_v14, %v1857_v22  ;;  %v4058_v14 = vrot.slane %v12837_v12, 5  ;;  %v3414_v22 = vrot.slane %v3412_v9, 5  ;;  %v12863_v12 = vld [vmem:[%s11878_s8 + $0x40] sm:$0xf]  ;;  %v3405_v48 = vsel %vm11917_vm2, %v3400_v20, %v3404_v6 }
 0x1bf   : > { %v3426_v8 = vshll.u32 %v12863_v12, 16 }
 0x1c0   : > { %v12853_v0 = vadd.f32 %v2909_v35, %v2539_v11  ;;  %v3410_v35 = vrot.slane %v3409_v58, 4  ;;  %v4060_v63 = vrot.slane %v4058_v14, 4  ;;  %v3430_v58 = vshrl.u32 %v12863_v12, 16 }
 0x1c1   : > { %v1488_v4 = vpop.f32.mrf.mxu2 }
 0x1c2   : > { %v1803_v50 = vpop.f32.mrf.mxu3  ;;  %v1543_v36 = vadd.f32 %v1488_v4, %v12296_v46  ;;  %v4061_v46 = vrot.slane %v10580_v24, 5  ;;  %v3415_v47 = vsel %vm11917_vm2, %v3410_v35, %v3414_v22  ;;  %v3417_v4 = vshrl.u32 %v10581_v34, 16  ;;  %v10583_v22 = vld [vmem:[%s11878_s8 + $0x44] sm:$0x1] }
 0x1c3   : > { %v2488_v49 = vpop.f32.mrf.mxu0  ;;  %v3432_v20 = vrot.slane %v3430_v58, 4 }
 0x1c4   : > { %v1858_v31 = vadd.f32 %v1803_v50, %v1543_v36  ;;  %v4062_v24 = vsel %vm12233_vm5, %v4060_v63, %v4061_v46  ;;  %v3420_v50 = vshll.u32 %v10581_v34, 16  ;;  %v3419_v38 = vrot.slane %v3417_v4, 4  ;;  %v11363_v34 = vld [vmem:[%s11878_s8 + $0x30] sm:$0xff]  ;;  %v10671_v4 = vld [vmem:[%s11878_s8 + $0x3c] sm:$0xe] }
 0x1c5   : > { %v2914_v54 = vpop.f32.mrf.mxu1 }
 0x1c6   : > { %3188 = vmatmul.bf16.gmra.mxu2 %v11362_v13  ;;  %v12859_v56 = vadd.f32 %v2485_v27, %v1858_v31  ;;  %4296 = vmatmul.bf16.gmra.mxu0 %v4204_v26  ;;  %v4059_v27 = vsel %vm12233_vm5, %v10686_v21, %v4058_v14  ;;  %v3750_v13 = vunpack.c.l.b16 %v3415_v47  ;;  %v4176_v26 = vunpack.c.l.b16 %v4062_v24 }
 0x1c7   : > { %3870 = vmatmul.bf16.gmra.mxu3 %v3778_v37  ;;  %v4175_v37 = vunpack.c.l.b16 %v4059_v27  ;;  %v3422_v14 = vrot.slane %v3420_v50, 5  ;;  %v3428_v31 = vrot.slane %v3426_v8, 5  ;;  %v3436_v47 = vshll.u32 %v10583_v22, 16  ;;  %v10584_v8 = vld [vmem:[%s11878_s8 + $0x48] sm:$0xf] }
 0x1c9   : > { %v1491_v11 = vpop.f32.mrf.mxu2 }
 0x1ca   : > { %v1806_v62 = vpop.f32.mrf.mxu3  ;;  %v1544_v59 = vadd.f32 %v1491_v11, %v12310_v18  ;;  %v3749_v18 = vunpack.c.l.b16 %v3405_v48  ;;  %v3423_v48 = vor.u32 %v3422_v14, %v3419_v38  ;;  %v3441_v14 = vshrl.u32 %v10584_v8, 16 }
 0x1cb   : > { %v2490_v6 = vpop.f32.mrf.mxu0 }
 0x1cc   : > { %v1859_v9 = vadd.f32 %v1806_v62, %v1544_v59  ;;  %v3779_v11 = vpack.c.b16 %v3750_v13, %v3749_v18  ;;  %v4205_v62 = vpack.c.b16 %v4176_v26, %v4175_v37  ;;  %v3433_v59 = vor.u32 %v3432_v20, %v3428_v31 }
 0x1cd   : > { %v3424_v58 = vrot.slane %v3423_v48, 4  ;;  %v3438_v18 = vrot.slane %v3436_v47, 5  ;;  %v4068_v37 = vrot.slane %v10583_v22, 5  ;;  %v3444_v20 = vshll.u32 %v10584_v8, 16 }
 0x1ce   : > { %v2541_v36 = vadd.f32 %v2488_v49, %v1859_v9  ;;  %v12881_v49 = vpop.f32.mrf.mxu1  ;;  %v3434_v9 = vrot.slane %v3433_v59, 4  ;;  %v3443_v59 = vrot.slane %v3441_v14, 4  ;;  %v11364_v14 = vld [vmem:[%s11878_s8 + $0x3c] sm:$0xff] }
 0x1cf   : > { %v3446_v47 = vrot.slane %v3444_v20, 5 }
 0x1d0   : > { %v12876_v35 = vadd.f32 %v2914_v54, %v2541_v36  ;;  %v4065_v54 = vrot.slane %v12863_v12, 5  ;;  %v10687_v36 = vrot.slane %v10671_v4, 9 }
 0x1d1   : > { %v1493_v21 = vpop.f32.mrf.mxu2 }
 0x1d2   : > { %v1808_v63 = vpop.f32.mrf.mxu3  ;;  %v1545_v46 = vadd.f32 %v1493_v21, %v12329_v57  ;;  %v12889_v57 = vld [vmem:[%s11878_s8 + $0x4c] sm:$0xf]  ;;  %v4067_v13 = vrot.slane %v4065_v54, 4  ;;  %v4066_v22 = vsel %vm12233_vm5, %v10687_v36, %v4065_v54  ;;  %v3447_v36 = vor.u32 %v3446_v47, %v3443_v59 }
 0x1d3   : > { %v2493_v24 = vpop.f32.mrf.mxu0  ;;  %v3450_v12 = vshll.u32 %v12889_v57, 16  ;;  %v3454_v21 = vshrl.u32 %v12889_v57, 16 }
 0x1d4   : > { %v1860_v27 = vadd.f32 %v1808_v63, %v1545_v46  ;;  %v3429_v63 = vsel %vm11917_vm2, %v3424_v58, %v3428_v31  ;;  %v3439_v46 = vsel %vm11917_vm2, %v3434_v9, %v3438_v18  ;;  %v10586_v58 = vld [vmem:[%s11878_s8 + $0x50] sm:$0x1]  ;;  %v4177_v9 = vunpack.c.l.b16 %v4066_v22 }
 0x1d5   : > { %v3751_v8 = vunpack.c.l.b16 %v3429_v63  ;;  %v3752_v31 = vunpack.c.l.b16 %v3439_v46 }
 0x1d6   : > { %3193 = vmatmul.bf16.gmra.mxu2 %v11363_v34  ;;  %v12885_v50 = vadd.f32 %v2490_v6, %v1860_v27  ;;  %4301 = vmatmul.bf16.gmra.mxu0 %v4205_v62  ;;  %v4069_v62 = vsel %vm12233_vm5, %v4067_v13, %v4068_v37  ;;  %v2919_v48 = vpop.f32.mrf.mxu1  ;;  %v3452_v27 = vrot.slane %v3450_v12, 5  ;;  %v3460_v13 = vshll.u32 %v10586_v58, 16 }
 0x1d7   : > { %3875 = vmatmul.bf16.gmra.mxu3 %v3779_v11  ;;  %v4178_v18 = vunpack.c.l.b16 %v4069_v62  ;;  %v3780_v20 = vpack.c.b16 %v3752_v31, %v3751_v8 }
 0x1d8   : > { %v3462_v62 = vrot.slane %v3460_v13, 5 }
 0x1d9   : > { %v1496_v26 = vpop.f32.mrf.mxu2  ;;  %v4206_v12 = vpack.c.b16 %v4178_v18, %v4177_v9 }
 0x1da   : > { %v1811_v38 = vpop.f32.mrf.mxu3  ;;  %v1546_v6 = vadd.f32 %v1496_v26, %v12349_v32  ;;  %v3456_v32 = vrot.slane %v3454_v21, 4  ;;  %v10672_v21 = vld [vmem:[%s11878_s8 + $0x48] sm:$0xe] }
 0x1db   : > { %v2495_v11 = vpop.f32.mrf.mxu0  ;;  %v10688_v59 = vrot.slane %v10672_v21, 9 }
 0x1dc   : > { %v1861_v34 = vadd.f32 %v1811_v38, %v1546_v6  ;;  %v3457_v6 = vor.u32 %v3456_v32, %v3452_v27  ;;  %v10587_v32 = vld [vmem:[%s11878_s8 + $0x54] sm:$0xf] }
 0x1de   : > { %v2543_v4 = vadd.f32 %v2493_v24, %v1861_v34  ;;  %v4072_v24 = vrot.slane %v12889_v57, 5  ;;  %v3448_v34 = vrot.slane %v3447_v36, 4  ;;  %v3458_v22 = vrot.slane %v3457_v6, 4 }
 0x1e0   : > { %v12903_v26 = vadd.f32 %v2919_v48, %v2543_v4  ;;  %v4074_v47 = vrot.slane %v4072_v24, 4  ;;  %v10588_v4 = vld [vmem:[%s11878_s8 + $0x58] sm:$0xf]  ;;  %v3453_v31 = vsel %vm11917_vm2, %v3448_v34, %v3452_v27  ;;  %v3463_v18 = vsel %vm11917_vm2, %v3458_v22, %v3462_v62  ;;  %v10589_v22 = vld [vmem:[%s11878_s8 + $0x5c] sm:$0x1] }
 0x1e1   : > { %v1498_v38 = vpop.f32.mrf.mxu2  ;;  %v3474_v36 = vshll.u32 %v10588_v4, 16  ;;  %v3478_v6 = vshrl.u32 %v10588_v4, 16  ;;  %v3753_v27 = vunpack.c.l.b16 %v3453_v31  ;;  %v3484_v31 = vshll.u32 %v10589_v22, 16 }
 0x1e2   : > { %v1813_v54 = vpop.f32.mrf.mxu3  ;;  %v1547_v37 = vadd.f32 %v1498_v38, %v12373_v10  ;;  %v4075_v10 = vrot.slane %v10586_v58, 5  ;;  %v3465_v58 = vshrl.u32 %v10587_v32, 16 }
 0x1e3   : > { %v2498_v46 = vpop.f32.mrf.mxu0  ;;  %v3480_v34 = vrot.slane %v3478_v6, 4 }
 0x1e4   : > { %v1862_v63 = vadd.f32 %v1813_v54, %v1547_v37  ;;  %v4076_v38 = vsel %vm12233_vm5, %v4074_v47, %v4075_v10  ;;  %v3468_v54 = vshll.u32 %v10587_v32, 16  ;;  %v3467_v21 = vrot.slane %v3465_v58, 4  ;;  %v11365_v10 = vld [vmem:[%s11878_s8 + $0x48] sm:$0xff] }
 0x1e6   : > { %3198 = vmatmul.bf16.gmra.mxu2 %v11364_v14  ;;  %v12909_v48 = vadd.f32 %v2495_v11, %v1862_v63  ;;  %4306 = vmatmul.bf16.gmra.mxu0 %v4206_v12  ;;  %v4073_v11 = vsel %vm12233_vm5, %v10688_v59, %v4072_v24  ;;  %v4180_v12 = vunpack.c.l.b16 %v4076_v38  ;;  %v3470_v63 = vrot.slane %v3468_v54, 5  ;;  %v10673_v38 = vld [vmem:[%s11878_s8 + $0x54] sm:$0xe]  ;;  %v10590_v54 = vld [vmem:[%s11878_s8 + $0x60] sm:$0xf] }
 0x1e7   : > { %3880 = vmatmul.bf16.gmra.mxu3 %v3780_v20  ;;  %v4179_v20 = vunpack.c.l.b16 %v4073_v11  ;;  %v3476_v24 = vrot.slane %v3474_v36, 5  ;;  %v4079_v11 = vrot.slane %v10588_v4, 5  ;;  %v12932_v36 = vld [vmem:[%s11878_s8 + $0x64] sm:$0xf] }
 0x1e8   : > { %v3498_v4 = vshll.u32 %v12932_v36, 16 }
 0x1e9   : > { %v1501_v8 = vpop.f32.mrf.mxu2 }
 0x1ea   : > { %v1816_v57 = vpop.f32.mrf.mxu3  ;;  %v1548_v9 = vadd.f32 %v1501_v8, %v12391_v45  ;;  %v3754_v45 = vunpack.c.l.b16 %v3463_v18  ;;  %v4207_v8 = vpack.c.b16 %v4180_v12, %v4179_v20  ;;  %v4082_v20 = vrot.slane %v10589_v22, 5 }
 0x1eb   : > { %v2500_v37 = vpop.f32.mrf.mxu0 }
 0x1ec   : > { %v1863_v13 = vadd.f32 %v1816_v57, %v1548_v9  ;;  %v3781_v32 = vpack.c.b16 %v3754_v45, %v3753_v27  ;;  %v3481_v57 = vor.u32 %v3480_v34, %v3476_v24  ;;  %v10689_v27 = vrot.slane %v10673_v38, 9 }
 0x1ed   : > { %v4081_v45 = vrot.slane %v4079_v11, 4  ;;  %v3492_v34 = vshll.u32 %v10590_v54, 16 }
 0x1ee   : > { %v12922_v14 = vadd.f32 %v2498_v46, %v1863_v13  ;;  %v3471_v46 = vor.u32 %v3470_v63, %v3467_v21  ;;  %v3486_v13 = vrot.slane %v3484_v31, 5  ;;  %v3489_v63 = vshrl.u32 %v10590_v54, 16  ;;  %v10592_v54 = vld [vmem:[%s11878_s8 + $0x68] sm:$0x1] }
 0x1ef   : > { %v4080_v22 = vsel %vm12233_vm5, %v10689_v27, %v4079_v11  ;;  %v3500_v31 = vrot.slane %v3498_v4, 5  ;;  %v3508_v27 = vshll.u32 %v10592_v54, 16  ;;  %v10674_v4 = vld [vmem:[%s11878_s8 + $0x60] sm:$0xe] }
 0x1f0   : > { %v3472_v6 = vrot.slane %v3471_v46, 4  ;;  %v3491_v46 = vrot.slane %v3489_v63, 4 }
 0x1f1   : > { %v1503_v62 = vpop.f32.mrf.mxu2 }
 0x1f2   : > { %v1818_v59 = vpop.f32.mrf.mxu3  ;;  %v1549_v47 = vadd.f32 %v1503_v62, %v12404_v15  ;;  %v3482_v15 = vrot.slane %v3481_v57, 4  ;;  %v3494_v57 = vrot.slane %v3492_v34, 5  ;;  %v4086_v34 = vrot.slane %v12932_v36, 5 }
 0x1f3   : > { %v2503_v18 = vpop.f32.mrf.mxu0 }
 0x1f4   : > { %v1864_v9 = vadd.f32 %v1818_v59, %v1549_v47  ;;  %v3477_v59 = vsel %vm11917_vm2, %v3472_v6, %v3476_v24  ;;  %v3487_v47 = vsel %vm11917_vm2, %v3482_v15, %v3486_v13  ;;  %v4181_v6 = vunpack.c.l.b16 %v4080_v22 }
 0x1f5   : > { %v3755_v24 = vunpack.c.l.b16 %v3477_v59  ;;  %v3756_v38 = vunpack.c.l.b16 %v3487_v47 }
 0x1f6   : > { %3203 = vmatmul.bf16.gmra.mxu2 %v11365_v10  ;;  %v12928_v58 = vadd.f32 %v2500_v37, %v1864_v9  ;;  %4311 = vmatmul.bf16.gmra.mxu0 %v4207_v8  ;;  %v3502_v37 = vshrl.u32 %v12932_v36, 16  ;;  %v4083_v8 = vsel %vm12233_vm5, %v4081_v45, %v4082_v20  ;;  %v11366_v20 = vld [vmem:[%s11878_s8 + $0x54] sm:$0xff] }
 0x1f7   : > { %3885 = vmatmul.bf16.gmra.mxu3 %v3781_v32  ;;  %v4182_v15 = vunpack.c.l.b16 %v4083_v8  ;;  %v3782_v63 = vpack.c.b16 %v3756_v38, %v3755_v24  ;;  %v10690_v8 = vrot.slane %v10674_v4, 9 }
 0x1f8   : > { %v3504_v9 = vrot.slane %v3502_v37, 4 }
 0x1f9   : > { %v1506_v12 = vpop.f32.mrf.mxu2 }
 0x1fa   : > { %v1821_v21 = vpop.f32.mrf.mxu3  ;;  %v1550_v62 = vadd.f32 %v1506_v12, %v12424_v60  ;;  %v3505_v11 = vor.u32 %v3504_v9, %v3500_v31  ;;  %v10594_v9 = vld [vmem:[%s11878_s8 + $0x70] sm:$0xf] }
 0x1fb   : > { %v2505_v32 = vpop.f32.mrf.mxu0 }
 0x1fc   : > { %v1865_v10 = vadd.f32 %v1821_v21, %v1550_v62  ;;  %v3495_v21 = vor.u32 %v3494_v57, %v3491_v46  ;;  %v3506_v47 = vrot.slane %v3505_v11, 4  ;;  %v4088_v46 = vrot.slane %v4086_v34, 4  ;;  %v10593_v57 = vld [vmem:[%s11878_s8 + $0x6c] sm:$0xf] }
 0x1fd   : > { %v3526_v11 = vshrl.u32 %v10594_v9, 16 }
 0x1fe   : > { %v12945_v60 = vadd.f32 %v2503_v18, %v1865_v10  ;;  %v4208_v18 = vpack.c.b16 %v4182_v15, %v4181_v6  ;;  %v3496_v59 = vrot.slane %v3495_v21, 4  ;;  %v3510_v10 = vrot.slane %v3508_v27, 5 }
 0x1ff   : > { %v3522_v21 = vshll.u32 %v10594_v9, 16 }
 0x200   : > { %15620 = vst [vmem:[#allocation17_spill] sm:$0xff] %v12945_v60  ;;  %v3501_v38 = vsel %vm11917_vm2, %v3496_v59, %v3500_v31  ;;  %v3511_v15 = vsel %vm11917_vm2, %v3506_v47, %v3510_v10  ;;  %v3528_v59 = vrot.slane %v3526_v11, 4  ;;  %v10595_v47 = vld [vmem:[%s11878_s8 + $0x74] sm:$0x1] }
 0x201   : > { %v1508_v13 = vpop.f32.mrf.mxu2  ;;  %v3757_v31 = vunpack.c.l.b16 %v3501_v38  ;;  %v3532_v38 = vshll.u32 %v10595_v47, 16 }
 0x202   : > { %v1823_v12 = vpop.f32.mrf.mxu3  ;;  %v1551_v45 = vadd.f32 %v1508_v13, %v12446_v43  ;;  %v4089_v43 = vrot.slane %v10592_v54, 5  ;;  %v3513_v54 = vshrl.u32 %v10593_v57, 16 }
 0x203   : > { %v2508_v62 = vpop.f32.mrf.mxu0 }
 0x204   : > { %v1866_v37 = vadd.f32 %v1823_v12, %v1551_v45  ;;  %v4090_v13 = vsel %vm12233_vm5, %v4088_v46, %v4089_v43  ;;  %v3516_v12 = vshll.u32 %v10593_v57, 16  ;;  %v3515_v4 = vrot.slane %v3513_v54, 4  ;;  %v11367_v43 = vld [vmem:[%s11878_s8 + $0x60] sm:$0xff] }
 0x206   : > { %3208 = vmatmul.bf16.gmra.mxu2 %v11366_v20  ;;  %v12952_v22 = vadd.f32 %v2505_v32, %v1866_v37  ;;  %4316 = vmatmul.bf16.gmra.mxu0 %v4208_v18  ;;  %v4087_v32 = vsel %vm12233_vm5, %v10690_v8, %v4086_v34  ;;  %v4184_v18 = vunpack.c.l.b16 %v4090_v13  ;;  %v3518_v37 = vrot.slane %v3516_v12, 5  ;;  %v10675_v13 = vld [vmem:[%s11878_s8 + $0x6c] sm:$0xe]  ;;  %v10596_v12 = vld [vmem:[%s11878_s8 + $0x78] sm:$0xf] }
 0x207   : > { %3890 = vmatmul.bf16.gmra.mxu3 %v3782_v63  ;;  %v4183_v63 = vunpack.c.l.b16 %v4087_v32  ;;  %v3524_v34 = vrot.slane %v3522_v21, 5  ;;  %v4093_v32 = vrot.slane %v10594_v9, 5  ;;  %v12975_v21 = vld [vmem:[%s11878_s8 + $0x7c] sm:$0xf] }
 0x208   : > { %15621 = vst [vmem:[#allocation18_spill] sm:$0xff] %v12952_v22  ;;  %v3546_v9 = vshll.u32 %v12975_v21, 16 }
 0x209   : > { %v1511_v24 = vpop.f32.mrf.mxu2 }
 0x20a   : > { %v1826_v36 = vpop.f32.mrf.mxu3  ;;  %v1552_v6 = vadd.f32 %v1511_v24, %v12460_v25  ;;  %v3758_v25 = vunpack.c.l.b16 %v3511_v15  ;;  %v4209_v24 = vpack.c.b16 %v4184_v18, %v4183_v63  ;;  %v4096_v63 = vrot.slane %v10595_v47, 5 }
 0x20b   : > { %v2510_v45 = vpop.f32.mrf.mxu0 }
 0x20c   : > { %v1867_v27 = vadd.f32 %v1826_v36, %v1552_v6  ;;  %v3783_v57 = vpack.c.b16 %v3758_v25, %v3757_v31  ;;  %v3529_v36 = vor.u32 %v3528_v59, %v3524_v34  ;;  %v10691_v31 = vrot.slane %v10675_v13, 9 }
 0x20d   : > { %v4095_v25 = vrot.slane %v4093_v32, 4  ;;  %v3540_v59 = vshll.u32 %v10596_v12, 16 }
 0x20e   : > { %v12965_v20 = vadd.f32 %v2508_v62, %v1867_v27  ;;  %v3519_v62 = vor.u32 %v3518_v37, %v3515_v4  ;;  %v3534_v27 = vrot.slane %v3532_v38, 5  ;;  %v3537_v37 = vshrl.u32 %v10596_v12, 16  ;;  %v10598_v12 = vld [vmem:[%s11878_s8 + $0x80] sm:$0x1] }
 0x20f   : > { %v4094_v47 = vsel %vm12233_vm5, %v10691_v31, %v4093_v32  ;;  %v3548_v38 = vrot.slane %v3546_v9, 5 }
 0x210   : > { %15622 = vst [vmem:[#allocation19_spill] sm:$0xff] %v12965_v20  ;;  %v3520_v11 = vrot.slane %v3519_v62, 4  ;;  %v3539_v62 = vrot.slane %v3537_v37, 4  ;;  %v11368_v37 = vld [vmem:[%s11878_s8 + $0x6c] sm:$0xff] }
 0x211   : > { %v1513_v10 = vpop.f32.mrf.mxu2 }
 0x212   : > { %v1828_v8 = vpop.f32.mrf.mxu3  ;;  %v1553_v46 = vadd.f32 %v1513_v10, %v12481_v7  ;;  %v3530_v7 = vrot.slane %v3529_v36, 4  ;;  %v3542_v36 = vrot.slane %v3540_v59, 5 }
 0x213   : > { %v2513_v15 = vpop.f32.mrf.mxu0 }
 0x214   : > { %v1868_v6 = vadd.f32 %v1828_v8, %v1553_v46  ;;  %v3525_v8 = vsel %vm11917_vm2, %v3520_v11, %v3524_v34  ;;  %v3535_v46 = vsel %vm11917_vm2, %v3530_v7, %v3534_v27  ;;  %v4185_v11 = vunpack.c.l.b16 %v4094_v47 }
 0x215   : > { %v3759_v13 = vunpack.c.l.b16 %v3525_v8  ;;  %v3760_v34 = vunpack.c.l.b16 %v3535_v46  ;;  %v3543_v32 = vor.u32 %v3542_v36, %v3539_v62 }
 0x216   : > { %3213 = vmatmul.bf16.gmra.mxu2 %v11367_v43  ;;  %v12971_v54 = vadd.f32 %v2510_v45, %v1868_v6  ;;  %4321 = vmatmul.bf16.gmra.mxu0 %v4209_v24  ;;  %v3550_v45 = vshrl.u32 %v12975_v21, 16  ;;  %v4097_v24 = vsel %vm12233_vm5, %v4095_v25, %v4096_v63  ;;  %v4704_v25 = vld [vmem:[#allocation2 + $0xc] sm:$0x1] }
 0x217   : > { %3895 = vmatmul.bf16.gmra.mxu3 %v3783_v57  ;;  %v4186_v7 = vunpack.c.l.b16 %v4097_v24  ;;  %v3784_v59 = vpack.c.b16 %v3760_v34, %v3759_v13  ;;  %v4705_v8 = vsel %vm12996_vm8, 0, %v4704_v25  ;;  %v10599_v13 = vld [vmem:[%s11878_s8 + $0x84] sm:$0xf]  ;;  %v13007_v34 = vld [vmem:[%s11878_s8 + $0x88] sm:$0xf] }
 0x218   : > { %15623 = vst [vmem:[#allocation20_spill] sm:$0xff] %v12971_v54  ;;  %v3552_v6 = vrot.slane %v3550_v45, 4  ;;  %v4760_v25 = vld [vmem:[#allocation2 + $0x14] sm:$0x1] }
 0x219   : > { %v1516_v18 = vpop.f32.mrf.mxu2  ;;  %v4210_v45 = vpack.c.b16 %v4186_v7, %v4185_v11  ;;  %4706 = vst [vmem:[#allocation2 + $0xc] sm:$0x1] %v4705_v8 }
 0x21a   : > { %v1831_v4 = vpop.f32.mrf.mxu3  ;;  %v1554_v10 = vadd.f32 %v1516_v18, %v12505_v52  ;;  %v3553_v31 = vor.u32 %v3552_v6, %v3548_v38  ;;  %v4103_v6 = vrot.slane %v10598_v12, 5 }
 0x21b   : > { %v2515_v57 = vpop.f32.mrf.mxu0 }
 0x21c   : > { %v1869_v43 = vadd.f32 %v1831_v4, %v1554_v10  ;;  %v3556_v4 = vshll.u32 %v10598_v12, 16  ;;  %v10676_v10 = vld [vmem:[%s11878_s8 + $0x78] sm:$0xe]  ;;  %v3554_v47 = vrot.slane %v3553_v31, 4 }
 0x21d   : > { %v10692_v62 = vrot.slane %v10676_v10, 9 }
 0x21e   : > { %v12988_v52 = vadd.f32 %v2513_v15, %v1869_v43  ;;  %v4100_v15 = vrot.slane %v12975_v21, 5  ;;  %v3558_v24 = vrot.slane %v3556_v4, 5 }
 0x220   : > { %15624 = vst [vmem:[#allocation21_spill] sm:$0xff] %v12988_v52  ;;  %v4102_v36 = vrot.slane %v4100_v15, 4 }
 0x221   : > { %v1518_v27 = vpop.f32.mrf.mxu2 }
 0x222   : > { %v1833_v18 = vpop.f32.mrf.mxu3  ;;  %v1555_v63 = vadd.f32 %v1518_v27, %v12521_v29  ;;  %v3544_v29 = vrot.slane %v3543_v32, 4  ;;  %v15628_v32 = vld [vmem:[#allocation12_spill] sm:$0xff]  ;;  %v4104_v12 = vsel %vm12233_vm5, %v4102_v36, %v4103_v6 }
 0x223   : > { %v2518_v43 = vpop.f32.mrf.mxu0 }
 0x224   : > { %v1870_v46 = vadd.f32 %v1833_v18, %v1555_v63  ;;  %v3549_v27 = vsel %vm11917_vm2, %v3544_v29, %v3548_v38  ;;  %v3559_v18 = vsel %vm11917_vm2, %v3554_v47, %v3558_v24  ;;  %v3561_v63 = vshrl.u32 %v10599_v13, 16 }
 0x225   : > { %v4761_v38 = vsel %vm13020_vm10, 0, %v4760_v25  ;;  %v3761_v8 = vunpack.c.l.b16 %v3549_v27  ;;  %v3762_v29 = vunpack.c.l.b16 %v3559_v18  ;;  %v4188_v24 = vunpack.c.l.b16 %v4104_v12 }
 0x226   : > { %3218 = vmatmul.bf16.gmra.mxu2 %v11368_v37  ;;  %v13003_v21 = vadd.f32 %v2515_v57, %v1870_v46  ;;  %4326 = vmatmul.bf16.gmra.mxu0 %v4210_v45  ;;  %v4101_v57 = vsel %vm12233_vm5, %v10692_v62, %v4100_v15  ;;  %v3564_v37 = vshll.u32 %v10599_v13, 16  ;;  %v3574_v15 = vshrl.u32 %v13007_v34, 16  ;;  %4762 = vst [vmem:[#allocation2 + $0x14] sm:$0x1] %v4761_v38 }
 0x227   : > { %3900 = vmatmul.bf16.gmra.mxu3 %v3784_v59  ;;  %v3570_v59 = vshll.u32 %v13007_v34, 16  ;;  %v4187_v47 = vunpack.c.l.b16 %v4101_v57  ;;  %v3563_v62 = vrot.slane %v3561_v63, 4 }
 0x228   : > { %15627 = vst [vmem:[#allocation22_spill] sm:$0xff] %v13003_v21  ;;  %v3566_v36 = vrot.slane %v3564_v37, 5  ;;  %v15632_v21 = vld [vmem:[#allocation13_spill] sm:$0xff] }
 0x229   : > { %v1521_v11 = vpop.f32.mrf.mxu2  ;;  %v3572_v6 = vrot.slane %v3570_v59, 5  ;;  %v4211_v27 = vpack.c.b16 %v4188_v24, %v4187_v47  ;;  %v4107_v59 = vrot.slane %v13007_v34, 5 }
 0x22a   : > { %v1836_v7 = vpop.f32.mrf.mxu3  ;;  %v1556_v31 = vadd.f32 %v1521_v11, %v15628_v32  ;;  %v3576_v11 = vrot.slane %v3574_v15, 4  ;;  %v10601_v32 = vld [vmem:[%s11878_s8 + $0x8c] sm:$0x1]  ;;  %v3567_v38 = vor.u32 %v3566_v36, %v3563_v62  ;;  %v10677_v15 = vld [vmem:[%s11878_s8 + $0x84] sm:$0xe] }
 0x22b   : > { %v2520_v10 = vpop.f32.mrf.mxu0  ;;  %v3580_v57 = vshll.u32 %v10601_v32, 16  ;;  %v10693_v62 = vrot.slane %v10677_v15, 9  ;;  %v4109_v36 = vrot.slane %v4107_v59, 4 }
 0x22c   : > { %v1871_v45 = vadd.f32 %v1836_v7, %v1556_v31  ;;  %v11369_v7 = vld [vmem:[%s11878_s8 + $0x78] sm:$0xff]  ;;  %v3785_v31 = vpack.c.b16 %v3762_v29, %v3761_v8  ;;  %v3577_v18 = vor.u32 %v3576_v11, %v3572_v6  ;;  %v13041_v8 = vld [vmem:[%s11878_s8 + $0x94] sm:$0xf]  ;;  %v3568_v29 = vrot.slane %v3567_v38, 4 }
 0x22d   : > { %v3582_v24 = vrot.slane %v3580_v57, 5  ;;  %v4110_v11 = vrot.slane %v10601_v32, 5 }
 0x22e   : > { %v13028_v46 = vadd.f32 %v2518_v43, %v1871_v45  ;;  %v4707_v43 = vld [vmem:[#allocation2 + $0x18] sm:$0x1]  ;;  %v10602_v45 = vld [vmem:[%s11878_s8 + $0x90] sm:$0xf]  ;;  %v3578_v47 = vrot.slane %v3577_v18, 4 }
 0x22f   : > { %v4708_v12 = vsel %vm12996_vm8, 0, %v4707_v43  ;;  %v3588_v34 = vshll.u32 %v10602_v45, 16  ;;  %v3594_v43 = vshll.u32 %v13041_v8, 16  ;;  %v4111_v15 = vsel %vm12233_vm5, %v4109_v36, %v4110_v11  ;;  %v11370_v11 = vld [vmem:[%s11878_s8 + $0x84] sm:$0xff] }
 0x230   : > { %15631 = vst [vmem:[#allocation12_spill] sm:$0xff] %v13028_v46  ;;  %v3583_v38 = vsel %vm11917_vm2, %v3578_v47, %v3582_v24 }
 0x231   : > { %v1523_v13 = vpop.f32.mrf.mxu2  ;;  %4709 = vst [vmem:[#allocation2 + $0x18] sm:$0x1] %v4708_v12  ;;  %v4763_v12 = vld [vmem:[#allocation2 + $0x20] sm:$0x1]  ;;  %v3764_v24 = vunpack.c.l.b16 %v3583_v38 }
 0x232   : > { %v1838_v25 = vpop.f32.mrf.mxu3  ;;  %v1557_v52 = vadd.f32 %v1523_v13, %v15632_v21  ;;  %v4764_v32 = vsel %vm13020_vm10, 0, %v4763_v12  ;;  %v10604_v12 = vld [vmem:[%s11878_s8 + $0x98] sm:$0x1] }
 0x233   : > { %v4292_v37 = vpop.f32.mrf.mxu0  ;;  %4765 = vst [vmem:[#allocation2 + $0x20] sm:$0x1] %v4764_v32  ;;  %v3604_v54 = vshll.u32 %v10604_v12, 16 }
 0x234   : > { %v1872_v63 = vadd.f32 %v1838_v25, %v1557_v52  ;;  %v3585_v25 = vshrl.u32 %v10602_v45, 16 }
 0x236   : > { %3223 = vmatmul.bf16.gmra.mxu2 %v11369_v7  ;;  %v13037_v21 = vadd.f32 %v2520_v10, %v1872_v63  ;;  %4331 = vmatmul.bf16.gmra.mxu0 %v4211_v27  ;;  %v3598_v7 = vshrl.u32 %v13041_v8, 16  ;;  %v15634_v10 = vld [vmem:[#allocation14_spill] sm:$0xff]  ;;  %v3573_v27 = vsel %vm11917_vm2, %v3568_v29, %v3572_v6  ;;  %v4108_v63 = vsel %vm12233_vm5, %v10693_v62, %v4107_v59 }
 0x237   : > { %3905 = vmatmul.bf16.gmra.mxu3 %v3785_v31  ;;  %v3587_v45 = vrot.slane %v3585_v25, 4  ;;  %v3763_v47 = vunpack.c.l.b16 %v3573_v27 }
 0x238   : > { %15633 = vst [vmem:[#allocation13_spill] sm:$0xff] %v13037_v21  ;;  %v3600_v6 = vrot.slane %v3598_v7, 4  ;;  %v10678_v7 = vld [vmem:[%s11878_s8 + $0x90] sm:$0xe] }
 0x239   : > { %v3184_v52 = vpop.f32.mrf.mxu2  ;;  %v3786_v25 = vpack.c.b16 %v3764_v24, %v3763_v47 }
 0x23a   : > { %v3866_v13 = vpop.f32.mrf.mxu3  ;;  %v3264_v31 = vadd.f32 %v3184_v52, %v15634_v10  ;;  %v3590_v52 = vrot.slane %v3588_v34, 5  ;;  %v3596_v10 = vrot.slane %v3594_v43, 5  ;;  %v4114_v34 = vrot.slane %v13041_v8, 5  ;;  %v4710_v43 = vld [vmem:[#allocation2 + $0x24] sm:$0x1] }
 0x23b   : > { %v4294_v57 = vpop.f32.mrf.mxu0  ;;  %v4711_v27 = vsel %vm12996_vm8, 0, %v4710_v43  ;;  %v4117_v8 = vrot.slane %v10604_v12, 5 }
 0x23c   : > { %v3946_v18 = vadd.f32 %v3866_v13, %v3264_v31  ;;  %v4189_v13 = vunpack.c.l.b16 %v4108_v63  ;;  %v4190_v31 = vunpack.c.l.b16 %v4111_v15  ;;  %v3591_v59 = vor.u32 %v3590_v52, %v3587_v45  ;;  %4712 = vst [vmem:[#allocation2 + $0x24] sm:$0x1] %v4711_v27  ;;  %v10605_v52 = vld [vmem:[%s11878_s8 + $0x9c] sm:$0xf] }
 0x23d   : > { %v3601_v62 = vor.u32 %v3600_v6, %v3596_v10  ;;  %v3606_v15 = vrot.slane %v3604_v54, 5  ;;  %v13069_v6 = vld [vmem:[%s11878_s8 + $0xa0] sm:$0xf] }
 0x23e   : > { %v13056_v29 = vadd.f32 %v4292_v37, %v3946_v18  ;;  %v4212_v37 = vpack.c.b16 %v4190_v31, %v4189_v13  ;;  %v3592_v18 = vrot.slane %v3591_v59, 4  ;;  %v15636_v54 = vld [vmem:[#allocation15_spill] sm:$0xff]  ;;  %v4766_v59 = vld [vmem:[#allocation2 + $0x2c] sm:$0x1] }
 0x23f   : > { %v3602_v63 = vrot.slane %v3601_v62, 4  ;;  %v3609_v62 = vshrl.u32 %v10605_v52, 16 }
 0x241   : > { %v3186_v21 = vpop.f32.mrf.mxu2  ;;  %v3607_v13 = vsel %vm11917_vm2, %v3602_v63, %v3606_v15  ;;  %v3611_v63 = vrot.slane %v3609_v62, 4 }
 0x242   : > { %v3868_v46 = vpop.f32.mrf.mxu3  ;;  %v3265_v36 = vadd.f32 %v3186_v21, %v12601_v33  ;;  %v10694_v33 = vrot.slane %v10678_v7, 9  ;;  %v4116_v21 = vrot.slane %v4114_v34, 4  ;;  %v3766_v27 = vunpack.c.l.b16 %v3607_v13 }
 0x243   : > { %v4297_v32 = vpop.f32.mrf.mxu0 }
 0x244   : > { %v3947_v38 = vadd.f32 %v3868_v46, %v3265_v36  ;;  %v3597_v46 = vsel %vm11917_vm2, %v3592_v18, %v3596_v10  ;;  %v4115_v31 = vsel %vm12233_vm5, %v10694_v33, %v4114_v34  ;;  %v4118_v12 = vsel %vm12233_vm5, %v4116_v21, %v4117_v8  ;;  %v10607_v8 = vld [vmem:[%s11878_s8 + $0xa4] sm:$0x1] }
 0x245   : > { %v4767_v36 = vsel %vm13020_vm10, 0, %v4766_v59  ;;  %v3618_v10 = vshll.u32 %v13069_v6, 16  ;;  %v3765_v7 = vunpack.c.l.b16 %v3597_v46  ;;  %v4192_v18 = vunpack.c.l.b16 %v4118_v12 }
 0x246   : > { %v13065_v45 = vadd.f32 %v4294_v57, %v3947_v38  ;;  %3228 = vmatmul.bf16.gmra.mxu2 %v11370_v11  ;;  %4336 = vmatmul.bf16.gmra.mxu0 %v4212_v37  ;;  %v3612_v11 = vshll.u32 %v10605_v52, 16  ;;  %4768 = vst [vmem:[#allocation2 + $0x2c] sm:$0x1] %v4767_v36  ;;  %v4191_v38 = vunpack.c.l.b16 %v4115_v31  ;;  %v3628_v31 = vshll.u32 %v10607_v8, 16 }
 0x247   : > { %3910 = vmatmul.bf16.gmra.mxu3 %v3786_v25  ;;  %v3622_v25 = vshrl.u32 %v13069_v6, 16  ;;  %v3620_v33 = vrot.slane %v3618_v10, 5  ;;  %v10679_v10 = vld [vmem:[%s11878_s8 + $0x9c] sm:$0xe] }
 0x248   : > { %15635 = vst [vmem:[#allocation14_spill] sm:$0xff] %v13065_v45  ;;  %v3614_v15 = vrot.slane %v3612_v11, 5  ;;  %v4213_v46 = vpack.c.b16 %v4192_v18, %v4191_v38  ;;  %v4121_v11 = vrot.slane %v13069_v6, 5  ;;  %v3630_v38 = vrot.slane %v3628_v31, 5 }
 0x249   : > { %v3189_v47 = vpop.f32.mrf.mxu2  ;;  %v3624_v21 = vrot.slane %v3622_v25, 4  ;;  %v10695_v18 = vrot.slane %v10679_v10, 9 }
 0x24a   : > { %v3871_v24 = vpop.f32.mrf.mxu3  ;;  %v3266_v57 = vadd.f32 %v3189_v47, %v15636_v54  ;;  %v3615_v59 = vor.u32 %v3614_v15, %v3611_v63  ;;  %v4123_v63 = vrot.slane %v4121_v11, 4  ;;  %v4124_v15 = vrot.slane %v10607_v8, 5 }
 0x24b   : > { %v4299_v37 = vpop.f32.mrf.mxu0  ;;  %v3625_v13 = vor.u32 %v3624_v21, %v3620_v33 }
 0x24c   : > { %v3948_v43 = vadd.f32 %v3871_v24, %v3266_v57  ;;  %v11371_v24 = vld [vmem:[%s11878_s8 + $0x90] sm:$0xff]  ;;  %v3787_v57 = vpack.c.b16 %v3766_v27, %v3765_v7  ;;  %v3616_v7 = vrot.slane %v3615_v59, 4 }
 0x24d   : > { %v3626_v27 = vrot.slane %v3625_v13, 4 }
 0x24e   : > { %v13084_v34 = vadd.f32 %v4297_v32, %v3948_v43  ;;  %v4713_v32 = vld [vmem:[#allocation2 + $0x30] sm:$0x1]  ;;  %v13097_v43 = vld [vmem:[%s11878_s8 + $0xac] sm:$0xf] }
 0x24f   : > { %v4714_v12 = vsel %vm12996_vm8, 0, %v4713_v32  ;;  %v11432_v32 = vld [vmem:[#allocation4 + $0x78] sm:$0xff]  ;;  %v3631_v59 = vsel %vm11917_vm2, %v3626_v27, %v3630_v38 }
 0x250   : > { %4715 = vst [vmem:[#allocation2 + $0x30] sm:$0x1] %v4714_v12  ;;  %v4122_v12 = vsel %vm12233_vm5, %v10695_v18, %v4121_v11  ;;  %5857 = vmatpush.bf16.msra.mxu1 %v11432_v32  ;;  %v3768_v38 = vunpack.c.l.b16 %v3631_v59 }
 0x251   : > { %v3191_v52 = vpop.f32.mrf.mxu2 }
 0x252   : > { %v3873_v47 = vpop.f32.mrf.mxu3  ;;  %v3267_v54 = vadd.f32 %v3191_v52, %v12635_v55  ;;  %v10608_v55 = vld [vmem:[%s11878_s8 + $0xa8] sm:$0xf] }
 0x253   : > { %v4302_v36 = vpop.f32.mrf.mxu0  ;;  %v3636_v6 = vshll.u32 %v10608_v55, 16 }
 0x254   : > { %v3949_v62 = vadd.f32 %v3873_v47, %v3267_v54  ;;  %v3633_v47 = vshrl.u32 %v10608_v55, 16  ;;  %v3642_v54 = vshll.u32 %v13097_v43, 16 }
 0x256   : > { %v13093_v25 = vadd.f32 %v4299_v37, %v3949_v62  ;;  %3233 = vmatmul.bf16.gmra.mxu2 %v11371_v24  ;;  %4341 = vmatmul.bf16.gmra.mxu0 %v4213_v46  ;;  %v3646_v37 = vshrl.u32 %v13097_v43, 16  ;;  %v3621_v46 = vsel %vm11917_vm2, %v3616_v7, %v3620_v33  ;;  %v3635_v62 = vrot.slane %v3633_v47, 4  ;;  %v11372_v47 = vld [vmem:[%s11878_s8 + $0x9c] sm:$0xff] }
 0x257   : > { %3915 = vmatmul.bf16.gmra.mxu3 %v3787_v57  ;;  %v4769_v57 = vld [vmem:[#allocation2 + $0x38] sm:$0x1]  ;;  %v3638_v33 = vrot.slane %v3636_v6, 5  ;;  %v3644_v10 = vrot.slane %v3642_v54, 5  ;;  %v3767_v27 = vunpack.c.l.b16 %v3621_v46  ;;  %v4128_v6 = vrot.slane %v13097_v43, 5 }
 0x258   : > { %15637 = vst [vmem:[#allocation15_spill] sm:$0xff] %v13093_v25  ;;  %v4770_v8 = vsel %vm13020_vm10, 0, %v4769_v57  ;;  %v3648_v55 = vrot.slane %v3646_v37, 4  ;;  %v4716_v54 = vld [vmem:[#allocation2 + $0x3c] sm:$0x1] }
 0x259   : > { %v3194_v21 = vpop.f32.mrf.mxu2  ;;  %4771 = vst [vmem:[#allocation2 + $0x38] sm:$0x1] %v4770_v8  ;;  %v3639_v18 = vor.u32 %v3638_v33, %v3635_v62  ;;  %v3788_v32 = vpack.c.b16 %v3768_v38, %v3767_v27  ;;  %v10680_v37 = vld [vmem:[%s11878_s8 + $0xa8] sm:$0xe]  ;;  %v4717_v46 = vsel %vm12996_vm8, 0, %v4716_v54  ;;  %v4130_v43 = vrot.slane %v4128_v6, 4 }
 0x25a   : > { %v3876_v52 = vpop.f32.mrf.mxu3  ;;  %v3268_v24 = vadd.f32 %v3194_v21, %v12658_v19  ;;  %v4125_v19 = vsel %vm12233_vm5, %v4123_v63, %v4124_v15  ;;  %v10610_v21 = vld [vmem:[%s11878_s8 + $0xb0] sm:$0x1]  ;;  %v3649_v20 = vor.u32 %v3648_v55, %v3644_v10  ;;  %4718 = vst [vmem:[#allocation2 + $0x3c] sm:$0x1] %v4717_v46  ;;  %v10611_v55 = vld [vmem:[%s11878_s8 + $0xb4] sm:$0xf] }
 0x25b   : > { %v4304_v31 = vpop.f32.mrf.mxu0  ;;  %v3652_v63 = vshll.u32 %v10610_v21, 16  ;;  %v4131_v33 = vrot.slane %v10610_v21, 5  ;;  %v13125_v27 = vld [vmem:[%s11878_s8 + $0xb8] sm:$0xf] }
 0x25c   : > { %v3950_v13 = vadd.f32 %v3876_v52, %v3268_v24  ;;  %v4193_v52 = vunpack.c.l.b16 %v4122_v12  ;;  %v4194_v24 = vunpack.c.l.b16 %v4125_v19  ;;  %v3650_v12 = vrot.slane %v3649_v20, 4 }
 0x25d   : > { %v3654_v19 = vrot.slane %v3652_v63, 5  ;;  %v4132_v21 = vsel %vm12233_vm5, %v4130_v43, %v4131_v33 }
 0x25e   : > { %v13112_v7 = vadd.f32 %v4302_v36, %v3950_v13  ;;  %v4214_v36 = vpack.c.b16 %v4194_v24, %v4193_v52  ;;  %v3640_v13 = vrot.slane %v3639_v18, 4  ;;  %v3657_v18 = vshrl.u32 %v10611_v55, 16 }
 0x25f   : > { %v3655_v20 = vsel %vm11917_vm2, %v3650_v12, %v3654_v19  ;;  %v4196_v46 = vunpack.c.l.b16 %v4132_v21 }
 0x260   : > { %v3645_v24 = vsel %vm11917_vm2, %v3640_v13, %v3644_v10  ;;  %v3666_v10 = vshll.u32 %v13125_v27, 16 }
 0x261   : > { %v3196_v57 = vpop.f32.mrf.mxu2  ;;  %v3769_v54 = vunpack.c.l.b16 %v3645_v24 }
 0x262   : > { %v3878_v11 = vpop.f32.mrf.mxu3  ;;  %v3269_v15 = vadd.f32 %v3196_v57, %v12672_v53  ;;  %v10696_v53 = vrot.slane %v10680_v37, 9  ;;  %v3668_v12 = vrot.slane %v3666_v10, 5 }
 0x263   : > { %v4307_v8 = vpop.f32.mrf.mxu0 }
 0x264   : > { %v3951_v59 = vadd.f32 %v3878_v11, %v3269_v15  ;;  %v4129_v57 = vsel %vm12233_vm5, %v10696_v53, %v4128_v6  ;;  %v4772_v11 = vld [vmem:[#allocation2 + $0x44] sm:$0x1]  ;;  %v3660_v15 = vshll.u32 %v10611_v55, 16  ;;  %v10613_v53 = vld [vmem:[%s11878_s8 + $0xbc] sm:$0x1] }
 0x265   : > { %v4773_v63 = vsel %vm13020_vm10, 0, %v4772_v11  ;;  %v4195_v37 = vunpack.c.l.b16 %v4129_v57  ;;  %v3676_v57 = vshll.u32 %v10613_v53, 16 }
 0x266   : > { %v13121_v62 = vadd.f32 %v4304_v31, %v3951_v59  ;;  %3238 = vmatmul.bf16.gmra.mxu2 %v11372_v47  ;;  %4346 = vmatmul.bf16.gmra.mxu0 %v4214_v36  ;;  %v3670_v47 = vshrl.u32 %v13125_v27, 16  ;;  %4774 = vst [vmem:[#allocation2 + $0x44] sm:$0x1] %v4773_v63  ;;  %v3770_v36 = vunpack.c.l.b16 %v3655_v20  ;;  %v3659_v59 = vrot.slane %v3657_v18, 4 }
 0x267   : > { %3920 = vmatmul.bf16.gmra.mxu3 %v3788_v32  ;;  %v3662_v13 = vrot.slane %v3660_v15, 5  ;;  %v4215_v24 = vpack.c.b16 %v4196_v46, %v4195_v37  ;;  %v4135_v63 = vrot.slane %v13125_v27, 5  ;;  %v10681_v15 = vld [vmem:[%s11878_s8 + $0xb4] sm:$0xe] }
 0x268   : > { %v3672_v19 = vrot.slane %v3670_v47, 4  ;;  %v13153_v47 = vld [vmem:[%s11878_s8 + $0xc4] sm:$0xf]  ;;  %v10697_v37 = vrot.slane %v10681_v15, 9 }
 0x269   : > { %v3199_v38 = vpop.f32.mrf.mxu2  ;;  %v4137_v46 = vrot.slane %v4135_v63, 4 }
 0x26a   : > { %v3881_v52 = vpop.f32.mrf.mxu3  ;;  %v3270_v31 = vadd.f32 %v3199_v38, %v12692_v30  ;;  %v11373_v38 = vld [vmem:[%s11878_s8 + $0xa8] sm:$0xff]  ;;  %v3673_v20 = vor.u32 %v3672_v19, %v3668_v12 }
 0x26b   : > { %v4309_v30 = vpop.f32.mrf.mxu0 }
 0x26c   : > { %v3952_v32 = vadd.f32 %v3881_v52, %v3270_v31  ;;  %v3789_v52 = vpack.c.b16 %v3770_v36, %v3769_v54  ;;  %v3663_v31 = vor.u32 %v3662_v13, %v3659_v59  ;;  %v3674_v54 = vrot.slane %v3673_v20, 4 }
 0x26d   : > { %v3678_v36 = vrot.slane %v3676_v57, 5  ;;  %v4138_v59 = vrot.slane %v10613_v53, 5  ;;  %v4136_v57 = vsel %vm12233_vm5, %v10697_v37, %v4135_v63 }
 0x26e   : > { %v13140_v6 = vadd.f32 %v4307_v8, %v3952_v32  ;;  %v4719_v8 = vld [vmem:[#allocation2 + $0x48] sm:$0x1]  ;;  %v3664_v32 = vrot.slane %v3663_v31, 4 }
 0x26f   : > { %v4720_v21 = vsel %vm12996_vm8, 0, %v4719_v8  ;;  %v3679_v8 = vsel %vm11917_vm2, %v3674_v54, %v3678_v36  ;;  %v10616_v36 = vld [vmem:[%s11878_s8 + $0xc8] sm:$0x1] }
 0x270   : > { %4721 = vst [vmem:[#allocation2 + $0x48] sm:$0x1] %v4720_v21  ;;  %v3772_v54 = vunpack.c.l.b16 %v3679_v8 }
 0x271   : > { %v3201_v43 = vpop.f32.mrf.mxu2 }
 0x272   : > { %v3883_v33 = vpop.f32.mrf.mxu3  ;;  %v3271_v55 = vadd.f32 %v3201_v43, %v12706_v28  ;;  %v10614_v28 = vld [vmem:[%s11878_s8 + $0xc0] sm:$0xf] }
 0x273   : > { %v4312_v18 = vpop.f32.mrf.mxu0  ;;  %v3681_v43 = vshrl.u32 %v10614_v28, 16  ;;  %v3684_v27 = vshll.u32 %v10614_v28, 16 }
 0x274   : > { %v3953_v11 = vadd.f32 %v3883_v33, %v3271_v55  ;;  %v3690_v33 = vshll.u32 %v13153_v47, 16 }
 0x275   : > { %v3686_v21 = vrot.slane %v3684_v27, 5  ;;  %v4142_v27 = vrot.slane %v13153_v47, 5 }
 0x276   : > { %v13149_v10 = vadd.f32 %v4309_v30, %v3953_v11  ;;  %3243 = vmatmul.bf16.gmra.mxu2 %v11373_v38  ;;  %4351 = vmatmul.bf16.gmra.mxu0 %v4215_v24  ;;  %v3694_v30 = vshrl.u32 %v13153_v47, 16  ;;  %v4775_v38 = vld [vmem:[#allocation2 + $0x50] sm:$0x1]  ;;  %v3669_v24 = vsel %vm11917_vm2, %v3664_v32, %v3668_v12  ;;  %v3683_v12 = vrot.slane %v3681_v43, 4  ;;  %v10617_v47 = vld [vmem:[%s11878_s8 + $0xcc] sm:$0xf] }
 0x277   : > { %3925 = vmatmul.bf16.gmra.mxu3 %v3789_v52  ;;  %v11431_v52 = vld [vmem:[#allocation4 + $0x70] sm:$0xff]  ;;  %v4776_v53 = vsel %vm13020_vm10, 0, %v4775_v38  ;;  %v3692_v11 = vrot.slane %v3690_v33, 5  ;;  %v3771_v32 = vunpack.c.l.b16 %v3669_v24  ;;  %v11374_v38 = vld [vmem:[%s11878_s8 + $0xb4] sm:$0xff] }
 0x278   : > { %4777 = vst [vmem:[#allocation2 + $0x50] sm:$0x1] %v4776_v53  ;;  %5858 = vmatpush.bf16.msra.mxu1 %v11431_v52  ;;  %v3696_v15 = vrot.slane %v3694_v30, 4  ;;  %v3687_v37 = vor.u32 %v3686_v21, %v3683_v12  ;;  %v10682_v30 = vld [vmem:[%s11878_s8 + $0xc0] sm:$0xe]  ;;  %v4145_v12 = vrot.slane %v10616_v36, 5 }
 0x279   : > { %v3204_v13 = vpop.f32.mrf.mxu2  ;;  %v3790_v43 = vpack.c.b16 %v3772_v54, %v3771_v32  ;;  %v10618_v21 = vld [vmem:[%s11878_s8 + $0xd0] sm:$0xf] }
 0x27a   : > { %v3886_v19 = vpop.f32.mrf.mxu3  ;;  %v3272_v55 = vadd.f32 %v3204_v13, %v12731_v41  ;;  %v4139_v41 = vsel %vm12233_vm5, %v4137_v46, %v4138_v59  ;;  %v4197_v13 = vunpack.c.l.b16 %v4136_v57  ;;  %v3697_v46 = vor.u32 %v3696_v15, %v3692_v11 }
 0x27b   : > { %v13164_v20 = vpop.f32.mrf.mxu0  ;;  %v3700_v59 = vshll.u32 %v10616_v36, 16  ;;  %v3688_v8 = vrot.slane %v3687_v37, 4  ;;  %v10698_v57 = vrot.slane %v10682_v30, 9  ;;  %v4778_v36 = vld [vmem:[#allocation2 + $0x5c] sm:$0x1] }
 0x27c   : > { %v3954_v31 = vadd.f32 %v3886_v19, %v3272_v55  ;;  %v4198_v19 = vunpack.c.l.b16 %v4139_v41  ;;  %v3698_v53 = vrot.slane %v3697_v46, 4  ;;  %v4144_v41 = vrot.slane %v4142_v27, 4 }
 0x27d   : > { %v3693_v54 = vsel %vm11917_vm2, %v3688_v8, %v3692_v11  ;;  %v4143_v37 = vsel %vm12233_vm5, %v10698_v57, %v4142_v27  ;;  %v3718_v11 = vshrl.u32 %v10618_v21, 16 }
 0x27e   : > { %v13170_v28 = vadd.f32 %v4312_v18, %v3954_v31  ;;  %v4722_v18 = vld [vmem:[#allocation2 + $0x54] sm:$0x1]  ;;  %v4216_v33 = vpack.c.b16 %v4198_v19, %v4197_v13  ;;  %v3702_v31 = vrot.slane %v3700_v59, 5  ;;  %v4146_v46 = vsel %vm12233_vm5, %v4144_v41, %v4145_v12 }
 0x27f   : > { %v4723_v52 = vsel %vm12996_vm8, 0, %v4722_v18  ;;  %v3705_v59 = vshrl.u32 %v10617_v47, 16  ;;  %v3714_v18 = vshll.u32 %v10618_v21, 16  ;;  %v4199_v8 = vunpack.c.l.b16 %v4143_v37 }
 0x280   : > { %4724 = vst [vmem:[#allocation2 + $0x54] sm:$0x1] %v4723_v52  ;;  %v3703_v13 = vsel %vm11917_vm2, %v3698_v53, %v3702_v31  ;;  %v4200_v53 = vunpack.c.l.b16 %v4146_v46  ;;  %v3720_v12 = vrot.slane %v3718_v11, 4  ;;  %v4149_v46 = vrot.slane %v10618_v21, 5 }
 0x281   : > { %v13173_v55 = vpop.f32.mrf.mxu2  ;;  %v3774_v27 = vunpack.c.l.b16 %v3703_v13  ;;  %v3707_v31 = vrot.slane %v3705_v59, 4  ;;  %v3716_v41 = vrot.slane %v3714_v18, 5  ;;  %v10683_v59 = vld [vmem:[%s11878_s8 + $0xcc] sm:$0xe] }
 0x282   : > { %v13175_v63 = vpop.f32.mrf.mxu3  ;;  %v4217_v22 = vpack.c.b16 %v4200_v53, %v4199_v8  ;;  %v10699_v60 = vrot.slane %v10683_v59, 9 }
 0x283   : > { %v4317_v24 = vpop.f32.mrf.mxu0 }
 0x286   : > { %3248 = vmatmul.bf16.gmra.mxu2 %v11374_v38  ;;  %4356 = vmatmul.bf16.gmra.mxu0 %v4216_v33  ;;  %v4779_v38 = vsel %vm13020_vm10, 0, %v4778_v36 }
 0x287   : > { %3930 = vmatmul.bf16.gmra.mxu3 %v3790_v43  ;;  %v3708_v43 = vshll.u32 %v10617_v47, 16  ;;  %4780 = vst [vmem:[#allocation2 + $0x5c] sm:$0x1] %v4779_v38  ;;  %v4725_v38 = vld [vmem:[#allocation2 + $0x60] sm:$0x1] }
 0x288   : > { %v4726_v13 = vsel %vm12996_vm8, 0, %v4725_v38 }
 0x289   : > { %v3209_v15 = vpop.f32.mrf.mxu2  ;;  %v3710_v57 = vrot.slane %v3708_v43, 5  ;;  %4727 = vst [vmem:[#allocation2 + $0x60] sm:$0x1] %v4726_v13 }
 0x28a   : > { %v3891_v32 = vpop.f32.mrf.mxu3  ;;  %v3274_v19 = vadd.f32 %v3209_v15, %v12767_v42  ;;  %v3773_v42 = vunpack.c.l.b16 %v3693_v54  ;;  %v10619_v15 = vld [vmem:[%s11878_s8 + $0xd4] sm:$0x1] }
 0x28b   : > { %v13195_v30 = vpop.f32.mrf.mxu0  ;;  %v3711_v54 = vor.u32 %v3710_v57, %v3707_v31  ;;  %v4781_v57 = vld [vmem:[#allocation2 + $0x68] sm:$0x1] }
 0x28c   : > { %v3956_v33 = vadd.f32 %v3891_v32, %v3274_v19  ;;  %v11375_v32 = vld [vmem:[%s11878_s8 + $0xc0] sm:$0xff]  ;;  %v3791_v19 = vpack.c.b16 %v3774_v27, %v3773_v42  ;;  %v4151_v42 = vrot.slane %v4149_v46, 4  ;;  %v4152_v27 = vrot.slane %v10619_v15, 5 }
 0x28d   : > { %v3712_v43 = vrot.slane %v3711_v54, 4 }
 0x28e   : > { %v13197_v52 = vadd.f32 %v4317_v24, %v3956_v33  ;;  %v3721_v24 = vor.u32 %v3720_v12, %v3716_v41  ;;  %v3724_v33 = vshll.u32 %v10619_v15, 16  ;;  %v11430_v12 = vld [vmem:[#allocation4 + $0x68] sm:$0xff]  ;;  %v4150_v15 = vsel %vm12233_vm5, %v10699_v60, %v4149_v46 }
 0x28f   : > { %v3717_v21 = vsel %vm11917_vm2, %v3712_v43, %v3716_v41  ;;  %5859 = vmatpush.bf16.msra.mxu1 %v11430_v12 }
 0x290   : > { %v3722_v18 = vrot.slane %v3721_v24, 4  ;;  %v3726_v11 = vrot.slane %v3724_v33, 5  ;;  %v3775_v41 = vunpack.c.l.b16 %v3717_v21  ;;  %v4201_v33 = vunpack.c.l.b16 %v4150_v15  ;;  %v4731_v15 = vld [vmem:[#allocation2 + $0x78] sm:$0x1] }
 0x291   : > { %v13200_v47 = vpop.f32.mrf.mxu2 }
 0x292   : > { %v13202_v36 = vpop.f32.mrf.mxu3 }
 0x293   : > { %v4322_v37 = vpop.f32.mrf.mxu0 }
 0x296   : > { %3253 = vmatmul.bf16.gmra.mxu2 %v11375_v32  ;;  %4361 = vmatmul.bf16.gmra.mxu0 %v4217_v22  ;;  %v3727_v32 = vsel %vm11917_vm2, %v3722_v18, %v3726_v11  ;;  %v4782_v22 = vsel %vm13020_vm10, 0, %v4781_v57  ;;  %v11376_v18 = vld [vmem:[%s11878_s8 + $0xcc] sm:$0xff]  ;;  %s9803_s8 = scalar_lea.sflag [#allocation6], %s232_s17 }
 0x297   : > { %3935 = vmatmul.bf16.gmra.mxu3 %v3791_v19  ;;  %4783 = vst [vmem:[#allocation2 + $0x68] sm:$0x1] %v4782_v22  ;;  %v3776_v24 = vunpack.c.l.b16 %v3727_v32 }
 0x299   : > { %v3214_v8 = vpop.f32.mrf.mxu2  ;;  %v3792_v11 = vpack.c.b16 %v3776_v24, %v3775_v41 }
 0x29a   : > { %v3896_v53 = vpop.f32.mrf.mxu3  ;;  %v3276_v31 = vadd.f32 %v3214_v8, %v12801_v16  ;;  %v4153_v16 = vsel %vm12233_vm5, %v4151_v42, %v4152_v27  ;;  %v4728_v8 = vld [vmem:[#allocation2 + $0x6c] sm:$0x1] }
 0x29b   : > { %v13215_v38 = vpop.f32.mrf.mxu0  ;;  %v4202_v13 = vunpack.c.l.b16 %v4153_v16  ;;  %v4729_v60 = vsel %vm12996_vm8, 0, %v4728_v8  ;;  %v4732_v16 = vsel %vm12996_vm8, 0, %v4731_v15 }
 0x29c   : > { %v3958_v19 = vadd.f32 %v3896_v53, %v3276_v31  ;;  %4730 = vst [vmem:[#allocation2 + $0x6c] sm:$0x1] %v4729_v60  ;;  %v4784_v31 = vld [vmem:[#allocation2 + $0x74] sm:$0x1] }
 0x29d   : > { %v4218_v53 = vpack.c.b16 %v4202_v13, %v4201_v33  ;;  %v4785_v57 = vsel %vm13020_vm10, 0, %v4784_v31  ;;  %4733 = vst [vmem:[#allocation2 + $0x78] sm:$0x1] %v4732_v16  ;;  %v4787_v13 = vld [vmem:[#allocation2 + $0x80] sm:$0x1]  ;;  %v13256_v31 = vpop.f32.mrf.mxu1 }
 0x29e   : > { %v13221_v54 = vadd.f32 %v4322_v37, %v3958_v19  ;;  %4786 = vst [vmem:[#allocation2 + $0x74] sm:$0x1] %v4785_v57  ;;  %v4790_v16 = vld [vmem:[#allocation2 + $0x8c] sm:$0x1] }
 0x2a1   : > { %v13223_v59 = vpop.f32.mrf.mxu2 }
 0x2a2   : > { %v13225_v43 = vpop.f32.mrf.mxu3 }
 0x2a3   : > { %v4327_v46 = vpop.f32.mrf.mxu0 }
 0x2a6   : > { %3258 = vmatmul.bf16.gmra.mxu2 %v11376_v18  ;;  %4366 = vmatmul.bf16.gmra.mxu0 %v4218_v53  ;;  %v11429_v18 = vld [vmem:[#allocation4 + $0x60] sm:$0xff] }
 0x2a7   : > { %3940 = vmatmul.bf16.gmra.mxu3 %v3792_v11  ;;  %v4788_v11 = vsel %vm13020_vm10, 0, %v4787_v13  ;;  %5860 = vmatpush.bf16.msra.mxu1 %v11429_v18 }
 0x2a8   : > { %4789 = vst [vmem:[#allocation2 + $0x80] sm:$0x1] %v4788_v11  ;;  %v13269_v11 = vpop.f32.mrf.mxu1 }
 0x2a9   : > { %v3219_v37 = vpop.f32.mrf.mxu2 }
 0x2aa   : > { %v3901_v42 = vpop.f32.mrf.mxu3  ;;  %v3278_v27 = vadd.f32 %v3219_v37, %v12826_v61 }
 0x2ab   : > { %v13233_v21 = vpop.f32.mrf.mxu0 }
 0x2ac   : > { %v3960_v12 = vadd.f32 %v3901_v42, %v3278_v27  ;;  %v4734_v42 = vld [vmem:[#allocation2 + $0x84] sm:$0x1] }
 0x2ae   : > { %v13235_v32 = vadd.f32 %v4327_v46, %v3960_v12 }
 0x2b1   : > { %v13237_v22 = vpop.f32.mrf.mxu2 }
 0x2b2   : > { %v13239_v19 = vpop.f32.mrf.mxu3 }
 0x2b3   : > { %v4332_v41 = vpop.f32.mrf.mxu0 }
 0x2b9   : > { %v3224_v61 = vpop.f32.mrf.mxu2 }
 0x2ba   : > { %v3906_v24 = vpop.f32.mrf.mxu3  ;;  %v3280_v33 = vadd.f32 %v3224_v61, %v12853_v0  ;;  %v4735_v0 = vsel %vm12996_vm8, 0, %v4734_v42 }
 0x2bb   : > { %v13246_v53 = vpop.f32.mrf.mxu0  ;;  %4736 = vst [vmem:[#allocation2 + $0x84] sm:$0x1] %v4735_v0 }
 0x2bc   : > { %v3962_v8 = vadd.f32 %v3906_v24, %v3280_v33 }
 0x2be   : > { %v13248_v60 = vadd.f32 %v4332_v41, %v3962_v8  ;;  %v4791_v41 = vsel %vm13020_vm10, 0, %v4790_v16  ;;  %v4737_v8 = vld [vmem:[#allocation2 + $0x90] sm:$0x1] }
 0x2bf   : > { %4792 = vst [vmem:[#allocation2 + $0x8c] sm:$0x1] %v4791_v41  ;;  %v11428_v16 = vld [vmem:[#allocation4 + $0x58] sm:$0xff]  ;;  %v13276_v41 = vpop.f32.mrf.mxu1 }
 0x2c0   : > { %5861 = vmatpush.bf16.msra.mxu1 %v11428_v16 }
 0x2c1   : > { %v13250_v46 = vpop.f32.mrf.mxu2 }
 0x2c2   : > { %v13252_v37 = vpop.f32.mrf.mxu3 }
 0x2c3   : > { %v4337_v27 = vpop.f32.mrf.mxu0 }
 0x2c9   : > { %v3229_v57 = vpop.f32.mrf.mxu2 }
 0x2ca   : > { %v3911_v12 = vpop.f32.mrf.mxu3  ;;  %v3282_v15 = vadd.f32 %v3229_v57, %v12876_v35  ;;  %v4738_v35 = vsel %vm12996_vm8, 0, %v4737_v8  ;;  %v4443_v8 = vmul.f32 %v13065_v45, %v13065_v45 }
 0x2cb   : > { %v13261_v24 = vpop.f32.mrf.mxu0  ;;  %4739 = vst [vmem:[#allocation2 + $0x90] sm:$0x1] %v4738_v35  ;;  %v4444_v35 = vmul.f32 %v13084_v34, %v13084_v34 }
 0x2cc   : > { %v3964_v61 = vadd.f32 %v3911_v12, %v3282_v15  ;;  %v4793_v15 = vld [vmem:[#allocation2 + $0x98] sm:$0x1] }
 0x2ce   : > { %v13263_v33 = vadd.f32 %v4337_v27, %v3964_v61  ;;  %v4794_v27 = vsel %vm13020_vm10, 0, %v4793_v15 }
 0x2cf   : > { %4795 = vst [vmem:[#allocation2 + $0x98] sm:$0x1] %v4794_v27  ;;  %v4445_v27 = vmul.f32 %v13093_v25, %v13093_v25 }
 0x2d0   : > { %15638 = vst [vmem:[#allocation23_spill] sm:$0xff] %v13263_v33 }
 0x2d1   : > { %v13265_v13 = vpop.f32.mrf.mxu2 }
 0x2d2   : > { %v13267_v18 = vpop.f32.mrf.mxu3 }
 0x2d3   : > { %v4342_v42 = vpop.f32.mrf.mxu0 }
 0x2d9   : > { %v3234_v0 = vpop.f32.mrf.mxu2 }
 0x2da   : > { %v3916_v57 = vpop.f32.mrf.mxu3  ;;  %v3284_v12 = vadd.f32 %v3234_v0, %v12903_v26  ;;  %v4442_v26 = vmul.f32 %v13056_v29, %v13056_v29 }
 0x2db   : > { %v13278_v39 = vpop.f32.mrf.mxu0 }
 0x2dc   : > { %v3966_v61 = vadd.f32 %v3916_v57, %v3284_v12  ;;  %15639 = vst [vmem:[#allocation24_spill] sm:$0xff] %v13278_v39  ;;  %v2958_v57 = vadd.f32 %v12725_v23, %v12743_v40  ;;  %v4740_v12 = vld [vmem:[#allocation2 + $0x9c] sm:$0x1]  ;;  %v4474_v16 = vadd.f32 %v4443_v8, %v4442_v26  ;;  %v4446_v23 = vmul.f32 %v13112_v7, %v13112_v7  ;;  %v13308_v8 = vpop.f32.mrf.mxu1 }
 0x2dd   : > { %v2960_v40 = vadd.f32 %v12760_v3, %v12776_v17  ;;  %v15642_v3 = vld [vmem:[#allocation16_spill] sm:$0xff] }
 0x2de   : > { %v13280_v1 = vadd.f32 %v4342_v42, %v3966_v61  ;;  %v4404_v42 = vadd.f32 %v13065_v45, %v13056_v29  ;;  %v4741_v61 = vsel %vm12996_vm8, 0, %v4740_v12  ;;  %v2962_v17 = vadd.f32 %v15642_v3, %v12807_v51 }
 0x2df   : > { %4742 = vst [vmem:[#allocation2 + $0x9c] sm:$0x1] %v4741_v61  ;;  %v3275_v12 = vadd.f32 %v13200_v47, %v2960_v40 }
 0x2e0   : > { %15640 = vst [vmem:[#allocation25_spill] sm:$0xff] %v13280_v1  ;;  %v3273_v1 = vadd.f32 %v13173_v55, %v2958_v57  ;;  %v4405_v33 = vadd.f32 %v4404_v42, %v13084_v34  ;;  %v4447_v55 = vmul.f32 %v13121_v62, %v13121_v62  ;;  %v3277_v51 = vadd.f32 %v13223_v59, %v2962_v17 }
 0x2e1   : > { %v13288_v0 = vpop.f32.mrf.mxu2  ;;  %v3957_v47 = vadd.f32 %v13202_v36, %v3275_v12 }
 0x2e2   : > { %v13290_v15 = vpop.f32.mrf.mxu3  ;;  %v4406_v26 = vadd.f32 %v4405_v33, %v13093_v25  ;;  %v3955_v57 = vadd.f32 %v13175_v63, %v3273_v1  ;;  %v4448_v33 = vmul.f32 %v13140_v6, %v13140_v6  ;;  %v3959_v12 = vadd.f32 %v13225_v43, %v3277_v51 }
 0x2e3   : > { %15641 = vst [vmem:[#allocation26_spill] sm:$0xff] %v13290_v15  ;;  %v13301_v39 = vpop.f32.mrf.mxu0  ;;  %v4475_v15 = vadd.f32 %v4474_v16, %v4444_v35  ;;  %v13347_v59 = vadd.f32 %v13195_v30, %v3957_v47 }
 0x2e4   : > { %v4407_v35 = vadd.f32 %v4406_v26, %v13112_v7  ;;  %v13330_v63 = vadd.f32 %v13164_v20, %v3955_v57  ;;  %v13342_v20 = vpop.f32.mrf.mxu1 }
 0x2e5   : > { %v4476_v45 = vadd.f32 %v4475_v15, %v4445_v27  ;;  %v4796_v15 = vld [vmem:[#allocation2 + $0xa4] sm:$0x1] }
 0x2e6   : > { %v4408_v27 = vadd.f32 %v4407_v35, %v13121_v62  ;;  %v4797_v1 = vsel %vm13020_vm10, 0, %v4796_v15  ;;  %v2964_v35 = vadd.f32 %v12824_v5, %v12833_v44  ;;  %v4451_v36 = vmul.f32 %v13330_v63, %v13330_v63  ;;  %v4743_v15 = vld [vmem:[#allocation2 + $0xa8] sm:$0x1] }
 0x2e7   : > { %v4477_v42 = vadd.f32 %v4476_v45, %v4446_v23  ;;  %v4449_v45 = vmul.f32 %v13149_v10, %v13149_v10  ;;  %4798 = vst [vmem:[#allocation2 + $0xa4] sm:$0x1] %v4797_v1  ;;  %v4452_v44 = vmul.f32 %v13197_v52, %v13197_v52  ;;  %v4744_v43 = vsel %vm12996_vm8, 0, %v4743_v15 }
 0x2e8   : > { %v4409_v40 = vadd.f32 %v4408_v27, %v13140_v6  ;;  %v3279_v3 = vadd.f32 %v13237_v22, %v2964_v35  ;;  %v2966_v27 = vadd.f32 %v12850_v2, %v12859_v56  ;;  %v4453_v22 = vmul.f32 %v13347_v59, %v13347_v59  ;;  %4745 = vst [vmem:[#allocation2 + $0xa8] sm:$0x1] %v4744_v43 }
 0x2e9   : > { %v13316_v16 = vpop.f32.mrf.mxu2  ;;  %v4478_v25 = vadd.f32 %v4477_v42, %v4447_v55  ;;  %v4450_v55 = vmul.f32 %v13170_v28, %v13170_v28  ;;  %v4456_v15 = vmul.f32 %v13235_v32, %v13235_v32 }
 0x2ea   : > { %v13318_v61 = vpop.f32.mrf.mxu3  ;;  %v4410_v42 = vadd.f32 %v4409_v40, %v13149_v10  ;;  %v3961_v40 = vadd.f32 %v13239_v19, %v3279_v3  ;;  %v3281_v2 = vadd.f32 %v13250_v46, %v2966_v27 }
 0x2eb   : > { %v13334_v23 = vpop.f32.mrf.mxu0  ;;  %v4479_v26 = vadd.f32 %v4478_v25, %v4448_v33 }
 0x2ec   : > { %v4411_v25 = vadd.f32 %v4410_v42, %v13170_v28  ;;  %v3963_v19 = vadd.f32 %v13252_v37, %v3281_v2  ;;  %v2934_v3 = vpop.f32.mrf.mxu1  ;;  %v4458_v2 = vmul.f32 %v13248_v60, %v13248_v60 }
 0x2ed   : > { %v4480_v57 = vadd.f32 %v4479_v26, %v4449_v45  ;;  %v13364_v45 = vadd.f32 %v13215_v38, %v3959_v12  ;;  %v4454_v26 = vmul.f32 %v13221_v54, %v13221_v54 }
 0x2ee   : > { %v4412_v30 = vadd.f32 %v4411_v25, %v13330_v63 }
 0x2ef   : > { %v4481_v5 = vadd.f32 %v4480_v57, %v4450_v55  ;;  %v2968_v55 = vadd.f32 %v12881_v49, %v12885_v50  ;;  %v4455_v42 = vmul.f32 %v13364_v45, %v13364_v45  ;;  %v4799_v49 = vld [vmem:[#allocation2 + $0xb0] sm:$0x1]  ;;  %v11427_v50 = vld [vmem:[#allocation4 + $0x50] sm:$0xff] }
 0x2f0   : > { %v4413_v51 = vadd.f32 %v4412_v30, %v13197_v52  ;;  %v4800_v27 = vsel %vm13020_vm10, 0, %v4799_v49  ;;  %5862 = vmatpush.bf16.msra.mxu1 %v11427_v50 }
 0x2f1   : > { %v3241_v17 = vpop.f32.mrf.mxu2  ;;  %v4482_v1 = vadd.f32 %v4481_v5, %v4451_v36  ;;  %v13380_v36 = vadd.f32 %v13233_v21, %v3961_v40  ;;  %v3283_v46 = vadd.f32 %v13265_v13, %v2968_v55  ;;  %v2970_v21 = vadd.f32 %v13256_v31, %v12909_v48  ;;  %4801 = vst [vmem:[#allocation2 + $0xb0] sm:$0x1] %v4800_v27 }
 0x2f2   : > { %v13352_v33 = vpop.f32.mrf.mxu3  ;;  %v4414_v35 = vadd.f32 %v4413_v51, %v13347_v59  ;;  %v2971_v51 = vadd.f32 %v13269_v11, %v12922_v14 }
 0x2f3   : > { %v13366_v47 = vpop.f32.mrf.mxu0  ;;  %v4483_v56 = vadd.f32 %v4482_v1, %v4452_v44  ;;  %v4457_v43 = vmul.f32 %v13380_v36, %v13380_v36  ;;  %v13397_v1 = vadd.f32 %v13246_v53, %v3963_v19  ;;  %v3285_v48 = vadd.f32 %v13288_v0, %v2970_v21 }
 0x2f4   : > { %v4415_v57 = vadd.f32 %v4414_v35, %v13221_v54  ;;  %v15643_v35 = vld [vmem:[#allocation17_spill] sm:$0xff] }
 0x2f5   : > { %v4484_v38 = vadd.f32 %v4483_v56, %v4453_v22  ;;  %v3965_v22 = vadd.f32 %v13267_v18, %v3283_v46  ;;  %v2972_v56 = vadd.f32 %v13276_v41, %v12928_v58  ;;  %v4459_v18 = vmul.f32 %v13397_v1, %v13397_v1  ;;  %v4746_v58 = vld [vmem:[#allocation2 + $0xb4] sm:$0x1]  ;;  %v15645_v46 = vld [vmem:[#allocation23_spill] sm:$0xff] }
 0x2f6   : > { %v4416_v44 = vadd.f32 %v4415_v57, %v13364_v45  ;;  %v4747_v49 = vsel %vm12996_vm8, 0, %v4746_v58 }
 0x2f7   : > { %v4485_v5 = vadd.f32 %v4484_v38, %v4454_v26  ;;  %v3286_v26 = vadd.f32 %v13316_v16, %v2971_v51  ;;  %v13413_v14 = vadd.f32 %v13261_v24, %v3965_v22  ;;  %v2973_v38 = vadd.f32 %v13308_v8, %v15643_v35  ;;  %v15646_v24 = vld [vmem:[#allocation18_spill] sm:$0xff]  ;;  %4748 = vst [vmem:[#allocation2 + $0xb4] sm:$0x1] %v4747_v49 }
 0x2f8   : > { %v4417_v13 = vadd.f32 %v4416_v44, %v13235_v32  ;;  %v3287_v19 = vadd.f32 %v3241_v17, %v2972_v56  ;;  %v2974_v50 = vadd.f32 %v13342_v20, %v15646_v24  ;;  %v2936_v44 = vpop.f32.mrf.mxu1  ;;  %v15650_v24 = vld [vmem:[#allocation20_spill] sm:$0xff] }
 0x2f9   : > { %v3244_v12 = vpop.f32.mrf.mxu2  ;;  %v4486_v37 = vadd.f32 %v4485_v5, %v4455_v42  ;;  %v15644_v42 = vld [vmem:[#allocation26_spill] sm:$0xff]  ;;  %v4460_v5 = vmul.f32 %v15645_v46, %v15645_v46 }
 0x2fa   : > { %v3926_v25 = vpop.f32.mrf.mxu3  ;;  %v4418_v40 = vadd.f32 %v4417_v13, %v13380_v36  ;;  %v3967_v57 = vadd.f32 %v15644_v42, %v3285_v48  ;;  %v3288_v8 = vadd.f32 %v3244_v12, %v2973_v38  ;;  %v15647_v13 = vld [vmem:[#allocation24_spill] sm:$0xff]  ;;  %v3969_v22 = vadd.f32 %v13352_v33, %v3287_v19  ;;  %v15649_v12 = vld [vmem:[#allocation19_spill] sm:$0xff]  ;;  %v4802_v42 = vld [vmem:[#allocation2 + $0xbc] sm:$0x1] }
 0x2fb   : > { %v13391_v30 = vpop.f32.mrf.mxu0  ;;  %v4487_v31 = vadd.f32 %v4486_v37, %v4456_v15  ;;  %v3968_v15 = vadd.f32 %v13318_v61, %v3286_v26  ;;  %v4461_v37 = vmul.f32 %v13413_v14, %v13413_v14 }
 0x2fc   : > { %v4419_v55 = vadd.f32 %v4418_v40, %v13248_v60  ;;  %v2975_v40 = vadd.f32 %v2934_v3, %v15649_v12  ;;  %v3970_v56 = vadd.f32 %v3926_v25, %v3288_v8 }
 0x2fd   : > { %v4488_v53 = vadd.f32 %v4487_v31, %v4457_v43  ;;  %v13430_v43 = vadd.f32 %v15647_v13, %v3967_v57  ;;  %v15648_v31 = vld [vmem:[#allocation25_spill] sm:$0xff] }
 0x2fe   : > { %v4420_v16 = vadd.f32 %v4419_v55, %v13397_v1  ;;  %v4462_v61 = vmul.f32 %v15648_v31, %v15648_v31  ;;  %v13452_v19 = vadd.f32 %v13366_v47, %v3970_v56 }
 0x2ff   : > { %v4489_v41 = vadd.f32 %v4488_v53, %v4458_v2  ;;  %v13438_v2 = vadd.f32 %v13301_v39, %v3968_v15  ;;  %v4463_v33 = vmul.f32 %v13430_v43, %v13430_v43  ;;  %v4803_v39 = vsel %vm13020_vm10, 0, %v4802_v42 }
 0x300   : > { %v4421_v21 = vadd.f32 %v4420_v16, %v15645_v46  ;;  %4804 = vst [vmem:[#allocation2 + $0xbc] sm:$0x1] %v4803_v39  ;;  %v4466_v47 = vmul.f32 %v13452_v19, %v13452_v19 }
 0x301   : > { %v3246_v11 = vpop.f32.mrf.mxu2  ;;  %v4490_v17 = vadd.f32 %v4489_v41, %v4459_v18  ;;  %v4464_v3 = vmul.f32 %v13438_v2, %v13438_v2 }
 0x302   : > { %v3928_v0 = vpop.f32.mrf.mxu3  ;;  %v3289_v51 = vadd.f32 %v3246_v11, %v2974_v50  ;;  %v4422_v20 = vadd.f32 %v4421_v21, %v13413_v14  ;;  %v13444_v11 = vadd.f32 %v13334_v23, %v3969_v22  ;;  %v2939_v23 = vpop.f32.mrf.mxu1  ;;  %v2976_v50 = vadd.f32 %v2936_v44, %v15650_v24 }
 0x303   : > { %v4357_v27 = vpop.f32.mrf.mxu0  ;;  %v4491_v48 = vadd.f32 %v4490_v17, %v4460_v5 }
 0x304   : > { %v4423_v53 = vadd.f32 %v4422_v20, %v15648_v31  ;;  %v3971_v35 = vadd.f32 %v3928_v0, %v3289_v51  ;;  %v4465_v5 = vmul.f32 %v13444_v11, %v13444_v11 }
 0x305   : > { %v4492_v26 = vadd.f32 %v4491_v48, %v4461_v37  ;;  %v4749_v48 = vld [vmem:[#allocation2 + $0xc0] sm:$0x1] }
 0x306   : > { %v4424_v25 = vadd.f32 %v4423_v53, %v13430_v43  ;;  %v13458_v49 = vadd.f32 %v13391_v30, %v3971_v35  ;;  %v4750_v44 = vsel %vm12996_vm8, 0, %v4749_v48 }
 0x307   : > { %v4493_v57 = vadd.f32 %v4492_v26, %v4462_v61  ;;  %4751 = vst [vmem:[#allocation2 + $0xc0] sm:$0x1] %v4750_v44 }
 0x308   : > { %v4425_v0 = vadd.f32 %v4424_v25, %v13438_v2  ;;  %v4467_v51 = vmul.f32 %v13458_v49, %v13458_v49 }
 0x309   : > { %v3249_v55 = vpop.f32.mrf.mxu2  ;;  %v4494_v16 = vadd.f32 %v4493_v57, %v4463_v33 }
 0x30a   : > { %v3931_v18 = vpop.f32.mrf.mxu3  ;;  %v3290_v38 = vadd.f32 %v3249_v55, %v2975_v40  ;;  %v4426_v8 = vadd.f32 %v4425_v0, %v13444_v11  ;;  %v15651_v55 = vld [vmem:[#allocation21_spill] sm:$0xff]  ;;  %v2941_v33 = vpop.f32.mrf.mxu1  ;;  %v15652_v0 = vld [vmem:[#allocation22_spill] sm:$0xff] }
 0x30b   : > { %v4359_v41 = vpop.f32.mrf.mxu0  ;;  %v4495_v15 = vadd.f32 %v4494_v16, %v4464_v3 }
 0x30c   : > { %v3972_v58 = vadd.f32 %v3931_v18, %v3290_v38  ;;  %v4427_v22 = vadd.f32 %v4426_v8, %v13452_v19  ;;  %v2977_v18 = vadd.f32 %v2939_v23, %v15651_v55  ;;  %v15654_v55 = vld [vmem:[#allocation13_spill] sm:$0xff] }
 0x30d   : > { %v4496_v13 = vadd.f32 %v4495_v15, %v4465_v5 }
 0x30e   : > { %v13464_v17 = vadd.f32 %v4357_v27, %v3972_v58  ;;  %v4428_v61 = vadd.f32 %v4427_v22, %v13458_v49  ;;  %v15653_v22 = vld [vmem:[#allocation12_spill] sm:$0xff] }
 0x30f   : > { %v4497_v20 = vadd.f32 %v4496_v13, %v4466_v47 }
 0x310   : > { %v4468_v27 = vmul.f32 %v13464_v17, %v13464_v17  ;;  %v4429_v56 = vadd.f32 %v4428_v61, %v13464_v17 }
 0x311   : > { %v3251_v21 = vpop.f32.mrf.mxu2  ;;  %v4498_v40 = vadd.f32 %v4497_v20, %v4467_v51 }
 0x312   : > { %v3933_v37 = vpop.f32.mrf.mxu3  ;;  %v3291_v30 = vadd.f32 %v3251_v21, %v2976_v50  ;;  %v2944_v21 = vpop.f32.mrf.mxu1 }
 0x313   : > { %v4362_v53 = vpop.f32.mrf.mxu0  ;;  %v4499_v35 = vadd.f32 %v4498_v40, %v4468_v27  ;;  %v2979_v51 = vadd.f32 %v2944_v21, %v15653_v22 }
 0x314   : > { %v3973_v12 = vadd.f32 %v3933_v37, %v3291_v30 }
 0x316   : > { %v13475_v26 = vadd.f32 %v4359_v41, %v3973_v12  ;;  %v2978_v41 = vadd.f32 %v2941_v33, %v15652_v0 }
 0x318   : > { %v4430_v38 = vadd.f32 %v4429_v56, %v13475_v26  ;;  %v4469_v42 = vmul.f32 %v13475_v26, %v13475_v26 }
 0x319   : > { %v3254_v57 = vpop.f32.mrf.mxu2 }
 0x31a   : > { %v3936_v39 = vpop.f32.mrf.mxu3  ;;  %v4500_v25 = vadd.f32 %v4499_v35, %v4469_v42  ;;  %v3292_v3 = vadd.f32 %v3254_v57, %v2977_v18  ;;  %v2946_v56 = vpop.f32.mrf.mxu1 }
 0x31b   : > { %v4364_v24 = vpop.f32.mrf.mxu0  ;;  %v2980_v18 = vadd.f32 %v2946_v56, %v15654_v55 }
 0x31c   : > { %v3974_v58 = vadd.f32 %v3936_v39, %v3292_v3 }
 0x31e   : > { %v13481_v16 = vadd.f32 %v4362_v53, %v3974_v58 }
 0x320   : > { %v4431_v5 = vadd.f32 %v4430_v38, %v13481_v16  ;;  %v4470_v23 = vmul.f32 %v13481_v16, %v13481_v16 }
 0x321   : > { %v3256_v50 = vpop.f32.mrf.mxu2 }
 0x322   : > { %v3938_v15 = vpop.f32.mrf.mxu3  ;;  %v4501_v8 = vadd.f32 %v4500_v25, %v4470_v23  ;;  %v3293_v47 = vadd.f32 %v3256_v50, %v2978_v41 }
 0x323   : > { %v4367_v12 = vpop.f32.mrf.mxu0 }
 0x324   : > { %v3975_v37 = vadd.f32 %v3938_v15, %v3293_v47 }
 0x326   : > { %v13487_v13 = vadd.f32 %v4364_v24, %v3975_v37 }
 0x328   : > { %v4432_v30 = vadd.f32 %v4431_v5, %v13487_v13  ;;  %v4471_v48 = vmul.f32 %v13487_v13, %v13487_v13 }
 0x329   : > { %v3259_v44 = vpop.f32.mrf.mxu2 }
 0x32a   : > { %v3941_v20 = vpop.f32.mrf.mxu3  ;;  %v4502_v61 = vadd.f32 %v4501_v8, %v4471_v48  ;;  %v3294_v27 = vadd.f32 %v3259_v44, %v2979_v51 }
 0x32b   : > { %v4369_v3 = vpop.f32.mrf.mxu0 }
 0x32c   : > { %v3976_v40 = vadd.f32 %v3941_v20, %v3294_v27  ;;  %v4805_v20 = vld [vmem:[#allocation2 + $0xc8] sm:$0x1] }
 0x32e   : > { %v13493_v53 = vadd.f32 %v4367_v12, %v3976_v40 }
 0x330   : > { %v4433_v33 = vadd.f32 %v4432_v30, %v13493_v53  ;;  %v4472_v35 = vmul.f32 %v13493_v53, %v13493_v53 }
 0x331   : > { %v3261_v38 = vpop.f32.mrf.mxu2 }
 0x332   : > { %v4503_v42 = vadd.f32 %v4502_v61, %v4472_v35  ;;  %v3295_v57 = vadd.f32 %v3261_v38, %v2980_v18  ;;  %v3943_v39 = vpop.f32.mrf.mxu3  ;;  %v4806_v61 = vsel %vm13020_vm10, 0, %v4805_v20 }
 0x333   : > { %4807 = vst [vmem:[#allocation2 + $0xc8] sm:$0x1] %v4806_v61 }
 0x334   : > { %v3977_v25 = vadd.f32 %v3943_v39, %v3295_v57 }
 0x336   : > { %v13499_v58 = vadd.f32 %v4369_v3, %v3977_v25  ;;  %v15655_v3 = vld [vmem:[#allocation14_spill] sm:$0xff] }
 0x338   : > { %v4434_v0 = vadd.f32 %v4433_v33, %v13499_v58  ;;  %v4473_v41 = vmul.f32 %v13499_v58, %v13499_v58 }
 0x33a   : > { %v4435_v5 = vrot.slane %v4434_v0, 4  ;;  %v4504_v23 = vadd.f32 %v4503_v42, %v4473_v41  ;;  %v15656_v41 = vld [vmem:[#allocation15_spill] sm:$0xff] }
 0x33c   : > { %v4436_v24 = vadd.f32 %v4435_v5, %v4434_v0  ;;  %v4505_v50 = vrot.slane %v4504_v23, 4 }
 0x33e   : > { %v4437_v15 = vrot.slane %v4436_v24, 2  ;;  %v4506_v8 = vadd.f32 %v4505_v50, %v4504_v23 }
 0x340   : > { %v4438_v47 = vadd.f32 %v4437_v15, %v4436_v24  ;;  %v4507_v21 = vrot.slane %v4506_v8, 2 }
 0x342   : > { %v4439_v37 = vrot.slane %v4438_v47, 1  ;;  %v4508_v22 = vadd.f32 %v4507_v21, %v4506_v8 }
 0x344   : > { %v4440_v51 = vadd.f32 %v4439_v37, %v4438_v47  ;;  %v4509_v30 = vrot.slane %v4508_v22, 1 }
 0x346   : > { %v13504_v48 = vmul.f32 0.00390625, %v4440_v51  ;;  %v4510_v44 = vadd.f32 %v4509_v30, %v4508_v22 }
 0x348   : > { %v4511_v27 = vmul.f32 0.00390625, %v4510_v44  ;;  %v4512_v12 = vmul.f32 %v13504_v48, %v13504_v48  ;;  %v4544_v40 = vsub.f32 %v13493_v53, %v13504_v48  ;;  %v4545_v56 = vsub.f32 %v13499_v58, %v13504_v48 }
 0x349   : > { %v4540_v33 = vsub.f32 %v13464_v17, %v13504_v48  ;;  %v4541_v35 = vsub.f32 %v13475_v26, %v13504_v48  ;;  %v4542_v38 = vsub.f32 %v13481_v16, %v13504_v48  ;;  %v4543_v42 = vsub.f32 %v13487_v13, %v13504_v48  ;;  %v13952_v13 = vld [vmem:[#allocation2 + $0x48] sm:$0xf] }
 0x34a   : > { %v4513_v55 = vsub.f32 %v4511_v27, %v4512_v12  ;;  %v4514_v25 = vsub.f32 %v13056_v29, %v13504_v48  ;;  %v4515_v58 = vsub.f32 %v15655_v3, %v13504_v48  ;;  %v4516_v0 = vsub.f32 %v13084_v34, %v13504_v48  ;;  %v14020_v26 = vld [vmem:[#allocation2 + $0xa8] sm:$0xf] }
 0x34b   : > { %v4517_v5 = vsub.f32 %v15656_v41, %v13504_v48  ;;  %v4518_v24 = vsub.f32 %v13112_v7, %v13504_v48  ;;  %v4519_v50 = vsub.f32 %v13121_v62, %v13504_v48  ;;  %v4520_v15 = vsub.f32 %v13140_v6, %v13504_v48 }
 0x34c   : > { %v4546_v18 = vadd.f32 1e-05, %v4513_v55  ;;  %v4521_v29 = vsub.f32 %v13149_v10, %v13504_v48  ;;  %v4522_v8 = vsub.f32 %v13170_v28, %v13504_v48  ;;  %v4523_v34 = vsub.f32 %v13330_v63, %v13504_v48 }
 0x34d   : > { %v4524_v47 = vsub.f32 %v13197_v52, %v13504_v48  ;;  %v4525_v7 = vsub.f32 %v13347_v59, %v13504_v48  ;;  %v4526_v62 = vsub.f32 %v13221_v54, %v13504_v48  ;;  %v4527_v6 = vsub.f32 %v13364_v45, %v13504_v48  ;;  %v13563_v45 = vld [vmem:[%s15591_s3] ss:$0 sm:$0xff] }
 0x34e   : > { %11619 = vrsqrt.f32 %v4546_v18  ;;  %v4528_v10 = vsub.f32 %v13235_v32, %v13504_v48  ;;  %v4529_v28 = vsub.f32 %v13380_v36, %v13504_v48  ;;  %v4530_v52 = vsub.f32 %v13248_v60, %v13504_v48 }
 0x34f   : > { %vm4553_vm12 = vweird.f32 %v4546_v18  ;;  %v4531_v59 = vsub.f32 %v13397_v1, %v13504_v48  ;;  %v4532_v54 = vsub.f32 %v15645_v46, %v13504_v48  ;;  %v4533_v32 = vsub.f32 %v13413_v14, %v13504_v48  ;;  %v13582_v14 = vld [vmem:[%s15592_s4] ss:$0 sm:$0xff] }
 0x350   : > { %v4534_v60 = vsub.f32 %v15648_v31, %v13504_v48  ;;  %v4535_v36 = vsub.f32 %v13430_v43, %v13504_v48  ;;  %v4536_v1 = vsub.f32 %v13438_v2, %v13504_v48  ;;  %v4537_v46 = vsub.f32 %v13444_v11, %v13504_v48 }
 0x351   : > { %v4538_v22 = vsub.f32 %v13452_v19, %v13504_v48  ;;  %v4539_v51 = vsub.f32 %v13458_v49, %v13504_v48 }
 0x354   : > { %v11620_v53 = vpop.eup %11619 }
 0x355   : > { %v4548_v57 = vmul.f32 %v11620_v53, %v4546_v18  ;;  %vm4554_vm11 = vweird.f32 %v11620_v53 }
 0x356   : > { %vm4555_vm13 = vmor %vm4553_vm12, %vm4554_vm11 }
 0x357   : > { %v4549_v39 = vmul.f32 %v11620_v53, %v4548_v57 }
 0x359   : > { %v4550_v23 = vmul.f32 0.5, %v4549_v39 }
 0x35b   : > { %v4551_v21 = vsub.f32 1.5, %v4550_v23 }
 0x35d   : > { %v4552_v63 = vmul.f32 %v11620_v53, %v4551_v21 }
 0x35f   : > { %v4556_v37 = vsel %vm4555_vm13, %v11620_v53, %v4552_v63 }
 0x360   : > { %v4587_v31 = vmul.f32 %v4556_v37, %v4544_v40  ;;  %v4588_v43 = vmul.f32 %v4556_v37, %v4545_v56  ;;  %v4557_v30 = vmul.f32 %v4556_v37, %v4514_v25  ;;  %v4558_v44 = vmul.f32 %v4556_v37, %v4515_v58 }
 0x361   : > { %v4559_v2 = vmul.f32 %v4556_v37, %v4516_v0  ;;  %v4560_v20 = vmul.f32 %v4556_v37, %v4517_v5  ;;  %v4561_v61 = vmul.f32 %v4556_v37, %v4518_v24  ;;  %v4562_v27 = vmul.f32 %v4556_v37, %v4519_v50 }
 0x362   : > { %v4622_v11 = vmul.f32 %v13563_v45, %v4587_v31  ;;  %v4623_v19 = vmul.f32 %v13563_v45, %v4588_v43  ;;  %v4563_v12 = vmul.f32 %v4556_v37, %v4520_v15  ;;  %v4564_v55 = vmul.f32 %v4556_v37, %v4521_v29 }
 0x363   : > { %v4565_v49 = vmul.f32 %v4556_v37, %v4522_v8  ;;  %v4566_v18 = vmul.f32 %v4556_v37, %v4523_v34  ;;  %v4567_v53 = vmul.f32 %v4556_v37, %v4524_v47  ;;  %v4568_v57 = vmul.f32 %v4556_v37, %v4525_v7 }
 0x364   : > { %v4657_v39 = vadd.f32 %v13582_v14, %v4622_v11  ;;  %v4658_v40 = vadd.f32 %v13582_v14, %v4623_v19  ;;  %v4569_v56 = vmul.f32 %v4556_v37, %v4526_v62  ;;  %v4570_v25 = vmul.f32 %v4556_v37, %v4527_v6 }
 0x365   : > { %v4571_v3 = vmul.f32 %v4556_v37, %v4528_v10  ;;  %v4572_v58 = vmul.f32 %v4556_v37, %v4529_v28  ;;  %v4573_v0 = vmul.f32 %v4556_v37, %v4530_v52  ;;  %v4574_v41 = vmul.f32 %v4556_v37, %v4531_v59 }
 0x366   : > { %v4689_v5 = vmax.f32 %v4657_v39, 0.0  ;;  %v4690_v23 = vmax.f32 %v4658_v40, 0.0  ;;  %v4575_v24 = vmul.f32 %v4556_v37, %v4532_v54  ;;  %v4576_v50 = vmul.f32 %v4556_v37, %v4533_v32 }
 0x367   : > { %v4577_v15 = vmul.f32 %v4556_v37, %v4534_v60  ;;  %v4578_v29 = vmul.f32 %v4556_v37, %v4535_v36  ;;  %v4579_v8 = vmul.f32 %v4556_v37, %v4536_v1  ;;  %v4580_v34 = vmul.f32 %v4556_v37, %v4537_v46 }
 0x368   : > { %v13588_v47 = vpack.c.bf16 %v4689_v5, %v4689_v5  ;;  %v4842_v21 = vpack.c.bf16 %v4690_v23, %v4690_v23  ;;  %v4581_v7 = vmul.f32 %v4556_v37, %v4538_v22  ;;  %v4582_v63 = vmul.f32 %v4556_v37, %v4539_v51 }
 0x369   : > { %v4583_v62 = vmul.f32 %v4556_v37, %v4540_v33  ;;  %v4584_v6 = vmul.f32 %v4556_v37, %v4541_v35  ;;  %v4585_v10 = vmul.f32 %v4556_v37, %v4542_v38  ;;  %v4586_v28 = vmul.f32 %v4556_v37, %v4543_v42  ;;  %v5277_v35 = vld [vmem:[#allocation2 + $0xc8] sm:$0x1] }
 0x36a   : > { %v5101_v52 = vshrl.u32 %v13588_v47, 16  ;;  %v5109_v59 = vshrl.u32 %v4842_v21, 16  ;;  %v5112_v33 = vshll.u32 %v4842_v21, 16  ;;  %v4592_v48 = vmul.f32 %v13563_v45, %v4557_v30 }
 0x36b   : > { %v4593_v42 = vmul.f32 %v13563_v45, %v4558_v44  ;;  %v4594_v60 = vmul.f32 %v13563_v45, %v4559_v2  ;;  %v4595_v37 = vmul.f32 %v13563_v45, %v4560_v20  ;;  %v4596_v46 = vmul.f32 %v13563_v45, %v4561_v61 }
 0x36c   : > { %v13603_v54 = vrot.slane %v5101_v52, 7  ;;  %v5111_v17 = vrot.slane %v5109_v59, 7  ;;  %v4597_v22 = vmul.f32 %v13563_v45, %v4562_v27  ;;  %v4598_v51 = vmul.f32 %v13563_v45, %v4563_v12 }
 0x36d   : > { %v4599_v31 = vmul.f32 %v13563_v45, %v4564_v55  ;;  %v4600_v43 = vmul.f32 %v13563_v45, %v4565_v49  ;;  %v4601_v30 = vmul.f32 %v13563_v45, %v4566_v18  ;;  %v4602_v44 = vmul.f32 %v13563_v45, %v4567_v53 }
 0x36e   : > { %v5107_v16 = vrot.slane %v13603_v54, 4  ;;  %v5114_v38 = vor.u32 %v5112_v33, %v5111_v17  ;;  %v5116_v32 = vrot.slane %v5111_v17, 4  ;;  %v4603_v2 = vmul.f32 %v13563_v45, %v4568_v57 }
 0x36f   : > { %v4604_v20 = vmul.f32 %v13563_v45, %v4569_v56  ;;  %v4605_v61 = vmul.f32 %v13563_v45, %v4570_v25  ;;  %v4606_v11 = vmul.f32 %v13563_v45, %v4571_v3  ;;  %v4607_v27 = vmul.f32 %v13563_v45, %v4572_v58 }
 0x370   : > { %v5115_v36 = vsel %vm13606_vm15, %v5107_v16, %v5114_v38  ;;  %v5278_v1 = vsel %vm12996_vm8, %v5116_v32, %v5277_v35  ;;  %v4608_v19 = vmul.f32 %v13563_v45, %v4573_v0  ;;  %v4609_v12 = vmul.f32 %v13563_v45, %v4574_v41 }
 0x371   : > { %5276 = vst [vmem:[#allocation2 + $0xc4] sm:$0xf] %v5115_v36  ;;  %v4610_v55 = vmul.f32 %v13563_v45, %v4575_v24  ;;  %v4611_v49 = vmul.f32 %v13563_v45, %v4576_v50  ;;  %v4612_v18 = vmul.f32 %v13563_v45, %v4577_v15  ;;  %v4613_v53 = vmul.f32 %v13563_v45, %v4578_v29 }
 0x372   : > { %5279 = vst [vmem:[#allocation2 + $0xc8] sm:$0x1] %v5278_v1  ;;  %v4614_v57 = vmul.f32 %v13563_v45, %v4579_v8  ;;  %v4615_v39 = vmul.f32 %v13563_v45, %v4580_v34  ;;  %v4616_v40 = vmul.f32 %v13563_v45, %v4581_v7  ;;  %v4617_v56 = vmul.f32 %v13563_v45, %v4582_v63 }
 0x373   : > { %v4618_v25 = vmul.f32 %v13563_v45, %v4583_v62  ;;  %v4619_v3 = vmul.f32 %v13563_v45, %v4584_v6  ;;  %v4620_v58 = vmul.f32 %v13563_v45, %v4585_v10  ;;  %v4621_v0 = vmul.f32 %v13563_v45, %v4586_v28 }
 0x374   : > { %v4627_v41 = vadd.f32 %v13582_v14, %v4592_v48  ;;  %v4628_v5 = vadd.f32 %v13582_v14, %v4593_v42  ;;  %v4629_v23 = vadd.f32 %v13582_v14, %v4594_v60  ;;  %v4630_v24 = vadd.f32 %v13582_v14, %v4595_v37 }
 0x375   : > { %v4631_v50 = vadd.f32 %v13582_v14, %v4596_v46  ;;  %v4632_v15 = vadd.f32 %v13582_v14, %v4597_v22  ;;  %v4633_v29 = vadd.f32 %v13582_v14, %v4598_v51  ;;  %v4634_v8 = vadd.f32 %v13582_v14, %v4599_v31 }
 0x376   : > { %v4635_v34 = vadd.f32 %v13582_v14, %v4600_v43  ;;  %v4636_v45 = vadd.f32 %v13582_v14, %v4601_v30  ;;  %v4637_v21 = vadd.f32 %v13582_v14, %v4602_v44  ;;  %v4638_v7 = vadd.f32 %v13582_v14, %v4603_v2 }
 0x377   : > { %v4639_v63 = vadd.f32 %v13582_v14, %v4604_v20  ;;  %v4640_v62 = vadd.f32 %v13582_v14, %v4605_v61  ;;  %v4641_v6 = vadd.f32 %v13582_v14, %v4606_v11  ;;  %v4642_v10 = vadd.f32 %v13582_v14, %v4607_v27 }
 0x378   : > { %v4643_v28 = vadd.f32 %v13582_v14, %v4608_v19  ;;  %v4644_v52 = vadd.f32 %v13582_v14, %v4609_v12  ;;  %v13665_v59 = vadd.f32 %v13582_v14, %v4610_v55  ;;  %v13668_v17 = vadd.f32 %v13582_v14, %v4611_v49 }
 0x379   : > { %v13671_v33 = vadd.f32 %v13582_v14, %v4612_v18  ;;  %v13674_v35 = vadd.f32 %v13582_v14, %v4613_v53  ;;  %v13677_v16 = vadd.f32 %v13582_v14, %v4614_v57  ;;  %v13680_v38 = vadd.f32 %v13582_v14, %v4615_v39 }
 0x37a   : > { %v13683_v32 = vadd.f32 %v13582_v14, %v4616_v40  ;;  %v13686_v48 = vadd.f32 %v13582_v14, %v4617_v56  ;;  %v13689_v42 = vadd.f32 %v13582_v14, %v4618_v25  ;;  %v13692_v60 = vadd.f32 %v13582_v14, %v4619_v3 }
 0x37b   : > { %v13695_v36 = vadd.f32 %v13582_v14, %v4620_v58  ;;  %v13698_v1 = vadd.f32 %v13582_v14, %v4621_v0  ;;  %v4659_v37 = vmax.f32 %v4627_v41, 0.0  ;;  %v4660_v46 = vmax.f32 %v4628_v5, 0.0 }
 0x37c   : > { %v4661_v22 = vmax.f32 %v4629_v23, 0.0  ;;  %v4662_v51 = vmax.f32 %v4630_v24, 0.0  ;;  %v4663_v31 = vmax.f32 %v4631_v50, 0.0  ;;  %v4664_v43 = vmax.f32 %v4632_v15, 0.0 }
 0x37d   : > { %v4665_v30 = vmax.f32 %v4633_v29, 0.0  ;;  %v4666_v44 = vmax.f32 %v4634_v8, 0.0  ;;  %v4667_v2 = vmax.f32 %v4635_v34, 0.0  ;;  %v4668_v20 = vmax.f32 %v4636_v45, 0.0 }
 0x37e   : > { %v4669_v61 = vmax.f32 %v4637_v21, 0.0  ;;  %v4670_v11 = vmax.f32 %v4638_v7, 0.0  ;;  %v4671_v27 = vmax.f32 %v4639_v63, 0.0  ;;  %v4672_v19 = vmax.f32 %v4640_v62, 0.0 }
 0x37f   : > { %v4673_v12 = vmax.f32 %v4641_v6, 0.0  ;;  %v4674_v55 = vmax.f32 %v4642_v10, 0.0  ;;  %v4675_v49 = vmax.f32 %v4643_v28, 0.0  ;;  %v4676_v18 = vmax.f32 %v4644_v52, 0.0  ;;  %v11424_v52 = vld [vmem:[#allocation4 + $0x38] sm:$0xff] }
 0x380   : > { %v4677_v14 = vmax.f32 %v13665_v59, 0.0  ;;  %v4678_v53 = vmax.f32 %v13668_v17, 0.0  ;;  %v4679_v57 = vmax.f32 %v13671_v33, 0.0  ;;  %v4680_v39 = vmax.f32 %v13674_v35, 0.0  ;;  %6090 = vmatpush.bf16.msrb.mxu2 %v11424_v52 }
 0x381   : > { %v4681_v40 = vmax.f32 %v13677_v16, 0.0  ;;  %v4682_v56 = vmax.f32 %v13680_v38, 0.0  ;;  %v4683_v25 = vmax.f32 %v13683_v32, 0.0  ;;  %v4684_v3 = vmax.f32 %v13686_v48, 0.0 }
 0x382   : > { %v4685_v58 = vmax.f32 %v13689_v42, 0.0  ;;  %v4686_v0 = vmax.f32 %v13692_v60, 0.0  ;;  %v4687_v41 = vmax.f32 %v13695_v36, 0.0  ;;  %v4688_v5 = vmax.f32 %v13698_v1, 0.0  ;;  %v11440_v42 = vld [vmem:[#allocation4 + $0xb8] sm:$0xff]  ;;  %v11421_v1 = vld [vmem:[#allocation4 + $0x20] sm:$0xff] }
 0x383   : > { %v13712_v23 = vpack.c.bf16 %v4659_v37, %v4659_v37  ;;  %v4812_v24 = vpack.c.bf16 %v4660_v46, %v4660_v46  ;;  %v13714_v50 = vpack.c.bf16 %v4661_v22, %v4661_v22  ;;  %v4814_v15 = vpack.c.bf16 %v4662_v51, %v4662_v51  ;;  %6468 = vmatpush.bf16.msrb.mxu3 %v11440_v42 }
 0x384   : > { %v13716_v29 = vpack.c.bf16 %v4663_v31, %v4663_v31  ;;  %v4816_v8 = vpack.c.bf16 %v4664_v43, %v4664_v43  ;;  %v13718_v34 = vpack.c.bf16 %v4665_v30, %v4665_v30  ;;  %v13720_v45 = vpack.c.bf16 %v4666_v44, %v4666_v44  ;;  %v11423_v30 = vld [vmem:[#allocation4 + $0x30] sm:$0xff] }
 0x385   : > { %v13722_v21 = vpack.c.bf16 %v4667_v2, %v4667_v2  ;;  %v13724_v7 = vpack.c.bf16 %v4668_v20, %v4668_v20  ;;  %v13726_v63 = vpack.c.bf16 %v4669_v61, %v4669_v61  ;;  %v13728_v62 = vpack.c.bf16 %v4670_v11, %v4670_v11  ;;  %6091 = vmatpush.bf16.msrb.mxu2 %v11423_v30 }
 0x386   : > { %v13730_v6 = vpack.c.bf16 %v4671_v27, %v4671_v27  ;;  %v13732_v10 = vpack.c.bf16 %v4672_v19, %v4672_v19  ;;  %v13734_v28 = vpack.c.bf16 %v4673_v12, %v4673_v12  ;;  %v13736_v59 = vpack.c.bf16 %v4674_v55, %v4674_v55  ;;  %v11439_v55 = vld [vmem:[#allocation4 + $0xb0] sm:$0xff] }
 0x387   : > { %v13738_v17 = vpack.c.bf16 %v4675_v49, %v4675_v49  ;;  %v13740_v33 = vpack.c.bf16 %v4676_v18, %v4676_v18  ;;  %v4846_v35 = vshrl.u32 %v13712_v23, 16  ;;  %v13743_v16 = vpack.c.bf16 %v4677_v14, %v4677_v14  ;;  %6469 = vmatpush.bf16.msrb.mxu3 %v11439_v55 }
 0x388   : > { %v13745_v38 = vpack.c.bf16 %v4678_v53, %v4678_v53  ;;  %v4854_v32 = vshrl.u32 %v4812_v24, 16  ;;  %v4863_v48 = vshrl.u32 %v13714_v50, 16  ;;  %v13748_v60 = vpack.c.bf16 %v4679_v57, %v4679_v57 }
 0x389   : > { %v13750_v36 = vpack.c.bf16 %v4680_v39, %v4680_v39  ;;  %v4848_v37 = vrot.slane %v4846_v35, 7  ;;  %v4871_v46 = vshrl.u32 %v4814_v15, 16  ;;  %v4857_v51 = vshll.u32 %v4812_v24, 16  ;;  %v11422_v24 = vld [vmem:[#allocation4 + $0x28] sm:$0xff] }
 0x38a   : > { %v13752_v22 = vrot.slane %v4854_v32, 7  ;;  %v13754_v31 = vrot.slane %v4863_v48, 7  ;;  %v4880_v43 = vshrl.u32 %v13716_v29, 16  ;;  %v4874_v20 = vshll.u32 %v4814_v15, 16  ;;  %6092 = vmatpush.bf16.msrb.mxu2 %v11422_v24 }
 0x38b   : > { %v4852_v44 = vrot.slane %v4848_v37, 4  ;;  %v13757_v2 = vrot.slane %v4871_v46, 7  ;;  %v4888_v61 = vshrl.u32 %v4816_v8, 16  ;;  %v13759_v11 = vpack.c.bf16 %v4681_v40, %v4681_v40 }
 0x38c   : > { %v13761_v27 = vpack.c.bf16 %v4682_v56, %v4682_v56  ;;  %v4859_v19 = vor.u32 %v4857_v51, %v13752_v22  ;;  %v4869_v12 = vrot.slane %v13754_v31, 4  ;;  %v13765_v49 = vpack.c.bf16 %v4683_v25, %v4683_v25 }
 0x38d   : > { %v4876_v18 = vor.u32 %v4874_v20, %v13757_v2  ;;  %v13768_v14 = vrot.slane %v4880_v43, 7  ;;  %v13770_v53 = vrot.slane %v4888_v61, 7  ;;  %v13772_v57 = vpack.c.bf16 %v4684_v3, %v4684_v3 }
 0x38e   : > { %v4860_v39 = vsel %vm13606_vm15, %v4852_v44, %v4859_v19  ;;  %v4891_v40 = vshll.u32 %v4816_v8, 16  ;;  %v4897_v56 = vshrl.u32 %v13718_v34, 16  ;;  %v13777_v15 = vpack.c.bf16 %v4685_v58, %v4685_v58  ;;  %v11438_v58 = vld [vmem:[#allocation4 + $0xa8] sm:$0xff]  ;;  %6093 = vmatpush.bf16.msrb.mxu2 %v11421_v1 }
 0x38f   : > { %v13779_v25 = vpack.c.bf16 %v4686_v0, %v4686_v0  ;;  %v4877_v52 = vsel %vm13606_vm15, %v4869_v12, %v4876_v18  ;;  %v4886_v35 = vrot.slane %v13768_v14, 4  ;;  %5171 = vst [vmem:[#allocation2 + $0x10] sm:$0xf] %v4860_v39  ;;  %v13784_v3 = vpack.c.bf16 %v4687_v41, %v4687_v41  ;;  %6470 = vmatpush.bf16.msrb.mxu3 %v11438_v58 }
 0x390   : > { %v4893_v32 = vor.u32 %v4891_v40, %v13770_v53  ;;  %v13787_v48 = vrot.slane %v4897_v56, 7  ;;  %v4905_v8 = vshrl.u32 %v13720_v45, 16  ;;  %5178 = vst [vmem:[#allocation2 + $0x1c] sm:$0xf] %v4877_v52  ;;  %v13793_v0 = vpack.c.bf16 %v4688_v5, %v4688_v5 }
 0x391   : > { %v4849_v42 = vshll.u32 %v13712_v23, 16  ;;  %v4914_v46 = vshrl.u32 %v13722_v21, 16  ;;  %v4922_v41 = vshrl.u32 %v13724_v7, 16  ;;  %v4908_v44 = vshll.u32 %v13720_v45, 16  ;;  %v11437_v45 = vld [vmem:[#allocation4 + $0xa0] sm:$0xff] }
 0x392   : > { %v4894_v51 = vsel %vm13606_vm15, %v4886_v35, %v4893_v32  ;;  %v4903_v43 = vrot.slane %v13787_v48, 4  ;;  %v13801_v30 = vrot.slane %v4905_v8, 7  ;;  %v4925_v23 = vshll.u32 %v13724_v7, 16  ;;  %v11420_v35 = vld [vmem:[#allocation4 + $0x18] sm:$0xff] }
 0x393   : > { %v13804_v20 = vrot.slane %v4914_v46, 7  ;;  %v13806_v5 = vrot.slane %v4922_v41, 7  ;;  %v4931_v61 = vshrl.u32 %v13726_v63, 16  ;;  %5185 = vst [vmem:[#allocation2 + $0x28] sm:$0xf] %v4894_v51  ;;  %v4866_v19 = vshll.u32 %v13714_v50, 16  ;;  %6471 = vmatpush.bf16.msrb.mxu3 %v11437_v45  ;;  %6094 = vmatpush.bf16.msrb.mxu2 %v11420_v35 }
 0x394   : > { %v4883_v12 = vshll.u32 %v13716_v29, 16  ;;  %v4910_v55 = vor.u32 %v4908_v44, %v13801_v30  ;;  %v4939_v18 = vshrl.u32 %v13728_v62, 16  ;;  %v13814_v39 = vor.u32 %v4849_v42, %v4848_v37  ;;  %v11436_v51 = vld [vmem:[#allocation4 + $0x98] sm:$0xff]  ;;  %v11463_v35 = vld [vmem:[#allocation4 + $0xf0] sm:$0xff]  ;;  %v5193_v45 = vld [vmem:[#allocation2 + $0x38] sm:$0x1] }
 0x395   : > { %v4920_v40 = vrot.slane %v13804_v20, 4  ;;  %v4927_v56 = vor.u32 %v4925_v23, %v13806_v5  ;;  %v4942_v7 = vshll.u32 %v13728_v62, 16  ;;  %v13821_v50 = vrot.slane %v4931_v61, 7  ;;  %v5210_v32 = vld [vmem:[#allocation2 + $0x54] sm:$0xf] }
 0x396   : > { %v4911_v24 = vsel %vm13606_vm15, %v4903_v43, %v4910_v55  ;;  %v13823_v29 = vrot.slane %v4939_v18, 7  ;;  %v4948_v52 = vshrl.u32 %v13730_v6, 16  ;;  %v4861_v37 = vrot.slane %v13752_v22, 4  ;;  %v11464_v43 = vld [vmem:[#allocation4 + $0xf8] sm:$0xff]  ;;  %v11419_v18 = vld [vmem:[#allocation4 + $0x10] sm:$0xff] }
 0x397   : > { %v4928_v8 = vsel %vm13606_vm15, %v4920_v40, %v4927_v56  ;;  %v4956_v62 = vshrl.u32 %v13732_v10, 16  ;;  %5192 = vst [vmem:[#allocation2 + $0x34] sm:$0xf] %v4911_v24  ;;  %v13832_v58 = vor.u32 %v4866_v19, %v13754_v31  ;;  %v4900_v42 = vshll.u32 %v13718_v34, 16  ;;  %6472 = vmatpush.bf16.msrb.mxu3 %v11436_v51  ;;  %6782 = vmatpush.bf16.msrb.mxu0 %v11464_v43 }
 0x398   : > { %v4937_v46 = vrot.slane %v13821_v50, 4  ;;  %v4944_v41 = vor.u32 %v4942_v7, %v13823_v29  ;;  %5199 = vst [vmem:[#allocation2 + $0x40] sm:$0xf] %v4928_v8  ;;  %v13837_v44 = vrot.slane %v4948_v52, 7  ;;  %v4959_v23 = vshll.u32 %v13732_v10, 16  ;;  %6095 = vmatpush.bf16.msrb.mxu2 %v11419_v18  ;;  %v11435_v52 = vld [vmem:[#allocation4 + $0x90] sm:$0xff] }
 0x399   : > { %v13839_v1 = vrot.slane %v4956_v62, 7  ;;  %v4965_v61 = vshrl.u32 %v13734_v28, 16  ;;  %v13844_v31 = vor.u32 %v4883_v12, %v13768_v14  ;;  %v4973_v19 = vshrl.u32 %v13736_v59, 16 }
 0x39a   : > { %v4945_v34 = vsel %vm13606_vm15, %v4937_v46, %v4944_v41  ;;  %v4982_v55 = vshrl.u32 %v13738_v17, 16  ;;  %v4917_v40 = vshll.u32 %v13722_v21, 16  ;;  %v4954_v10 = vrot.slane %v13837_v44, 4  ;;  %v5196_v41 = vld [vmem:[#allocation2 + $0x3c] sm:$0xf] }
 0x39b   : > { %v4961_v56 = vor.u32 %v4959_v23, %v13839_v1  ;;  %5206 = vst [vmem:[#allocation2 + $0x4c] sm:$0xf] %v4945_v34  ;;  %v13854_v14 = vrot.slane %v4965_v61, 7  ;;  %v13856_v12 = vrot.slane %v4973_v19, 7  ;;  %v4976_v7 = vshll.u32 %v13736_v59, 16  ;;  %6473 = vmatpush.bf16.msrb.mxu3 %v11435_v52  ;;  %6783 = vmatpush.bf16.msrb.mxu0 %v11463_v35 }
 0x39c   : > { %v13859_v24 = vrot.slane %v4982_v55, 7  ;;  %v13862_v8 = vor.u32 %v4900_v42, %v13787_v48  ;;  %v4990_v62 = vshrl.u32 %v13740_v33, 16  ;;  %v4999_v46 = vshrl.u32 %v13743_v16, 16  ;;  %v11418_v48 = vld [vmem:[#allocation4 + $0x8] sm:$0xff] }
 0x39d   : > { %v4962_v21 = vsel %vm13606_vm15, %v4954_v10, %v4961_v56  ;;  %v4934_v51 = vshll.u32 %v13726_v63, 16  ;;  %v4971_v59 = vrot.slane %v13854_v14, 4  ;;  %v4978_v43 = vor.u32 %v4976_v7, %v13856_v12  ;;  %6096 = vmatpush.bf16.msrb.mxu2 %v11418_v48  ;;  %v11434_v10 = vld [vmem:[#allocation4 + $0x88] sm:$0xff] }
 0x39e   : > { %5213 = vst [vmem:[#allocation2 + $0x58] sm:$0xf] %v4962_v21  ;;  %v4988_v42 = vrot.slane %v13859_v24, 4  ;;  %v13873_v23 = vrot.slane %v4990_v62, 7  ;;  %v4993_v61 = vshll.u32 %v13740_v33, 16  ;;  %v5001_v34 = vrot.slane %v4999_v46, 7 }
 0x39f   : > { %v13877_v19 = vor.u32 %v4917_v40, %v13804_v20  ;;  %v4979_v55 = vsel %vm13606_vm15, %v4971_v59, %v4978_v43  ;;  %v5007_v18 = vshrl.u32 %v13745_v38, 16  ;;  %v11462_v56 = vld [vmem:[#allocation4 + $0xe8] sm:$0xff]  ;;  %v13884_v7 = vor.u32 %v4934_v51, %v13821_v50  ;;  %6474 = vmatpush.bf16.msrb.mxu3 %v11434_v10  ;;  %v11417_v46 = vld [vmem:[#allocation4] sm:$0xff] }
 0x3a0   : > { %v4951_v33 = vshll.u32 %v13730_v6, 16  ;;  %v4995_v52 = vor.u32 %v4993_v61, %v13873_v23  ;;  %v5016_v20 = vshrl.u32 %v13748_v60, 16  ;;  %5220 = vst [vmem:[#allocation2 + $0x64] sm:$0xf] %v4979_v55  ;;  %v5005_v40 = vrot.slane %v5001_v34, 4  ;;  %6784 = vmatpush.bf16.msrb.mxu0 %v11462_v56  ;;  %v11426_v55 = vld [vmem:[#allocation4 + $0x48] sm:$0xff] }
 0x3a1   : > { %v13889_v35 = vrot.slane %v5007_v18, 7  ;;  %v5010_v21 = vshll.u32 %v13745_v38, 16  ;;  %v5024_v62 = vshrl.u32 %v13750_v36, 16  ;;  %v5033_v59 = vshrl.u32 %v13759_v11, 16  ;;  %6097 = vmatpush.bf16.msrb.mxu2 %v11417_v46  ;;  %5863 = vmatpush.bf16.msra.mxu1 %v11426_v55 }
 0x3a2   : > { %v4996_v6 = vsel %vm13606_vm15, %v4988_v42, %v4995_v52  ;;  %v5018_v51 = vrot.slane %v5016_v20, 7  ;;  %v4968_v43 = vshll.u32 %v13734_v28, 16  ;;  %v5027_v38 = vshll.u32 %v13750_v36, 16  ;;  %v11433_v52 = vld [vmem:[#allocation4 + $0x80] sm:$0xff] }
 0x3a3   : > { %v5012_v48 = vor.u32 %v5010_v21, %v13889_v35  ;;  %v13899_v61 = vrot.slane %v5024_v62, 7  ;;  %5227 = vst [vmem:[#allocation2 + $0x70] sm:$0xf] %v4996_v6  ;;  %v13903_v18 = vor.u32 %v4951_v33, %v13837_v44  ;;  %v5035_v56 = vrot.slane %v5033_v59, 7  ;;  %6475 = vmatpush.bf16.msrb.mxu3 %v11433_v52  ;;  %v11425_v59 = vld [vmem:[#allocation4 + $0x40] sm:$0xff] }
 0x3a4   : > { %v5022_v10 = vrot.slane %v5018_v51, 4  ;;  %v5041_v42 = vshrl.u32 %v13761_v27, 16  ;;  %v4985_v20 = vshll.u32 %v13738_v17, 16  ;;  %v5002_v28 = vshll.u32 %v13743_v16, 16  ;;  %v5172_v52 = vld [vmem:[#allocation2 + $0x14] sm:$0x1] }
 0x3a5   : > { %v5013_v21 = vsel %vm13606_vm15, %v5005_v40, %v5012_v48  ;;  %v5029_v36 = vor.u32 %v5027_v38, %v13899_v61  ;;  %v5039_v62 = vrot.slane %v5035_v56, 4  ;;  %v5044_v44 = vshll.u32 %v13761_v27, 16  ;;  %5864 = vmatpush.bf16.msra.mxu1 %v11425_v59  ;;  %v5189_v59 = vld [vmem:[#allocation2 + $0x30] sm:$0xf] }
 0x3a6   : > { %v13911_v46 = vrot.slane %v5041_v42, 7  ;;  %v5050_v33 = vshrl.u32 %v13765_v49, 16  ;;  %5234 = vst [vmem:[#allocation2 + $0x7c] sm:$0xf] %v5013_v21  ;;  %v13916_v6 = vor.u32 %v4968_v43, %v13854_v14  ;;  %v13919_v17 = vor.u32 %v4985_v20, %v13859_v24  ;;  %v5168_v42 = vld [vmem:[#allocation2 + $0xc] sm:$0xf] }
 0x3a7   : > { %v5030_v16 = vsel %vm13606_vm15, %v5022_v10, %v5029_v36  ;;  %v5058_v40 = vshrl.u32 %v13772_v57, 16  ;;  %v13924_v48 = vor.u32 %v5002_v28, %v5001_v34  ;;  %v5067_v55 = vshrl.u32 %v13777_v15, 16 }
 0x3a8   : > { %v5046_v27 = vor.u32 %v5044_v44, %v13911_v46  ;;  %v5052_v38 = vrot.slane %v5050_v33, 7  ;;  %5241 = vst [vmem:[#allocation2 + $0x88] sm:$0xf] %v5030_v16  ;;  %v5019_v14 = vshll.u32 %v13748_v60, 16  ;;  %v5061_v24 = vshll.u32 %v13772_v57, 16 }
 0x3a9   : > { %v13929_v43 = vrot.slane %v5058_v40, 7  ;;  %v5075_v10 = vshrl.u32 %v13779_v25, 16  ;;  %v5036_v34 = vshll.u32 %v13759_v11, 16  ;;  %v5069_v21 = vrot.slane %v5067_v55, 7  ;;  %v5175_v60 = vld [vmem:[#allocation2 + $0x18] sm:$0xf] }
 0x3aa   : > { %v5047_v20 = vsel %vm13606_vm15, %v5039_v62, %v5046_v27  ;;  %v5056_v28 = vrot.slane %v5052_v38, 4  ;;  %v5179_v44 = vld [vmem:[#allocation2 + $0x20] sm:$0x1]  ;;  %v5078_v16 = vshll.u32 %v13779_v25, 16  ;;  %v5084_v11 = vshrl.u32 %v13784_v3, 16 }
 0x3ab   : > { %v5063_v57 = vor.u32 %v5061_v24, %v13929_v43  ;;  %v13943_v33 = vrot.slane %v5075_v10, 7  ;;  %5248 = vst [vmem:[#allocation2 + $0x94] sm:$0xf] %v5047_v20  ;;  %v5182_v62 = vld [vmem:[#allocation2 + $0x24] sm:$0xf]  ;;  %v13947_v27 = vor.u32 %v5019_v14, %v5018_v51  ;;  %v13949_v55 = vor.u32 %v5036_v34, %v5035_v56 }
 0x3ac   : > { %v5186_v40 = vld [vmem:[#allocation2 + $0x2c] sm:$0x1]  ;;  %v5073_v50 = vrot.slane %v5069_v21, 4  ;;  %v5092_v63 = vshrl.u32 %v13793_v0, 16  ;;  %v5053_v24 = vshll.u32 %v13765_v49, 16  ;;  %v5086_v20 = vrot.slane %v5084_v11, 7 }
 0x3ad   : > { %v5064_v25 = vsel %vm13606_vm15, %v5056_v28, %v5063_v57  ;;  %v5080_v10 = vor.u32 %v5078_v16, %v13943_v33  ;;  %v5070_v51 = vshll.u32 %v13777_v15, 16  ;;  %v5095_v56 = vshll.u32 %v13793_v0, 16  ;;  %v5200_v0 = vld [vmem:[#allocation2 + $0x44] sm:$0x1]  ;;  %v13975_v16 = vld [vmem:[#allocation2 + $0x6c] sm:$0xf] }
 0x3ae   : > { %v13959_v14 = vrot.slane %v5092_v63, 7  ;;  %v5169_v34 = vsel %vm13938_vm1, %v13814_v39, %v5168_v42  ;;  %5255 = vst [vmem:[#allocation2 + $0xa0] sm:$0xf] %v5064_v25  ;;  %v13965_v49 = vor.u32 %v5053_v24, %v5052_v38  ;;  %v5090_v57 = vrot.slane %v5086_v20, 4  ;;  %v5217_v63 = vld [vmem:[#allocation2 + $0x60] sm:$0xf] }
 0x3af   : > { %v13969_v28 = vsel %vm13606_vm15, %v5073_v50, %v5080_v10  ;;  %5170 = vst [vmem:[#allocation2 + $0xc] sm:$0xf] %v5169_v34  ;;  %v5173_v15 = vsel %vm12996_vm8, %v4861_v37, %v5172_v52  ;;  %v13977_v39 = vor.u32 %v5070_v51, %v5069_v21  ;;  %v5176_v50 = vsel %vm13938_vm1, %v13832_v58, %v5175_v60  ;;  %v13987_v11 = vld [vmem:[#allocation2 + $0x78] sm:$0xf]  ;;  %v5207_v58 = vld [vmem:[#allocation2 + $0x50] sm:$0x1] }
 0x3b0   : > { %v5097_v38 = vor.u32 %v5095_v56, %v13959_v14  ;;  %5174 = vst [vmem:[#allocation2 + $0x14] sm:$0x1] %v5173_v15  ;;  %v15661_v42 = vrot.slane %v13757_v2, 4  ;;  %v5087_v37 = vshll.u32 %v13784_v3, 16  ;;  %v5183_v52 = vsel %vm13938_vm1, %v13844_v31, %v5182_v62  ;;  %v5238_v60 = vld [vmem:[#allocation2 + $0x84] sm:$0xf] }
 0x3b1   : > { %5177 = vst [vmem:[#allocation2 + $0x18] sm:$0xf] %v5176_v50  ;;  %v15662_v21 = vrot.slane %v13770_v53, 4  ;;  %v5190_v2 = vsel %vm13938_vm1, %v13862_v8, %v5189_v59  ;;  %v15663_v31 = vshll.u32 %v13588_v47, 16  ;;  %v5197_v53 = vsel %vm13938_vm1, %v13877_v19, %v5196_v41  ;;  %v14034_v19 = vld [vmem:[#allocation2 + $0xb4] sm:$0xf] }
 0x3b2   : > { %v5180_v22 = vsel %vm12996_vm8, %v15661_v42, %v5179_v44  ;;  %v14000_v44 = vld [vmem:[#allocation2 + $0x90] sm:$0xf]  ;;  %v14004_v3 = vsel %vm13606_vm15, %v5090_v57, %v5097_v38  ;;  %v5204_v8 = vsel %vm13938_vm1, %v13884_v7, %v13952_v13  ;;  %v14022_v59 = vor.u32 %v5087_v37, %v5086_v20  ;;  %5184 = vst [vmem:[#allocation2 + $0x24] sm:$0xf] %v5183_v52  ;;  %v14036_v7 = vld [vmem:[#allocation2 + $0xc0] sm:$0xf] }
 0x3b3   : > { %v5187_v24 = vsel %vm12996_vm8, %v15662_v21, %v5186_v40  ;;  %v14009_v62 = vor.u32 %v15663_v31, %v13603_v54  ;;  %5181 = vst [vmem:[#allocation2 + $0x20] sm:$0x1] %v5180_v22  ;;  %v14018_v40 = vld [vmem:[#allocation2 + $0x9c] sm:$0xf]  ;;  %v15664_v47 = vrot.slane %v13801_v30, 4  ;;  %v5211_v41 = vsel %vm13938_vm1, %v13903_v18, %v5210_v32  ;;  %v11460_v21 = vld [vmem:[#allocation4 + $0xd8] sm:$0xff] }
 0x3b4   : > { %v5218_v13 = vsel %vm13938_vm1, %v13916_v6, %v5217_v63  ;;  %5188 = vst [vmem:[#allocation2 + $0x2c] sm:$0x1] %v5187_v24  ;;  %v5225_v30 = vsel %vm13938_vm1, %v13919_v17, %v13975_v16  ;;  %v4963_v32 = vrot.slane %v13839_v1, 4  ;;  %v15665_v18 = vrot.slane %v13806_v5, 4  ;;  %v5214_v10 = vld [vmem:[#allocation2 + $0x5c] sm:$0x1] }
 0x3b5   : > { %v5194_v54 = vsel %vm12996_vm8, %v15664_v47, %v5193_v45  ;;  %v5232_v45 = vsel %vm13938_vm1, %v13924_v48, %v13987_v11  ;;  %5191 = vst [vmem:[#allocation2 + $0x30] sm:$0xf] %v5190_v2  ;;  %v5239_v25 = vsel %vm13938_vm1, %v13947_v27, %v5238_v60  ;;  %v5246_v17 = vsel %vm13938_vm1, %v13949_v55, %v14000_v44  ;;  %v5221_v56 = vld [vmem:[#allocation2 + $0x68] sm:$0x1]  ;;  %v5228_v34 = vld [vmem:[#allocation2 + $0x74] sm:$0x1] }
 0x3b6   : > { %v5201_v6 = vsel %vm12996_vm8, %v15665_v18, %v5200_v0  ;;  %5195 = vst [vmem:[#allocation2 + $0x38] sm:$0x1] %v5194_v54  ;;  %v5253_v1 = vsel %vm13938_vm1, %v13965_v49, %v14018_v40  ;;  %v5260_v5 = vsel %vm13938_vm1, %v13977_v39, %v14020_v26  ;;  %v4980_v48 = vrot.slane %v13856_v12, 4  ;;  %v5235_v15 = vld [vmem:[#allocation2 + $0x80] sm:$0x1]  ;;  %v11461_v50 = vld [vmem:[#allocation4 + $0xe0] sm:$0xff] }
 0x3b7   : > { %5198 = vst [vmem:[#allocation2 + $0x3c] sm:$0xf] %v5197_v53  ;;  %v15666_v27 = vrot.slane %v13823_v29, 4  ;;  %v5267_v20 = vsel %vm13938_vm1, %v14022_v59, %v14034_v19  ;;  %v5274_v51 = vsel %vm13938_vm1, %v14009_v62, %v14036_v7  ;;  %v4997_v12 = vrot.slane %v13873_v23, 4  ;;  %v5242_v0 = vld [vmem:[#allocation2 + $0x8c] sm:$0x1]  ;;  %6785 = vmatpush.bf16.msrb.mxu0 %v11461_v50 }
 0x3b8   : > { %5202 = vst [vmem:[#allocation2 + $0x44] sm:$0x1] %v5201_v6  ;;  %v5215_v29 = vsel %vm12996_vm8, %v4963_v32, %v5214_v10  ;;  %v5014_v49 = vrot.slane %v13889_v35, 4  ;;  %v5222_v57 = vsel %vm12996_vm8, %v4980_v48, %v5221_v56  ;;  %v5031_v36 = vrot.slane %v13899_v61, 4  ;;  %v5249_v16 = vld [vmem:[#allocation2 + $0x98] sm:$0x1] }
 0x3b9   : > { %v5208_v55 = vsel %vm12996_vm8, %v15666_v27, %v5207_v58  ;;  %5205 = vst [vmem:[#allocation2 + $0x48] sm:$0xf] %v5204_v8  ;;  %v5229_v23 = vsel %vm12996_vm8, %v4997_v12, %v5228_v34  ;;  %v5048_v63 = vrot.slane %v13911_v46, 4  ;;  %v5065_v39 = vrot.slane %v13929_v43, 4  ;;  %v5256_v38 = vld [vmem:[#allocation2 + $0xa4] sm:$0x1] }
 0x3ba   : > { %5209 = vst [vmem:[#allocation2 + $0x50] sm:$0x1] %v5208_v55  ;;  %v5236_v35 = vsel %vm12996_vm8, %v5014_v49, %v5235_v15  ;;  %v5243_v61 = vsel %vm12996_vm8, %v5031_v36, %v5242_v0  ;;  %v5082_v46 = vrot.slane %v13943_v33, 4  ;;  %v5263_v22 = vld [vmem:[#allocation2 + $0xb0] sm:$0x1]  ;;  %v5099_v11 = vrot.slane %v13959_v14, 4 }
 0x3bb   : > { %5212 = vst [vmem:[#allocation2 + $0x54] sm:$0xf] %v5211_v41  ;;  %v5250_v42 = vsel %vm12996_vm8, %v5048_v63, %v5249_v16  ;;  %v5257_v43 = vsel %vm12996_vm8, %v5065_v39, %v5256_v38  ;;  %v5270_v37 = vld [vmem:[#allocation2 + $0xbc] sm:$0x1]  ;;  %6786 = vmatpush.bf16.msrb.mxu0 %v11460_v21  ;;  %v11459_v24 = vld [vmem:[#allocation4 + $0xd0] sm:$0xff]  ;;  %v11472_v14 = vld [vmem:[#allocation4 + $0x138] sm:$0xff] }
 0x3bc   : > { %5216 = vst [vmem:[#allocation2 + $0x5c] sm:$0x1] %v5215_v29  ;;  %v5264_v52 = vsel %vm12996_vm8, %v5082_v46, %v5263_v22  ;;  %v5271_v33 = vsel %vm12996_vm8, %v5099_v11, %v5270_v37  ;;  %v11458_v2 = vld [vmem:[#allocation4 + $0xc8] sm:$0xff]  ;;  %v11770_v58 = vmov 0   ;;  %7464 = vmatpush.bf16.msrb.mxu1 %v11472_v14  ;;  %v11441_v60 = vld [vmem:[#allocation2 + $0xc] sm:$0xff] }
 0x3bd   : > { %5219 = vst [vmem:[#allocation2 + $0x60] sm:$0xf] %v5218_v13  ;;  %v5282_v13 = vld [vmem:[#allocation2 + $0xc] sm:$0xf]  ;;  %v5283_v7 = vld [vmem:[#allocation2 + $0x10] sm:$0xf] }
 0x3be   : > { %5223 = vst [vmem:[#allocation2 + $0x68] sm:$0x1] %v5222_v57  ;;  %v5369_v32 = vshrl.u32 %v5282_v13, 16  ;;  %v5372_v48 = vshll.u32 %v5282_v13, 16  ;;  %v5378_v27 = vshll.u32 %v5283_v7, 16  ;;  %v5382_v55 = vshrl.u32 %v5283_v7, 16 }
 0x3bf   : > { %5226 = vst [vmem:[#allocation2 + $0x6c] sm:$0xf] %v5225_v30  ;;  %6787 = vmatpush.bf16.msrb.mxu0 %v11459_v24  ;;  %v6236_v36 = vrot.slane %v5283_v7, 5  ;;  %v6180_v11 = vld [vmem:[#allocation2 + $0xc] sm:$0xe] }
 0x3c0   : > { %5230 = vst [vmem:[#allocation2 + $0x74] sm:$0x1] %v5229_v23  ;;  %v5371_v23 = vrot.slane %v5369_v32, 4  ;;  %v5374_v0 = vrot.slane %v5372_v48, 5  ;;  %v5380_v39 = vrot.slane %v5378_v27, 5  ;;  %v10877_v24 = vrot.slane %v6180_v11, 9 }
 0x3c1   : > { %5233 = vst [vmem:[#allocation2 + $0x78] sm:$0xf] %v5232_v45  ;;  %v6238_v37 = vrot.slane %v6236_v36, 4  ;;  %v5330_v48 = vld [vmem:[#allocation2 + $0x20] sm:$0x1] }
 0x3c2   : > { %5237 = vst [vmem:[#allocation2 + $0x80] sm:$0x1] %v5236_v35  ;;  %v6181_v27 = vld [vmem:[#allocation2 + $0x18] sm:$0xe] }
 0x3c3   : > { %5240 = vst [vmem:[#allocation2 + $0x84] sm:$0xf] %v5239_v25  ;;  %6788 = vmatpush.bf16.msrb.mxu0 %v11458_v2 }
 0x3c4   : > { %5244 = vst [vmem:[#allocation2 + $0x8c] sm:$0x1] %v5243_v61  ;;  %v5384_v61 = vrot.slane %v5382_v55, 4 }
 0x3c5   : > { %5247 = vst [vmem:[#allocation2 + $0x90] sm:$0xf] %v5246_v17 }
 0x3c6   : > { %5251 = vst [vmem:[#allocation2 + $0x98] sm:$0x1] %v5250_v42  ;;  %v11442_v42 = vld [vmem:[#allocation2 + $0x18] sm:$0xff]  ;;  %v5385_v21 = vor.u32 %v5384_v61, %v5380_v39 }
 0x3c7   : > { %5254 = vst [vmem:[#allocation2 + $0x9c] sm:$0xf] %v5253_v1 }
 0x3c8   : > { %5258 = vst [vmem:[#allocation2 + $0xa4] sm:$0x1] %v5257_v43  ;;  %v5329_v43 = vld [vmem:[#allocation2 + $0x14] sm:$0x1] }
 0x3c9   : > { %5261 = vst [vmem:[#allocation2 + $0xa8] sm:$0xf] %v5260_v5  ;;  %v6239_v14 = vrot.slane %v5329_v43, 5  ;;  %v5388_v2 = vshll.u32 %v5329_v43, 16 }
 0x3ca   : > { %5262 = vst [vmem:[#allocation2 + $0xac] sm:$0xf] %v13969_v28  ;;  %v11457_v28 = vld [vmem:[#allocation4 + $0xc0] sm:$0xff] }
 0x3cb   : > { %5265 = vst [vmem:[#allocation2 + $0xb0] sm:$0x1] %v5264_v52  ;;  %6789 = vmatpush.bf16.msrb.mxu0 %v11457_v28  ;;  %v5375_v52 = vor.u32 %v5374_v0, %v5371_v23  ;;  %v11471_v28 = vld [vmem:[#allocation4 + $0x130] sm:$0xff] }
 0x3cc   : > { %5268 = vst [vmem:[#allocation2 + $0xb4] sm:$0xf] %v5267_v20  ;;  %7465 = vmatpush.bf16.msrb.mxu1 %v11471_v28  ;;  %v5287_v23 = vld [vmem:[#allocation2 + $0x28] sm:$0xf]  ;;  %v5331_v28 = vld [vmem:[#allocation2 + $0x2c] sm:$0x1] }
 0x3cd   : > { %5269 = vst [vmem:[#allocation2 + $0xb8] sm:$0xf] %v14004_v3 }
 0x3ce   : > { %5272 = vst [vmem:[#allocation2 + $0xbc] sm:$0x1] %v5271_v33  ;;  %6790 = vmatmul.bf16.vlgmr.msrb.gmra.mxu0 %v11441_v60  ;;  %v6240_v60 = vsel %vm12233_vm5, %v6238_v37, %v6239_v14 }
 0x3cf   : > { %5275 = vst [vmem:[#allocation2 + $0xc0] sm:$0xf] %v5274_v51 }
 0x3d0   : > { %4691 = vst [vmem:[#allocation2] sm:$0xf] %v11770_v58 }
 0x3d1   : > { %4692 = vst [vmem:[#allocation2 + $0x4] sm:$0xf] %v11770_v58 }
 0x3d2   : > { %4693 = vst [vmem:[#allocation2 + $0x8] sm:$0x1] %v11770_v58 }
 0x3d3   : > { %4695 = vst [vmem:[#allocation2 + $0xcc] sm:$0xf] %v11770_v58 }
 0x3d4   : > { %4696 = vst [vmem:[#allocation2 + $0xd0] sm:$0xf] %v11770_v58 }
 0x3d5   : > { %4697 = vst [vmem:[#allocation2 + $0xd4] sm:$0x1] %v11770_v58  ;;  %v11402_v58 = vld [vmem:[#allocation2 + $0xc] sm:$0xff] }
 0x3d7   : > { %v4701_v44 = vld [vmem:[#allocation2] sm:$0x1]  ;;  %v6179_v40 = vld [vmem:[#allocation2] sm:$0xe] }
 0x3d8   : > { %v4702_v3 = vsel %vm12996_vm8, 0, %v4701_v44  ;;  %v5281_v31 = vld [vmem:[#allocation2 + $0x4] sm:$0xf]  ;;  %v10876_v54 = vrot.slane %v6179_v40, 9  ;;  %v5376_v44 = vrot.slane %v5375_v52, 4  ;;  %v6250_v52 = vrot.slane %v5287_v23, 5 }
 0x3d9   : > { %4703 = vst [vmem:[#allocation2] sm:$0x1] %v4702_v3  ;;  %v4757_v62 = vld [vmem:[#allocation2 + $0x8] sm:$0x1]  ;;  %v5354_v53 = vshll.u32 %v5281_v31, 16  ;;  %v5358_v26 = vshrl.u32 %v5281_v31, 16 }
 0x3da   : > { %v4758_v8 = vsel %vm13020_vm10, 0, %v4757_v62  ;;  %v6229_v41 = vrot.slane %v5281_v31, 5  ;;  %v5386_v3 = vrot.slane %v5385_v21, 4  ;;  %v6237_v31 = vsel %vm12233_vm5, %v10877_v24, %v6236_v36  ;;  %v5284_v40 = vld [vmem:[#allocation2 + $0x18] sm:$0xf]  ;;  %v11444_v21 = vld [vmem:[#allocation2 + $0x30] sm:$0xff] }
 0x3db   : > { %4759 = vst [vmem:[#allocation2 + $0x8] sm:$0x1] %v4758_v8  ;;  %v5356_v59 = vrot.slane %v5354_v53, 5  ;;  %v5360_v47 = vrot.slane %v5358_v26, 4  ;;  %v5390_v62 = vrot.slane %v5388_v2, 5  ;;  %v6359_v53 = vunpack.c.l.b16 %v6240_v60 }
 0x3dc   : > { %v6230_v6 = vsel %vm12233_vm5, %v10876_v54, %v6229_v41  ;;  %v6231_v25 = vrot.slane %v6229_v41, 4  ;;  %v5285_v8 = vld [vmem:[#allocation2 + $0x1c] sm:$0xf]  ;;  %v5381_v26 = vsel %vm11917_vm2, %v5376_v44, %v5380_v39  ;;  %v5393_v54 = vshrl.u32 %v5284_v40, 16  ;;  %v5286_v36 = vld [vmem:[#allocation2 + $0x24] sm:$0xf] }
 0x3dd   : > { %v5361_v19 = vor.u32 %v5360_v47, %v5356_v59  ;;  %v6356_v29 = vunpack.c.l.b16 %v6230_v6  ;;  %v6358_v47 = vunpack.c.l.b16 %v6237_v31  ;;  %v5396_v41 = vshll.u32 %v5284_v40, 16  ;;  %v11443_v6 = vld [vmem:[#allocation2 + $0x24] sm:$0xff] }
 0x3de   : > { %6795 = vmatmul.bf16.gmra.mxu0 %v11442_v42  ;;  %v5402_v13 = vshll.u32 %v5285_v8, 16  ;;  %v6243_v32 = vrot.slane %v5285_v8, 5  ;;  %v5417_v39 = vshrl.u32 %v5286_v36, 16  ;;  %v5420_v61 = vshll.u32 %v5286_v36, 16  ;;  %v6182_v60 = vld [vmem:[#allocation2 + $0x24] sm:$0xe] }
 0x3df   : > { %v5362_v5 = vrot.slane %v5361_v19, 4  ;;  %v5406_v19 = vshrl.u32 %v5285_v8, 16  ;;  %v6389_v7 = vpack.c.b16 %v6359_v53, %v6358_v47  ;;  %v5426_v42 = vshll.u32 %v5287_v23, 16 }
 0x3e0   : > { %v11401_v30 = vld [vmem:[#allocation2] sm:$0xff]  ;;  %v6245_v55 = vrot.slane %v6243_v32, 4  ;;  %v5422_v24 = vrot.slane %v5420_v61, 5  ;;  %v6252_v44 = vrot.slane %v6250_v52, 4  ;;  %v10879_v53 = vrot.slane %v6182_v60, 9 }
 0x3e1   : > { %v5280_v45 = vld [vmem:[#allocation2] sm:$0xf]  ;;  %6098 = vmatmul.bf16.vlgmr.msrb.gmra.mxu2 %v11401_v30  ;;  %v5747_v30 = vunpack.c.l.b16 %v5381_v26  ;;  %v5428_v14 = vrot.slane %v5426_v42, 5  ;;  %v6253_v8 = vrot.slane %v5331_v28, 5  ;;  %v5436_v40 = vshll.u32 %v5331_v28, 16  ;;  %v11404_v26 = vld [vmem:[#allocation2 + $0x24] sm:$0xff] }
 0x3e2   : > { %v5345_v17 = vshrl.u32 %v5280_v45, 16  ;;  %v5348_v10 = vshll.u32 %v5280_v45, 16  ;;  %v5328_v1 = vld [vmem:[#allocation2 + $0x8] sm:$0x1]  ;;  %v5290_v42 = vld [vmem:[#allocation2 + $0x3c] sm:$0xf] }
 0x3e3   : > { %v6232_v20 = vrot.slane %v5328_v1, 5  ;;  %v5364_v12 = vshll.u32 %v5328_v1, 16  ;;  %v5408_v1 = vrot.slane %v5406_v19, 4  ;;  %v6251_v19 = vsel %vm12233_vm5, %v10879_v53, %v6250_v52 }
 0x3e4   : > { %v5347_v51 = vrot.slane %v5345_v17, 4  ;;  %v5350_v56 = vrot.slane %v5348_v10, 5  ;;  %v5398_v17 = vrot.slane %v5396_v41, 5  ;;  %v5404_v10 = vrot.slane %v5402_v13, 5  ;;  %v5288_v41 = vld [vmem:[#allocation2 + $0x30] sm:$0xf] }
 0x3e5   : > { %v6233_v34 = vsel %vm12233_vm5, %v6231_v25, %v6232_v20  ;;  %v5366_v57 = vrot.slane %v5364_v12, 5  ;;  %v5395_v25 = vrot.slane %v5393_v54, 4  ;;  %v6246_v12 = vrot.slane %v5330_v48, 5  ;;  %v5289_v13 = vld [vmem:[#allocation2 + $0x34] sm:$0xf] }
 0x3e6   : > { %v5351_v49 = vor.u32 %v5350_v56, %v5347_v51  ;;  %v6357_v15 = vunpack.c.l.b16 %v6233_v34  ;;  %v5409_v51 = vor.u32 %v5408_v1, %v5404_v10  ;;  %v10878_v56 = vrot.slane %v6181_v27, 9  ;;  %v11403_v34 = vld [vmem:[#allocation2 + $0x18] sm:$0xff] }
 0x3e7   : > { %v5367_v16 = vsel %vm11917_vm2, %v5362_v5, %v5366_v57  ;;  %v5399_v20 = vor.u32 %v5398_v17, %v5395_v25  ;;  %v5450_v17 = vshll.u32 %v5289_v13, 16  ;;  %v6362_v1 = vunpack.c.l.b16 %v6251_v19 }
 0x3e8   : > { %v5352_v63 = vrot.slane %v5351_v49, 4  ;;  %v6388_v38 = vpack.c.b16 %v6357_v15, %v6356_v29  ;;  %v5746_v50 = vunpack.c.l.b16 %v5367_v16  ;;  %v5412_v29 = vshll.u32 %v5330_v48, 16 }
 0x3e9   : > { %v6247_v49 = vsel %vm12233_vm5, %v6245_v55, %v6246_v12  ;;  %v5400_v57 = vrot.slane %v5399_v20, 4  ;;  %v5410_v15 = vrot.slane %v5409_v51, 4  ;;  %v6244_v0 = vsel %vm12233_vm5, %v10878_v56, %v6243_v32  ;;  %v11445_v20 = vld [vmem:[#allocation2 + $0x3c] sm:$0xff] }
 0x3ea   : > { %v5357_v46 = vsel %vm11917_vm2, %v5352_v63, %v5356_v59  ;;  %6476 = vmatmul.bf16.vlgmr.msrb.gmra.mxu3 %v6388_v38  ;;  %v5391_v59 = vsel %vm11917_vm2, %v5386_v3, %v5390_v62  ;;  %v5414_v63 = vrot.slane %v5412_v29, 5  ;;  %v6361_v16 = vunpack.c.l.b16 %v6247_v49  ;;  %v11470_v62 = vld [vmem:[#allocation4 + $0x128] sm:$0xff]  ;;  %v5332_v49 = vld [vmem:[#allocation2 + $0x38] sm:$0x1] }
 0x3eb   : > { %v5745_v22 = vunpack.c.l.b16 %v5357_v46  ;;  %v5748_v45 = vunpack.c.l.b16 %v5391_v59  ;;  %v5405_v38 = vsel %vm11917_vm2, %v5400_v57, %v5404_v10  ;;  %v5430_v46 = vshrl.u32 %v5287_v23, 16  ;;  %7466 = vmatpush.bf16.msrb.mxu1 %v11470_v62  ;;  %v6183_v57 = vld [vmem:[#allocation2 + $0x30] sm:$0xe] }
 0x3ec   : > { %v5749_v11 = vunpack.c.l.b16 %v5405_v38  ;;  %v6254_v59 = vsel %vm12233_vm5, %v6252_v44, %v6253_v8  ;;  %v5444_v32 = vshll.u32 %v5288_v41, 16  ;;  %v5454_v10 = vshrl.u32 %v5289_v13, 16 }
 0x3ed   : > { %v5777_v33 = vpack.c.b16 %v5746_v50, %v5745_v22  ;;  %v5778_v5 = vpack.c.b16 %v5748_v45, %v5747_v30  ;;  %v5415_v50 = vsel %vm11917_vm2, %v5410_v15, %v5414_v63  ;;  %v6360_v22 = vunpack.c.l.b16 %v6244_v0 }
 0x3ee   : > { %6800 = vmatmul.bf16.gmra.mxu0 %v11443_v6  ;;  %v5750_v37 = vunpack.c.l.b16 %v5415_v50  ;;  %v5432_v2 = vrot.slane %v5430_v46, 4  ;;  %v6363_v30 = vunpack.c.l.b16 %v6254_v59  ;;  %v5441_v45 = vshrl.u32 %v5288_v41, 16  ;;  %v5291_v46 = vld [vmem:[#allocation2 + $0x40] sm:$0xf]  ;;  %v6184_v59 = vld [vmem:[#allocation2 + $0x3c] sm:$0xe] }
 0x3ef   : > { %5865 = vmatmul.bf16.vlgmr.msra.gmra.mxu1 %v5777_v33  ;;  %v6390_v43 = vpack.c.b16 %v6361_v16, %v6360_v22  ;;  %v5419_v33 = vrot.slane %v5417_v39, 4  ;;  %v6257_v55 = vrot.slane %v5289_v13, 5  ;;  %v5446_v56 = vrot.slane %v5444_v32, 5  ;;  %v11405_v39 = vld [vmem:[#allocation2 + $0x30] sm:$0xff]  ;;  %v11469_v13 = vld [vmem:[#allocation4 + $0x120] sm:$0xff] }
 0x3f0   : > { %v5433_v31 = vor.u32 %v5432_v2, %v5428_v14  ;;  %v5443_v51 = vrot.slane %v5441_v45, 4  ;;  %v5452_v12 = vrot.slane %v5450_v17, 5  ;;  %v5456_v29 = vrot.slane %v5454_v10, 4  ;;  %v11406_v45 = vld [vmem:[#allocation2 + $0x3c] sm:$0xff]  ;;  %7467 = vmatpush.bf16.msrb.mxu1 %v11469_v13  ;;  %v5292_v17 = vld [vmem:[#allocation2 + $0x48] sm:$0xf] }
 0x3f1   : > { %6103 = vmatmul.bf16.gmra.mxu2 %v11402_v58  ;;  %v5779_v58 = vpack.c.b16 %v5750_v37, %v5749_v11  ;;  %v5423_v3 = vor.u32 %v5422_v24, %v5419_v33  ;;  %v6259_v15 = vrot.slane %v6257_v55, 4  ;;  %v10880_v0 = vrot.slane %v6183_v57, 9  ;;  %v5293_v10 = vld [vmem:[#allocation2 + $0x4c] sm:$0xf] }
 0x3f2   : > { %v5434_v54 = vrot.slane %v5433_v31, 4  ;;  %v5447_v36 = vor.u32 %v5446_v56, %v5443_v51  ;;  %v5457_v23 = vor.u32 %v5456_v29, %v5452_v12  ;;  %v6260_v63 = vrot.slane %v5332_v49, 5 }
 0x3f3   : > { %v5424_v47 = vrot.slane %v5423_v3, 4  ;;  %v5460_v16 = vshll.u32 %v5332_v49, 16  ;;  %v6258_v22 = vsel %vm12233_vm5, %v10880_v0, %v6257_v55  ;;  %v5465_v37 = vshrl.u32 %v5290_v42, 16  ;;  %v11446_v3 = vld [vmem:[#allocation2 + $0x48] sm:$0xff] }
 0x3f4   : > { %v6261_v61 = vsel %vm12233_vm5, %v6259_v15, %v6260_v63  ;;  %v5448_v38 = vrot.slane %v5447_v36, 4  ;;  %v5458_v50 = vrot.slane %v5457_v23, 4  ;;  %v5468_v52 = vshll.u32 %v5290_v42, 16  ;;  %v11447_v36 = vld [vmem:[#allocation2 + $0x54] sm:$0xff] }
 0x3f5   : > { %v5429_v6 = vsel %vm11917_vm2, %v5424_v47, %v5428_v14  ;;  %v6365_v11 = vunpack.c.l.b16 %v6261_v61  ;;  %v5474_v24 = vshll.u32 %v5291_v46, 16  ;;  %v5478_v14 = vshrl.u32 %v5291_v46, 16  ;;  %v5334_v61 = vld [vmem:[#allocation2 + $0x50] sm:$0x1] }
 0x3f6   : > { %v5751_v48 = vunpack.c.l.b16 %v5429_v6  ;;  %v6364_v2 = vunpack.c.l.b16 %v6258_v22  ;;  %v6264_v44 = vrot.slane %v5291_v46, 5  ;;  %v5467_v31 = vrot.slane %v5465_v37, 4  ;;  %v11407_v37 = vld [vmem:[#allocation2 + $0x48] sm:$0xff] }
 0x3f7   : > { %v5470_v62 = vrot.slane %v5468_v52, 5  ;;  %v5476_v53 = vrot.slane %v5474_v24, 5  ;;  %v5480_v8 = vrot.slane %v5478_v14, 4  ;;  %v10881_v19 = vrot.slane %v6184_v59, 9  ;;  %v5294_v14 = vld [vmem:[#allocation2 + $0x54] sm:$0xf] }
 0x3f8   : > { %v6266_v47 = vrot.slane %v6264_v44, 4  ;;  %v5492_v55 = vshll.u32 %v5292_v17, 16  ;;  %v5498_v56 = vshll.u32 %v5293_v10, 16  ;;  %v6271_v15 = vrot.slane %v5293_v10, 5 }
 0x3f9   : > { %v5481_v41 = vor.u32 %v5480_v8, %v5476_v53 }
 0x3fa   : > { %6481 = vmatmul.bf16.gmra.mxu3 %v6389_v7  ;;  %v5438_v7 = vrot.slane %v5436_v40, 5  ;;  %v5494_v0 = vrot.slane %v5492_v55, 5  ;;  %v5500_v63 = vrot.slane %v5498_v56, 5  ;;  %v5297_v56 = vld [vmem:[#allocation2 + $0x64] sm:$0xf] }
 0x3fc   : > { %v5439_v25 = vsel %vm11917_vm2, %v5434_v54, %v5438_v7  ;;  %v5471_v54 = vor.u32 %v5470_v62, %v5467_v31 }
 0x3fd   : > { %v5752_v27 = vunpack.c.l.b16 %v5439_v25  ;;  %v5482_v25 = vrot.slane %v5481_v41, 4  ;;  %v11448_v41 = vld [vmem:[#allocation2 + $0x60] sm:$0xff] }
 0x3fe   : > { %6805 = vmatmul.bf16.gmra.mxu0 %v11444_v21  ;;  %v5453_v21 = vsel %vm11917_vm2, %v5448_v38, %v5452_v12  ;;  %v5472_v6 = vrot.slane %v5471_v54, 4  ;;  %v5502_v12 = vshrl.u32 %v5293_v10, 16 }
 0x3ff   : > { %5870 = vmatmul.bf16.gmra.mxu1 %v5778_v5  ;;  %v6391_v5 = vpack.c.b16 %v6363_v30, %v6362_v1  ;;  %v5753_v28 = vunpack.c.l.b16 %v5453_v21  ;;  %v6265_v1 = vsel %vm12233_vm5, %v10881_v19, %v6264_v44  ;;  %v5513_v44 = vshrl.u32 %v5294_v14, 16 }
 0x400   : > { %v6366_v29 = vunpack.c.l.b16 %v6265_v1 }
 0x401   : > { %6108 = vmatmul.bf16.gmra.mxu2 %v11403_v34  ;;  %v5780_v34 = vpack.c.b16 %v5752_v27, %v5751_v48  ;;  %v5489_v27 = vshrl.u32 %v5292_v17, 16 }
 0x403   : > { %v5491_v23 = vrot.slane %v5489_v27, 4 }
 0x405   : > { %v5495_v46 = vor.u32 %v5494_v0, %v5491_v23  ;;  %v5546_v23 = vshll.u32 %v5297_v56, 16  ;;  %v5550_v0 = vshrl.u32 %v5297_v56, 16 }
 0x40a   : > { %6486 = vmatmul.bf16.gmra.mxu3 %v6390_v43  ;;  %v5462_v43 = vrot.slane %v5460_v16, 5  ;;  %v5504_v16 = vrot.slane %v5502_v12, 4 }
 0x40c   : > { %v5463_v33 = vsel %vm11917_vm2, %v5458_v50, %v5462_v43  ;;  %v6273_v50 = vrot.slane %v6271_v15, 4  ;;  %v5505_v22 = vor.u32 %v5504_v16, %v5500_v63  ;;  %v6274_v43 = vrot.slane %v5334_v61, 5  ;;  %v11468_v16 = vld [vmem:[#allocation4 + $0x118] sm:$0xff] }
 0x40d   : > { %v5754_v60 = vunpack.c.l.b16 %v5463_v33  ;;  %v5496_v33 = vrot.slane %v5495_v46, 4  ;;  %7468 = vmatpush.bf16.msrb.mxu1 %v11468_v16  ;;  %v11449_v46 = vld [vmem:[#allocation2 + $0x6c] sm:$0xff] }
 0x40e   : > { %6810 = vmatmul.bf16.gmra.mxu0 %v11445_v20  ;;  %v5477_v20 = vsel %vm11917_vm2, %v5472_v6, %v5476_v53  ;;  %v6275_v52 = vsel %vm12233_vm5, %v6273_v50, %v6274_v43  ;;  %v5506_v24 = vrot.slane %v5505_v22, 4 }
 0x40f   : > { %5875 = vmatmul.bf16.gmra.mxu1 %v5779_v58  ;;  %v6392_v58 = vpack.c.b16 %v6365_v11, %v6364_v2  ;;  %v5781_v40 = vpack.c.b16 %v5754_v60, %v5753_v28  ;;  %v5755_v49 = vunpack.c.l.b16 %v5477_v20  ;;  %v5508_v11 = vshll.u32 %v5334_v61, 16  ;;  %v5295_v2 = vld [vmem:[#allocation2 + $0x58] sm:$0xf] }
 0x410   : > { %v5501_v31 = vsel %vm11917_vm2, %v5496_v33, %v5500_v63  ;;  %v5522_v53 = vshll.u32 %v5295_v2, 16  ;;  %v5526_v8 = vshrl.u32 %v5295_v2, 16  ;;  %v6278_v13 = vrot.slane %v5295_v2, 5  ;;  %v6187_v33 = vld [vmem:[#allocation2 + $0x60] sm:$0xe] }
 0x411   : > { %6113 = vmatmul.bf16.gmra.mxu2 %v11404_v26  ;;  %v5333_v26 = vld [vmem:[#allocation2 + $0x44] sm:$0x1]  ;;  %v5510_v28 = vrot.slane %v5508_v11, 5  ;;  %v5548_v11 = vrot.slane %v5546_v23, 5 }
 0x412   : > { %v6267_v7 = vrot.slane %v5333_v26, 5  ;;  %v5484_v30 = vshll.u32 %v5333_v26, 16  ;;  %v5757_v26 = vunpack.c.l.b16 %v5501_v31  ;;  %v5524_v19 = vrot.slane %v5522_v53, 5 }
 0x413   : > { %v5511_v62 = vsel %vm11917_vm2, %v5506_v24, %v5510_v28 }
 0x414   : > { %v6268_v32 = vsel %vm12233_vm5, %v6266_v47, %v6267_v7  ;;  %v5758_v59 = vunpack.c.l.b16 %v5511_v62  ;;  %v5515_v47 = vrot.slane %v5513_v44, 4  ;;  %v5528_v7 = vrot.slane %v5526_v8, 4  ;;  %v5298_v8 = vld [vmem:[#allocation2 + $0x6c] sm:$0xf] }
 0x415   : > { %v6367_v48 = vunpack.c.l.b16 %v6268_v32  ;;  %v6186_v32 = vld [vmem:[#allocation2 + $0x54] sm:$0xe] }
 0x416   : > { %v5529_v17 = vor.u32 %v5528_v7, %v5524_v19  ;;  %v10883_v10 = vrot.slane %v6186_v32, 9 }
 0x418   : > { %v5530_v20 = vrot.slane %v5529_v17, 4  ;;  %v6279_v12 = vsel %vm12233_vm5, %v10883_v10, %v6278_v13 }
 0x419   : > { %v6370_v63 = vunpack.c.l.b16 %v6279_v12 }
 0x41a   : > { %6491 = vmatmul.bf16.gmra.mxu3 %v6391_v5  ;;  %v5486_v5 = vrot.slane %v5484_v30, 5  ;;  %v5783_v30 = vpack.c.b16 %v5758_v59, %v5757_v26 }
 0x41c   : > { %v5487_v51 = vsel %vm11917_vm2, %v5482_v25, %v5486_v5  ;;  %v6280_v25 = vrot.slane %v6278_v13, 4 }
 0x41d   : > { %v5756_v57 = vunpack.c.l.b16 %v5487_v51  ;;  %v5296_v51 = vld [vmem:[#allocation2 + $0x60] sm:$0xf] }
 0x41e   : > { %6815 = vmatmul.bf16.gmra.mxu0 %v11446_v3  ;;  %v5516_v3 = vshll.u32 %v5294_v14, 16 }
 0x41f   : > { %5880 = vmatmul.bf16.gmra.mxu1 %v5780_v34  ;;  %v6393_v34 = vpack.c.b16 %v6367_v48, %v6366_v29  ;;  %v5782_v38 = vpack.c.b16 %v5756_v57, %v5755_v49  ;;  %v11408_v48 = vld [vmem:[#allocation2 + $0x54] sm:$0xff]  ;;  %v5537_v57 = vshrl.u32 %v5296_v51, 16 }
 0x420   : > { %v5518_v54 = vrot.slane %v5516_v3, 5  ;;  %v11409_v3 = vld [vmem:[#allocation2 + $0x60] sm:$0xff] }
 0x421   : > { %6118 = vmatmul.bf16.gmra.mxu2 %v11405_v39  ;;  %v6185_v39 = vld [vmem:[#allocation2 + $0x48] sm:$0xe]  ;;  %v5539_v22 = vrot.slane %v5537_v57, 4 }
 0x422   : > { %v10882_v42 = vrot.slane %v6185_v39, 9  ;;  %v5519_v6 = vor.u32 %v5518_v54, %v5515_v47  ;;  %v5561_v54 = vshrl.u32 %v5298_v8, 16 }
 0x424   : > { %v6272_v21 = vsel %vm12233_vm5, %v10882_v42, %v6271_v15  ;;  %v5520_v27 = vrot.slane %v5519_v6, 4  ;;  %v6285_v42 = vrot.slane %v5297_v56, 5 }
 0x425   : > { %v6368_v60 = vunpack.c.l.b16 %v6272_v21  ;;  %v5336_v21 = vld [vmem:[#allocation2 + $0x68] sm:$0x1] }
 0x426   : > { %v5525_v49 = vsel %vm11917_vm2, %v5520_v27, %v5524_v19  ;;  %v6287_v24 = vrot.slane %v6285_v42, 4  ;;  %v6288_v28 = vrot.slane %v5336_v21, 5 }
 0x428   : > { %v6289_v31 = vsel %vm12233_vm5, %v6287_v24, %v6288_v28 }
 0x429   : > { %v6373_v47 = vunpack.c.l.b16 %v6289_v31 }
 0x42a   : > { %6496 = vmatmul.bf16.gmra.mxu3 %v6392_v58  ;;  %v6369_v58 = vunpack.c.l.b16 %v6275_v52 }
 0x42e   : > { %6820 = vmatmul.bf16.gmra.mxu0 %v11447_v36  ;;  %v5540_v36 = vshll.u32 %v5296_v51, 16 }
 0x42f   : > { %5885 = vmatmul.bf16.gmra.mxu1 %v5781_v40  ;;  %v6394_v40 = vpack.c.b16 %v6369_v58, %v6368_v60  ;;  %v10884_v58 = vrot.slane %v6187_v33, 9  ;;  %v5556_v60 = vshll.u32 %v5336_v21, 16 }
 0x430   : > { %v5542_v43 = vrot.slane %v5540_v36, 5 }
 0x431   : > { %6123 = vmatmul.bf16.gmra.mxu2 %v11406_v45  ;;  %v5335_v45 = vld [vmem:[#allocation2 + $0x5c] sm:$0x1]  ;;  %v6286_v26 = vsel %vm12233_vm5, %v10884_v58, %v6285_v42  ;;  %v5558_v59 = vrot.slane %v5556_v60, 5 }
 0x432   : > { %v6281_v1 = vrot.slane %v5335_v45, 5  ;;  %v5532_v5 = vshll.u32 %v5335_v45, 16  ;;  %v5543_v14 = vor.u32 %v5542_v43, %v5539_v22  ;;  %v6372_v32 = vunpack.c.l.b16 %v6286_v26 }
 0x434   : > { %v6282_v55 = vsel %vm12233_vm5, %v6280_v25, %v6281_v1  ;;  %v5534_v29 = vrot.slane %v5532_v5, 5  ;;  %v5544_v62 = vrot.slane %v5543_v14, 4  ;;  %v6396_v25 = vpack.c.b16 %v6373_v47, %v6372_v32  ;;  %v11450_v5 = vld [vmem:[#allocation2 + $0x78] sm:$0xff] }
 0x436   : > { %v5535_v15 = vsel %vm11917_vm2, %v5530_v20, %v5534_v29  ;;  %v5549_v19 = vsel %vm11917_vm2, %v5544_v62, %v5548_v11  ;;  %v5337_v29 = vld [vmem:[#allocation2 + $0x74] sm:$0x1] }
 0x437   : > { %v5760_v50 = vunpack.c.l.b16 %v5535_v15  ;;  %v5761_v17 = vunpack.c.l.b16 %v5549_v19  ;;  %v11451_v19 = vld [vmem:[#allocation2 + $0x84] sm:$0xff] }
 0x43a   : > { %6501 = vmatmul.bf16.gmra.mxu3 %v6393_v34  ;;  %v6371_v34 = vunpack.c.l.b16 %v6282_v55 }
 0x43c   : > { %v6395_v61 = vpack.c.b16 %v6371_v34, %v6370_v63  ;;  %v6188_v34 = vld [vmem:[#allocation2 + $0x6c] sm:$0xe] }
 0x43d   : > { %v11467_v63 = vld [vmem:[#allocation4 + $0x110] sm:$0xff]  ;;  %v10885_v16 = vrot.slane %v6188_v34, 9 }
 0x43e   : > { %6825 = vmatmul.bf16.gmra.mxu0 %v11448_v41  ;;  %v5564_v41 = vshll.u32 %v5298_v8, 16  ;;  %7469 = vmatpush.bf16.msrb.mxu1 %v11467_v63  ;;  %v5302_v63 = vld [vmem:[#allocation2 + $0x84] sm:$0xf] }
 0x43f   : > { %5890 = vmatmul.bf16.gmra.mxu1 %v5782_v38  ;;  %v5759_v38 = vunpack.c.l.b16 %v5525_v49 }
 0x440   : > { %v5566_v27 = vrot.slane %v5564_v41, 5 }
 0x441   : > { %6128 = vmatmul.bf16.gmra.mxu2 %v11407_v37  ;;  %v5552_v37 = vrot.slane %v5550_v0, 4  ;;  %v5784_v52 = vpack.c.b16 %v5760_v50, %v5759_v38  ;;  %v5580_v38 = vshll.u32 %v5337_v29, 16 }
 0x443   : > { %v5553_v2 = vor.u32 %v5552_v37, %v5548_v11  ;;  %v5300_v37 = vld [vmem:[#allocation2 + $0x78] sm:$0xf]  ;;  %v5582_v24 = vrot.slane %v5580_v38, 5 }
 0x444   : > { %v5585_v58 = vshrl.u32 %v5300_v37, 16 }
 0x445   : > { %v5554_v53 = vrot.slane %v5553_v2, 4 }
 0x447   : > { %v5559_v7 = vsel %vm11917_vm2, %v5554_v53, %v5558_v59 }
 0x448   : > { %v5762_v10 = vunpack.c.l.b16 %v5559_v7  ;;  %v5587_v7 = vrot.slane %v5585_v58, 4 }
 0x44a   : > { %6506 = vmatmul.bf16.gmra.mxu3 %v6394_v40  ;;  %v5299_v40 = vld [vmem:[#allocation2 + $0x70] sm:$0xf]  ;;  %v5785_v12 = vpack.c.b16 %v5762_v10, %v5761_v17  ;;  %v5338_v10 = vld [vmem:[#allocation2 + $0x80] sm:$0x1] }
 0x44b   : > { %v14174_v39 = vpop.f32.mrf.mxu0  ;;  %v5574_v45 = vshrl.u32 %v5299_v40, 16  ;;  %v6292_v1 = vrot.slane %v5299_v40, 5 }
 0x44d   : > { %v5576_v20 = vrot.slane %v5574_v45, 4  ;;  %v6294_v15 = vrot.slane %v6292_v1, 4  ;;  %v6293_v33 = vsel %vm12233_vm5, %v10885_v16, %v6292_v1  ;;  %v5303_v16 = vld [vmem:[#allocation2 + $0x88] sm:$0xf] }
 0x44e   : > { %6830 = vmatmul.bf16.gmra.mxu0 %v11449_v46  ;;  %v11410_v46 = vld [vmem:[#allocation2 + $0x6c] sm:$0xff] }
 0x44f   : > { %5895 = vmatmul.bf16.gmra.mxu1 %v5783_v30  ;;  %v5570_v30 = vshll.u32 %v5299_v40, 16  ;;  %v6374_v40 = vunpack.c.l.b16 %v6293_v33 }
 0x451   : > { %6133 = vmatmul.bf16.gmra.mxu2 %v11408_v48  ;;  %v5563_v48 = vrot.slane %v5561_v54, 4  ;;  %v5572_v55 = vrot.slane %v5570_v30, 5 }
 0x453   : > { %v14176_v44 = vpop.f32.mrf.mxu0  ;;  %v5567_v36 = vor.u32 %v5566_v27, %v5563_v48  ;;  %v5577_v23 = vor.u32 %v5576_v20, %v5572_v55 }
 0x455   : > { %v5568_v43 = vrot.slane %v5567_v36, 4  ;;  %v5578_v11 = vrot.slane %v5577_v23, 4 }
 0x457   : > { %v5583_v31 = vsel %vm11917_vm2, %v5578_v11, %v5582_v24  ;;  %v5609_v11 = vshrl.u32 %v5302_v63, 16  ;;  %v5618_v24 = vshll.u32 %v5303_v16, 16 }
 0x45a   : > { %6511 = vmatmul.bf16.gmra.mxu3 %v6395_v61  ;;  %v6295_v61 = vrot.slane %v5337_v29, 5  ;;  %v5604_v29 = vshll.u32 %v5338_v10, 16 }
 0x45b   : > { %v14186_v6 = vpop.f32.mrf.mxu0 }
 0x45c   : > { %v6296_v22 = vsel %vm12233_vm5, %v6294_v15, %v6295_v61 }
 0x45d   : > { %v6375_v2 = vunpack.c.l.b16 %v6296_v22 }
 0x45e   : > { %6835 = vmatmul.bf16.gmra.mxu0 %v11450_v5 }
 0x45f   : > { %5900 = vmatmul.bf16.gmra.mxu1 %v5784_v52  ;;  %v5301_v52 = vld [vmem:[#allocation2 + $0x7c] sm:$0xf]  ;;  %v6397_v54 = vpack.c.b16 %v6375_v2, %v6374_v40  ;;  %v5620_v40 = vrot.slane %v5618_v24, 5 }
 0x460   : > { %v5594_v62 = vshll.u32 %v5301_v52, 16  ;;  %v5598_v53 = vshrl.u32 %v5301_v52, 16  ;;  %v6299_v26 = vrot.slane %v5301_v52, 5 }
 0x461   : > { %6138 = vmatmul.bf16.gmra.mxu2 %v11409_v3  ;;  %v5573_v3 = vsel %vm11917_vm2, %v5568_v43, %v5572_v55 }
 0x462   : > { %v5763_v41 = vunpack.c.l.b16 %v5573_v3  ;;  %v5596_v45 = vrot.slane %v5594_v62, 5  ;;  %v5600_v32 = vrot.slane %v5598_v53, 4  ;;  %v6301_v48 = vrot.slane %v6299_v26, 4  ;;  %v11452_v62 = vld [vmem:[#allocation2 + $0x90] sm:$0xff] }
 0x463   : > { %v14188_v50 = vpop.f32.mrf.mxu0  ;;  %v5611_v53 = vrot.slane %v5609_v11, 4 }
 0x464   : > { %v6099_v13 = vpop.f32.mrf.mxu2 }
 0x46a   : > { %6516 = vmatmul.bf16.gmra.mxu3 %v6396_v25  ;;  %v6189_v25 = vld [vmem:[#allocation2 + $0x78] sm:$0xe] }
 0x46b   : > { %v14201_v59 = vpop.f32.mrf.mxu0 }
 0x46c   : > { %v5866_v51 = vpop.f32.mrf.mxu1  ;;  %v6101_v57 = vpop.f32.mrf.mxu2 }
 0x46d   : > { %v6100_v56 = vadd.f32 %v6099_v13, %v5866_v51  ;;  %v6477_v49 = vpop.f32.mrf.mxu3  ;;  %v5764_v13 = vunpack.c.l.b16 %v5583_v31  ;;  %v5601_v51 = vor.u32 %v5600_v32, %v5596_v45  ;;  %v6306_v31 = vrot.slane %v5303_v16, 5 }
 0x46e   : > { %6840 = vmatmul.bf16.gmra.mxu0 %v11451_v19 }
 0x46f   : > { %v6557_v0 = vadd.f32 %v6477_v49, %v6100_v56  ;;  %5905 = vmatmul.bf16.gmra.mxu1 %v5785_v12  ;;  %v5786_v5 = vpack.c.b16 %v5764_v13, %v5763_v41  ;;  %v6302_v12 = vrot.slane %v5338_v10, 5  ;;  %v5339_v13 = vld [vmem:[#allocation2 + $0x8c] sm:$0x1] }
 0x471   : > { %v14191_v42 = vadd.f32 %v14174_v39, %v6557_v0  ;;  %6143 = vmatmul.bf16.gmra.mxu2 %v11410_v46  ;;  %v5588_v39 = vshll.u32 %v5300_v37, 16  ;;  %v6303_v15 = vsel %vm12233_vm5, %v6301_v48, %v6302_v12  ;;  %v5602_v0 = vrot.slane %v5601_v51, 4  ;;  %v5304_v51 = vld [vmem:[#allocation2 + $0x90] sm:$0xf] }
 0x472   : > { %v6377_v38 = vunpack.c.l.b16 %v6303_v15  ;;  %v5606_v46 = vrot.slane %v5604_v29, 5  ;;  %v5628_v48 = vshll.u32 %v5339_v13, 16 }
 0x473   : > { %v5590_v30 = vrot.slane %v5588_v39, 5  ;;  %v14206_v34 = vpop.f32.mrf.mxu0 }
 0x474   : > { %v5868_v21 = vpop.f32.mrf.mxu1  ;;  %v6104_v60 = vpop.f32.mrf.mxu2  ;;  %v5607_v33 = vsel %vm11917_vm2, %v5602_v0, %v5606_v46  ;;  %v5633_v0 = vshrl.u32 %v5304_v51, 16 }
 0x475   : > { %v6102_v14 = vadd.f32 %v6101_v57, %v5868_v21  ;;  %v6479_v28 = vpop.f32.mrf.mxu3  ;;  %v5591_v20 = vor.u32 %v5590_v30, %v5587_v7  ;;  %v11411_v57 = vld [vmem:[#allocation2 + $0x78] sm:$0xff]  ;;  %v5766_v3 = vunpack.c.l.b16 %v5607_v33  ;;  %v6308_v30 = vrot.slane %v6306_v31, 4 }
 0x477   : > { %v6558_v8 = vadd.f32 %v6479_v28, %v6102_v14  ;;  %v5592_v23 = vrot.slane %v5591_v20, 4  ;;  %v5622_v14 = vshrl.u32 %v5303_v16, 16  ;;  %v5636_v16 = vshll.u32 %v5304_v51, 16 }
 0x479   : > { %v14204_v47 = vadd.f32 %v14176_v44, %v6558_v8  ;;  %v10886_v44 = vrot.slane %v6189_v25, 9  ;;  %v5597_v21 = vsel %vm11917_vm2, %v5592_v23, %v5596_v45  ;;  %v5630_v23 = vrot.slane %v5628_v48, 5 }
 0x47a   : > { %6521 = vmatmul.bf16.gmra.mxu3 %v6397_v54  ;;  %v6190_v54 = vld [vmem:[#allocation2 + $0x84] sm:$0xe] }
 0x47b   : > { %v6300_v36 = vsel %vm12233_vm5, %v10886_v44, %v6299_v26  ;;  %v14219_v39 = vpop.f32.mrf.mxu0  ;;  %v5624_v26 = vrot.slane %v5622_v14, 4  ;;  %v11412_v44 = vld [vmem:[#allocation2 + $0x84] sm:$0xff] }
 0x47c   : > { %v5871_v17 = vpop.f32.mrf.mxu1  ;;  %v6106_v55 = vpop.f32.mrf.mxu2  ;;  %v6376_v43 = vunpack.c.l.b16 %v6300_v36 }
 0x47d   : > { %v6105_v1 = vadd.f32 %v6104_v60, %v5871_v17  ;;  %v6482_v27 = vpop.f32.mrf.mxu3  ;;  %v5765_v60 = vunpack.c.l.b16 %v5597_v21  ;;  %v5625_v17 = vor.u32 %v5624_v26, %v5620_v40  ;;  %v5635_v21 = vrot.slane %v5633_v0, 4 }
 0x47e   : > { %v6398_v58 = vpack.c.b16 %v6377_v38, %v6376_v43  ;;  %6845 = vmatmul.bf16.gmra.mxu0 %v11452_v62  ;;  %v6191_v62 = vld [vmem:[#allocation2 + $0x90] sm:$0xe] }
 0x47f   : > { %v6559_v56 = vadd.f32 %v6482_v27, %v6105_v1  ;;  %5910 = vmatmul.bf16.gmra.mxu1 %v5786_v5  ;;  %v5787_v7 = vpack.c.b16 %v5766_v3, %v5765_v60  ;;  %v6309_v1 = vrot.slane %v5339_v13, 5  ;;  %v11466_v5 = vld [vmem:[#allocation4 + $0x108] sm:$0xff]  ;;  %v5626_v29 = vrot.slane %v5625_v17, 4  ;;  %v11413_v17 = vld [vmem:[#allocation2 + $0x90] sm:$0xff] }
 0x480   : > { %7470 = vmatpush.bf16.msrb.mxu1 %v11466_v5  ;;  %v11453_v60 = vld [vmem:[#allocation2 + $0x9c] sm:$0xff] }
 0x481   : > { %v14209_v49 = vadd.f32 %v14186_v6, %v6559_v56  ;;  %6148 = vmatmul.bf16.gmra.mxu2 %v11411_v57  ;;  %v5612_v6 = vshll.u32 %v5302_v63, 16  ;;  %v6310_v20 = vsel %vm12233_vm5, %v6308_v30, %v6309_v1  ;;  %v5305_v57 = vld [vmem:[#allocation2 + $0x94] sm:$0xf] }
 0x482   : > { %v6379_v36 = vunpack.c.l.b16 %v6310_v20  ;;  %v5642_v43 = vshll.u32 %v5305_v57, 16  ;;  %v5646_v11 = vshrl.u32 %v5305_v57, 16  ;;  %v14251_v20 = vld [vmem:[#allocation2 + $0xa0] sm:$0xf] }
 0x483   : > { %v5614_v8 = vrot.slane %v5612_v6, 5  ;;  %v14224_v27 = vpop.f32.mrf.mxu0 }
 0x484   : > { %v5873_v61 = vpop.f32.mrf.mxu1  ;;  %v6109_v52 = vpop.f32.mrf.mxu2  ;;  %v5644_v3 = vrot.slane %v5642_v43, 5 }
 0x485   : > { %v6107_v22 = vadd.f32 %v6106_v55, %v5873_v61  ;;  %v6484_v37 = vpop.f32.mrf.mxu3  ;;  %v5615_v25 = vor.u32 %v5614_v8, %v5611_v53  ;;  %v5340_v8 = vld [vmem:[#allocation2 + $0x98] sm:$0x1] }
 0x487   : > { %v6560_v2 = vadd.f32 %v6484_v37, %v6107_v22  ;;  %v5616_v12 = vrot.slane %v5615_v25, 4  ;;  %v5631_v22 = vsel %vm11917_vm2, %v5626_v29, %v5630_v23 }
 0x489   : > { %v14222_v28 = vadd.f32 %v14188_v50, %v6560_v2  ;;  %v10887_v50 = vrot.slane %v6190_v54, 9  ;;  %v5621_v46 = vsel %vm11917_vm2, %v5616_v12, %v5620_v40  ;;  %v5768_v2 = vunpack.c.l.b16 %v5631_v22 }
 0x48a   : > { %6526 = vmatmul.bf16.gmra.mxu3 %v6398_v58  ;;  %v5767_v14 = vunpack.c.l.b16 %v5621_v46  ;;  %v5638_v58 = vrot.slane %v5636_v16, 5  ;;  %v5666_v16 = vshll.u32 %v14251_v20, 16 }
 0x48b   : > { %v6307_v56 = vsel %vm12233_vm5, %v10887_v50, %v6306_v31  ;;  %v14237_v33 = vpop.f32.mrf.mxu0  ;;  %v5648_v31 = vrot.slane %v5646_v11, 4 }
 0x48c   : > { %v5876_v41 = vpop.f32.mrf.mxu1  ;;  %v6111_v32 = vpop.f32.mrf.mxu2  ;;  %v5788_v26 = vpack.c.b16 %v5768_v2, %v5767_v14 }
 0x48d   : > { %v6110_v19 = vadd.f32 %v6109_v52, %v5876_v41  ;;  %v6487_v45 = vpop.f32.mrf.mxu3  ;;  %v6313_v52 = vrot.slane %v5305_v57, 5  ;;  %v5639_v41 = vor.u32 %v5638_v58, %v5635_v21  ;;  %v11479_v21 = vld [vmem:[#allocation4 + $0x170] sm:$0xff]  ;;  %v14265_v58 = vrot.slane %v5666_v16, 5 }
 0x48e   : > { %6850 = vmatmul.bf16.gmra.mxu0 %v11453_v60 }
 0x48f   : > { %v6561_v10 = vadd.f32 %v6487_v45, %v6110_v19  ;;  %5915 = vmatmul.bf16.gmra.mxu1 %v5787_v7  ;;  %v6315_v54 = vrot.slane %v6313_v52, 4  ;;  %v10888_v7 = vrot.slane %v6191_v62, 9  ;;  %v6316_v45 = vrot.slane %v5340_v8, 5 }
 0x490   : > { %v5640_v1 = vrot.slane %v5639_v41, 4 }
 0x491   : > { %v14227_v55 = vadd.f32 %v14201_v59, %v6561_v10  ;;  %6153 = vmatmul.bf16.gmra.mxu2 %v11412_v44  ;;  %v6378_v59 = vunpack.c.l.b16 %v6307_v56  ;;  %v6317_v10 = vsel %vm12233_vm5, %v6315_v54, %v6316_v45  ;;  %v6314_v5 = vsel %vm12233_vm5, %v10888_v7, %v6313_v52  ;;  %v5306_v44 = vld [vmem:[#allocation2 + $0x9c] sm:$0xf]  ;;  %v11454_v52 = vld [vmem:[#allocation2 + $0xa8] sm:$0xff] }
 0x492   : > { %v6381_v56 = vunpack.c.l.b16 %v6317_v10  ;;  %v6380_v57 = vunpack.c.l.b16 %v6314_v5  ;;  %v11414_v5 = vld [vmem:[#allocation2 + $0x9c] sm:$0xff] }
 0x493   : > { %v6399_v37 = vpack.c.b16 %v6379_v36, %v6378_v59  ;;  %v14242_v50 = vpop.f32.mrf.mxu0  ;;  %v11480_v36 = vld [vmem:[#allocation4 + $0x178] sm:$0xff]  ;;  %v5660_v59 = vshll.u32 %v5306_v44, 16 }
 0x494   : > { %v5878_v15 = vpop.f32.mrf.mxu1  ;;  %v6114_v38 = vpop.f32.mrf.mxu2  ;;  %7890 = vmatpush.bf16.msra.mxu2 %v11480_v36  ;;  %v6400_v46 = vpack.c.b16 %v6381_v56, %v6380_v57 }
 0x495   : > { %v6112_v63 = vadd.f32 %v6111_v32, %v5878_v15  ;;  %v6489_v61 = vpop.f32.mrf.mxu3  ;;  %v5652_v32 = vshll.u32 %v5340_v8, 16  ;;  %v5657_v15 = vshrl.u32 %v5306_v44, 16  ;;  %v5662_v2 = vrot.slane %v5660_v59, 5  ;;  %v11504_v8 = vld [vmem:[#allocation4 + $0x1b8] sm:$0xff]  ;;  %v11477_v44 = vld [vmem:[#allocation4 + $0x160] sm:$0xff] }
 0x496   : > { %8205 = vmatpush.bf16.msra.mxu3 %v11504_v8  ;;  %v11512_v59 = vld [vmem:[#allocation4 + $0x1f8] sm:$0xff] }
 0x497   : > { %v6562_v6 = vadd.f32 %v6489_v61, %v6112_v63  ;;  %v5654_v12 = vrot.slane %v5652_v32, 5  ;;  %v5670_v61 = vshrl.u32 %v14251_v20, 16  ;;  %v5659_v14 = vrot.slane %v5657_v15, 4  ;;  %8887 = vmatpush.bf16.msra.mxu0 %v11512_v59  ;;  %v11455_v8 = vld [vmem:[#allocation2 + $0xb4] sm:$0xff] }
 0x498   : > { %7891 = vmatpush.bf16.msra.mxu2 %v11479_v21  ;;  %v6193_v21 = vld [vmem:[#allocation2 + $0xa8] sm:$0xe] }
 0x499   : > { %v14240_v24 = vadd.f32 %v14206_v34, %v6562_v6  ;;  %v5649_v34 = vor.u32 %v5648_v31, %v5644_v3  ;;  %v5672_v60 = vrot.slane %v5670_v61, 4  ;;  %v5341_v31 = vld [vmem:[#allocation2 + $0xa4] sm:$0x1] }
 0x49a   : > { %6531 = vmatmul.bf16.gmra.mxu3 %v6399_v37  ;;  %v6320_v37 = vrot.slane %v14251_v20, 5  ;;  %v6323_v32 = vrot.slane %v5341_v31, 5 }
 0x49b   : > { %v5650_v48 = vrot.slane %v5649_v34, 4  ;;  %v14259_v22 = vpop.f32.mrf.mxu0  ;;  %v11465_v34 = vld [vmem:[#allocation4 + $0x100] sm:$0xff] }
 0x49c   : > { %v5881_v53 = vpop.f32.mrf.mxu1  ;;  %v6116_v19 = vpop.f32.mrf.mxu2  ;;  %v6322_v41 = vrot.slane %v6320_v37, 4  ;;  %7471 = vmatpush.bf16.msrb.mxu1 %v11465_v34 }
 0x49d   : > { %v6115_v40 = vadd.f32 %v6114_v38, %v5881_v53  ;;  %v6492_v13 = vpop.f32.mrf.mxu3  ;;  %v5655_v63 = vsel %vm11917_vm2, %v5650_v48, %v5654_v12  ;;  %v5308_v48 = vld [vmem:[#allocation2 + $0xa8] sm:$0xf]  ;;  %v14275_v12 = vld [vmem:[#allocation2 + $0xac] sm:$0xf] }
 0x49e   : > { %v5770_v6 = vunpack.c.l.b16 %v5655_v63  ;;  %6855 = vmatmul.bf16.gmra.mxu0 %v11454_v52  ;;  %v6324_v20 = vsel %vm12233_vm5, %v6322_v41, %v6323_v32  ;;  %v5684_v15 = vshll.u32 %v5308_v48, 16  ;;  %v11476_v63 = vld [vmem:[#allocation4 + $0x158] sm:$0xff] }
 0x49f   : > { %v6563_v30 = vadd.f32 %v6492_v13, %v6115_v40  ;;  %5920 = vmatmul.bf16.gmra.mxu1 %v5788_v26  ;;  %v11478_v40 = vld [vmem:[#allocation4 + $0x168] sm:$0xff]  ;;  %v5663_v13 = vor.u32 %v5662_v2, %v5659_v14  ;;  %v6327_v14 = vrot.slane %v14275_v12, 5  ;;  %v11500_v32 = vld [vmem:[#allocation4 + $0x198] sm:$0xff] }
 0x4a0   : > { %7892 = vmatpush.bf16.msra.mxu2 %v11478_v40  ;;  %v11475_v40 = vld [vmem:[#allocation4 + $0x150] sm:$0xff] }
 0x4a1   : > { %v14245_v25 = vadd.f32 %v14219_v39, %v6563_v30  ;;  %6158 = vmatmul.bf16.gmra.mxu2 %v11413_v17  ;;  %v5645_v39 = vsel %vm11917_vm2, %v5640_v1, %v5644_v3  ;;  %v11503_v30 = vld [vmem:[#allocation4 + $0x1b0] sm:$0xff]  ;;  %v5676_v17 = vshll.u32 %v5341_v31, 16  ;;  %v6329_v34 = vrot.slane %v6327_v14, 4 }
 0x4a2   : > { %v5769_v11 = vunpack.c.l.b16 %v5645_v39  ;;  %8206 = vmatpush.bf16.msra.mxu3 %v11503_v30 }
 0x4a3   : > { %v14268_v10 = vpop.f32.mrf.mxu0  ;;  %v5678_v39 = vrot.slane %v5676_v17, 5  ;;  %v11474_v17 = vld [vmem:[#allocation4 + $0x148] sm:$0xff] }
 0x4a4   : > { %v5883_v51 = vpop.f32.mrf.mxu1  ;;  %v6119_v0 = vpop.f32.mrf.mxu2  ;;  %v5789_v53 = vpack.c.b16 %v5770_v6, %v5769_v11  ;;  %7893 = vmatpush.bf16.msra.mxu2 %v11477_v44  ;;  %v5690_v11 = vshll.u32 %v14275_v12, 16  ;;  %v5694_v6 = vshrl.u32 %v14275_v12, 16 }
 0x4a5   : > { %v6117_v29 = vadd.f32 %v6116_v19, %v5883_v51  ;;  %v6494_v23 = vpop.f32.mrf.mxu3  ;;  %v5673_v19 = vor.u32 %v5672_v60, %v14265_v58  ;;  %v5664_v51 = vrot.slane %v5663_v13, 4  ;;  %v5686_v60 = vrot.slane %v5684_v15, 5  ;;  %v5342_v13 = vld [vmem:[#allocation2 + $0xb0] sm:$0x1] }
 0x4a6   : > { %v5696_v41 = vrot.slane %v5694_v6, 4 }
 0x4a7   : > { %v6564_v38 = vadd.f32 %v6494_v23, %v6117_v29  ;;  %v5674_v56 = vrot.slane %v5673_v19, 4  ;;  %v6383_v23 = vunpack.c.l.b16 %v6324_v20  ;;  %v6330_v20 = vrot.slane %v5342_v13, 5 }
 0x4a8   : > { %7894 = vmatpush.bf16.msra.mxu2 %v11476_v63  ;;  %v11499_v63 = vld [vmem:[#allocation4 + $0x190] sm:$0xff] }
 0x4a9   : > { %v14262_v43 = vadd.f32 %v14224_v27, %v6564_v38  ;;  %v6192_v27 = vld [vmem:[#allocation2 + $0x9c] sm:$0xe]  ;;  %v5669_v38 = vsel %vm11917_vm2, %v5664_v51, %v14265_v58 }
 0x4aa   : > { %6536 = vmatmul.bf16.gmra.mxu3 %v6400_v46  ;;  %v10889_v45 = vrot.slane %v6192_v27, 9  ;;  %v5679_v46 = vsel %vm11917_vm2, %v5674_v56, %v5678_v39  ;;  %v11501_v58 = vld [vmem:[#allocation4 + $0x1a0] sm:$0xff] }
 0x4ab   : > { %v5772_v27 = vunpack.c.l.b16 %v5679_v46  ;;  %v8326_v56 = vld [vmem:[#allocation2 + $0x18] sm:$0xf] }
 0x4ac   : > { %v5886_v3 = vpop.f32.mrf.mxu1  ;;  %v6121_v54 = vpop.f32.mrf.mxu2  ;;  %v6321_v57 = vsel %vm12233_vm5, %v10889_v45, %v6320_v37  ;;  %7895 = vmatpush.bf16.msra.mxu2 %v11475_v40  ;;  %v8375_v46 = vshrl.u32 %v8326_v56, 16 }
 0x4ad   : > { %v6120_v62 = vadd.f32 %v6119_v0, %v5886_v3  ;;  %v6497_v26 = vpop.f32.mrf.mxu3  ;;  %v11502_v0 = vld [vmem:[#allocation4 + $0x1a8] sm:$0xff]  ;;  %v6382_v52 = vunpack.c.l.b16 %v6321_v57  ;;  %v14287_v3 = vpop.f32.mrf.mxu0  ;;  %v11415_v57 = vld [vmem:[#allocation2 + $0xa8] sm:$0xff] }
 0x4ae   : > { %8207 = vmatpush.bf16.msra.mxu3 %v11502_v0  ;;  %6860 = vmatmul.bf16.gmra.mxu0 %v11455_v8  ;;  %v14301_v0 = vld [vmem:[#allocation2 + $0xb8] sm:$0xf] }
 0x4af   : > { %v6565_v7 = vadd.f32 %v6497_v26, %v6120_v62  ;;  %5925 = vmatmul.bf16.gmra.mxu1 %v5789_v53  ;;  %v6401_v62 = vpack.c.b16 %v6383_v23, %v6382_v52  ;;  %v5771_v53 = vunpack.c.l.b16 %v5669_v38  ;;  %v11511_v26 = vld [vmem:[#allocation4 + $0x1f0] sm:$0xff]  ;;  %v11509_v38 = vld [vmem:[#allocation4 + $0x1e0] sm:$0xff]  ;;  %v5714_v40 = vshll.u32 %v14301_v0, 16 }
 0x4b0   : > { %8888 = vmatpush.bf16.msra.mxu0 %v11511_v26  ;;  %7896 = vmatpush.bf16.msra.mxu2 %v11474_v17  ;;  %v11498_v26 = vld [vmem:[#allocation4 + $0x188] sm:$0xff] }
 0x4b1   : > { %v14271_v1 = vadd.f32 %v14237_v33, %v6565_v7  ;;  %6163 = vmatmul.bf16.gmra.mxu2 %v11414_v5  ;;  %v5681_v33 = vshrl.u32 %v5308_v48, 16  ;;  %v10890_v7 = vrot.slane %v6193_v21, 9  ;;  %v5790_v45 = vpack.c.b16 %v5772_v27, %v5771_v53  ;;  %v11510_v5 = vld [vmem:[#allocation4 + $0x1e8] sm:$0xff] }
 0x4b2   : > { %8208 = vmatpush.bf16.msra.mxu3 %v11501_v58 }
 0x4b3   : > { %v5683_v2 = vrot.slane %v5681_v33, 4  ;;  %v6328_v39 = vsel %vm12233_vm5, %v10890_v7, %v6327_v14  ;;  %v6331_v33 = vsel %vm12233_vm5, %v6329_v34, %v6330_v20 }
 0x4b4   : > { %v5888_v29 = vpop.f32.mrf.mxu1  ;;  %v6124_v61 = vpop.f32.mrf.mxu2  ;;  %8889 = vmatpush.bf16.msra.mxu0 %v11510_v5  ;;  %v6384_v21 = vunpack.c.l.b16 %v6328_v39  ;;  %v6385_v14 = vunpack.c.l.b16 %v6331_v33  ;;  %v11456_v33 = vld [vmem:[#allocation2 + $0xc0] sm:$0xff] }
 0x4b5   : > { %v6122_v36 = vadd.f32 %v6121_v54, %v5888_v29  ;;  %v6499_v16 = vpop.f32.mrf.mxu3  ;;  %v14292_v54 = vrot.slane %v5690_v11, 5  ;;  %v5687_v30 = vor.u32 %v5686_v60, %v5683_v2  ;;  %v8327_v29 = vld [vmem:[#allocation2 + $0x1c] sm:$0xf]  ;;  %v14299_v23 = vpop.f32.mrf.mxu0  ;;  %v8378_v11 = vshll.u32 %v8326_v56, 16 }
 0x4b6   : > { %8209 = vmatpush.bf16.msra.mxu3 %v11500_v32  ;;  %v8388_v52 = vshrl.u32 %v8327_v29, 16  ;;  %v6334_v2 = vrot.slane %v14301_v0, 5  ;;  %v6402_v5 = vpack.c.b16 %v6385_v14, %v6384_v21 }
 0x4b7   : > { %v6566_v37 = vadd.f32 %v6499_v16, %v6122_v36  ;;  %v5697_v51 = vor.u32 %v5696_v41, %v14292_v54  ;;  %v5688_v15 = vrot.slane %v5687_v30, 4  ;;  %v5700_v36 = vshll.u32 %v5342_v13, 16  ;;  %v5310_v16 = vld [vmem:[#allocation2 + $0xb4] sm:$0xf] }
 0x4b8   : > { %v5705_v53 = vshrl.u32 %v5310_v16, 16  ;;  %v5708_v27 = vshll.u32 %v5310_v16, 16  ;;  %8890 = vmatpush.bf16.msra.mxu0 %v11509_v38  ;;  %v11508_v41 = vld [vmem:[#allocation4 + $0x1d8] sm:$0xff]  ;;  %v8377_v13 = vrot.slane %v8375_v46, 4 }
 0x4b9   : > { %v14290_v31 = vadd.f32 %v14242_v50, %v6566_v37  ;;  %v5698_v6 = vrot.slane %v5697_v51, 4  ;;  %v8384_v37 = vshll.u32 %v8327_v29, 16  ;;  %v5702_v58 = vrot.slane %v5700_v36, 5  ;;  %v8328_v36 = vld [vmem:[#allocation2 + $0x20] sm:$0x1] }
 0x4ba   : > { %6541 = vmatmul.bf16.gmra.mxu3 %v6401_v62  ;;  %v6194_v62 = vld [vmem:[#allocation2 + $0xb4] sm:$0xe]  ;;  %v5707_v20 = vrot.slane %v5705_v53, 4  ;;  %v5710_v51 = vrot.slane %v5708_v27, 5 }
 0x4bb   : > { %8210 = vmatpush.bf16.msra.mxu3 %v11499_v63  ;;  %v5703_v30 = vsel %vm11917_vm2, %v5698_v6, %v5702_v58  ;;  %v10891_v17 = vrot.slane %v6194_v62, 9  ;;  %v14321_v63 = vrot.slane %v5714_v40, 5 }
 0x4bc   : > { %v5891_v19 = vpop.f32.mrf.mxu1  ;;  %v6126_v44 = vpop.f32.mrf.mxu2  ;;  %v5774_v39 = vunpack.c.l.b16 %v5703_v30  ;;  %8891 = vmatpush.bf16.msra.mxu0 %v11508_v41  ;;  %v14334_v41 = vld [vmem:[#allocation2 + $0x14] sm:$0x1] }
 0x4bd   : > { %v6125_v50 = vadd.f32 %v6124_v61, %v5891_v19  ;;  %v6502_v48 = vpop.f32.mrf.mxu3  ;;  %v11473_v61 = vld [vmem:[#allocation4 + $0x140] sm:$0xff]  ;;  %v8380_v19 = vrot.slane %v8378_v11, 5  ;;  %v14316_v56 = vpop.f32.mrf.mxu0  ;;  %v5711_v11 = vor.u32 %v5710_v51, %v5707_v20 }
 0x4be   : > { %7897 = vmatpush.bf16.msra.mxu2 %v11473_v61  ;;  %6865 = vmatmul.bf16.gmra.mxu0 %v11456_v33 }
 0x4bf   : > { %v6567_v12 = vadd.f32 %v6502_v48, %v6125_v50  ;;  %5930 = vmatmul.bf16.gmra.mxu1 %v5790_v45  ;;  %v14314_v50 = vrot.slane %v8384_v37, 5  ;;  %v8390_v45 = vrot.slane %v8388_v52, 4  ;;  %v5343_v48 = vld [vmem:[#allocation2 + $0xbc] sm:$0x1]  ;;  %8211 = vmatpush.bf16.msra.mxu3 %v11498_v26  ;;  %v14328_v37 = vld [vmem:[#allocation2 + $0x10] sm:$0xf] }
 0x4c0   : > { %v6337_v38 = vrot.slane %v5343_v48, 5  ;;  %v5724_v6 = vshll.u32 %v5343_v48, 16  ;;  %v8394_v52 = vshll.u32 %v8328_v36, 16  ;;  %v5712_v30 = vrot.slane %v5711_v11, 4  ;;  %v11416_v48 = vld [vmem:[#allocation2 + $0xb4] sm:$0xff] }
 0x4c1   : > { %v14304_v59 = vadd.f32 %v14259_v22, %v6567_v12  ;;  %6168 = vmatmul.bf16.gmra.mxu2 %v11415_v57  ;;  %v5693_v22 = vsel %vm11917_vm2, %v5688_v15, %v14292_v54  ;;  %v5718_v54 = vshrl.u32 %v14301_v0, 16  ;;  %v11497_v12 = vld [vmem:[#allocation4 + $0x180] sm:$0xff]  ;;  %v11507_v15 = vld [vmem:[#allocation4 + $0x1d0] sm:$0xff]  ;;  %v8381_v0 = vor.u32 %v8380_v19, %v8377_v13  ;;  %v11520_v19 = vld [vmem:[#allocation4 + $0x238] sm:$0xff] }
 0x4c2   : > { %v5773_v57 = vunpack.c.l.b16 %v5693_v22  ;;  %v8391_v61 = vor.u32 %v8390_v45, %v14314_v50  ;;  %8892 = vmatpush.bf16.msra.mxu0 %v11507_v15  ;;  %v11506_v22 = vld [vmem:[#allocation4 + $0x1c8] sm:$0xff]  ;;  %v7651_v13 = vrot.slane %v14328_v37, 5  ;;  %9313 = vmatpush.bf16.msra.mxu1 %v11520_v19  ;;  %v7585_v36 = vld [vmem:[#allocation2 + $0xc] sm:$0xe] }
 0x4c3   : > { %v5720_v16 = vrot.slane %v5718_v54, 4  ;;  %8212 = vmatpush.bf16.msra.mxu3 %v11497_v12  ;;  %v8382_v58 = vrot.slane %v8381_v0, 4  ;;  %v5726_v54 = vrot.slane %v5724_v6, 5  ;;  %v7654_v0 = vrot.slane %v14334_v41, 5 }
 0x4c4   : > { %v5893_v60 = vpop.f32.mrf.mxu1  ;;  %v6129_v34 = vpop.f32.mrf.mxu2  ;;  %v5791_v14 = vpack.c.b16 %v5774_v39, %v5773_v57 }
 0x4c5   : > { %v6127_v8 = vadd.f32 %v6126_v44, %v5893_v60  ;;  %v6504_v7 = vpop.f32.mrf.mxu3  ;;  %v6336_v44 = vrot.slane %v6334_v2, 4  ;;  %v5721_v27 = vor.u32 %v5720_v16, %v14321_v63  ;;  %v14337_v45 = vpop.f32.mrf.mxu0  ;;  %v8387_v20 = vsel %vm11917_vm2, %v8382_v58, %v14314_v50 }
 0x4c6   : > { %8893 = vmatpush.bf16.msra.mxu0 %v11506_v22  ;;  %v5717_v50 = vsel %vm11917_vm2, %v5712_v30, %v14321_v63  ;;  %v8775_v11 = vunpack.c.l.b16 %v8387_v20 }
 0x4c7   : > { %v6568_v32 = vadd.f32 %v6504_v7, %v6127_v8  ;;  %v6338_v60 = vsel %vm12233_vm5, %v6336_v44, %v6337_v38  ;;  %v8329_v8 = vld [vmem:[#allocation2 + $0x24] sm:$0xf]  ;;  %v8330_v7 = vld [vmem:[#allocation2 + $0x28] sm:$0xf]  ;;  %v11505_v44 = vld [vmem:[#allocation4 + $0x1c0] sm:$0xff]  ;;  %v5722_v57 = vrot.slane %v5721_v27, 4 }
 0x4c8   : > { %v8399_v51 = vshrl.u32 %v8329_v8, 16  ;;  %v8402_v12 = vshll.u32 %v8329_v8, 16  ;;  %v8408_v33 = vshll.u32 %v8330_v7, 16  ;;  %v8412_v15 = vshrl.u32 %v8330_v7, 16 }
 0x4c9   : > { %v14319_v29 = vadd.f32 %v14268_v10, %v6568_v32  ;;  %v14326_v10 = vsel %vm12233_vm5, %v10891_v17, %v6334_v2  ;;  %v8392_v2 = vrot.slane %v8391_v61, 4  ;;  %v6903_v32 = vld [vmem:[#allocation2 + $0xc] sm:$0xf]  ;;  %v8396_v17 = vrot.slane %v8394_v52, 5 }
 0x4ca   : > { %6546 = vmatmul.bf16.gmra.mxu3 %v6402_v5  ;;  %v6386_v26 = vunpack.c.l.b16 %v14326_v10  ;;  %v6952_v16 = vshrl.u32 %v6903_v32, 16  ;;  %v6955_v61 = vshll.u32 %v6903_v32, 16  ;;  %v6965_v10 = vshrl.u32 %v14328_v37, 16  ;;  %8894 = vmatpush.bf16.msra.mxu0 %v11505_v44  ;;  %v8331_v44 = vld [vmem:[#allocation2 + $0x2c] sm:$0x1] }
 0x4cb   : > { %v8397_v39 = vsel %vm11917_vm2, %v8392_v2, %v8396_v17  ;;  %v5727_v58 = vsel %vm11917_vm2, %v5722_v57, %v5726_v54  ;;  %v14355_v27 = vrot.slane %v8408_v33, 5  ;;  %v8414_v2 = vrot.slane %v8412_v15, 4 }
 0x4cc   : > { %v5896_v46 = vpop.f32.mrf.mxu1  ;;  %v6131_v53 = vpop.f32.mrf.mxu2  ;;  %v8776_v52 = vunpack.c.l.b16 %v8397_v39  ;;  %v6957_v19 = vrot.slane %v6955_v61, 5  ;;  %v6967_v30 = vrot.slane %v6965_v10, 4  ;;  %v5776_v54 = vunpack.c.l.b16 %v5727_v58  ;;  %v6906_v58 = vld [vmem:[#allocation2 + $0x18] sm:$0xf] }
 0x4cd   : > { %v6130_v21 = vadd.f32 %v6129_v34, %v5896_v46  ;;  %v6507_v62 = vpop.f32.mrf.mxu3  ;;  %v6387_v34 = vunpack.c.l.b16 %v6338_v60  ;;  %v6961_v46 = vshll.u32 %v14328_v37, 16  ;;  %v14361_v32 = vpop.f32.mrf.mxu0  ;;  %v8418_v33 = vshll.u32 %v8331_v44, 16 }
 0x4ce   : > { %v6979_v44 = vshll.u32 %v6906_v58, 16 }
 0x4cf   : > { %v6569_v40 = vadd.f32 %v6507_v62, %v6130_v21  ;;  %5935 = vmatmul.bf16.gmra.mxu1 %v5791_v14  ;;  %v8401_v21 = vrot.slane %v8399_v51, 4  ;;  %v8404_v14 = vrot.slane %v8402_v12, 5  ;;  %v11052_v62 = vrot.slane %v7585_v36, 9 }
 0x4d0   : > { %v6403_v8 = vpack.c.b16 %v6387_v34, %v6386_v26  ;;  %v14359_v7 = vrot.slane %v6961_v46, 5  ;;  %v8415_v34 = vor.u32 %v8414_v2, %v14355_v27 }
 0x4d1   : > { %v14340_v5 = vadd.f32 %v14287_v3, %v6569_v40  ;;  %6173 = vmatmul.bf16.gmra.mxu2 %v11416_v48  ;;  %v7653_v3 = vrot.slane %v7651_v13, 4  ;;  %v6954_v40 = vrot.slane %v6952_v16, 4  ;;  %v8807_v48 = vpack.c.b16 %v8776_v52, %v8775_v11  ;;  %v14371_v11 = vld [vmem:[#allocation2 + $0x20] sm:$0x1]  ;;  %v8333_v52 = vld [vmem:[#allocation2 + $0x34] sm:$0xf] }
 0x4d2   : > { %v8405_v20 = vor.u32 %v8404_v14, %v8401_v21  ;;  %v7652_v26 = vsel %vm12233_vm5, %v11052_v62, %v7651_v13  ;;  %v6968_v39 = vor.u32 %v6967_v30, %v14359_v7  ;;  %v8416_v13 = vrot.slane %v8415_v34, 4 }
 0x4d3   : > { %v7655_v37 = vsel %vm12233_vm5, %v7653_v3, %v7654_v0  ;;  %8895 = vmatmul.bf16.vlgmr.msra.gmra.mxu0 %v8807_v48  ;;  %v6958_v57 = vor.u32 %v6957_v19, %v6954_v40  ;;  %v7778_v36 = vunpack.c.l.b16 %v7652_v26  ;;  %v6907_v3 = vld [vmem:[#allocation2 + $0x1c] sm:$0xf]  ;;  %v8420_v62 = vrot.slane %v8418_v33, 5 }
 0x4d4   : > { %v5898_v38 = vpop.f32.mrf.mxu1  ;;  %v6134_v22 = vpop.f32.mrf.mxu2  ;;  %v7779_v51 = vunpack.c.l.b16 %v7655_v37  ;;  %v8406_v0 = vrot.slane %v8405_v20, 4  ;;  %v6969_v14 = vrot.slane %v6968_v39, 4  ;;  %v8436_v19 = vshrl.u32 %v8333_v52, 16 }
 0x4d5   : > { %v6132_v6 = vadd.f32 %v6131_v53, %v5898_v38  ;;  %v6509_v60 = vpop.f32.mrf.mxu3  ;;  %v5775_v53 = vunpack.c.l.b16 %v5717_v50  ;;  %v6971_v38 = vshll.u32 %v14334_v41, 16  ;;  %v8332_v50 = vld [vmem:[#allocation2 + $0x30] sm:$0xf]  ;;  %v6959_v21 = vrot.slane %v6958_v57, 4 }
 0x4d6   : > { %v7810_v10 = vpack.c.b16 %v7779_v51, %v7778_v36  ;;  %v8411_v41 = vsel %vm11917_vm2, %v8406_v0, %v14355_v27  ;;  %v8421_v40 = vsel %vm11917_vm2, %v8416_v13, %v8420_v62  ;;  %v6976_v48 = vshrl.u32 %v6906_v58, 16 }
 0x4d7   : > { %v6570_v63 = vadd.f32 %v6509_v60, %v6132_v6  ;;  %v7586_v6 = vld [vmem:[#allocation2 + $0x18] sm:$0xe]  ;;  %v7658_v60 = vrot.slane %v6907_v3, 5  ;;  %v6973_v37 = vrot.slane %v6971_v38, 5  ;;  %v6964_v20 = vsel %vm11917_vm2, %v6959_v21, %v14359_v7  ;;  %v14398_v21 = vld [vmem:[#allocation2 + $0x28] sm:$0xf] }
 0x4d8   : > { %v11053_v30 = vrot.slane %v7586_v6, 9  ;;  %v8777_v34 = vunpack.c.l.b16 %v8411_v41  ;;  %v6989_v36 = vshrl.u32 %v6907_v3, 16  ;;  %v6978_v13 = vrot.slane %v6976_v48, 4  ;;  %v11481_v6 = vld [vmem:[#allocation2 + $0x18] sm:$0xff] }
 0x4d9   : > { %v14364_v17 = vadd.f32 %v14299_v23, %v6570_v63  ;;  %v5792_v23 = vpack.c.b16 %v5776_v54, %v5775_v53  ;;  %v8423_v63 = vshrl.u32 %v8332_v50, 16  ;;  %v8432_v53 = vshll.u32 %v8333_v52, 16 }
 0x4da   : > { %6551 = vmatmul.bf16.gmra.mxu3 %v6403_v8  ;;  %v8426_v8 = vshll.u32 %v8332_v50, 16  ;;  %v7661_v54 = vrot.slane %v14371_v11, 5  ;;  %v6974_v27 = vsel %vm11917_vm2, %v6969_v14, %v6973_v37  ;;  %v7660_v26 = vrot.slane %v7658_v60, 4  ;;  %v8334_v14 = vld [vmem:[#allocation2 + $0x38] sm:$0x1] }
 0x4db   : > { %v8425_v57 = vrot.slane %v8423_v63, 4  ;;  %v14389_v0 = vrot.slane %v8432_v53, 5  ;;  %v6981_v50 = vrot.slane %v6979_v44, 5  ;;  %v7352_v7 = vunpack.c.l.b16 %v6964_v20  ;;  %v7587_v20 = vld [vmem:[#allocation2 + $0x24] sm:$0xe] }
 0x4dc   : > { %v5901_v12 = vpop.f32.mrf.mxu1  ;;  %v6136_v61 = vpop.f32.mrf.mxu2  ;;  %v8428_v39 = vrot.slane %v8426_v8, 5  ;;  %v7353_v52 = vunpack.c.l.b16 %v6974_v27  ;;  %v7659_v62 = vsel %vm12233_vm5, %v11053_v30, %v7658_v60  ;;  %v6991_v63 = vrot.slane %v6989_v36, 4 }
 0x4dd   : > { %v6135_v15 = vadd.f32 %v6134_v22, %v5901_v12  ;;  %v6512_v16 = vpop.f32.mrf.mxu3  ;;  %v14373_v22 = vpop.f32.mrf.mxu0  ;;  %v8778_v12 = vunpack.c.l.b16 %v8421_v40  ;;  %v6982_v40 = vor.u32 %v6981_v50, %v6978_v13  ;;  %v7665_v53 = vrot.slane %v14398_v21, 5  ;;  %v6909_v50 = vld [vmem:[#allocation2 + $0x24] sm:$0xf] }
 0x4de   : > { %v8429_v58 = vor.u32 %v8428_v39, %v8425_v57  ;;  %v7384_v48 = vpack.c.b16 %v7353_v52, %v7352_v7  ;;  %v7780_v44 = vunpack.c.l.b16 %v7659_v62  ;;  %v11054_v36 = vrot.slane %v7587_v20, 9 }
 0x4df   : > { %v6571_v46 = vadd.f32 %v6512_v16, %v6135_v15  ;;  %5940 = vmatmul.bf16.gmra.mxu1 %v5792_v23  ;;  %v6985_v23 = vshll.u32 %v6907_v3, 16  ;;  %v8438_v16 = vrot.slane %v8436_v19, 4  ;;  %v8808_v3 = vpack.c.b16 %v8778_v12, %v8777_v34 }
 0x4e0   : > { %v8442_v19 = vshll.u32 %v8334_v14, 16  ;;  %v8430_v60 = vrot.slane %v8429_v58, 4  ;;  %v6983_v39 = vrot.slane %v6982_v40, 4 }
 0x4e1   : > { %v14376_v2 = vadd.f32 %v14316_v56, %v6571_v46  ;;  %7898 = vmatmul.bf16.vlgmr.msra.gmra.mxu2 %v7810_v10  ;;  %v7662_v46 = vsel %vm12233_vm5, %v7660_v26, %v7661_v54  ;;  %v14402_v41 = vrot.slane %v6985_v23, 5  ;;  %v8439_v8 = vor.u32 %v8438_v16, %v14389_v0  ;;  %v11519_v23 = vld [vmem:[#allocation4 + $0x230] sm:$0xff] }
 0x4e2   : > { %v7781_v37 = vunpack.c.l.b16 %v7662_v46  ;;  %v7667_v16 = vrot.slane %v7665_v53, 4  ;;  %v8444_v7 = vrot.slane %v8442_v19, 5  ;;  %9314 = vmatpush.bf16.msra.mxu1 %v11519_v23  ;;  %v7013_v19 = vshrl.u32 %v14398_v21, 16 }
 0x4e3   : > { %8900 = vmatmul.bf16.gmra.mxu0 %v8808_v3  ;;  %v6992_v26 = vor.u32 %v6991_v63, %v14402_v41  ;;  %v8440_v34 = vrot.slane %v8439_v8, 4  ;;  %v6988_v63 = vsel %vm11917_vm2, %v6983_v39, %v14402_v41  ;;  %v7000_v8 = vshrl.u32 %v6909_v50, 16 }
 0x4e4   : > { %v5903_v56 = vpop.f32.mrf.mxu1  ;;  %v6139_v15 = vpop.f32.mrf.mxu2  ;;  %v7811_v57 = vpack.c.b16 %v7781_v37, %v7780_v44  ;;  %v7003_v37 = vshll.u32 %v6909_v50, 16 }
 0x4e5   : > { %v6137_v51 = vadd.f32 %v6136_v61, %v5903_v56  ;;  %v6514_v33 = vpop.f32.mrf.mxu3  ;;  %v14393_v10 = vpop.f32.mrf.mxu0  ;;  %v14406_v56 = vld [vmem:[#allocation2 + $0x2c] sm:$0x1]  ;;  %v6993_v3 = vrot.slane %v6992_v26, 4  ;;  %v8445_v14 = vsel %vm11917_vm2, %v8440_v34, %v8444_v7  ;;  %v7002_v39 = vrot.slane %v7000_v8, 4  ;;  %v11482_v7 = vld [vmem:[#allocation2 + $0x24] sm:$0xff] }
 0x4e6   : > { %v8780_v44 = vunpack.c.l.b16 %v8445_v14  ;;  %v7588_v14 = vld [vmem:[#allocation2 + $0x30] sm:$0xe] }
 0x4e7   : > { %v6572_v38 = vadd.f32 %v6514_v33, %v6137_v51  ;;  %v8335_v51 = vld [vmem:[#allocation2 + $0x3c] sm:$0xf]  ;;  %v6995_v33 = vshll.u32 %v14371_v11, 16 }
 0x4e8   : > { %v8447_v52 = vshrl.u32 %v8335_v51, 16  ;;  %v8450_v11 = vshll.u32 %v8335_v51, 16 }
 0x4e9   : > { %v14396_v61 = vadd.f32 %v14337_v45, %v6572_v38  ;;  %v7668_v38 = vrot.slane %v14406_v56, 5 }
 0x4ea   : > { %8213 = vmatmul.bf16.vlgmr.msra.gmra.mxu3 %v11481_v6  ;;  %v8435_v6 = vsel %vm11917_vm2, %v8430_v60, %v14389_v0  ;;  %v8449_v20 = vrot.slane %v8447_v52, 4  ;;  %v8452_v60 = vrot.slane %v8450_v11, 5  ;;  %v8337_v11 = vld [vmem:[#allocation2 + $0x44] sm:$0x1] }
 0x4eb   : > { %15669 = vst [vmem:[#allocation16_spill] sm:$0xff] %v14396_v61  ;;  %v7669_v0 = vsel %vm12233_vm5, %v7667_v16, %v7668_v38  ;;  %v7015_v16 = vrot.slane %v7013_v19, 4 }
 0x4ec   : > { %v5906_v45 = vpop.f32.mrf.mxu1  ;;  %v6141_v27 = vpop.f32.mrf.mxu2  ;;  %v7783_v23 = vunpack.c.l.b16 %v7669_v0  ;;  %v8466_v0 = vshll.u32 %v8337_v11, 16 }
 0x4ed   : > { %v6140_v54 = vadd.f32 %v6139_v15, %v5906_v45  ;;  %v6517_v30 = vpop.f32.mrf.mxu3  ;;  %v8336_v15 = vld [vmem:[#allocation2 + $0x40] sm:$0xf]  ;;  %v14411_v13 = vpop.f32.mrf.mxu0  ;;  %v7009_v45 = vshll.u32 %v14398_v21, 16  ;;  %v14434_v21 = vld [vmem:[#allocation2 + $0x34] sm:$0xf] }
 0x4ee   : > { %v8456_v58 = vshll.u32 %v8336_v15, 16  ;;  %v8460_v62 = vshrl.u32 %v8336_v15, 16 }
 0x4ef   : > { %v6573_v12 = vadd.f32 %v6517_v30, %v6140_v54  ;;  %7472 = vmatmul.bf16.vlgmr.msrb.gmra.mxu1 %v7384_v48  ;;  %v8779_v54 = vunpack.c.l.b16 %v8435_v6  ;;  %v14436_v15 = vrot.slane %v7009_v45, 5 }
 0x4f0   : > { %v14430_v34 = vrot.slane %v8456_v58, 5  ;;  %v8462_v51 = vrot.slane %v8460_v62, 4  ;;  %v7672_v58 = vrot.slane %v14434_v21, 5 }
 0x4f1   : > { %v14414_v46 = vadd.f32 %v14361_v32, %v6573_v12  ;;  %7903 = vmatmul.bf16.gmra.mxu2 %v7811_v57  ;;  %v6997_v32 = vrot.slane %v6995_v33, 5  ;;  %v7666_v57 = vsel %vm12233_vm5, %v11054_v36, %v7665_v53  ;;  %v7005_v33 = vrot.slane %v7003_v37, 5 }
 0x4f2   : > { %v8809_v52 = vpack.c.b16 %v8780_v44, %v8779_v54  ;;  %v7782_v53 = vunpack.c.l.b16 %v7666_v57  ;;  %v7019_v36 = vshll.u32 %v14406_v56, 16  ;;  %v8463_v62 = vor.u32 %v8462_v51, %v14430_v34  ;;  %v8338_v51 = vld [vmem:[#allocation2 + $0x48] sm:$0xf] }
 0x4f3   : > { %15670 = vst [vmem:[#allocation17_spill] sm:$0xff] %v14414_v46  ;;  %v6998_v41 = vsel %vm11917_vm2, %v6993_v3, %v6997_v32  ;;  %v8453_v3 = vor.u32 %v8452_v60, %v8449_v20  ;;  %v14446_v32 = vld [vmem:[#allocation2 + $0x38] sm:$0x1]  ;;  %v7016_v37 = vor.u32 %v7015_v16, %v14436_v15  ;;  %v11055_v54 = vrot.slane %v7588_v14, 9 }
 0x4f4   : > { %v5908_v40 = vpop.f32.mrf.mxu1  ;;  %v6144_v26 = vpop.f32.mrf.mxu2  ;;  %v7355_v6 = vunpack.c.l.b16 %v6998_v41  ;;  %8905 = vmatmul.bf16.gmra.mxu0 %v8809_v52  ;;  %v7812_v8 = vpack.c.b16 %v7783_v23, %v7782_v53  ;;  %v7021_v20 = vrot.slane %v7019_v36, 5  ;;  %v7674_v60 = vrot.slane %v7672_v58, 4  ;;  %v8339_v23 = vld [vmem:[#allocation2 + $0x4c] sm:$0xf] }
 0x4f5   : > { %v6142_v48 = vadd.f32 %v6141_v27, %v5908_v40  ;;  %v6519_v30 = vpop.f32.mrf.mxu3  ;;  %v7354_v27 = vunpack.c.l.b16 %v6988_v63  ;;  %v14438_v38 = vpop.f32.mrf.mxu0  ;;  %v7006_v63 = vor.u32 %v7005_v33, %v7002_v39  ;;  %v6912_v40 = vld [vmem:[#allocation2 + $0x30] sm:$0xf]  ;;  %v8454_v56 = vrot.slane %v8453_v3, 4 }
 0x4f6   : > { %v8464_v41 = vrot.slane %v8463_v62, 4  ;;  %v7024_v39 = vshrl.u32 %v6912_v40, 16  ;;  %v7027_v33 = vshll.u32 %v6912_v40, 16  ;;  %v7017_v16 = vrot.slane %v7016_v37, 4 }
 0x4f7   : > { %v6574_v12 = vadd.f32 %v6519_v30, %v6142_v48  ;;  %v7385_v19 = vpack.c.b16 %v7355_v6, %v7354_v27  ;;  %v7675_v30 = vrot.slane %v14446_v32, 5  ;;  %v7007_v57 = vrot.slane %v7006_v63, 4 }
 0x4f8   : > { %v7037_v27 = vshrl.u32 %v14434_v21, 16  ;;  %v8468_v6 = vrot.slane %v8466_v0, 5  ;;  %v8459_v11 = vsel %vm11917_vm2, %v8454_v56, %v14430_v34  ;;  %v8471_v3 = vshrl.u32 %v8338_v51, 16 }
 0x4f9   : > { %v14441_v50 = vadd.f32 %v14373_v22, %v6574_v12  ;;  %v8474_v53 = vshll.u32 %v8338_v51, 16  ;;  %v7673_v36 = vsel %vm12233_vm5, %v11055_v54, %v7672_v58  ;;  %v8480_v62 = vshll.u32 %v8339_v23, 16 }
 0x4fa   : > { %8218 = vmatmul.bf16.gmra.mxu3 %v11482_v7  ;;  %v8469_v14 = vsel %vm11917_vm2, %v8464_v41, %v8468_v6  ;;  %v8484_v63 = vshrl.u32 %v8339_v23, 16  ;;  %v7029_v34 = vrot.slane %v7027_v33, 5  ;;  %v7022_v40 = vsel %vm11917_vm2, %v7017_v16, %v7021_v20 }
 0x4fb   : > { %15671 = vst [vmem:[#allocation26_spill] sm:$0xff] %v14441_v50  ;;  %v7039_v0 = vrot.slane %v7037_v27, 4  ;;  %v8782_v54 = vunpack.c.l.b16 %v8469_v14  ;;  %v8476_v56 = vrot.slane %v8474_v53, 5  ;;  %v14475_v51 = vrot.slane %v8480_v62, 5  ;;  %v11483_v27 = vld [vmem:[#allocation2 + $0x30] sm:$0xff] }
 0x4fc   : > { %v5911_v22 = vpop.f32.mrf.mxu1  ;;  %v6146_v44 = vpop.f32.mrf.mxu2  ;;  %v7357_v33 = vunpack.c.l.b16 %v7022_v40  ;;  %v7784_v23 = vunpack.c.l.b16 %v7673_v36  ;;  %v8340_v53 = vld [vmem:[#allocation2 + $0x50] sm:$0x1]  ;;  %v7043_v62 = vshll.u32 %v14446_v32, 16 }
 0x4fd   : > { %v6145_v45 = vadd.f32 %v6144_v26, %v5911_v22  ;;  %v6522_v48 = vpop.f32.mrf.mxu3  ;;  %v14450_v7 = vpop.f32.mrf.mxu0  ;;  %v7033_v26 = vshll.u32 %v14434_v21, 16  ;;  %v7676_v21 = vsel %vm12233_vm5, %v7674_v60, %v7675_v30  ;;  %v7026_v22 = vrot.slane %v7024_v39, 4  ;;  %v7589_v39 = vld [vmem:[#allocation2 + $0x3c] sm:$0xe] }
 0x4fe   : > { %v8486_v60 = vrot.slane %v8484_v63, 4  ;;  %v11056_v63 = vrot.slane %v7589_v39, 9 }
 0x4ff   : > { %v6575_v12 = vadd.f32 %v6522_v48, %v6145_v45  ;;  %7477 = vmatmul.bf16.gmra.mxu1 %v7385_v19  ;;  %v14471_v58 = vrot.slane %v7033_v26, 5  ;;  %v8781_v45 = vunpack.c.l.b16 %v8459_v11 }
 0x501   : > { %v14455_v52 = vadd.f32 %v14393_v10, %v6575_v12  ;;  %7908 = vmatmul.bf16.gmra.mxu2 %v7812_v8  ;;  %v7012_v10 = vsel %vm11917_vm2, %v7007_v57, %v14436_v15  ;;  %v8473_v8 = vrot.slane %v8471_v3, 4  ;;  %v14473_v15 = vld [vmem:[#allocation2 + $0x40] sm:$0xf]  ;;  %v7785_v12 = vunpack.c.l.b16 %v7676_v21  ;;  %v6915_v3 = vld [vmem:[#allocation2 + $0x3c] sm:$0xf] }
 0x502   : > { %v7030_v57 = vor.u32 %v7029_v34, %v7026_v22  ;;  %v7356_v20 = vunpack.c.l.b16 %v7012_v10  ;;  %v7040_v16 = vor.u32 %v7039_v0, %v14471_v58  ;;  %v7679_v6 = vrot.slane %v14473_v15, 5  ;;  %v14486_v22 = vld [vmem:[#allocation2 + $0x44] sm:$0x1] }
 0x503   : > { %15672 = vst [vmem:[#allocation23_spill] sm:$0xff] %v14455_v52  ;;  %v8810_v11 = vpack.c.b16 %v8782_v54, %v8781_v45  ;;  %v8477_v14 = vor.u32 %v8476_v56, %v8473_v8  ;;  %v8487_v10 = vor.u32 %v8486_v60, %v14475_v51  ;;  %v7813_v36 = vpack.c.b16 %v7785_v12, %v7784_v23  ;;  %v11518_v23 = vld [vmem:[#allocation4 + $0x228] sm:$0xff] }
 0x504   : > { %v5913_v37 = vpop.f32.mrf.mxu1  ;;  %v6149_v41 = vpop.f32.mrf.mxu2  ;;  %v7031_v21 = vrot.slane %v7030_v57, 4  ;;  %v7041_v34 = vrot.slane %v7040_v16, 4  ;;  %v7051_v40 = vshll.u32 %v6915_v3, 16  ;;  %v8490_v0 = vshll.u32 %v8340_v53, 16  ;;  %v8341_v57 = vld [vmem:[#allocation2 + $0x54] sm:$0xf]  ;;  %9315 = vmatpush.bf16.msra.mxu1 %v11518_v23 }
 0x505   : > { %v6147_v19 = vadd.f32 %v6146_v44, %v5913_v37  ;;  %v6524_v48 = vpop.f32.mrf.mxu3  ;;  %v14478_v44 = vpop.f32.mrf.mxu0  ;;  %8910 = vmatmul.bf16.gmra.mxu0 %v8810_v11  ;;  %v7048_v37 = vshrl.u32 %v6915_v3, 16  ;;  %v7681_v54 = vrot.slane %v7679_v6, 4  ;;  %v8478_v8 = vrot.slane %v8477_v14, 4  ;;  %v8342_v16 = vld [vmem:[#allocation2 + $0x58] sm:$0xf] }
 0x506   : > { %v14490_v60 = vsel %vm12233_vm5, %v11056_v63, %v7679_v6  ;;  %v8488_v12 = vrot.slane %v8487_v10, 4  ;;  %v7053_v3 = vrot.slane %v7051_v40, 5  ;;  %v8492_v53 = vrot.slane %v8490_v0, 5  ;;  %v14512_v63 = vld [vmem:[#allocation2 + $0x4c] sm:$0xf] }
 0x507   : > { %v6576_v30 = vadd.f32 %v6524_v48, %v6147_v19  ;;  %v7386_v19 = vpack.c.b16 %v7357_v33, %v7356_v20  ;;  %v7045_v48 = vrot.slane %v7043_v62, 5  ;;  %v7057_v20 = vshll.u32 %v14473_v15, 16  ;;  %v14524_v23 = vld [vmem:[#allocation2 + $0x50] sm:$0x1] }
 0x508   : > { %v7061_v33 = vshrl.u32 %v14473_v15, 16  ;;  %v7050_v11 = vrot.slane %v7048_v37, 4  ;;  %v8483_v15 = vsel %vm11917_vm2, %v8478_v8, %v14475_v51  ;;  %v8495_v62 = vshrl.u32 %v8341_v57, 16 }
 0x509   : > { %v14481_v26 = vadd.f32 %v14411_v13, %v6576_v30  ;;  %v7682_v30 = vrot.slane %v14486_v22, 5  ;;  %v8493_v10 = vsel %vm11917_vm2, %v8488_v12, %v8492_v53  ;;  %v14519_v40 = vrot.slane %v7057_v20, 5 }
 0x50a   : > { %8223 = vmatmul.bf16.gmra.mxu3 %v11483_v27  ;;  %v7046_v27 = vsel %vm11917_vm2, %v7041_v34, %v7045_v48  ;;  %v8508_v34 = vshrl.u32 %v8342_v16, 16  ;;  %v7063_v0 = vrot.slane %v7061_v33, 4  ;;  %v7067_v8 = vshll.u32 %v14486_v22, 16 }
 0x50b   : > { %15673 = vst [vmem:[#allocation18_spill] sm:$0xff] %v14481_v26  ;;  %v7686_v12 = vrot.slane %v14512_v63, 5  ;;  %v8497_v20 = vrot.slane %v8495_v62, 4 }
 0x50c   : > { %v5916_v13 = vpop.f32.mrf.mxu1  ;;  %v6151_v32 = vpop.f32.mrf.mxu2 }
 0x50d   : > { %v6150_v45 = vadd.f32 %v6149_v41, %v5916_v13  ;;  %v6527_v56 = vpop.f32.mrf.mxu3  ;;  %v7036_v41 = vsel %vm11917_vm2, %v7031_v21, %v14471_v58  ;;  %v14500_v6 = vpop.f32.mrf.mxu0  ;;  %v14507_v58 = vsel %vm12233_vm5, %v7681_v54, %v7682_v30  ;;  %v8498_v21 = vshll.u32 %v8341_v57, 16  ;;  %v7590_v30 = vld [vmem:[#allocation2 + $0x48] sm:$0xe] }
 0x50e   : > { %v8504_v13 = vshll.u32 %v8342_v16, 16  ;;  %v7054_v54 = vor.u32 %v7053_v3, %v7050_v11  ;;  %v8784_v57 = vunpack.c.l.b16 %v8493_v10  ;;  %v7064_v11 = vor.u32 %v7063_v0, %v14519_v40  ;;  %v8345_v0 = vld [vmem:[#allocation2 + $0x64] sm:$0xf] }
 0x50f   : > { %v6577_v39 = vadd.f32 %v6527_v56, %v6150_v45  ;;  %7482 = vmatmul.bf16.gmra.mxu1 %v7386_v19  ;;  %v7359_v19 = vunpack.c.l.b16 %v7046_v27  ;;  %v6918_v56 = vld [vmem:[#allocation2 + $0x48] sm:$0xf]  ;;  %v8500_v33 = vrot.slane %v8498_v21, 5  ;;  %v8510_v27 = vrot.slane %v8508_v34, 4 }
 0x510   : > { %v14526_v16 = vrot.slane %v8504_v13, 5  ;;  %v7072_v22 = vshrl.u32 %v6918_v56, 16  ;;  %v7075_v3 = vshll.u32 %v6918_v56, 16  ;;  %v7055_v51 = vrot.slane %v7054_v54, 4 }
 0x511   : > { %v14503_v14 = vadd.f32 %v14438_v38, %v6577_v39  ;;  %7913 = vmatmul.bf16.gmra.mxu2 %v7813_v36  ;;  %v14516_v38 = vunpack.c.l.b16 %v7036_v41  ;;  %v8783_v36 = vunpack.c.l.b16 %v8483_v15  ;;  %v7069_v15 = vrot.slane %v7067_v8, 5 }
 0x512   : > { %v11057_v37 = vrot.slane %v7590_v30, 9  ;;  %v7688_v21 = vrot.slane %v7686_v12, 4  ;;  %v7689_v13 = vrot.slane %v14524_v23, 5  ;;  %v7081_v56 = vshll.u32 %v14512_v63, 16 }
 0x513   : > { %15674 = vst [vmem:[#allocation24_spill] sm:$0xff] %v14503_v14  ;;  %v8343_v14 = vld [vmem:[#allocation2 + $0x5c] sm:$0x1]  ;;  %v8811_v34 = vpack.c.b16 %v8784_v57, %v8783_v36  ;;  %v7065_v54 = vrot.slane %v7064_v11, 4  ;;  %v7074_v8 = vrot.slane %v7072_v22, 4  ;;  %v7077_v30 = vrot.slane %v7075_v3, 5 }
 0x514   : > { %v5918_v45 = vpop.f32.mrf.mxu1  ;;  %v6154_v41 = vpop.f32.mrf.mxu2  ;;  %v8528_v52 = vshll.u32 %v8345_v0, 16  ;;  %v8532_v36 = vshrl.u32 %v8345_v0, 16  ;;  %v7060_v50 = vsel %vm11917_vm2, %v7055_v51, %v14519_v40  ;;  %v14546_v11 = vrot.slane %v7081_v56, 5 }
 0x515   : > { %v6152_v48 = vadd.f32 %v6151_v32, %v5918_v45  ;;  %v6529_v39 = vpop.f32.mrf.mxu3  ;;  %v11484_v32 = vld [vmem:[#allocation2 + $0x3c] sm:$0xff]  ;;  %v7387_v45 = vpack.c.b16 %v7359_v19, %v14516_v38  ;;  %v14530_v10 = vpop.f32.mrf.mxu0  ;;  %v8501_v38 = vor.u32 %v8500_v33, %v8497_v20  ;;  %v8511_v19 = vor.u32 %v8510_v27, %v14526_v16  ;;  %8915 = vmatmul.bf16.gmra.mxu0 %v8811_v34 }
 0x516   : > { %v7690_v20 = vsel %vm12233_vm5, %v7688_v21, %v7689_v13  ;;  %v7078_v34 = vor.u32 %v7077_v30, %v7074_v8  ;;  %v8534_v21 = vrot.slane %v8532_v36, 4  ;;  %v15677_v0 = vunpack.c.l.b16 %v14490_v60 }
 0x517   : > { %v6578_v53 = vadd.f32 %v6529_v39, %v6152_v48  ;;  %v8344_v48 = vld [vmem:[#allocation2 + $0x60] sm:$0xf]  ;;  %v7085_v39 = vshrl.u32 %v14512_v63, 16  ;;  %v7687_v63 = vsel %vm12233_vm5, %v11057_v37, %v7686_v12  ;;  %v8502_v22 = vrot.slane %v8501_v38, 4 }
 0x518   : > { %v8522_v26 = vshll.u32 %v8344_v48, 16  ;;  %v8512_v3 = vrot.slane %v8511_v19, 4  ;;  %v15678_v56 = vunpack.c.l.b16 %v14507_v58  ;;  %v7788_v60 = vunpack.c.l.b16 %v7687_v63  ;;  %v8346_v58 = vld [vmem:[#allocation2 + $0x68] sm:$0x1] }
 0x519   : > { %v14533_v62 = vadd.f32 %v14450_v7, %v6578_v53  ;;  %v8514_v7 = vshll.u32 %v8343_v14, 16  ;;  %v7087_v14 = vrot.slane %v7085_v39, 4  ;;  %v7789_v38 = vunpack.c.l.b16 %v7690_v20 }
 0x51a   : > { %8228 = vmatmul.bf16.gmra.mxu3 %v11484_v32  ;;  %v8524_v12 = vrot.slane %v8522_v26, 5  ;;  %v14569_v26 = vunpack.c.l.b16 %v7060_v50  ;;  %v7091_v8 = vshll.u32 %v14524_v23, 16  ;;  %v8538_v63 = vshll.u32 %v8346_v58, 16 }
 0x51b   : > { %15675 = vst [vmem:[#allocation25_spill] sm:$0xff] %v14533_v62  ;;  %v8519_v62 = vshrl.u32 %v8344_v48, 16  ;;  %v8516_v40 = vrot.slane %v8514_v7, 5  ;;  %v14552_v48 = vrot.slane %v8528_v52, 5  ;;  %v7088_v39 = vor.u32 %v7087_v14, %v14546_v11 }
 0x51c   : > { %v5921_v53 = vpop.f32.mrf.mxu1  ;;  %v6156_v27 = vpop.f32.mrf.mxu2 }
 0x51d   : > { %v6155_v57 = vadd.f32 %v6154_v41, %v5921_v53  ;;  %v6532_v33 = vpop.f32.mrf.mxu3  ;;  %v7070_v41 = vsel %vm11917_vm2, %v7065_v54, %v7069_v15  ;;  %v14550_v51 = vpop.f32.mrf.mxu0  ;;  %v8521_v37 = vrot.slane %v8519_v62, 4  ;;  %v14562_v15 = vld [vmem:[#allocation2 + $0x58] sm:$0xf]  ;;  %v8507_v62 = vsel %vm11917_vm2, %v8502_v22, %v14526_v16 }
 0x51e   : > { %v8517_v52 = vsel %vm11917_vm2, %v8512_v3, %v8516_v40  ;;  %v14573_v54 = vrot.slane %v7078_v34, 4  ;;  %v8535_v7 = vor.u32 %v8534_v21, %v14552_v48  ;;  %v15602_v53 = vrot.slane %v14562_v15, 5  ;;  %v14582_v3 = vld [vmem:[#allocation2 + $0x54] sm:$0xf] }
 0x51f   : > { %v6579_v32 = vadd.f32 %v6532_v33, %v6155_v57  ;;  %7487 = vmatmul.bf16.gmra.mxu1 %v7387_v45  ;;  %v7814_v45 = vpack.c.b16 %v15678_v56, %v15677_v0  ;;  %v8525_v30 = vor.u32 %v8524_v12, %v8521_v37  ;;  %v8785_v36 = vunpack.c.l.b16 %v8507_v62  ;;  %v14594_v37 = vld [vmem:[#allocation2 + $0x6c] sm:$0xf]  ;;  %v14609_v62 = vld [vmem:[#allocation2 + $0xb8] sm:$0xf] }
 0x520   : > { %v8786_v57 = vunpack.c.l.b16 %v8517_v52  ;;  %v14578_v14 = vrot.slane %v7088_v39, 4  ;;  %v14580_v22 = vpack.c.b16 %v7789_v38, %v7788_v60  ;;  %v14592_v40 = vrot.slane %v8535_v7, 4  ;;  %v14596_v12 = vld [vmem:[#allocation2 + $0xac] sm:$0xf]  ;;  %v9021_v52 = vld [vmem:[#allocation2 + $0xb4] sm:$0xe] }
 0x521   : > { %v14555_v13 = vadd.f32 %v14478_v44, %v6579_v32  ;;  %7918 = vmatmul.bf16.gmra.mxu2 %v7814_v45  ;;  %v14571_v44 = vunpack.c.l.b16 %v7070_v41  ;;  %v9020_v32 = vld [vmem:[#allocation2 + $0xa8] sm:$0xe]  ;;  %v14586_v41 = vrot.slane %v7091_v8, 5  ;;  %v14590_v34 = vrot.slane %v8525_v30, 4  ;;  %v8348_v60 = vld [vmem:[#allocation2 + $0x70] sm:$0xf] }
 0x522   : > { %v11485_v0 = vld [vmem:[#allocation2 + $0x48] sm:$0xff]  ;;  %v14607_v45 = vrot.slane %v15602_v53, 4  ;;  %v8812_v39 = vpack.c.b16 %v8786_v57, %v8785_v36  ;;  %v11240_v38 = vrot.slane %v9020_v32, 9  ;;  %v14619_v30 = vld [vmem:[#allocation2 + $0xb0] sm:$0x1]  ;;  %v9158_v7 = vrot.slane %v14596_v12, 5 }
 0x523   : > { %15676 = vst [vmem:[#allocation19_spill] sm:$0xff] %v14555_v13  ;;  %v7388_v23 = vpack.c.b16 %v14571_v44, %v14569_v26  ;;  %v8540_v44 = vrot.slane %v8538_v63, 5  ;;  %v8531_v36 = vsel %vm11917_vm2, %v14590_v34, %v14552_v48  ;;  %v11241_v63 = vrot.slane %v9021_v52, 9  ;;  %v8369_v53 = vld [vmem:[#allocation2 + $0xc4] sm:$0xf] }
 0x524   : > { %v5923_v19 = vpop.f32.mrf.mxu1  ;;  %v6159_v33 = vpop.f32.mrf.mxu2  ;;  %v9159_v8 = vsel %vm12233_vm5, %v11240_v38, %v9158_v7  ;;  %v8552_v34 = vshll.u32 %v8348_v60, 16  ;;  %v9160_v58 = vrot.slane %v9158_v7, 4  ;;  %v8370_v26 = vld [vmem:[#allocation2 + $0xc8] sm:$0x1]  ;;  %v9172_v7 = vrot.slane %v8369_v53, 5 }
 0x525   : > { %v6157_v16 = vadd.f32 %v6156_v27, %v5923_v19  ;;  %v6534_v50 = vpop.f32.mrf.mxu3  ;;  %v14588_v27 = vpop.f32.mrf.mxu0  ;;  %8920 = vmatmul.bf16.gmra.mxu0 %v8812_v39  ;;  %v8541_v57 = vsel %vm11917_vm2, %v14592_v40, %v8540_v44  ;;  %v8546_v39 = vshll.u32 %v14594_v37, 16  ;;  %v9022_v19 = vld [vmem:[#allocation2 + $0xc0] sm:$0xe]  ;;  %v9161_v40 = vrot.slane %v14619_v30, 5  ;;  %v7591_v53 = vld [vmem:[#allocation2 + $0x54] sm:$0xe] }
 0x526   : > { %v9225_v13 = vunpack.c.l.b16 %v9159_v8  ;;  %v11242_v46 = vrot.slane %v9022_v19, 9  ;;  %v8787_v19 = vunpack.c.l.b16 %v8531_v36 }
 0x527   : > { %v6580_v20 = vadd.f32 %v6534_v50, %v6157_v16  ;;  %v8367_v50 = vld [vmem:[#allocation2 + $0xbc] sm:$0x1]  ;;  %v9162_v38 = vsel %vm12233_vm5, %v9160_v58, %v9161_v40 }
 0x528   : > { %v9168_v56 = vrot.slane %v8367_v50, 5  ;;  %v9173_v50 = vsel %vm12233_vm5, %v11242_v46, %v9172_v7  ;;  %v14649_v58 = vld [vmem:[#allocation2 + $0x5c] sm:$0x1] }
 0x529   : > { %v14599_v21 = vadd.f32 %v14500_v6, %v6580_v20  ;;  %v9165_v20 = vrot.slane %v14609_v62, 5 }
 0x52a   : > { %8233 = vmatmul.bf16.gmra.mxu3 %v11485_v0  ;;  %v8543_v0 = vshrl.u32 %v14594_v37, 16 }
 0x52b   : > { %15679 = vst [vmem:[#allocation20_spill] sm:$0xff] %v14599_v21  ;;  %v9166_v52 = vsel %vm12233_vm5, %v11241_v63, %v9165_v20  ;;  %v9167_v37 = vrot.slane %v9165_v20, 4  ;;  %v9226_v63 = vunpack.c.l.b16 %v9162_v38  ;;  %v9174_v20 = vrot.slane %v9172_v7, 4 }
 0x52c   : > { %v5926_v16 = vpop.f32.mrf.mxu1  ;;  %v6161_v48 = vpop.f32.mrf.mxu2  ;;  %v8545_v8 = vrot.slane %v8543_v0, 4  ;;  %v7696_v0 = vrot.slane %v14649_v58, 5 }
 0x52d   : > { %v6160_v32 = vadd.f32 %v6159_v33, %v5926_v16  ;;  %v6537_v6 = vpop.f32.mrf.mxu3  ;;  %v11517_v33 = vld [vmem:[#allocation4 + $0x220] sm:$0xff]  ;;  %v8556_v16 = vshrl.u32 %v8348_v60, 16  ;;  %v14637_v21 = vpop.f32.mrf.mxu0  ;;  %v14651_v40 = vpack.c.b16 %v9226_v63, %v9225_v13  ;;  %v15682_v13 = vsel %vm11917_vm2, %v14573_v54, %v14546_v11 }
 0x52e   : > { %9316 = vmatpush.bf16.msra.mxu1 %v11517_v33  ;;  %v8548_v33 = vrot.slane %v8546_v39, 5  ;;  %v7362_v36 = vunpack.c.l.b16 %v15682_v13  ;;  %v7697_v11 = vsel %vm12233_vm5, %v14607_v45, %v7696_v0  ;;  %v15687_v54 = vshll.u32 %v14562_v15, 16 }
 0x52f   : > { %v6581_v44 = vadd.f32 %v6537_v6, %v6160_v32  ;;  %7492 = vmatmul.bf16.gmra.mxu1 %v7388_v23  ;;  %v9169_v23 = vsel %vm12233_vm5, %v9167_v37, %v9168_v56  ;;  %v9227_v6 = vunpack.c.l.b16 %v9166_v52  ;;  %v9175_v32 = vrot.slane %v8370_v26, 5  ;;  %15680 = vst [vmem:[#allocation21_spill] sm:$0xff] %v14651_v40 }
 0x530   : > { %v9228_v60 = vunpack.c.l.b16 %v9169_v23  ;;  %v14653_v56 = vrot.slane %v8552_v34, 5  ;;  %v8558_v37 = vrot.slane %v8556_v16, 4  ;;  %v15683_v34 = vshrl.u32 %v14582_v3, 16 }
 0x531   : > { %v14642_v61 = vadd.f32 %v14530_v10, %v6581_v44  ;;  %7923 = vmatmul.bf16.gmra.mxu2 %v14580_v22  ;;  %v8788_v10 = vunpack.c.l.b16 %v8541_v57  ;;  %v9176_v46 = vsel %vm12233_vm5, %v9174_v20, %v9175_v32  ;;  %v9229_v22 = vunpack.c.l.b16 %v9173_v50 }
 0x532   : > { %v14655_v52 = vpack.c.b16 %v9228_v60, %v9227_v6  ;;  %v9230_v38 = vunpack.c.l.b16 %v9176_v46  ;;  %v11058_v57 = vrot.slane %v7591_v53, 9  ;;  %v7098_v63 = vrot.slane %v15683_v34, 4 }
 0x533   : > { %v15686_v60 = vsel %vm11917_vm2, %v14578_v14, %v14586_v41  ;;  %v14681_v20 = vrot.slane %v15687_v54, 5  ;;  %v15688_v32 = vshrl.u32 %v14562_v15, 16  ;;  %v8813_v14 = vpack.c.b16 %v8788_v10, %v8787_v19  ;;  %v8350_v54 = vld [vmem:[#allocation2 + $0x78] sm:$0xf] }
 0x534   : > { %v5928_v44 = vpop.f32.mrf.mxu1  ;;  %15681 = vst [vmem:[#allocation22_spill] sm:$0xff] %v14655_v52  ;;  %v6164_v23 = vpop.f32.mrf.mxu2  ;;  %v14669_v6 = vpack.c.b16 %v9230_v38, %v9229_v22  ;;  %v7363_v50 = vunpack.c.l.b16 %v15686_v60  ;;  %v8549_v41 = vor.u32 %v8548_v33, %v8545_v8  ;;  %v8559_v22 = vor.u32 %v8558_v37, %v14653_v56 }
 0x535   : > { %v6162_v26 = vadd.f32 %v6161_v48, %v5928_v44  ;;  %v6539_v7 = vpop.f32.mrf.mxu3  ;;  %v15684_v48 = vshll.u32 %v14582_v3, 16  ;;  %v7111_v3 = vrot.slane %v15688_v32, 4  ;;  %v14685_v53 = vpop.f32.mrf.mxu0  ;;  %v8349_v44 = vld [vmem:[#allocation2 + $0x74] sm:$0x1]  ;;  %v15689_v45 = vrot.slane %v14562_v15, 5  ;;  %8925 = vmatmul.bf16.gmra.mxu0 %v8813_v14 }
 0x536   : > { %15685 = vst [vmem:[#allocation12_spill] sm:$0xff] %v14669_v6  ;;  %v8562_v13 = vshll.u32 %v8349_v44, 16  ;;  %v7389_v34 = vpack.c.b16 %v7363_v50, %v7362_v36  ;;  %v7115_v19 = vshll.u32 %v14649_v58, 16  ;;  %v8550_v10 = vrot.slane %v8549_v41, 4  ;;  %v8351_v44 = vld [vmem:[#allocation2 + $0x7c] sm:$0xf] }
 0x537   : > { %v6582_v39 = vadd.f32 %v6539_v7, %v6162_v26  ;;  %v7101_v16 = vrot.slane %v15684_v48, 5  ;;  %v11486_v26 = vld [vmem:[#allocation2 + $0x54] sm:$0xff]  ;;  %v7694_v38 = vsel %vm12233_vm5, %v11058_v57, %v15689_v45  ;;  %v7791_v48 = vunpack.c.l.b16 %v7697_v11  ;;  %v14697_v11 = vld [vmem:[#allocation2 + $0x68] sm:$0x1]  ;;  %v6924_v14 = vld [vmem:[#allocation2 + $0x60] sm:$0xf] }
 0x538   : > { %v8560_v8 = vrot.slane %v8559_v22, 4  ;;  %v7790_v15 = vunpack.c.l.b16 %v7694_v38  ;;  %v8555_v41 = vsel %vm11917_vm2, %v8550_v10, %v14653_v56  ;;  %v8567_v45 = vshrl.u32 %v8350_v54, 16 }
 0x539   : > { %v14688_v46 = vadd.f32 %v14550_v51, %v6582_v39  ;;  %v7102_v7 = vor.u32 %v7101_v16, %v7098_v63  ;;  %v7112_v51 = vor.u32 %v7111_v3, %v14681_v20  ;;  %v6925_v39 = vld [vmem:[#allocation2 + $0x64] sm:$0xf]  ;;  %v8564_v16 = vrot.slane %v8562_v13, 5  ;;  %v7592_v3 = vld [vmem:[#allocation2 + $0x60] sm:$0xe] }
 0x53a   : > { %8238 = vmatmul.bf16.gmra.mxu3 %v11486_v26  ;;  %v7700_v63 = vrot.slane %v6925_v39, 5  ;;  %v7816_v36 = vpack.c.b16 %v7791_v48, %v7790_v15  ;;  %v7117_v26 = vrot.slane %v7115_v19, 5  ;;  %v8570_v38 = vshll.u32 %v8350_v54, 16 }
 0x53b   : > { %v7103_v57 = vrot.slane %v7102_v7, 4  ;;  %v7113_v50 = vrot.slane %v7112_v51, 4  ;;  %v8565_v22 = vsel %vm11917_vm2, %v8560_v8, %v8564_v16  ;;  %v8576_v7 = vshll.u32 %v8351_v44, 16 }
 0x53c   : > { %v5931_v0 = vpop.f32.mrf.mxu1  ;;  %v6166_v37 = vpop.f32.mrf.mxu2  ;;  %v8580_v13 = vshrl.u32 %v8351_v44, 16  ;;  %v7703_v48 = vrot.slane %v14697_v11, 5  ;;  %v7123_v19 = vshll.u32 %v6924_v14, 16  ;;  %v7129_v10 = vshll.u32 %v6925_v39, 16 }
 0x53d   : > { %v6165_v60 = vadd.f32 %v6164_v23, %v5931_v0  ;;  %v6542_v33 = vpop.f32.mrf.mxu3  ;;  %v14699_v23 = vpop.f32.mrf.mxu0  ;;  %v7108_v0 = vsel %vm11917_vm2, %v7103_v57, %v14681_v20  ;;  %v7118_v56 = vsel %vm11917_vm2, %v7113_v50, %v7117_v26  ;;  %v8789_v15 = vunpack.c.l.b16 %v8555_v41 }
 0x53e   : > { %v8790_v54 = vunpack.c.l.b16 %v8565_v22  ;;  %v8569_v44 = vrot.slane %v8567_v45, 4  ;;  %v14715_v20 = vrot.slane %v8576_v7, 5  ;;  %v8582_v57 = vrot.slane %v8580_v13, 4  ;;  %v8352_v22 = vld [vmem:[#allocation2 + $0x80] sm:$0x1] }
 0x53f   : > { %v6583_v32 = vadd.f32 %v6542_v33, %v6165_v60  ;;  %7497 = vmatmul.bf16.gmra.mxu1 %v7389_v34  ;;  %v7702_v34 = vrot.slane %v7700_v63, 4  ;;  %v7120_v60 = vshrl.u32 %v6924_v14, 16  ;;  %v7133_v33 = vshrl.u32 %v6925_v39, 16 }
 0x540   : > { %v7364_v26 = vunpack.c.l.b16 %v7108_v0  ;;  %v7365_v14 = vunpack.c.l.b16 %v7118_v56  ;;  %v7125_v39 = vrot.slane %v7123_v19, 5  ;;  %v14726_v7 = vrot.slane %v7129_v10, 5  ;;  %v14729_v56 = vld [vmem:[#allocation2 + $0x70] sm:$0xf]  ;;  %v8353_v10 = vld [vmem:[#allocation2 + $0x84] sm:$0xf] }
 0x541   : > { %v14702_v58 = vadd.f32 %v14588_v27, %v6583_v32  ;;  %7928 = vmatmul.bf16.gmra.mxu2 %v7816_v36  ;;  %v11059_v27 = vrot.slane %v7592_v3, 9  ;;  %v8572_v36 = vrot.slane %v8570_v38, 5  ;;  %v7704_v50 = vsel %vm12233_vm5, %v7702_v34, %v7703_v48  ;;  %v11487_v38 = vld [vmem:[#allocation2 + $0x60] sm:$0xff] }
 0x542   : > { %v7135_v13 = vrot.slane %v7133_v33, 4  ;;  %v8586_v0 = vshll.u32 %v8352_v22, 16  ;;  %v7390_v19 = vpack.c.b16 %v7365_v14, %v7364_v26  ;;  %v7139_v22 = vshll.u32 %v14697_v11, 16 }
 0x543   : > { %v7701_v6 = vsel %vm12233_vm5, %v11059_v27, %v7700_v63  ;;  %v8573_v63 = vor.u32 %v8572_v36, %v8569_v44  ;;  %v8583_v27 = vor.u32 %v8582_v57, %v14715_v20  ;;  %v7593_v44 = vld [vmem:[#allocation2 + $0x6c] sm:$0xe]  ;;  %v8591_v14 = vshrl.u32 %v8353_v10, 16 }
 0x544   : > { %v5933_v51 = vpop.f32.mrf.mxu1  ;;  %v6169_v16 = vpop.f32.mrf.mxu2  ;;  %v7792_v48 = vunpack.c.l.b16 %v7701_v6  ;;  %v7707_v6 = vrot.slane %v14729_v56, 5 }
 0x545   : > { %v6167_v8 = vadd.f32 %v6166_v37, %v5933_v51  ;;  %v6544_v32 = vpop.f32.mrf.mxu3  ;;  %v7122_v37 = vrot.slane %v7120_v60, 4  ;;  %v14721_v41 = vpop.f32.mrf.mxu0  ;;  %v8814_v51 = vpack.c.b16 %v8790_v54, %v8789_v15  ;;  %v8574_v36 = vrot.slane %v8573_v63, 4 }
 0x546   : > { %v8584_v57 = vrot.slane %v8583_v27, 4  ;;  %v11060_v27 = vrot.slane %v7593_v44, 9 }
 0x547   : > { %v6584_v3 = vadd.f32 %v6544_v32, %v6167_v8  ;;  %v7793_v8 = vunpack.c.l.b16 %v7704_v50  ;;  %8930 = vmatmul.bf16.gmra.mxu0 %v8814_v51  ;;  %v7136_v32 = vor.u32 %v7135_v13, %v14726_v7 }
 0x549   : > { %v14724_v45 = vadd.f32 %v14637_v21, %v6584_v3  ;;  %v7126_v21 = vor.u32 %v7125_v39, %v7122_v37  ;;  %v8354_v3 = vld [vmem:[#allocation2 + $0x88] sm:$0xf]  ;;  %v7817_v54 = vpack.c.b16 %v7793_v8, %v7792_v48  ;;  %v8594_v37 = vshll.u32 %v8353_v10, 16  ;;  %v14739_v48 = vld [vmem:[#allocation2 + $0x74] sm:$0x1] }
 0x54a   : > { %8243 = vmatmul.bf16.gmra.mxu3 %v11487_v38  ;;  %v6927_v38 = vld [vmem:[#allocation2 + $0x6c] sm:$0xf]  ;;  %v8600_v39 = vshll.u32 %v8354_v3, 16  ;;  %v8604_v13 = vshrl.u32 %v8354_v3, 16  ;;  %v7137_v63 = vrot.slane %v7136_v32, 4  ;;  %v7141_v10 = vrot.slane %v7139_v22, 5 }
 0x54b   : > { %v7127_v8 = vrot.slane %v7126_v21, 4  ;;  %v7144_v11 = vshrl.u32 %v6927_v38, 16  ;;  %v7709_v3 = vrot.slane %v7707_v6, 4  ;;  %v7157_v21 = vshrl.u32 %v14729_v56, 16 }
 0x54c   : > { %v5936_v34 = vpop.f32.mrf.mxu1  ;;  %v6171_v15 = vpop.f32.mrf.mxu2  ;;  %v8596_v44 = vrot.slane %v8594_v37, 5 }
 0x54d   : > { %v6170_v60 = vadd.f32 %v6169_v16, %v5936_v34  ;;  %v6547_v33 = vpop.f32.mrf.mxu3  ;;  %v8588_v16 = vrot.slane %v8586_v0, 5  ;;  %v14734_v26 = vpop.f32.mrf.mxu0  ;;  %v11516_v34 = vld [vmem:[#allocation4 + $0x218] sm:$0xff]  ;;  %v8579_v0 = vsel %vm11917_vm2, %v8574_v36, %v14715_v20  ;;  %v7710_v20 = vrot.slane %v14739_v48, 5 }
 0x54e   : > { %9317 = vmatpush.bf16.msra.mxu1 %v11516_v34  ;;  %v8791_v36 = vunpack.c.l.b16 %v8579_v0  ;;  %v7132_v22 = vsel %vm11917_vm2, %v7127_v8, %v14726_v7  ;;  %v11488_v8 = vld [vmem:[#allocation2 + $0x6c] sm:$0xff] }
 0x54f   : > { %v6585_v50 = vadd.f32 %v6547_v33, %v6170_v60  ;;  %7502 = vmatmul.bf16.gmra.mxu1 %v7390_v19  ;;  %v7147_v60 = vshll.u32 %v6927_v38, 16  ;;  %v8589_v19 = vsel %vm11917_vm2, %v8584_v57, %v8588_v16  ;;  %v8593_v33 = vrot.slane %v8591_v14, 4 }
 0x550   : > { %v8606_v38 = vrot.slane %v8604_v13, 4  ;;  %v8792_v40 = vunpack.c.l.b16 %v8589_v19  ;;  %v7146_v16 = vrot.slane %v7144_v11, 4  ;;  %v7159_v13 = vrot.slane %v7157_v21, 4 }
 0x551   : > { %v14737_v51 = vadd.f32 %v14685_v53, %v6585_v50  ;;  %7933 = vmatmul.bf16.gmra.mxu2 %v7817_v54  ;;  %v7153_v53 = vshll.u32 %v14729_v56, 16  ;;  %v14748_v50 = vrot.slane %v8600_v39, 5  ;;  %v7142_v56 = vsel %vm11917_vm2, %v7137_v63, %v7141_v10 }
 0x552   : > { %v7149_v14 = vrot.slane %v7147_v60, 5  ;;  %v7711_v34 = vsel %vm12233_vm5, %v7709_v3, %v7710_v20  ;;  %v8597_v19 = vor.u32 %v8596_v44, %v8593_v33  ;;  %v7366_v63 = vunpack.c.l.b16 %v7132_v22  ;;  %v6931_v20 = vld [vmem:[#allocation2 + $0x7c] sm:$0xf] }
 0x553   : > { %v14756_v39 = vrot.slane %v7153_v53, 5  ;;  %v7367_v11 = vunpack.c.l.b16 %v7142_v56  ;;  %v8815_v60 = vpack.c.b16 %v8792_v40, %v8791_v36  ;;  %v7795_v21 = vunpack.c.l.b16 %v7711_v34  ;;  %v8356_v40 = vld [vmem:[#allocation2 + $0x90] sm:$0xf] }
 0x554   : > { %v5938_v32 = vpop.f32.mrf.mxu1  ;;  %v6174_v54 = vpop.f32.mrf.mxu2  ;;  %v7150_v10 = vor.u32 %v7149_v14, %v7146_v16  ;;  %v7163_v44 = vshll.u32 %v14739_v48, 16  ;;  %v8357_v14 = vld [vmem:[#allocation2 + $0x94] sm:$0xf] }
 0x555   : > { %v6172_v52 = vadd.f32 %v6171_v15, %v5938_v32  ;;  %v6549_v57 = vpop.f32.mrf.mxu3  ;;  %v8355_v15 = vld [vmem:[#allocation2 + $0x8c] sm:$0x1]  ;;  %v14760_v0 = vpop.f32.mrf.mxu0  ;;  %v8607_v32 = vor.u32 %v8606_v38, %v14748_v50  ;;  %v7160_v3 = vor.u32 %v7159_v13, %v14756_v39  ;;  %v7391_v22 = vpack.c.b16 %v7367_v11, %v7366_v63 }
 0x556   : > { %v8610_v53 = vshll.u32 %v8355_v15, 16  ;;  %v7165_v48 = vrot.slane %v7163_v44, 5  ;;  %v8615_v11 = vshrl.u32 %v8356_v40, 16 }
 0x557   : > { %v6586_v37 = vadd.f32 %v6549_v57, %v6172_v52  ;;  %v7708_v52 = vsel %vm12233_vm5, %v11060_v27, %v7707_v6  ;;  %8935 = vmatmul.bf16.gmra.mxu0 %v8815_v60  ;;  %v8608_v38 = vrot.slane %v8607_v32, 4  ;;  %v7151_v6 = vrot.slane %v7150_v10, 4  ;;  %v7594_v60 = vld [vmem:[#allocation2 + $0x78] sm:$0xe] }
 0x558   : > { %v7794_v56 = vunpack.c.l.b16 %v7708_v52  ;;  %v7714_v27 = vrot.slane %v6931_v20, 5  ;;  %v8612_v16 = vrot.slane %v8610_v53, 5  ;;  %v7161_v34 = vrot.slane %v7160_v3, 4 }
 0x559   : > { %v14764_v7 = vadd.f32 %v14699_v23, %v6586_v37  ;;  %v8598_v23 = vrot.slane %v8597_v19, 4  ;;  %v8618_v10 = vshll.u32 %v8356_v40, 16  ;;  %v8624_v53 = vshll.u32 %v8357_v14, 16 }
 0x55a   : > { %8248 = vmatmul.bf16.gmra.mxu3 %v11488_v8  ;;  %v7818_v13 = vpack.c.b16 %v7795_v21, %v7794_v56  ;;  %v14770_v8 = vld [vmem:[#allocation2 + $0x80] sm:$0x1]  ;;  %v8613_v63 = vsel %vm11917_vm2, %v8608_v38, %v8612_v16  ;;  %v8628_v21 = vshrl.u32 %v8357_v14, 16  ;;  %v7156_v3 = vsel %vm11917_vm2, %v7151_v6, %v14756_v39 }
 0x55b   : > { %15690 = vst [vmem:[#allocation13_spill] sm:$0xff] %v14764_v7  ;;  %v8603_v32 = vsel %vm11917_vm2, %v8598_v23, %v14748_v50  ;;  %v7716_v44 = vrot.slane %v7714_v27, 4  ;;  %v7166_v50 = vsel %vm11917_vm2, %v7161_v34, %v7165_v48  ;;  %v7181_v56 = vshrl.u32 %v6931_v20, 16 }
 0x55c   : > { %v5941_v33 = vpop.f32.mrf.mxu1  ;;  %v6176_v37 = vpop.f32.mrf.mxu2  ;;  %v8793_v40 = vunpack.c.l.b16 %v8603_v32  ;;  %v8617_v16 = vrot.slane %v8615_v11, 4  ;;  %v8630_v39 = vrot.slane %v8628_v21, 4  ;;  %v7368_v34 = vunpack.c.l.b16 %v7156_v3  ;;  %v11489_v21 = vld [vmem:[#allocation2 + $0x78] sm:$0xff] }
 0x55d   : > { %v6175_v57 = vadd.f32 %v6174_v54, %v5941_v33  ;;  %v6552_v36 = vpop.f32.mrf.mxu3  ;;  %v14772_v19 = vpop.f32.mrf.mxu0  ;;  %v6930_v54 = vld [vmem:[#allocation2 + $0x78] sm:$0xf]  ;;  %v11061_v33 = vrot.slane %v7594_v60, 9  ;;  %v7369_v48 = vunpack.c.l.b16 %v7166_v50 }
 0x55e   : > { %v7168_v23 = vshrl.u32 %v6930_v54, 16  ;;  %v7171_v38 = vshll.u32 %v6930_v54, 16 }
 0x55f   : > { %v6587_v15 = vadd.f32 %v6552_v36, %v6175_v57  ;;  %7507 = vmatmul.bf16.gmra.mxu1 %v7391_v22  ;;  %v7717_v57 = vrot.slane %v14770_v8, 5  ;;  %v7177_v22 = vshll.u32 %v6931_v20, 16  ;;  %v8794_v36 = vunpack.c.l.b16 %v8613_v63 }
 0x560   : > { %v7170_v20 = vrot.slane %v7168_v23, 4  ;;  %v7173_v32 = vrot.slane %v7171_v38, 5 }
 0x561   : > { %v14780_v52 = vadd.f32 %v14721_v41, %v6587_v15  ;;  %7938 = vmatmul.bf16.gmra.mxu2 %v7818_v13  ;;  %v8620_v15 = vrot.slane %v8618_v10, 5  ;;  %v7715_v13 = vsel %vm12233_vm5, %v11061_v33, %v7714_v27  ;;  %v7718_v54 = vsel %vm12233_vm5, %v7716_v44, %v7717_v57  ;;  %v8358_v10 = vld [vmem:[#allocation2 + $0x98] sm:$0x1] }
 0x562   : > { %v14794_v63 = vrot.slane %v7177_v22, 5  ;;  %v8816_v27 = vpack.c.b16 %v8794_v36, %v8793_v40  ;;  %v7796_v44 = vunpack.c.l.b16 %v7715_v13  ;;  %v7797_v57 = vunpack.c.l.b16 %v7718_v54 }
 0x563   : > { %15691 = vst [vmem:[#allocation14_spill] sm:$0xff] %v14780_v52  ;;  %v14788_v52 = vrot.slane %v8624_v53, 5  ;;  %v8621_v3 = vor.u32 %v8620_v15, %v8617_v16  ;;  %v8634_v50 = vshll.u32 %v8358_v10, 16  ;;  %v7174_v38 = vor.u32 %v7173_v32, %v7170_v20  ;;  %v8359_v32 = vld [vmem:[#allocation2 + $0x9c] sm:$0xf] }
 0x564   : > { %v5943_v41 = vpop.f32.mrf.mxu1  ;;  %v7899_v60 = vpop.f32.mrf.mxu2  ;;  %v7819_v54 = vpack.c.b16 %v7797_v57, %v7796_v44  ;;  %v8639_v44 = vshrl.u32 %v8359_v32, 16  ;;  %v8642_v57 = vshll.u32 %v8359_v32, 16 }
 0x565   : > { %v6177_v14 = vadd.f32 %v6176_v37, %v5943_v41  ;;  %v6554_v6 = vpop.f32.mrf.mxu3  ;;  %v7183_v37 = vrot.slane %v7181_v56, 4  ;;  %v14796_v11 = vpop.f32.mrf.mxu0  ;;  %v14801_v41 = vld [vmem:[#allocation2 + $0x88] sm:$0xf]  ;;  %v8631_v33 = vor.u32 %v8630_v39, %v14788_v52  ;;  %v7187_v56 = vshll.u32 %v14770_v8, 16  ;;  %v14808_v39 = vld [vmem:[#allocation2 + $0x8c] sm:$0x1] }
 0x566   : > { %v8622_v40 = vrot.slane %v8621_v3, 4  ;;  %v8636_v20 = vrot.slane %v8634_v50, 5  ;;  %v7175_v10 = vrot.slane %v7174_v38, 4  ;;  %v11515_v3 = vld [vmem:[#allocation4 + $0x210] sm:$0xff] }
 0x567   : > { %v6588_v7 = vadd.f32 %v6554_v6, %v6177_v14  ;;  %8940 = vmatmul.bf16.gmra.mxu0 %v8816_v27  ;;  %v7184_v22 = vor.u32 %v7183_v37, %v14794_v63  ;;  %v7392_v14 = vpack.c.b16 %v7369_v48, %v7368_v34  ;;  %v8632_v36 = vrot.slane %v8631_v33, 4  ;;  %v7595_v6 = vld [vmem:[#allocation2 + $0x84] sm:$0xe]  ;;  %v8360_v37 = vld [vmem:[#allocation2 + $0xa0] sm:$0xf]  ;;  %9318 = vmatpush.bf16.msra.mxu1 %v11515_v3 }
 0x568   : > { %v7724_v48 = vrot.slane %v14808_v39, 5  ;;  %v8648_v50 = vshll.u32 %v8360_v37, 16 }
 0x569   : > { %v14799_v53 = vadd.f32 %v14734_v26, %v6588_v7  ;;  %v7721_v26 = vrot.slane %v14801_v41, 5  ;;  %v7185_v8 = vrot.slane %v7184_v22, 4  ;;  %v8637_v33 = vsel %vm11917_vm2, %v8632_v36, %v8636_v20 }
 0x56a   : > { %8253 = vmatmul.bf16.gmra.mxu3 %v11489_v21  ;;  %v7189_v21 = vrot.slane %v7187_v56, 5  ;;  %v11062_v22 = vrot.slane %v7595_v6, 9  ;;  %v7205_v6 = vshrl.u32 %v14801_v41, 16 }
 0x56b   : > { %15692 = vst [vmem:[#allocation15_spill] sm:$0xff] %v14799_v53  ;;  %v7723_v27 = vrot.slane %v7721_v26, 4 }
 0x56c   : > { %v7473_v23 = vpop.f32.mrf.mxu1  ;;  %v7901_v15 = vpop.f32.mrf.mxu2 }
 0x56d   : > { %v7553_v7 = vadd.f32 %v7473_v23, %v14191_v42  ;;  %v8214_v16 = vpop.f32.mrf.mxu3  ;;  %v14810_v53 = vpop.f32.mrf.mxu0  ;;  %v6933_v42 = vld [vmem:[#allocation2 + $0x84] sm:$0xf]  ;;  %v8652_v23 = vshrl.u32 %v8360_v37, 16  ;;  %v7725_v36 = vsel %vm12233_vm5, %v7723_v27, %v7724_v48  ;;  %v8641_v37 = vrot.slane %v8639_v44, 4 }
 0x56e   : > { %v7192_v56 = vshrl.u32 %v6933_v42, 16  ;;  %v7722_v48 = vsel %vm12233_vm5, %v11062_v22, %v7721_v26  ;;  %v7207_v44 = vrot.slane %v7205_v6, 4 }
 0x56f   : > { %v7979_v13 = vadd.f32 %v7899_v60, %v7553_v7  ;;  %7512 = vmatmul.bf16.gmra.mxu1 %v7392_v14  ;;  %v8627_v60 = vsel %vm11917_vm2, %v8622_v40, %v14788_v52  ;;  %v7195_v7 = vshll.u32 %v6933_v42, 16  ;;  %v7180_v52 = vsel %vm11917_vm2, %v7175_v10, %v14794_v63 }
 0x570   : > { %v7190_v40 = vsel %vm11917_vm2, %v7185_v8, %v7189_v21  ;;  %v8644_v42 = vrot.slane %v8642_v57, 5  ;;  %v8654_v63 = vrot.slane %v8652_v23, 4  ;;  %v7194_v8 = vrot.slane %v7192_v56, 4 }
 0x571   : > { %v8294_v34 = vadd.f32 %v8214_v16, %v7979_v13  ;;  %7943 = vmatmul.bf16.gmra.mxu2 %v7819_v54  ;;  %v7201_v16 = vshll.u32 %v14801_v41, 16  ;;  %v8795_v13 = vunpack.c.l.b16 %v8627_v60  ;;  %v8796_v54 = vunpack.c.l.b16 %v8637_v33  ;;  %v8361_v41 = vld [vmem:[#allocation2 + $0xa4] sm:$0x1] }
 0x572   : > { %v7197_v21 = vrot.slane %v7195_v7, 5  ;;  %v7370_v3 = vunpack.c.l.b16 %v7180_v52  ;;  %v7371_v27 = vunpack.c.l.b16 %v7190_v40  ;;  %v11490_v33 = vld [vmem:[#allocation2 + $0x84] sm:$0xff]  ;;  %v7798_v26 = vunpack.c.l.b16 %v7722_v48  ;;  %v14844_v7 = vld [vmem:[#allocation2 + $0x90] sm:$0xe] }
 0x573   : > { %v14819_v38 = vadd.f32 %v14760_v0, %v8294_v34  ;;  %v14831_v34 = vrot.slane %v8648_v50, 5  ;;  %v8817_v57 = vpack.c.b16 %v8796_v54, %v8795_v13  ;;  %v7211_v50 = vshll.u32 %v14808_v39, 16  ;;  %v8362_v13 = vld [vmem:[#allocation2 + $0xa8] sm:$0xf] }
 0x574   : > { %v7475_v14 = vpop.f32.mrf.mxu1  ;;  %v7904_v32 = vpop.f32.mrf.mxu2  ;;  %v7198_v22 = vor.u32 %v7197_v21, %v7194_v8  ;;  %v8658_v52 = vshll.u32 %v8361_v41, 16 }
 0x575   : > { %15693 = vst [vmem:[#allocation11_spill] sm:$0xff] %v14819_v38  ;;  %v7554_v0 = vadd.f32 %v7475_v14, %v14204_v47  ;;  %v8216_v20 = vpop.f32.mrf.mxu3  ;;  %v7799_v47 = vunpack.c.l.b16 %v7725_v36  ;;  %v14835_v14 = vpop.f32.mrf.mxu0  ;;  %v14837_v38 = vrot.slane %v7201_v16, 5  ;;  %v8655_v23 = vor.u32 %v8654_v63, %v14831_v34  ;;  %v14846_v36 = vld [vmem:[#allocation2 + $0x94] sm:$0xf] }
 0x576   : > { %v7199_v21 = vrot.slane %v7198_v22, 4  ;;  %v7728_v48 = vrot.slane %v14846_v36, 5  ;;  %v8660_v41 = vrot.slane %v8658_v52, 5 }
 0x577   : > { %v7980_v10 = vadd.f32 %v7901_v15, %v7554_v0  ;;  %v8645_v15 = vor.u32 %v8644_v42, %v8641_v37  ;;  %8945 = vmatmul.bf16.gmra.mxu0 %v8817_v57  ;;  %v7393_v0 = vpack.c.b16 %v7371_v27, %v7370_v3  ;;  %v7820_v39 = vpack.c.b16 %v7799_v47, %v7798_v26  ;;  %v6936_v42 = vld [vmem:[#allocation2 + $0x90] sm:$0xf] }
 0x578   : > { %v7208_v6 = vor.u32 %v7207_v44, %v14837_v38  ;;  %v11063_v37 = vrot.slane %v14844_v7, 9  ;;  %v8663_v27 = vshrl.u32 %v8362_v13, 16  ;;  %v8666_v47 = vshll.u32 %v8362_v13, 16 }
 0x579   : > { %v8295_v60 = vadd.f32 %v8216_v20, %v7980_v10  ;;  %v7213_v20 = vrot.slane %v7211_v50, 5  ;;  %v8646_v63 = vrot.slane %v8645_v15, 4  ;;  %v8656_v10 = vrot.slane %v8655_v23, 4 }
 0x57a   : > { %8258 = vmatmul.bf16.gmra.mxu3 %v11490_v33  ;;  %v8676_v33 = vshrl.u32 %v14596_v12, 16  ;;  %v7209_v57 = vrot.slane %v7208_v6, 4  ;;  %v7216_v50 = vshrl.u32 %v6936_v42, 16  ;;  %v7219_v15 = vshll.u32 %v6936_v42, 16 }
 0x57b   : > { %v14842_v56 = vadd.f32 %v14772_v19, %v8295_v60  ;;  %v8672_v60 = vshll.u32 %v14596_v12, 16  ;;  %v7229_v23 = vshrl.u32 %v14846_v36, 16  ;;  %v8651_v26 = vsel %vm11917_vm2, %v8646_v63, %v14831_v34 }
 0x57c   : > { %v7478_v40 = vpop.f32.mrf.mxu1  ;;  %v7906_v19 = vpop.f32.mrf.mxu2  ;;  %v8661_v22 = vsel %vm11917_vm2, %v8656_v10, %v8660_v41  ;;  %v7204_v12 = vsel %vm11917_vm2, %v7199_v21, %v14837_v38  ;;  %v7730_v52 = vrot.slane %v7728_v48, 4  ;;  %v8678_v34 = vrot.slane %v8676_v33, 4 }
 0x57d   : > { %v7555_v16 = vadd.f32 %v7478_v40, %v14209_v49  ;;  %v8219_v54 = vpop.f32.mrf.mxu3  ;;  %v14852_v49 = vld [vmem:[#allocation2 + $0x98] sm:$0x1]  ;;  %v14854_v3 = vpop.f32.mrf.mxu0  ;;  %v14872_v6 = vrot.slane %v8672_v60, 5  ;;  %v7218_v10 = vrot.slane %v7216_v50, 4  ;;  %v7221_v38 = vrot.slane %v7219_v15, 5 }
 0x57e   : > { %v7731_v40 = vrot.slane %v14852_v49, 5  ;;  %v7231_v21 = vrot.slane %v7229_v23, 4  ;;  %v7729_v50 = vsel %vm12233_vm5, %v11063_v37, %v7728_v48 }
 0x57f   : > { %v7981_v8 = vadd.f32 %v7904_v32, %v7555_v16  ;;  %7517 = vmatmul.bf16.gmra.mxu1 %v7393_v0  ;;  %v7225_v32 = vshll.u32 %v14846_v36, 16  ;;  %v8665_v36 = vrot.slane %v8663_v27, 4  ;;  %v8668_v0 = vrot.slane %v8666_v47, 5 }
 0x580   : > { %v7732_v27 = vsel %vm12233_vm5, %v7730_v52, %v7731_v40  ;;  %v7222_v15 = vor.u32 %v7221_v38, %v7218_v10  ;;  %v14891_v52 = vld [vmem:[#allocation2 + $0xa0] sm:$0xf]  ;;  %v14896_v38 = vld [vmem:[#allocation2 + $0xa4] sm:$0x1] }
 0x581   : > { %v8296_v44 = vadd.f32 %v8219_v54, %v7981_v8  ;;  %7948 = vmatmul.bf16.gmra.mxu2 %v7820_v39  ;;  %v8797_v54 = vunpack.c.l.b16 %v8651_v26  ;;  %v8798_v39 = vunpack.c.l.b16 %v8661_v22  ;;  %v14877_v8 = vrot.slane %v7225_v32, 5 }
 0x582   : > { %v8669_v60 = vor.u32 %v8668_v0, %v8665_v36  ;;  %v7801_v22 = vunpack.c.l.b16 %v7732_v27  ;;  %v7800_v0 = vunpack.c.l.b16 %v7729_v50 }
 0x583   : > { %v14866_v7 = vadd.f32 %v14796_v11, %v8296_v44  ;;  %v7214_v11 = vsel %vm11917_vm2, %v7209_v57, %v7213_v20  ;;  %v11491_v20 = vld [vmem:[#allocation2 + $0x90] sm:$0xff]  ;;  %v7372_v44 = vunpack.c.l.b16 %v7204_v12  ;;  %v8818_v26 = vpack.c.b16 %v8798_v39, %v8797_v54 }
 0x584   : > { %v7480_v16 = vpop.f32.mrf.mxu1  ;;  %v7909_v63 = vpop.f32.mrf.mxu2  ;;  %v7373_v57 = vunpack.c.l.b16 %v7214_v11  ;;  %v7232_v32 = vor.u32 %v7231_v21, %v14877_v8  ;;  %v7235_v12 = vshll.u32 %v14852_v49, 16  ;;  %v7223_v11 = vrot.slane %v7222_v15, 4 }
 0x585   : > { %v7556_v13 = vadd.f32 %v7480_v16, %v14222_v28  ;;  %v8221_v42 = vpop.f32.mrf.mxu3  ;;  %v14881_v47 = vpop.f32.mrf.mxu0  ;;  %v8679_v28 = vor.u32 %v8678_v34, %v14872_v6  ;;  %v8670_v16 = vrot.slane %v8669_v60, 4  ;;  %v8365_v34 = vld [vmem:[#allocation2 + $0xb4] sm:$0xf]  ;;  %v7735_v54 = vrot.slane %v14891_v52, 5 }
 0x586   : > { %v7394_v48 = vpack.c.b16 %v7373_v57, %v7372_v44  ;;  %v7821_v10 = vpack.c.b16 %v7801_v22, %v7800_v0  ;;  %v7237_v49 = vrot.slane %v7235_v12, 5  ;;  %v8687_v60 = vshrl.u32 %v8365_v34, 16 }
 0x587   : > { %v7982_v41 = vadd.f32 %v7906_v19, %v7556_v13  ;;  %v8682_v19 = vshll.u32 %v14619_v30, 16  ;;  %8950 = vmatmul.bf16.gmra.mxu0 %v8818_v26  ;;  %v8680_v36 = vrot.slane %v8679_v28, 4  ;;  %v8700_v44 = vshrl.u32 %v14609_v62, 16 }
 0x588   : > { %v7228_v57 = vsel %vm11917_vm2, %v7223_v11, %v14877_v8  ;;  %v7737_v50 = vrot.slane %v7735_v54, 4  ;;  %v7253_v12 = vshrl.u32 %v14891_v52, 16 }
 0x589   : > { %v8297_v33 = vadd.f32 %v8221_v42, %v7982_v41  ;;  %v8684_v39 = vrot.slane %v8682_v19, 5  ;;  %v6939_v41 = vld [vmem:[#allocation2 + $0x9c] sm:$0xf] }
 0x58a   : > { %8263 = vmatmul.bf16.gmra.mxu3 %v11491_v20  ;;  %v8690_v20 = vshll.u32 %v8365_v34, 16  ;;  %v7240_v19 = vshrl.u32 %v6939_v41, 16  ;;  %v7243_v22 = vshll.u32 %v6939_v41, 16 }
 0x58b   : > { %v14889_v23 = vadd.f32 %v14810_v53, %v8297_v33  ;;  %v7233_v53 = vrot.slane %v7232_v32, 4  ;;  %v8685_v27 = vsel %vm11917_vm2, %v8680_v36, %v8684_v39  ;;  %v11514_v33 = vld [vmem:[#allocation4 + $0x208] sm:$0xff]  ;;  %v7597_v32 = vld [vmem:[#allocation2 + $0x9c] sm:$0xe]  ;;  %v8689_v36 = vrot.slane %v8687_v60, 4 }
 0x58c   : > { %v7483_v40 = vpop.f32.mrf.mxu1  ;;  %v7911_v30 = vpop.f32.mrf.mxu2  ;;  %9319 = vmatpush.bf16.msra.mxu1 %v11514_v33  ;;  %v11064_v11 = vrot.slane %v7597_v32, 9  ;;  %v7374_v39 = vunpack.c.l.b16 %v7228_v57 }
 0x58d   : > { %v7557_v37 = vadd.f32 %v7483_v40, %v14227_v55  ;;  %v8224_v13 = vpop.f32.mrf.mxu3  ;;  %v14898_v21 = vpop.f32.mrf.mxu0  ;;  %v8675_v55 = vsel %vm11917_vm2, %v8670_v16, %v14872_v6  ;;  %v7238_v26 = vsel %vm11917_vm2, %v7233_v53, %v7237_v49  ;;  %v7738_v6 = vrot.slane %v14896_v38, 5 }
 0x58e   : > { %v7249_v40 = vshll.u32 %v14891_v52, 16  ;;  %v8799_v8 = vunpack.c.l.b16 %v8675_v55  ;;  %v8800_v16 = vunpack.c.l.b16 %v8685_v27  ;;  %v7242_v49 = vrot.slane %v7240_v19, 4 }
 0x58f   : > { %v7983_v42 = vadd.f32 %v7909_v63, %v7557_v37  ;;  %7522 = vmatmul.bf16.gmra.mxu1 %v7394_v48  ;;  %v8696_v63 = vshll.u32 %v14609_v62, 16  ;;  %v8692_v48 = vrot.slane %v8690_v20, 5  ;;  %v7245_v52 = vrot.slane %v7243_v22, 5 }
 0x590   : > { %v14923_v41 = vrot.slane %v7249_v40, 5  ;;  %v7255_v55 = vrot.slane %v7253_v12, 4  ;;  %v14935_v40 = vld [vmem:[#allocation2 + $0xac] sm:$0xf] }
 0x591   : > { %v8298_v28 = vadd.f32 %v8224_v13, %v7983_v42  ;;  %7953 = vmatmul.bf16.gmra.mxu2 %v7821_v10  ;;  %v14919_v0 = vrot.slane %v8696_v63, 5  ;;  %v7375_v42 = vunpack.c.l.b16 %v7238_v26  ;;  %v7739_v10 = vsel %vm12233_vm5, %v7737_v50, %v7738_v6 }
 0x592   : > { %v8693_v33 = vor.u32 %v8692_v48, %v8689_v36  ;;  %v7736_v63 = vsel %vm12233_vm5, %v11064_v11, %v7735_v54  ;;  %v7803_v6 = vunpack.c.l.b16 %v7739_v10  ;;  %v7246_v32 = vor.u32 %v7245_v52, %v7242_v49  ;;  %v8368_v48 = vld [vmem:[#allocation2 + $0xc0] sm:$0xf]  ;;  %v11641_v52 = vld [vmem:[#allocation2 + $0xc4] sm:$0xf] }
 0x593   : > { %v14914_v15 = vadd.f32 %v14835_v14, %v8298_v28  ;;  %v8702_v14 = vrot.slane %v8700_v44, 4  ;;  %v8819_v28 = vpack.c.b16 %v8800_v16, %v8799_v8  ;;  %v11640_v44 = vld [vmem:[#allocation2 + $0xbc] sm:$0x1]  ;;  %v7395_v50 = vpack.c.b16 %v7375_v42, %v7374_v39 }
 0x594   : > { %v7485_v62 = vpop.f32.mrf.mxu1  ;;  %v7914_v13 = vpop.f32.mrf.mxu2  ;;  %v8706_v57 = vshll.u32 %v11640_v44, 16  ;;  %v7256_v22 = vor.u32 %v7255_v55, %v14923_v41  ;;  %v7802_v16 = vunpack.c.l.b16 %v7736_v63  ;;  %v7259_v54 = vshll.u32 %v14896_v38, 16 }
 0x595   : > { %v7558_v37 = vadd.f32 %v7485_v62, %v14240_v24  ;;  %v8226_v34 = vpop.f32.mrf.mxu3  ;;  %v11492_v24 = vld [vmem:[#allocation2 + $0x9c] sm:$0xff]  ;;  %v14925_v60 = vpop.f32.mrf.mxu0  ;;  %v8703_v20 = vor.u32 %v8702_v14, %v14919_v0  ;;  %v8694_v62 = vrot.slane %v8693_v33, 4  ;;  %v7742_v11 = vrot.slane %v14935_v40, 5 }
 0x596   : > { %v7822_v14 = vpack.c.b16 %v7803_v6, %v7802_v16  ;;  %v7257_v39 = vrot.slane %v7256_v22, 4  ;;  %v8714_v49 = vshll.u32 %v8368_v48, 16  ;;  %v8720_v38 = vshll.u32 %v11641_v52, 16  ;;  %v6944_v6 = vld [vmem:[#allocation2 + $0xb0] sm:$0x1] }
 0x597   : > { %v7984_v53 = vadd.f32 %v7911_v30, %v7558_v37  ;;  %8955 = vmatmul.bf16.gmra.mxu0 %v8819_v28  ;;  %v8708_v37 = vrot.slane %v8706_v57, 5  ;;  %v8699_v42 = vsel %vm11917_vm2, %v8694_v62, %v14919_v0  ;;  %v8724_v55 = vshrl.u32 %v11641_v52, 16 }
 0x598   : > { %v7744_v44 = vrot.slane %v7742_v11, 4  ;;  %v7273_v57 = vshll.u32 %v14935_v40, 16  ;;  %v8716_v16 = vrot.slane %v8714_v49, 5 }
 0x599   : > { %v8299_v27 = vadd.f32 %v8226_v34, %v7984_v53  ;;  %v7247_v34 = vrot.slane %v7246_v32, 4  ;;  %v7598_v32 = vld [vmem:[#allocation2 + $0xa8] sm:$0xe] }
 0x59a   : > { %8268 = vmatmul.bf16.gmra.mxu3 %v11492_v24  ;;  %v7261_v24 = vrot.slane %v7259_v54, 5 }
 0x59b   : > { %v14929_v30 = vadd.f32 %v14854_v3, %v8299_v27  ;;  %v8704_v3 = vrot.slane %v8703_v20, 4  ;;  %v7252_v0 = vsel %vm11917_vm2, %v7247_v34, %v14923_v41  ;;  %v8726_v41 = vrot.slane %v8724_v55, 4 }
 0x59c   : > { %v7488_v26 = vpop.f32.mrf.mxu1  ;;  %v7916_v8 = vpop.f32.mrf.mxu2 }
 0x59d   : > { %v7559_v19 = vadd.f32 %v7488_v26, %v14245_v25  ;;  %v8229_v12 = vpop.f32.mrf.mxu3  ;;  %v6942_v25 = vld [vmem:[#allocation2 + $0xa8] sm:$0xf]  ;;  %v8709_v10 = vsel %vm11917_vm2, %v8704_v3, %v8708_v37  ;;  %v14947_v28 = vpop.f32.mrf.mxu0  ;;  %v7277_v26 = vshrl.u32 %v14935_v40, 16  ;;  %v11065_v40 = vrot.slane %v7598_v32, 9 }
 0x59e   : > { %v7264_v33 = vshrl.u32 %v6942_v25, 16  ;;  %v7267_v20 = vshll.u32 %v6942_v25, 16  ;;  %v8802_v22 = vunpack.c.l.b16 %v8709_v10 }
 0x59f   : > { %v7985_v36 = vadd.f32 %v7914_v13, %v7559_v19  ;;  %7527 = vmatmul.bf16.gmra.mxu1 %v7395_v50  ;;  %v8711_v13 = vshrl.u32 %v8368_v48, 16  ;;  %v8801_v19 = vunpack.c.l.b16 %v8699_v42  ;;  %v7279_v34 = vrot.slane %v7277_v26, 4 }
 0x5a0   : > { %v7266_v37 = vrot.slane %v7264_v33, 4  ;;  %v7269_v48 = vrot.slane %v7267_v20, 5  ;;  %v11642_v20 = vld [vmem:[#allocation2 + $0xc8] sm:$0x1] }
 0x5a1   : > { %v8300_v53 = vadd.f32 %v8229_v12, %v7985_v36  ;;  %7958 = vmatmul.bf16.gmra.mxu2 %v7822_v14  ;;  %v8713_v12 = vrot.slane %v8711_v13, 4  ;;  %v14957_v36 = vrot.slane %v8720_v38, 5  ;;  %v7745_v14 = vrot.slane %v6944_v6, 5 }
 0x5a2   : > { %v8820_v10 = vpack.c.b16 %v8802_v22, %v8801_v19  ;;  %v7270_v38 = vor.u32 %v7269_v48, %v7266_v37  ;;  %v6945_v48 = vld [vmem:[#allocation2 + $0xb4] sm:$0xf] }
 0x5a3   : > { %v14945_v27 = vadd.f32 %v14881_v47, %v8300_v53  ;;  %v7262_v47 = vsel %vm11917_vm2, %v7257_v39, %v7261_v24  ;;  %v11493_v53 = vld [vmem:[#allocation2 + $0xa8] sm:$0xff]  ;;  %v7376_v39 = vunpack.c.l.b16 %v7252_v0  ;;  %v7746_v13 = vsel %vm12233_vm5, %v7744_v44, %v7745_v14 }
 0x5a4   : > { %v7490_v63 = vpop.f32.mrf.mxu1  ;;  %v7919_v3 = vpop.f32.mrf.mxu2  ;;  %v7377_v42 = vunpack.c.l.b16 %v7262_v47  ;;  %v8717_v49 = vor.u32 %v8716_v16, %v8713_v12  ;;  %v8727_v52 = vor.u32 %v8726_v41, %v14957_v36  ;;  %v7743_v24 = vsel %vm12233_vm5, %v11065_v40, %v7742_v11  ;;  %v6946_v11 = vld [vmem:[#allocation2 + $0xb8] sm:$0xf] }
 0x5a5   : > { %v7560_v50 = vadd.f32 %v7490_v63, %v14262_v43  ;;  %v8231_v62 = vpop.f32.mrf.mxu3  ;;  %v14959_v43 = vrot.slane %v7273_v57, 5  ;;  %v8730_v63 = vshll.u32 %v11642_v20, 16  ;;  %v7805_v57 = vunpack.c.l.b16 %v7746_v13  ;;  %v14971_v26 = vpop.f32.mrf.mxu0 }
 0x5a6   : > { %v7396_v44 = vpack.c.b16 %v7377_v42, %v7376_v39  ;;  %v7283_v47 = vshll.u32 %v6944_v6, 16  ;;  %v8718_v32 = vrot.slane %v8717_v49, 4  ;;  %v8728_v19 = vrot.slane %v8727_v52, 4 }
 0x5a7   : > { %v7986_v54 = vadd.f32 %v7916_v8, %v7560_v50  ;;  %8960 = vmatmul.bf16.gmra.mxu0 %v8820_v10  ;;  %v7280_v33 = vor.u32 %v7279_v34, %v14959_v43  ;;  %v7271_v12 = vrot.slane %v7270_v38, 4  ;;  %v8732_v41 = vrot.slane %v8730_v63, 5  ;;  %v7599_v10 = vld [vmem:[#allocation2 + $0xb4] sm:$0xe] }
 0x5a8   : > { %v7285_v40 = vrot.slane %v7283_v47, 5  ;;  %v7749_v14 = vrot.slane %v6946_v11, 5  ;;  %v8723_v34 = vsel %vm11917_vm2, %v8718_v32, %v14957_v36  ;;  %v7288_v13 = vshrl.u32 %v6945_v48, 16 }
 0x5a9   : > { %v8301_v25 = vadd.f32 %v8231_v62, %v7986_v54  ;;  %v7804_v62 = vunpack.c.l.b16 %v7743_v24  ;;  %v7281_v16 = vrot.slane %v7280_v33, 4  ;;  %v8733_v6 = vsel %vm11917_vm2, %v8728_v19, %v8732_v41 }
 0x5aa   : > { %8273 = vmatmul.bf16.gmra.mxu3 %v11493_v53  ;;  %v6947_v53 = vld [vmem:[#allocation2 + $0xbc] sm:$0x1]  ;;  %v7291_v36 = vshll.u32 %v6945_v48, 16  ;;  %v7297_v49 = vshll.u32 %v6946_v11, 16  ;;  %v7301_v38 = vshrl.u32 %v6946_v11, 16  ;;  %v7751_v20 = vrot.slane %v7749_v14, 4 }
 0x5ab   : > { %v14965_v8 = vadd.f32 %v14898_v21, %v8301_v25  ;;  %v7823_v37 = vpack.c.b16 %v7805_v57, %v7804_v62  ;;  %v7276_v25 = vsel %vm11917_vm2, %v7271_v12, %v14959_v43  ;;  %v7286_v42 = vsel %vm11917_vm2, %v7281_v16, %v7285_v40 }
 0x5ac   : > { %v7493_v55 = vpop.f32.mrf.mxu1  ;;  %v7921_v21 = vpop.f32.mrf.mxu2  ;;  %v11066_v43 = vrot.slane %v7599_v10, 9  ;;  %v7378_v57 = vunpack.c.l.b16 %v7276_v25  ;;  %v7290_v47 = vrot.slane %v7288_v13, 4  ;;  %v7293_v32 = vrot.slane %v7291_v36, 5 }
 0x5ad   : > { %v7561_v0 = vadd.f32 %v7493_v55, %v14271_v1  ;;  %v8234_v50 = vpop.f32.mrf.mxu3  ;;  %v11513_v1 = vld [vmem:[#allocation4 + $0x200] sm:$0xff]  ;;  %v8804_v55 = vunpack.c.l.b16 %v8733_v6  ;;  %v7299_v62 = vrot.slane %v7297_v49, 5  ;;  %v7303_v12 = vrot.slane %v7301_v38, 4  ;;  %v4752_v6 = vld [vmem:[#allocation2 + $0xcc] sm:$0x1] }
 0x5ae   : > { %9320 = vmatpush.bf16.msra.mxu1 %v11513_v1  ;;  %v7750_v41 = vsel %vm12233_vm5, %v11066_v43, %v7749_v14  ;;  %v7307_v13 = vshll.u32 %v6947_v53, 16 }
 0x5af   : > { %v7987_v22 = vadd.f32 %v7919_v3, %v7561_v0  ;;  %7532 = vmatmul.bf16.gmra.mxu1 %v7396_v44  ;;  %v7752_v0 = vrot.slane %v6947_v53, 5  ;;  %v14987_v44 = vpop.f32.mrf.mxu0  ;;  %v7304_v40 = vor.u32 %v7303_v12, %v7299_v62  ;;  %v7806_v10 = vunpack.c.l.b16 %v7750_v41 }
 0x5b0   : > { %v7309_v9 = vrot.slane %v7307_v13, 5 }
 0x5b1   : > { %v8302_v54 = vadd.f32 %v8234_v50, %v7987_v22  ;;  %7963 = vmatmul.bf16.gmra.mxu2 %v7823_v37  ;;  %v7379_v50 = vunpack.c.l.b16 %v7286_v42  ;;  %v11494_v22 = vld [vmem:[#allocation2 + $0xb4] sm:$0xff]  ;;  %v7753_v11 = vsel %vm12233_vm5, %v7751_v20, %v7752_v0  ;;  %v7600_v20 = vld [vmem:[#allocation2 + $0xc0] sm:$0xe] }
 0x5b2   : > { %v7807_v1 = vunpack.c.l.b16 %v7753_v11 }
 0x5b3   : > { %v14979_v3 = vadd.f32 %v14925_v60, %v8302_v54  ;;  %v8803_v60 = vunpack.c.l.b16 %v8723_v34  ;;  %v7294_v54 = vor.u32 %v7293_v32, %v7290_v47  ;;  %v7397_v48 = vpack.c.b16 %v7379_v50, %v7378_v57  ;;  %v6949_v34 = vld [vmem:[#allocation2 + $0xc4] sm:$0xf] }
 0x5b4   : > { %v7495_v39 = vpop.f32.mrf.mxu1  ;;  %v7924_v33 = vpop.f32.mrf.mxu2  ;;  %v7756_v14 = vrot.slane %v6949_v34, 5  ;;  %v7321_v32 = vshll.u32 %v6949_v34, 16 }
 0x5b5   : > { %v7562_v52 = vadd.f32 %v7495_v39, %v14290_v31  ;;  %v8236_v24 = vpop.f32.mrf.mxu3  ;;  %v8821_v31 = vpack.c.b16 %v8804_v55, %v8803_v60  ;;  %v7295_v36 = vrot.slane %v7294_v54, 4  ;;  %v15001_v60 = vld [vmem:[#allocation2 + $0xc8] sm:$0x1]  ;;  %v6948_v55 = vld [vmem:[#allocation2 + $0xc0] sm:$0xf]  ;;  %v11067_v54 = vrot.slane %v7600_v20, 9 }
 0x5b6   : > { %v7759_v43 = vrot.slane %v15001_v60, 5  ;;  %v7312_v0 = vshrl.u32 %v6948_v55, 16  ;;  %v7315_v47 = vshll.u32 %v6948_v55, 16 }
 0x5b7   : > { %v7988_v63 = vadd.f32 %v7921_v21, %v7562_v52  ;;  %8965 = vmatmul.bf16.gmra.mxu0 %v8821_v31  ;;  %v7824_v52 = vpack.c.b16 %v7807_v1, %v7806_v10  ;;  %v14999_v38 = vpop.f32.mrf.mxu0  ;;  %v7300_v53 = vsel %vm11917_vm2, %v7295_v36, %v7299_v62  ;;  %v7325_v31 = vshrl.u32 %v6949_v34, 16 }
 0x5b8   : > { %v7380_v1 = vunpack.c.l.b16 %v7300_v53  ;;  %v7314_v13 = vrot.slane %v7312_v0, 4  ;;  %v7317_v36 = vrot.slane %v7315_v47, 5 }
 0x5b9   : > { %v8303_v19 = vadd.f32 %v8236_v24, %v7988_v63  ;;  %v7758_v63 = vrot.slane %v7756_v14, 4 }
 0x5ba   : > { %8278 = vmatmul.bf16.gmra.mxu3 %v11494_v22 }
 0x5bb   : > { %v14992_v16 = vadd.f32 %v14947_v28, %v8303_v19  ;;  %v4753_v28 = vsel %vm12996_vm8, 0, %v4752_v6  ;;  %v15012_v19 = vld [vmem:[#allocation2 + $0xd0] sm:$0xf] }
 0x5bc   : > { %v7498_v21 = vpop.f32.mrf.mxu1  ;;  %v7926_v39 = vpop.f32.mrf.mxu2  ;;  %4754 = vst [vmem:[#allocation2 + $0xcc] sm:$0x1] %v4753_v28  ;;  %v8748_v41 = vshrl.u32 %v15012_v19, 16  ;;  %v11495_v28 = vld [vmem:[#allocation2 + $0xc0] sm:$0xff] }
 0x5bd   : > { %v7563_v37 = vadd.f32 %v7498_v21, %v14304_v59  ;;  %v8239_v25 = vpop.f32.mrf.mxu3  ;;  %v7305_v59 = vrot.slane %v7304_v40, 4  ;;  %v8744_v21 = vshll.u32 %v15012_v19, 16  ;;  %v7760_v40 = vsel %vm12233_vm5, %v7758_v63, %v7759_v43 }
 0x5be   : > { %v7809_v43 = vunpack.c.l.b16 %v7760_v40 }
 0x5bf   : > { %v7989_v42 = vadd.f32 %v7924_v33, %v7563_v37  ;;  %7537 = vmatmul.bf16.gmra.mxu1 %v7397_v48  ;;  %v7310_v50 = vsel %vm11917_vm2, %v7305_v59, %v7309_v9  ;;  %v8746_v6 = vrot.slane %v8744_v21, 5  ;;  %v7757_v59 = vsel %vm12233_vm5, %v11067_v54, %v7756_v14  ;;  %v8928_v55 = vpop.f32.mrf.mxu0 }
 0x5c0   : > { %v7381_v4 = vunpack.c.l.b16 %v7310_v50  ;;  %v7808_v47 = vunpack.c.l.b16 %v7757_v59 }
 0x5c1   : > { %v8304_v49 = vadd.f32 %v8239_v25, %v7989_v42  ;;  %7968 = vmatmul.bf16.gmra.mxu2 %v7824_v52  ;;  %v8750_v25 = vrot.slane %v8748_v41, 4  ;;  %v7327_v52 = vrot.slane %v7325_v31, 4 }
 0x5c2   : > { %v7398_v63 = vpack.c.b16 %v7381_v4, %v7380_v1  ;;  %v7825_v21 = vpack.c.b16 %v7809_v43, %v7808_v47 }
 0x5c3   : > { %v15004_v24 = vadd.f32 %v14971_v26, %v8304_v49  ;;  %v4808_v26 = vld [vmem:[#allocation2 + $0xd4] sm:$0x1]  ;;  %v8371_v11 = vld [vmem:[#allocation2 + $0xcc] sm:$0xf]  ;;  %v7323_v49 = vrot.slane %v7321_v32, 5  ;;  %v7318_v32 = vor.u32 %v7317_v36, %v7314_v13 }
 0x5c4   : > { %v7500_v33 = vpop.f32.mrf.mxu1  ;;  %v7929_v12 = vpop.f32.mrf.mxu2  ;;  %v4809_v62 = vsel %vm13020_vm10, 0, %v4808_v26  ;;  %v8735_v37 = vshrl.u32 %v8371_v11, 16  ;;  %v8738_v48 = vshll.u32 %v8371_v11, 16  ;;  %v11496_v13 = vld [vmem:[#allocation2 + $0xcc] sm:$0xff] }
 0x5c5   : > { %v7564_v57 = vadd.f32 %v7500_v33, %v14319_v29  ;;  %v8241_v22 = vpop.f32.mrf.mxu3  ;;  %4810 = vst [vmem:[#allocation2 + $0xd4] sm:$0x1] %v4809_v62  ;;  %v8751_v33 = vor.u32 %v8750_v25, %v8746_v6  ;;  %v7328_v26 = vor.u32 %v7327_v52, %v7323_v49 }
 0x5c6   : > { %v8737_v42 = vrot.slane %v8735_v37, 4  ;;  %v8740_v10 = vrot.slane %v8738_v48, 5 }
 0x5c7   : > { %v7990_v29 = vadd.f32 %v7926_v39, %v7564_v57  ;;  %v8752_v31 = vrot.slane %v8751_v33, 4  ;;  %v7329_v54 = vrot.slane %v7328_v26, 4 }
 0x5c8   : > { %v8741_v9 = vor.u32 %v8740_v10, %v8737_v42 }
 0x5c9   : > { %v8305_v34 = vadd.f32 %v8241_v22, %v7990_v29  ;;  %v7319_v29 = vrot.slane %v7318_v32, 4 }
 0x5ca   : > { %8283 = vmatmul.bf16.gmra.mxu3 %v11495_v28  ;;  %v8742_v57 = vrot.slane %v8741_v9, 4 }
 0x5cb   : > { %v15021_v39 = vadd.f32 %v14987_v44, %v8305_v34  ;;  %v8931_v34 = vpop.f32.mrf.mxu0  ;;  %v7324_v4 = vsel %vm11917_vm2, %v7319_v29, %v7323_v49  ;;  %v11643_v49 = vld [vmem:[#allocation2 + $0x1c] sm:$0xf] }
 0x5cc   : > { %v7503_v53 = vpop.f32.mrf.mxu1  ;;  %v7931_v50 = vpop.f32.mrf.mxu2  ;;  %v15026_v44 = vld [vmem:[#allocation2 + $0xd4] sm:$0x1]  ;;  %v8747_v14 = vsel %vm11917_vm2, %v8742_v57, %v8746_v6  ;;  %v7382_v52 = vunpack.c.l.b16 %v7324_v4  ;;  %v9074_v43 = vrot.slane %v11643_v49, 5 }
 0x5cd   : > { %v7565_v20 = vadd.f32 %v7503_v53, %v14340_v5  ;;  %v8244_v0 = vpop.f32.mrf.mxu3  ;;  %v8754_v62 = vshll.u32 %v15026_v44, 16  ;;  %v7331_v5 = vshll.u32 %v15001_v60, 16  ;;  %v8805_v37 = vunpack.c.l.b16 %v8747_v14 }
 0x5ce   : > { %v9076_v47 = vrot.slane %v9074_v43, 4 }
 0x5cf   : > { %v7991_v22 = vadd.f32 %v7929_v12, %v7565_v20  ;;  %7542 = vmatmul.bf16.gmra.mxu1 %v7398_v63  ;;  %v8756_v41 = vrot.slane %v8754_v62, 5  ;;  %v7333_v40 = vrot.slane %v7331_v5, 5 }
 0x5d1   : > { %v8306_v11 = vadd.f32 %v8244_v0, %v7991_v22  ;;  %7973 = vmatmul.bf16.gmra.mxu2 %v7825_v21  ;;  %v8757_v12 = vsel %vm11917_vm2, %v8752_v31, %v8756_v41  ;;  %v7334_v42 = vsel %vm11917_vm2, %v7329_v54, %v7333_v40  ;;  %v11644_v22 = vld [vmem:[#allocation2 + $0x20] sm:$0x1]  ;;  %v15694_v31 = vld [vmem:[#allocation16_spill] sm:$0xff] }
 0x5d2   : > { %v8806_v6 = vunpack.c.l.b16 %v8757_v12  ;;  %v7383_v59 = vunpack.c.l.b16 %v7334_v42  ;;  %v9077_v14 = vrot.slane %v11644_v22, 5 }
 0x5d3   : > { %v15033_v48 = vadd.f32 %v14999_v38, %v8306_v11  ;;  %v8933_v57 = vpop.f32.mrf.mxu0 }
 0x5d4   : > { %v7505_v1 = vpop.f32.mrf.mxu1  ;;  %v7934_v28 = vpop.f32.mrf.mxu2  ;;  %v8822_v38 = vpack.c.b16 %v8806_v6, %v8805_v37  ;;  %v7399_v53 = vpack.c.b16 %v7383_v59, %v7382_v52  ;;  %v9078_v11 = vsel %vm12233_vm5, %v9076_v47, %v9077_v14  ;;  %v15695_v6 = vld [vmem:[#allocation17_spill] sm:$0xff] }
 0x5d5   : > { %v7566_v25 = vadd.f32 %v7505_v1, %v14364_v17  ;;  %v8246_v60 = vpop.f32.mrf.mxu3  ;;  %v9202_v54 = vunpack.c.l.b16 %v9078_v11 }
 0x5d6   : > { %8970 = vmatmul.bf16.gmra.mxu0 %v8822_v38 }
 0x5d7   : > { %v7992_v10 = vadd.f32 %v7931_v50, %v7566_v25  ;;  %v9008_v50 = vld [vmem:[#allocation2 + $0x18] sm:$0xe] }
 0x5d9   : > { %v8307_v36 = vadd.f32 %v8246_v60, %v7992_v10 }
 0x5da   : > { %8288 = vmatmul.bf16.gmra.mxu3 %v11496_v13  ;;  %v9009_v13 = vld [vmem:[#allocation2 + $0x24] sm:$0xe] }
 0x5db   : > { %v15042_v9 = vadd.f32 %v8928_v55, %v8307_v36  ;;  %v11228_v55 = vrot.slane %v9008_v50, 9  ;;  %v8936_v37 = vpop.f32.mrf.mxu0 }
 0x5dc   : > { %v7508_v17 = vpop.f32.mrf.mxu1  ;;  %v7936_v63 = vpop.f32.mrf.mxu2 }
 0x5dd   : > { %v7567_v33 = vadd.f32 %v7508_v17, %v14376_v2  ;;  %v8249_v20 = vpop.f32.mrf.mxu3  ;;  %v9075_v41 = vsel %vm12233_vm5, %v11228_v55, %v9074_v43 }
 0x5de   : > { %v9201_v1 = vunpack.c.l.b16 %v9075_v41 }
 0x5df   : > { %v7993_v35 = vadd.f32 %v7934_v28, %v7567_v33  ;;  %7547 = vmatmul.bf16.gmra.mxu1 %v7399_v53  ;;  %v11645_v28 = vld [vmem:[#allocation2 + $0x28] sm:$0xf]  ;;  %v11229_v33 = vrot.slane %v9009_v13, 9  ;;  %v11646_v53 = vld [vmem:[#allocation2 + $0x2c] sm:$0x1] }
 0x5e0   : > { %v9081_v4 = vrot.slane %v11645_v28, 5 }
 0x5e1   : > { %v8308_v0 = vadd.f32 %v8249_v20, %v7993_v35  ;;  %v9084_v20 = vrot.slane %v11646_v53, 5 }
 0x5e2   : > { %v9083_v36 = vrot.slane %v9081_v4, 4 }
 0x5e3   : > { %v15045_v32 = vadd.f32 %v8931_v34, %v8308_v0  ;;  %v9233_v34 = vpack.c.b16 %v9202_v54, %v9201_v1  ;;  %v8938_v17 = vpop.f32.mrf.mxu0  ;;  %v9082_v0 = vsel %vm12233_vm5, %v11229_v33, %v9081_v4  ;;  %v15698_v4 = vld [vmem:[#allocation18_spill] sm:$0xff] }
 0x5e4   : > { %v7510_v26 = vpop.f32.mrf.mxu1  ;;  %v7939_v5 = vpop.f32.mrf.mxu2  ;;  %v9085_v35 = vsel %vm12233_vm5, %v9083_v36, %v9084_v20  ;;  %v9203_v22 = vunpack.c.l.b16 %v9082_v0  ;;  %v11649_v0 = vld [vmem:[#allocation2 + $0x40] sm:$0xf] }
 0x5e5   : > { %v7568_v62 = vadd.f32 %v7510_v26, %v15694_v31  ;;  %v8251_v2 = vpop.f32.mrf.mxu3  ;;  %v9204_v47 = vunpack.c.l.b16 %v9085_v35  ;;  %v15697_v31 = vld [vmem:[#allocation23_spill] sm:$0xff] }
 0x5e7   : > { %v7994_v21 = vadd.f32 %v7936_v63, %v7568_v62  ;;  %v15696_v63 = vld [vmem:[#allocation26_spill] sm:$0xff] }
 0x5e9   : > { %v8309_v29 = vadd.f32 %v8251_v2, %v7994_v21  ;;  %v9234_v2 = vpack.c.b16 %v9204_v47, %v9203_v22  ;;  %v11647_v21 = vld [vmem:[#allocation2 + $0x34] sm:$0xf] }
 0x5ea   : > { %v9088_v41 = vrot.slane %v11647_v21, 5  ;;  %v11650_v21 = vld [vmem:[#allocation2 + $0x44] sm:$0x1] }
 0x5eb   : > { %v15052_v12 = vadd.f32 %v8933_v57, %v8309_v29  ;;  %v8941_v11 = vpop.f32.mrf.mxu0 }
 0x5ec   : > { %v7513_v40 = vpop.f32.mrf.mxu1  ;;  %v7941_v38 = vpop.f32.mrf.mxu2  ;;  %v9090_v1 = vrot.slane %v9088_v41, 4 }
 0x5ed   : > { %v7569_v25 = vadd.f32 %v7513_v40, %v15695_v6  ;;  %v8254_v60 = vpop.f32.mrf.mxu3 }
 0x5ef   : > { %v7995_v42 = vadd.f32 %v7939_v5, %v7569_v25  ;;  %9321 = vmatmul.bf16.vlgmr.msra.gmra.mxu1 %v9233_v34 }
 0x5f1   : > { %v8310_v10 = vadd.f32 %v8254_v60, %v7995_v42  ;;  %v11648_v60 = vld [vmem:[#allocation2 + $0x38] sm:$0x1] }
 0x5f2   : > { %v9091_v28 = vrot.slane %v11648_v60, 5  ;;  %v15701_v60 = vld [vmem:[#allocation19_spill] sm:$0xff] }
 0x5f3   : > { %v15055_v52 = vadd.f32 %v8936_v37, %v8310_v10  ;;  %v9010_v37 = vld [vmem:[#allocation2 + $0x30] sm:$0xe]  ;;  %v8943_v36 = vpop.f32.mrf.mxu0 }
 0x5f4   : > { %v7515_v59 = vpop.f32.mrf.mxu1  ;;  %v7944_v26 = vpop.f32.mrf.mxu2  ;;  %v11230_v34 = vrot.slane %v9010_v37, 9  ;;  %v9092_v10 = vsel %vm12233_vm5, %v9090_v1, %v9091_v28 }
 0x5f5   : > { %v7570_v49 = vadd.f32 %v7515_v59, %v15696_v63  ;;  %v8256_v43 = vpop.f32.mrf.mxu3  ;;  %v9206_v33 = vunpack.c.l.b16 %v9092_v10  ;;  %v9012_v10 = vld [vmem:[#allocation2 + $0x48] sm:$0xe] }
 0x5f6   : > { %v9089_v59 = vsel %vm12233_vm5, %v11230_v34, %v9088_v41  ;;  %v9098_v41 = vrot.slane %v11650_v21, 5 }
 0x5f7   : > { %v7996_v57 = vadd.f32 %v7941_v38, %v7570_v49  ;;  %v9205_v20 = vunpack.c.l.b16 %v9089_v59  ;;  %v15699_v49 = vld [vmem:[#allocation24_spill] sm:$0xff]  ;;  %v11232_v59 = vrot.slane %v9012_v10, 9 }
 0x5f9   : > { %v8311_v50 = vadd.f32 %v8256_v43, %v7996_v57  ;;  %v9235_v35 = vpack.c.b16 %v9206_v33, %v9205_v20  ;;  %v15702_v20 = vld [vmem:[#allocation20_spill] sm:$0xff] }
 0x5fb   : > { %v15062_v55 = vadd.f32 %v8938_v17, %v8311_v50  ;;  %v9095_v50 = vrot.slane %v11649_v0, 5 }
 0x5fc   : > { %v7518_v14 = vpop.f32.mrf.mxu1  ;;  %v7946_v6 = vpop.f32.mrf.mxu2 }
 0x5fd   : > { %v7571_v62 = vadd.f32 %v7518_v14, %v15697_v31  ;;  %v8259_v5 = vpop.f32.mrf.mxu3  ;;  %v9011_v14 = vld [vmem:[#allocation2 + $0x3c] sm:$0xe]  ;;  %v8946_v31 = vpop.f32.mrf.mxu0 }
 0x5ff   : > { %v7997_v29 = vadd.f32 %v7944_v26, %v7571_v62  ;;  %9326 = vmatmul.bf16.gmra.mxu1 %v9234_v2  ;;  %v9097_v62 = vrot.slane %v9095_v50, 4 }
 0x601   : > { %v8312_v54 = vadd.f32 %v8259_v5, %v7997_v29  ;;  %v15700_v29 = vld [vmem:[#allocation25_spill] sm:$0xff]  ;;  %v9099_v37 = vsel %vm12233_vm5, %v9097_v62, %v9098_v41 }
 0x603   : > { %v15065_v40 = vadd.f32 %v8941_v11, %v8312_v54  ;;  %v11231_v11 = vrot.slane %v9011_v14, 9  ;;  %v9013_v14 = vld [vmem:[#allocation2 + $0x54] sm:$0xe] }
 0x604   : > { %v7520_v25 = vpop.f32.mrf.mxu1  ;;  %v7949_v57 = vpop.f32.mrf.mxu2 }
 0x605   : > { %v7572_v42 = vadd.f32 %v7520_v25, %v15698_v4  ;;  %v8261_v38 = vpop.f32.mrf.mxu3  ;;  %v9096_v1 = vsel %vm12233_vm5, %v11231_v11, %v9095_v50  ;;  %v11654_v11 = vld [vmem:[#allocation2 + $0x5c] sm:$0x1] }
 0x606   : > { %v9207_v25 = vunpack.c.l.b16 %v9096_v1  ;;  %v9112_v21 = vrot.slane %v11654_v11, 5 }
 0x607   : > { %v7998_v13 = vadd.f32 %v7946_v6, %v7572_v42  ;;  %v9208_v6 = vunpack.c.l.b16 %v9099_v37  ;;  %v11651_v42 = vld [vmem:[#allocation2 + $0x4c] sm:$0xf] }
 0x609   : > { %v8313_v17 = vadd.f32 %v8261_v38, %v7998_v13  ;;  %v9236_v4 = vpack.c.b16 %v9208_v6, %v9207_v25  ;;  %v9102_v38 = vrot.slane %v11651_v42, 5  ;;  %v9014_v42 = vld [vmem:[#allocation2 + $0x60] sm:$0xe] }
 0x60a   : > { %v11234_v10 = vrot.slane %v9014_v42, 9 }
 0x60b   : > { %v15072_v53 = vadd.f32 %v8943_v36, %v8313_v17  ;;  %v9104_v13 = vrot.slane %v9102_v38, 4  ;;  %v11652_v17 = vld [vmem:[#allocation2 + $0x50] sm:$0x1] }
 0x60c   : > { %v7523_v63 = vpop.f32.mrf.mxu1  ;;  %v9105_v33 = vrot.slane %v11652_v17, 5 }
 0x60d   : > { %v7573_v43 = vadd.f32 %v7523_v63, %v15699_v49  ;;  %v8264_v26 = vpop.f32.mrf.mxu3 }
 0x60e   : > { %v9106_v49 = vsel %vm12233_vm5, %v9104_v13, %v9105_v33  ;;  %v11656_v13 = vld [vmem:[#allocation2 + $0x68] sm:$0x1] }
 0x60f   : > { %v7999_v47 = vadd.f32 %v7949_v57, %v7573_v43  ;;  %9331 = vmatmul.bf16.gmra.mxu1 %v9235_v35  ;;  %v9103_v43 = vsel %vm12233_vm5, %v11232_v59, %v9102_v38  ;;  %v9210_v35 = vunpack.c.l.b16 %v9106_v49 }
 0x610   : > { %v9209_v57 = vunpack.c.l.b16 %v9103_v43 }
 0x611   : > { %v8314_v22 = vadd.f32 %v8264_v26, %v7999_v47  ;;  %v11653_v26 = vld [vmem:[#allocation2 + $0x58] sm:$0xf] }
 0x612   : > { %v9237_v47 = vpack.c.b16 %v9210_v35, %v9209_v57  ;;  %v11657_v57 = vld [vmem:[#allocation2 + $0x70] sm:$0xf] }
 0x613   : > { %v15075_v2 = vadd.f32 %v8946_v31, %v8314_v22  ;;  %v9109_v22 = vrot.slane %v11653_v26, 5 }
 0x614   : > { %v7525_v5 = vpop.f32.mrf.mxu1 }
 0x615   : > { %v15078_v54 = vadd.f32 %v7525_v5, %v15700_v29  ;;  %v9111_v31 = vrot.slane %v9109_v22, 4  ;;  %v11233_v5 = vrot.slane %v9013_v14, 9  ;;  %v11658_v14 = vld [vmem:[#allocation2 + $0x74] sm:$0x1] }
 0x617   : > { %v9113_v29 = vsel %vm12233_vm5, %v9111_v31, %v9112_v21  ;;  %v9126_v31 = vrot.slane %v11658_v14, 5 }
 0x618   : > { %v9212_v37 = vunpack.c.l.b16 %v9113_v29 }
 0x61c   : > { %v7528_v34 = vpop.f32.mrf.mxu1 }
 0x61d   : > { %v15085_v28 = vadd.f32 %v7528_v34, %v15701_v60  ;;  %v11655_v60 = vld [vmem:[#allocation2 + $0x64] sm:$0xf] }
 0x61f   : > { %9336 = vmatmul.bf16.gmra.mxu1 %v9236_v4  ;;  %v9116_v4 = vrot.slane %v11655_v60, 5 }
 0x621   : > { %v9118_v38 = vrot.slane %v9116_v4, 4 }
 0x624   : > { %v7530_v36 = vpop.f32.mrf.mxu1 }
 0x625   : > { %v15088_v63 = vadd.f32 %v7530_v36, %v15702_v20  ;;  %v9119_v36 = vrot.slane %v11656_v13, 5 }
 0x627   : > { %v9120_v17 = vsel %vm12233_vm5, %v9118_v38, %v9119_v36  ;;  %v15705_v36 = vld [vmem:[#allocation15_spill] sm:$0xff] }
 0x628   : > { %v9214_v33 = vunpack.c.l.b16 %v9120_v17 }
 0x62c   : > { %v7533_v0 = vpop.f32.mrf.mxu1 }
 0x62d   : > { %v15095_v50 = vadd.f32 %v7533_v0, %v14642_v61  ;;  %v9110_v61 = vsel %vm12233_vm5, %v11233_v5, %v9109_v22  ;;  %v9123_v0 = vrot.slane %v11657_v57, 5  ;;  %v15706_v57 = vld [vmem:[#allocation11_spill] sm:$0xff] }
 0x62e   : > { %v9211_v1 = vunpack.c.l.b16 %v9110_v61 }
 0x62f   : > { %9341 = vmatmul.bf16.gmra.mxu1 %v9237_v47  ;;  %v9015_v47 = vld [vmem:[#allocation2 + $0x6c] sm:$0xe]  ;;  %v9125_v26 = vrot.slane %v9123_v0, 4 }
 0x630   : > { %v9238_v34 = vpack.c.b16 %v9212_v37, %v9211_v1  ;;  %v11235_v22 = vrot.slane %v9015_v47, 9  ;;  %v15704_v37 = vld [vmem:[#allocation14_spill] sm:$0xff] }
 0x631   : > { %v9127_v11 = vsel %vm12233_vm5, %v9125_v26, %v9126_v31  ;;  %v11661_v26 = vld [vmem:[#allocation2 + $0x88] sm:$0xf] }
 0x632   : > { %v9216_v21 = vunpack.c.l.b16 %v9127_v11  ;;  %v11662_v11 = vld [vmem:[#allocation2 + $0x8c] sm:$0x1] }
 0x634   : > { %v7535_v62 = vpop.f32.mrf.mxu1 }
 0x635   : > { %v15098_v41 = vadd.f32 %v7535_v62, %v14688_v46  ;;  %v15703_v62 = vld [vmem:[#allocation13_spill] sm:$0xff] }
 0x63c   : > { %v7538_v6 = vpop.f32.mrf.mxu1 }
 0x63d   : > { %v15105_v25 = vadd.f32 %v7538_v6, %v14702_v58  ;;  %v9117_v58 = vsel %vm12233_vm5, %v11234_v10, %v9116_v4  ;;  %v9016_v4 = vld [vmem:[#allocation2 + $0x78] sm:$0xe]  ;;  %v11660_v10 = vld [vmem:[#allocation2 + $0x80] sm:$0x1] }
 0x63e   : > { %v9213_v20 = vunpack.c.l.b16 %v9117_v58  ;;  %v9133_v13 = vrot.slane %v11660_v10, 5 }
 0x63f   : > { %9346 = vmatmul.bf16.gmra.mxu1 %v9238_v34  ;;  %v11659_v34 = vld [vmem:[#allocation2 + $0x7c] sm:$0xf] }
 0x640   : > { %v9239_v35 = vpack.c.b16 %v9214_v33, %v9213_v20  ;;  %v9130_v60 = vrot.slane %v11659_v34, 5 }
 0x642   : > { %v9132_v42 = vrot.slane %v9130_v60, 4 }
 0x644   : > { %v7540_v46 = vpop.f32.mrf.mxu1  ;;  %v9134_v58 = vsel %vm12233_vm5, %v9132_v42, %v9133_v13  ;;  %v11663_v42 = vld [vmem:[#allocation2 + $0x94] sm:$0xf] }
 0x645   : > { %v15108_v59 = vadd.f32 %v7540_v46, %v14724_v45  ;;  %v11236_v46 = vrot.slane %v9016_v4, 9  ;;  %v9218_v20 = vunpack.c.l.b16 %v9134_v58 }
 0x647   : > { %v9131_v33 = vsel %vm12233_vm5, %v11236_v46, %v9130_v60  ;;  %v9018_v46 = vld [vmem:[#allocation2 + $0x90] sm:$0xe] }
 0x648   : > { %v11238_v13 = vrot.slane %v9018_v46, 9 }
 0x64c   : > { %v7543_v49 = vpop.f32.mrf.mxu1 }
 0x64d   : > { %v15115_v43 = vadd.f32 %v7543_v49, %v14737_v51  ;;  %v9124_v51 = vsel %vm12233_vm5, %v11235_v22, %v9123_v0  ;;  %v9217_v49 = vunpack.c.l.b16 %v9131_v33  ;;  %v9017_v22 = vld [vmem:[#allocation2 + $0x84] sm:$0xe] }
 0x64e   : > { %v9215_v29 = vunpack.c.l.b16 %v9124_v51  ;;  %v9140_v51 = vrot.slane %v11662_v11, 5  ;;  %v11666_v11 = vld [vmem:[#allocation2 + $0xa4] sm:$0x1] }
 0x64f   : > { %9351 = vmatmul.bf16.gmra.mxu1 %v9239_v35  ;;  %v9241_v47 = vpack.c.b16 %v9218_v20, %v9217_v49 }
 0x650   : > { %v9240_v6 = vpack.c.b16 %v9216_v21, %v9215_v29 }
 0x654   : > { %v7545_v45 = vpop.f32.mrf.mxu1 }
 0x655   : > { %v15118_v5 = vadd.f32 %v7545_v45, %v15703_v62  ;;  %v9137_v45 = vrot.slane %v11661_v26, 5  ;;  %v11237_v62 = vrot.slane %v9017_v22, 9 }
 0x657   : > { %v9139_v14 = vrot.slane %v9137_v45, 4 }
 0x659   : > { %v9141_v29 = vsel %vm12233_vm5, %v9139_v14, %v9140_v51  ;;  %v9019_v14 = vld [vmem:[#allocation2 + $0x9c] sm:$0xe]  ;;  %v9154_v51 = vrot.slane %v11666_v11, 5 }
 0x65c   : > { %v7548_v61 = vpop.f32.mrf.mxu1 }
 0x65d   : > { %v15125_v1 = vadd.f32 %v7548_v61, %v15704_v37  ;;  %v9138_v61 = vsel %vm12233_vm5, %v11237_v62, %v9137_v45  ;;  %v9220_v37 = vunpack.c.l.b16 %v9141_v29  ;;  %v11665_v45 = vld [vmem:[#allocation2 + $0xa0] sm:$0xf]  ;;  %v11239_v62 = vrot.slane %v9019_v14, 9 }
 0x65e   : > { %v9151_v22 = vrot.slane %v11665_v45, 5 }
 0x65f   : > { %9356 = vmatmul.bf16.gmra.mxu1 %v9240_v6  ;;  %v9219_v6 = vunpack.c.l.b16 %v9138_v61 }
 0x661   : > { %v9242_v4 = vpack.c.b16 %v9220_v37, %v9219_v6 }
 0x664   : > { %v7550_v38 = vpop.f32.mrf.mxu1 }
 0x665   : > { %v15128_v17 = vadd.f32 %v7550_v38, %v15705_v36  ;;  %v9144_v38 = vrot.slane %v11663_v42, 5  ;;  %v11664_v36 = vld [vmem:[#allocation2 + $0x98] sm:$0x1] }
 0x666   : > { %v9147_v58 = vrot.slane %v11664_v36, 5 }
 0x667   : > { %v9146_v10 = vrot.slane %v9144_v38, 4 }
 0x669   : > { %v9148_v20 = vsel %vm12233_vm5, %v9146_v10, %v9147_v58 }
 0x66a   : > { %v9222_v49 = vunpack.c.l.b16 %v9148_v20  ;;  %v15711_v20 = vld [vmem:[#allocation22_spill] sm:$0xff] }
 0x66c   : > { %v9322_v35 = vpop.f32.mrf.mxu1 }
 0x66d   : > { %v15135_v0 = vadd.f32 %v9322_v35, %v15706_v57 }
 0x66f   : > { %9361 = vmatmul.bf16.gmra.mxu1 %v9241_v47 }
 0x674   : > { %v9324_v31 = vpop.f32.mrf.mxu1 }
 0x675   : > { %v15138_v21 = vadd.f32 %v9324_v31, %v14842_v56  ;;  %v9153_v31 = vrot.slane %v9151_v22, 4 }
 0x677   : > { %v9155_v61 = vsel %vm12233_vm5, %v9153_v31, %v9154_v51 }
 0x678   : > { %v9224_v37 = vunpack.c.l.b16 %v9155_v61 }
 0x67c   : > { %v9327_v34 = vpop.f32.mrf.mxu1 }
 0x67d   : > { %v15145_v60 = vadd.f32 %v9327_v34, %v14866_v7  ;;  %v9145_v7 = vsel %vm12233_vm5, %v11238_v13, %v9144_v38 }
 0x67e   : > { %v9221_v35 = vunpack.c.l.b16 %v9145_v7 }
 0x67f   : > { %9366 = vmatmul.bf16.gmra.mxu1 %v9242_v4 }
 0x680   : > { %v9243_v26 = vpack.c.b16 %v9222_v49, %v9221_v35 }
 0x684   : > { %v9329_v56 = vpop.f32.mrf.mxu1 }
 0x685   : > { %v15148_v33 = vadd.f32 %v9329_v56, %v14889_v23  ;;  %v15708_v56 = vld [vmem:[#allocation21_spill] sm:$0xff] }
 0x68c   : > { %v9332_v57 = vpop.f32.mrf.mxu1 }
 0x68d   : > { %v15155_v47 = vadd.f32 %v9332_v57, %v14914_v15  ;;  %v9152_v15 = vsel %vm12233_vm5, %v11239_v62, %v9151_v22  ;;  %v9023_v57 = vld [vmem:[#allocation2 + $0xcc] sm:$0xe] }
 0x68e   : > { %v9223_v6 = vunpack.c.l.b16 %v9152_v15 }
 0x68f   : > { %9371 = vmatmul.bf16.gmra.mxu1 %v9243_v26  ;;  %v15713_v26 = vld [vmem:[#allocation12_spill] sm:$0xff] }
 0x690   : > { %v9244_v42 = vpack.c.b16 %v9224_v37, %v9223_v6  ;;  %v15209_v37 = vpop.f32.mrf.mxu2  ;;  %v15211_v6 = vpop.f32.mrf.mxu3 }
 0x694   : > { %v9334_v23 = vpop.f32.mrf.mxu1 }
 0x695   : > { %v15158_v29 = vadd.f32 %v9334_v23, %v14929_v30 }
 0x69c   : > { %v9337_v34 = vpop.f32.mrf.mxu1 }
 0x69d   : > { %v15165_v4 = vadd.f32 %v9337_v34, %v14945_v27 }
 0x69f   : > { %9376 = vmatmul.bf16.gmra.mxu1 %v9244_v42  ;;  %v15216_v42 = vpop.f32.mrf.mxu0 }
 0x6a4   : > { %v9339_v38 = vpop.f32.mrf.mxu1 }
 0x6a5   : > { %v15168_v46 = vadd.f32 %v9339_v38, %v14965_v8  ;;  %v15220_v38 = vpop.f32.mrf.mxu3 }
 0x6a7   : > { %15707 = vst [vmem:[#allocation10_spill] sm:$0xff] %v15168_v46 }
 0x6ac   : > { %v9342_v30 = vpop.f32.mrf.mxu1 }
 0x6ad   : > { %v15171_v10 = vadd.f32 %v9342_v30, %v14979_v3  ;;  %v9179_v3 = vrot.slane %v15012_v19, 5 }
 0x6af   : > { %9381 = vmatmul.bf16.gmra.mxu1 %v15708_v56  ;;  %v9181_v45 = vrot.slane %v9179_v3, 4 }
 0x6b4   : > { %v9344_v13 = vpop.f32.mrf.mxu1 }
 0x6b5   : > { %v15175_v36 = vadd.f32 %v9344_v13, %v14992_v16  ;;  %v11243_v16 = vrot.slane %v9023_v57, 9  ;;  %v9472_v57 = vmul.f32 %v15135_v0, %v15135_v0 }
 0x6b7   : > { %15709 = vst [vmem:[#allocation16_spill] sm:$0xff] %v15175_v36  ;;  %v9180_v14 = vsel %vm12233_vm5, %v11243_v16, %v9179_v3 }
 0x6b8   : > { %v9231_v19 = vunpack.c.l.b16 %v9180_v14 }
 0x6bc   : > { %v9347_v58 = vpop.f32.mrf.mxu1 }
 0x6bd   : > { %v15178_v27 = vadd.f32 %v9347_v58, %v15004_v24  ;;  %v9182_v24 = vrot.slane %v15026_v44, 5 }
 0x6bf   : > { %15710 = vst [vmem:[#allocation17_spill] sm:$0xff] %v15178_v27  ;;  %9386 = vmatmul.bf16.gmra.mxu1 %v15711_v20 }
 0x6c4   : > { %v9349_v7 = vpop.f32.mrf.mxu1 }
 0x6c5   : > { %v15182_v8 = vadd.f32 %v9349_v7, %v15021_v39  ;;  %v9183_v39 = vsel %vm12233_vm5, %v9181_v45, %v9182_v24  ;;  %v9475_v24 = vmul.f32 %v15148_v33, %v15148_v33 }
 0x6cc   : > { %v9352_v49 = vpop.f32.mrf.mxu1 }
 0x6cd   : > { %v15186_v35 = vadd.f32 %v9352_v49, %v15033_v48  ;;  %v9232_v48 = vunpack.c.l.b16 %v9183_v39 }
 0x6cf   : > { %15712 = vst [vmem:[#allocation26_spill] sm:$0xff] %v15186_v35  ;;  %9391 = vmatmul.bf16.gmra.mxu1 %v15713_v26  ;;  %v9248_v23 = vpack.c.b16 %v9232_v48, %v9231_v19  ;;  %v9474_v26 = vmul.f32 %v15145_v60, %v15145_v60  ;;  %v9476_v48 = vmul.f32 %v15155_v47, %v15155_v47 }
 0x6d4   : > { %v9354_v22 = vpop.f32.mrf.mxu1 }
 0x6d5   : > { %v15195_v31 = vadd.f32 %v9354_v22, %v15042_v9 }
 0x6dc   : > { %v9357_v62 = vpop.f32.mrf.mxu1 }
 0x6dd   : > { %v15198_v11 = vadd.f32 %v9357_v62, %v15045_v32 }
 0x6df   : > { %9396 = vmatmul.bf16.gmra.mxu1 %v9248_v23 }
 0x6e4   : > { %v9359_v51 = vpop.f32.mrf.mxu1 }
 0x6e5   : > { %v15201_v44 = vadd.f32 %v9359_v51, %v15052_v12  ;;  %v15218_v12 = vpop.f32.mrf.mxu2 }
 0x6ec   : > { %v9362_v61 = vpop.f32.mrf.mxu1 }
 0x6ed   : > { %v15204_v15 = vadd.f32 %v9362_v61, %v15055_v52  ;;  %v15227_v56 = vpop.f32.mrf.mxu2  ;;  %v9477_v61 = vmul.f32 %v15158_v29, %v15158_v29 }
 0x6f4   : > { %v9364_v18 = vpop.f32.mrf.mxu1 }
 0x6f5   : > { %v15207_v9 = vadd.f32 %v9364_v18, %v15062_v55  ;;  %v15225_v55 = vpop.f32.mrf.mxu0  ;;  %v15236_v7 = vpop.f32.mrf.mxu2 }
 0x6fc   : > { %v9367_v34 = vpop.f32.mrf.mxu1 }
 0x6fd   : > { %v15214_v32 = vadd.f32 %v9367_v34, %v15065_v40  ;;  %v15232_v40 = vpop.f32.mrf.mxu3  ;;  %v15234_v20 = vpop.f32.mrf.mxu0 }
 0x6fe   : > { %v7961_v23 = vpop.f32.mrf.mxu2 }
 0x704   : > { %v9369_v52 = vpop.f32.mrf.mxu1 }
 0x705   : > { %v15223_v30 = vadd.f32 %v9369_v52, %v15072_v53  ;;  %v9473_v53 = vmul.f32 %v15138_v21, %v15138_v21  ;;  %v15242_v3 = vpop.f32.mrf.mxu3  ;;  %v15253_v22 = vpop.f32.mrf.mxu0  ;;  %v9478_v52 = vmul.f32 %v15165_v4, %v15165_v4 }
 0x707   : > { %v9504_v16 = vadd.f32 %v9473_v53, %v9472_v57 }
 0x709   : > { %v9505_v39 = vadd.f32 %v9504_v16, %v9474_v26 }
 0x70b   : > { %v9506_v62 = vadd.f32 %v9505_v39, %v9475_v24  ;;  %v9480_v24 = vmul.f32 %v15171_v10, %v15171_v10 }
 0x70c   : > { %v9372_v13 = vpop.f32.mrf.mxu1 }
 0x70d   : > { %v15230_v58 = vadd.f32 %v9372_v13, %v15075_v2  ;;  %v9434_v2 = vadd.f32 %v15138_v21, %v15135_v0  ;;  %v9507_v18 = vadd.f32 %v9506_v62, %v9476_v48  ;;  %v15266_v13 = vpop.f32.mrf.mxu3  ;;  %v15276_v39 = vpop.f32.mrf.mxu0  ;;  %v9481_v62 = vmul.f32 %v15175_v36, %v15175_v36 }
 0x70f   : > { %v9435_v45 = vadd.f32 %v9434_v2, %v15145_v60  ;;  %v9508_v53 = vadd.f32 %v9507_v18, %v9477_v61  ;;  %v9479_v2 = vmul.f32 %v15168_v46, %v15168_v46 }
 0x711   : > { %v9436_v19 = vadd.f32 %v9435_v45, %v15148_v33  ;;  %v9509_v16 = vadd.f32 %v9508_v53, %v9478_v52 }
 0x713   : > { %v9437_v51 = vadd.f32 %v9436_v19, %v15155_v47  ;;  %v9510_v19 = vadd.f32 %v9509_v16, %v9479_v2 }
 0x714   : > { %v15238_v49 = vpop.f32.mrf.mxu1 }
 0x715   : > { %v9438_v34 = vadd.f32 %v9437_v51, %v15158_v29  ;;  %v7964_v51 = vpop.f32.mrf.mxu2  ;;  %v9511_v61 = vadd.f32 %v9510_v19, %v9480_v24  ;;  %v9484_v24 = vmul.f32 %v15186_v35, %v15186_v35 }
 0x717   : > { %v9439_v57 = vadd.f32 %v9438_v34, %v15165_v4  ;;  %v9482_v34 = vmul.f32 %v15178_v27, %v15178_v27  ;;  %v9512_v52 = vadd.f32 %v9511_v61, %v9481_v62  ;;  %v9485_v62 = vmul.f32 %v15195_v31, %v15195_v31  ;;  %v8961_v61 = vpop.f32.mrf.mxu0 }
 0x719   : > { %v9440_v45 = vadd.f32 %v9439_v57, %v15168_v46  ;;  %v9483_v57 = vmul.f32 %v15182_v8, %v15182_v8  ;;  %v8279_v46 = vpop.f32.mrf.mxu3  ;;  %v9513_v16 = vadd.f32 %v9512_v52, %v9482_v34  ;;  %v9486_v34 = vmul.f32 %v15198_v11, %v15198_v11 }
 0x71a   : > { %v8001_v52 = vadd.f32 %v15218_v12, %v15085_v28 }
 0x71b   : > { %v9441_v48 = vadd.f32 %v9440_v45, %v15171_v10  ;;  %v9514_v19 = vadd.f32 %v9513_v16, %v9483_v57 }
 0x71c   : > { %v15255_v14 = vpop.f32.mrf.mxu1  ;;  %v8316_v28 = vadd.f32 %v15220_v38, %v8001_v52  ;;  %v9490_v38 = vmul.f32 %v15214_v32, %v15214_v32  ;;  %v8005_v52 = vadd.f32 %v7964_v51, %v15105_v25  ;;  %v9492_v51 = vmul.f32 %v15230_v58, %v15230_v58 }
 0x71d   : > { %v9442_v18 = vadd.f32 %v9441_v48, %v15175_v36 }
 0x71f   : > { %v9443_v53 = vadd.f32 %v9442_v18, %v15178_v27  ;;  %v8000_v18 = vadd.f32 %v15209_v37, %v15078_v54  ;;  %v9515_v27 = vadd.f32 %v9514_v19, %v9484_v24 }
 0x721   : > { %v9444_v45 = vadd.f32 %v9443_v53, %v15182_v8  ;;  %v7966_v53 = vpop.f32.mrf.mxu2  ;;  %v9516_v57 = vadd.f32 %v9515_v27, %v9485_v62  ;;  %v8315_v37 = vadd.f32 %v15211_v6, %v8000_v18  ;;  %v8281_v27 = vpop.f32.mrf.mxu3 }
 0x723   : > { %v9445_v48 = vadd.f32 %v9444_v45, %v15186_v35  ;;  %v9487_v45 = vmul.f32 %v15201_v44, %v15201_v44  ;;  %v8002_v35 = vadd.f32 %v15227_v56, %v15088_v63  ;;  %v9517_v24 = vadd.f32 %v9516_v57, %v9486_v34 }
 0x724   : > { %v15271_v26 = vpop.f32.mrf.mxu1  ;;  %v9489_v63 = vmul.f32 %v15207_v9, %v15207_v9  ;;  %v8004_v56 = vadd.f32 %v7961_v23, %v15098_v41  ;;  %v8997_v18 = vadd.f32 %v15216_v42, %v8315_v37  ;;  %v9491_v41 = vmul.f32 %v15223_v30, %v15223_v30 }
 0x725   : > { %v9446_v36 = vadd.f32 %v9445_v48, %v15195_v31  ;;  %v9488_v48 = vmul.f32 %v15204_v15, %v15204_v15  ;;  %v9518_v12 = vadd.f32 %v9517_v24, %v9487_v45  ;;  %v8317_v6 = vadd.f32 %v15232_v40, %v8002_v35 }
 0x726   : > { %v15330_v42 = vadd.f32 %v15238_v49, %v8997_v18  ;;  %v8319_v23 = vadd.f32 %v15266_v13, %v8004_v56 }
 0x727   : > { %v9447_v16 = vadd.f32 %v9446_v36, %v15198_v11  ;;  %v8003_v36 = vadd.f32 %v15236_v7, %v15095_v50  ;;  %v9519_v34 = vadd.f32 %v9518_v12, %v9488_v48  ;;  %v8998_v50 = vadd.f32 %v15225_v55, %v8316_v28 }
 0x728   : > { %v8999_v40 = vadd.f32 %v15234_v20, %v8317_v6  ;;  %v8006_v55 = vadd.f32 %v7966_v53, %v15108_v59  ;;  %v8320_v48 = vadd.f32 %v8279_v46, %v8005_v52  ;;  %v9493_v59 = vmul.f32 %v15330_v42, %v15330_v42 }
 0x729   : > { %v9448_v19 = vadd.f32 %v9447_v16, %v15201_v44  ;;  %v8318_v7 = vadd.f32 %v15242_v3, %v8003_v36  ;;  %v8963_v16 = vpop.f32.mrf.mxu0  ;;  %v9520_v45 = vadd.f32 %v9519_v34, %v9489_v63  ;;  %v7969_v37 = vpop.f32.mrf.mxu2  ;;  %v9001_v53 = vadd.f32 %v15276_v39, %v8319_v23 }
 0x72a   : > { %v15346_v13 = vadd.f32 %v15271_v26, %v8999_v40  ;;  %v8321_v36 = vadd.f32 %v8281_v27, %v8006_v55  ;;  %v8284_v12 = vpop.f32.mrf.mxu3  ;;  %v9002_v63 = vadd.f32 %v8961_v61, %v8320_v48  ;;  %v8007_v6 = vadd.f32 %v7969_v37, %v15115_v43 }
 0x72b   : > { %v9449_v62 = vadd.f32 %v9448_v19, %v15204_v15  ;;  %v9521_v24 = vadd.f32 %v9520_v45, %v9490_v38  ;;  %v15339_v19 = vadd.f32 %v15255_v14, %v8998_v50  ;;  %v9000_v49 = vadd.f32 %v15253_v22, %v8318_v7 }
 0x72c   : > { %v15287_v2 = vpop.f32.mrf.mxu1  ;;  %v9495_v39 = vmul.f32 %v15346_v13, %v15346_v13  ;;  %v9003_v18 = vadd.f32 %v8963_v16, %v8321_v36  ;;  %v8322_v43 = vadd.f32 %v8284_v12, %v8007_v6 }
 0x72d   : > { %v9450_v57 = vadd.f32 %v9449_v62, %v15207_v9  ;;  %v9522_v28 = vadd.f32 %v9521_v24, %v9491_v41  ;;  %v9494_v22 = vmul.f32 %v15339_v19, %v15339_v19  ;;  %v15353_v46 = vadd.f32 %v15287_v2, %v9000_v49 }
 0x72f   : > { %v9451_v35 = vadd.f32 %v9450_v57, %v15214_v32  ;;  %v9523_v62 = vadd.f32 %v9522_v28, %v9492_v51  ;;  %v9496_v2 = vmul.f32 %v15353_v46, %v15353_v46 }
 0x731   : > { %v9452_v25 = vadd.f32 %v9451_v35, %v15223_v30  ;;  %v9524_v56 = vadd.f32 %v9523_v62, %v9493_v59  ;;  %v8966_v34 = vpop.f32.mrf.mxu0  ;;  %v7971_v7 = vpop.f32.mrf.mxu2 }
 0x732   : > { %v9004_v23 = vadd.f32 %v8966_v34, %v8322_v43  ;;  %v8286_v55 = vpop.f32.mrf.mxu3  ;;  %v8008_v37 = vadd.f32 %v7971_v7, %v15118_v5 }
 0x733   : > { %v9453_v20 = vadd.f32 %v9452_v25, %v15230_v58  ;;  %v9525_v38 = vadd.f32 %v9524_v56, %v9494_v22 }
 0x734   : > { %v9384_v54 = vpop.f32.mrf.mxu1  ;;  %v8323_v59 = vadd.f32 %v8286_v55, %v8008_v37 }
 0x735   : > { %v9454_v14 = vadd.f32 %v9453_v20, %v15330_v42  ;;  %v15359_v27 = vadd.f32 %v9384_v54, %v9001_v53  ;;  %v9526_v52 = vadd.f32 %v9525_v38, %v9495_v39 }
 0x737   : > { %v9455_v26 = vadd.f32 %v9454_v14, %v15339_v19  ;;  %v9497_v54 = vmul.f32 %v15359_v27, %v15359_v27  ;;  %v9527_v16 = vadd.f32 %v9526_v52, %v9496_v2 }
 0x739   : > { %v9456_v50 = vadd.f32 %v9455_v26, %v15346_v13  ;;  %v8968_v20 = vpop.f32.mrf.mxu0  ;;  %v7974_v12 = vpop.f32.mrf.mxu2 }
 0x73a   : > { %v8289_v14 = vpop.f32.mrf.mxu3  ;;  %v9005_v22 = vadd.f32 %v8968_v20, %v8323_v59 }
 0x73b   : > { %v9457_v45 = vadd.f32 %v9456_v50, %v15353_v46 }
 0x73c   : > { %v9387_v3 = vpop.f32.mrf.mxu1 }
 0x73d   : > { %v15364_v61 = vadd.f32 %v9387_v3, %v9002_v63  ;;  %v9458_v41 = vadd.f32 %v9457_v45, %v15359_v27  ;;  %v9528_v3 = vadd.f32 %v9527_v16, %v9497_v54  ;;  %v8009_v63 = vadd.f32 %v7974_v12, %v15125_v1 }
 0x73f   : > { %v9498_v40 = vmul.f32 %v15364_v61, %v15364_v61  ;;  %v9459_v24 = vadd.f32 %v9458_v41, %v15364_v61  ;;  %v8324_v39 = vadd.f32 %v8289_v14, %v8009_v63 }
 0x741   : > { %v9529_v49 = vadd.f32 %v9528_v3, %v9498_v40  ;;  %v8971_v26 = vpop.f32.mrf.mxu0  ;;  %v7976_v38 = vpop.f32.mrf.mxu2 }
 0x742   : > { %v9006_v50 = vadd.f32 %v8971_v26, %v8324_v39  ;;  %v8010_v2 = vadd.f32 %v7976_v38, %v15128_v17  ;;  %v8291_v43 = vpop.f32.mrf.mxu3 }
 0x744   : > { %v9389_v57 = vpop.f32.mrf.mxu1  ;;  %v8325_v1 = vadd.f32 %v8291_v43, %v8010_v2 }
 0x745   : > { %v15369_v35 = vadd.f32 %v9389_v57, %v9003_v18 }
 0x747   : > { %v9499_v25 = vmul.f32 %v15369_v35, %v15369_v35  ;;  %v9460_v48 = vadd.f32 %v9459_v24, %v15369_v35 }
 0x749   : > { %v9530_v53 = vadd.f32 %v9529_v49, %v9499_v25  ;;  %v8973_v16 = vpop.f32.mrf.mxu0 }
 0x74a   : > { %v9007_v40 = vadd.f32 %v8973_v16, %v8325_v1 }
 0x74c   : > { %v9392_v51 = vpop.f32.mrf.mxu1 }
 0x74d   : > { %v15379_v28 = vadd.f32 %v9392_v51, %v9004_v23 }
 0x74f   : > { %v9461_v36 = vadd.f32 %v9460_v48, %v15379_v28  ;;  %v9500_v5 = vmul.f32 %v15379_v28, %v15379_v28 }
 0x751   : > { %v9531_v62 = vadd.f32 %v9530_v53, %v9500_v5 }
 0x754   : > { %v9394_v6 = vpop.f32.mrf.mxu1 }
 0x755   : > { %v15385_v56 = vadd.f32 %v9394_v6, %v9005_v22 }
 0x757   : > { %v9462_v18 = vadd.f32 %v9461_v36, %v15385_v56  ;;  %v9501_v34 = vmul.f32 %v15385_v56, %v15385_v56 }
 0x759   : > { %v9532_v57 = vadd.f32 %v9531_v62, %v9501_v34 }
 0x75c   : > { %v9397_v7 = vpop.f32.mrf.mxu1 }
 0x75d   : > { %v15391_v52 = vadd.f32 %v9397_v7, %v9006_v50 }
 0x75f   : > { %v9463_v45 = vadd.f32 %v9462_v18, %v15391_v52  ;;  %v9502_v54 = vmul.f32 %v15391_v52, %v15391_v52 }
 0x761   : > { %v9533_v41 = vadd.f32 %v9532_v57, %v9502_v54 }
 0x764   : > { %v9399_v23 = vpop.f32.mrf.mxu1 }
 0x765   : > { %v15396_v55 = vadd.f32 %v9399_v23, %v9007_v40 }
 0x767   : > { %v9464_v37 = vadd.f32 %v9463_v45, %v15396_v55  ;;  %v9503_v17 = vmul.f32 %v15396_v55, %v15396_v55 }
 0x769   : > { %v9465_v3 = vrot.slane %v9464_v37, 4  ;;  %v9534_v24 = vadd.f32 %v9533_v41, %v9503_v17 }
 0x76b   : > { %v9466_v25 = vadd.f32 %v9465_v3, %v9464_v37  ;;  %v9535_v51 = vrot.slane %v9534_v24, 4 }
 0x76d   : > { %v9467_v49 = vrot.slane %v9466_v25, 2  ;;  %v9536_v48 = vadd.f32 %v9535_v51, %v9534_v24 }
 0x76f   : > { %v9468_v20 = vadd.f32 %v9467_v49, %v9466_v25  ;;  %v9537_v59 = vrot.slane %v9536_v48, 2 }
 0x771   : > { %v9469_v53 = vrot.slane %v9468_v20, 1  ;;  %v9538_v36 = vadd.f32 %v9537_v59, %v9536_v48 }
 0x773   : > { %v9470_v5 = vadd.f32 %v9469_v53, %v9468_v20  ;;  %v9539_v12 = vrot.slane %v9538_v36, 1 }
 0x775   : > { %v15401_v62 = vmul.f32 0.00390625, %v9470_v5  ;;  %v9540_v14 = vadd.f32 %v9539_v12, %v9538_v36 }
 0x777   : > { %v9541_v22 = vmul.f32 0.00390625, %v9540_v14  ;;  %v9542_v63 = vmul.f32 %v15401_v62, %v15401_v62  ;;  %v9573_v6 = vsub.f32 %v15385_v56, %v15401_v62  ;;  %v9575_v26 = vsub.f32 %v15396_v55, %v15401_v62 }
 0x778   : > { %v9571_v34 = vsub.f32 %v15369_v35, %v15401_v62  ;;  %v9572_v57 = vsub.f32 %v15379_v28, %v15401_v62  ;;  %v9574_v38 = vsub.f32 %v15391_v52, %v15401_v62  ;;  %v9544_v56 = vsub.f32 %v15135_v0, %v15401_v62  ;;  %v15714_v0 = vld [vmem:[#allocation10_spill] sm:$0xff] }
 0x779   : > { %v9543_v39 = vsub.f32 %v9541_v22, %v9542_v63  ;;  %v9545_v7 = vsub.f32 %v15138_v21, %v15401_v62  ;;  %v9546_v1 = vsub.f32 %v15145_v60, %v15401_v62  ;;  %v9547_v45 = vsub.f32 %v15148_v33, %v15401_v62  ;;  %v15715_v60 = vld [vmem:[#allocation16_spill] sm:$0xff]  ;;  %v15716_v33 = vld [vmem:[#allocation17_spill] sm:$0xff] }
 0x77a   : > { %v9548_v54 = vsub.f32 %v15155_v47, %v15401_v62  ;;  %v9549_v41 = vsub.f32 %v15158_v29, %v15401_v62  ;;  %v9550_v40 = vsub.f32 %v15165_v4, %v15401_v62  ;;  %v9551_v23 = vsub.f32 %v15714_v0, %v15401_v62  ;;  %v15717_v29 = vld [vmem:[#allocation26_spill] sm:$0xff] }
 0x77b   : > { %v9576_v18 = vadd.f32 1e-05, %v9543_v39  ;;  %v9552_v21 = vsub.f32 %v15171_v10, %v15401_v62  ;;  %v9553_v55 = vsub.f32 %v15715_v60, %v15401_v62  ;;  %v9554_v37 = vsub.f32 %v15716_v33, %v15401_v62  ;;  %v15479_v39 = vld [vmem:[%s15592_s4] ss:$0 sm:$0xff] }
 0x77c   : > { %v9555_v47 = vsub.f32 %v15182_v8, %v15401_v62  ;;  %v9556_v4 = vsub.f32 %v15717_v29, %v15401_v62  ;;  %v9557_v3 = vsub.f32 %v15195_v31, %v15401_v62  ;;  %v9558_v10 = vsub.f32 %v15198_v11, %v15401_v62 }
 0x77d   : > { %11621 = vrsqrt.f32 %v9576_v18  ;;  %vm9583_vm3 = vweird.f32 %v9576_v18  ;;  %v9559_v24 = vsub.f32 %v15201_v44, %v15401_v62  ;;  %v9560_v25 = vsub.f32 %v15204_v15, %v15401_v62 }
 0x77e   : > { %v9561_v8 = vsub.f32 %v15207_v9, %v15401_v62  ;;  %v9562_v49 = vsub.f32 %v15214_v32, %v15401_v62  ;;  %v9563_v31 = vsub.f32 %v15223_v30, %v15401_v62  ;;  %v9564_v11 = vsub.f32 %v15230_v58, %v15401_v62 }
 0x77f   : > { %v9565_v44 = vsub.f32 %v15330_v42, %v15401_v62  ;;  %v9566_v15 = vsub.f32 %v15339_v19, %v15401_v62  ;;  %v9567_v48 = vsub.f32 %v15346_v13, %v15401_v62  ;;  %v9568_v32 = vsub.f32 %v15353_v46, %v15401_v62  ;;  %v15472_v13 = vld [vmem:[%s15591_s3] ss:$0 sm:$0xff] }
 0x780   : > { %v9569_v30 = vsub.f32 %v15359_v27, %v15401_v62  ;;  %v9570_v20 = vsub.f32 %v15364_v61, %v15401_v62 }
 0x783   : > { %v11622_v50 = vpop.eup %11621 }
 0x784   : > { %v9578_v2 = vmul.f32 %v11622_v50, %v9576_v18  ;;  %vm9584_vm2 = vweird.f32 %v11622_v50 }
 0x785   : > { %vm9585_vm4 = vmor %vm9583_vm3, %vm9584_vm2 }
 0x786   : > { %v9579_v43 = vmul.f32 %v11622_v50, %v9578_v2 }
 0x788   : > { %v9580_v16 = vmul.f32 0.5, %v9579_v43 }
 0x78a   : > { %v9581_v17 = vsub.f32 1.5, %v9580_v16 }
 0x78c   : > { %v9582_v51 = vmul.f32 %v11622_v50, %v9581_v17 }
 0x78e   : > { %v9586_v9 = vsel %vm9585_vm4, %v11622_v50, %v9582_v51 }
 0x78f   : > { %v9616_v58 = vmul.f32 %v9586_v9, %v9573_v6  ;;  %v9618_v59 = vmul.f32 %v9586_v9, %v9575_v26  ;;  %v9587_v53 = vmul.f32 %v9586_v9, %v9544_v56  ;;  %v9588_v42 = vmul.f32 %v9586_v9, %v9545_v7 }
 0x790   : > { %v9589_v36 = vmul.f32 %v9586_v9, %v9546_v1  ;;  %v9590_v5 = vmul.f32 %v9586_v9, %v9547_v45  ;;  %v9591_v19 = vmul.f32 %v9586_v9, %v9548_v54  ;;  %v9592_v12 = vmul.f32 %v9586_v9, %v9549_v41 }
 0x791   : > { %v9648_v46 = vmul.f32 %v15472_v13, %v9616_v58  ;;  %v9650_v27 = vmul.f32 %v15472_v13, %v9618_v59  ;;  %v9593_v14 = vmul.f32 %v9586_v9, %v9550_v40  ;;  %v9594_v22 = vmul.f32 %v9586_v9, %v9551_v23 }
 0x792   : > { %v9595_v61 = vmul.f32 %v9586_v9, %v9552_v21  ;;  %v9596_v63 = vmul.f32 %v9586_v9, %v9553_v55  ;;  %v9597_v6 = vmul.f32 %v9586_v9, %v9554_v37  ;;  %v9598_v26 = vmul.f32 %v9586_v9, %v9555_v47 }
 0x793   : > { %v9680_v18 = vadd.f32 %v15479_v39, %v9648_v46  ;;  %v9682_v50 = vadd.f32 %v15479_v39, %v9650_v27  ;;  %v9599_v2 = vmul.f32 %v9586_v9, %v9556_v4  ;;  %v9600_v43 = vmul.f32 %v9586_v9, %v9557_v3 }
 0x794   : > { %v9601_v56 = vmul.f32 %v9586_v9, %v9558_v10  ;;  %v9602_v7 = vmul.f32 %v9586_v9, %v9559_v24  ;;  %v9603_v1 = vmul.f32 %v9586_v9, %v9560_v25  ;;  %v9604_v45 = vmul.f32 %v9586_v9, %v9561_v8 }
 0x795   : > { %v9712_v54 = vmax.f32 %v9680_v18, 0.0  ;;  %v9714_v16 = vmax.f32 %v9682_v50, 0.0  ;;  %v9605_v41 = vmul.f32 %v9586_v9, %v9562_v49  ;;  %v9606_v40 = vmul.f32 %v9586_v9, %v9563_v31 }
 0x796   : > { %v9607_v0 = vmul.f32 %v9586_v9, %v9564_v11  ;;  %v9608_v23 = vmul.f32 %v9586_v9, %v9565_v44  ;;  %v9609_v21 = vmul.f32 %v9586_v9, %v9566_v15  ;;  %v9610_v60 = vmul.f32 %v9586_v9, %v9567_v48 }
 0x797   : > { %v9730_v55 = vmax.f32 %v9712_v54, %v9714_v16  ;;  %v9611_v33 = vmul.f32 %v9586_v9, %v9568_v32  ;;  %v9612_v37 = vmul.f32 %v9586_v9, %v9569_v30  ;;  %v9613_v47 = vmul.f32 %v9586_v9, %v9570_v20 }
 0x798   : > { %v9614_v17 = vmul.f32 %v9586_v9, %v9571_v34  ;;  %v9615_v29 = vmul.f32 %v9586_v9, %v9572_v57  ;;  %v9617_v4 = vmul.f32 %v9586_v9, %v9574_v38  ;;  %v9619_v3 = vmul.f32 %v15472_v13, %v9587_v53 }
 0x799   : > { %9746 = vst [vmem:[#allocation3 + $0x78] sm:$0xff] %v9730_v55  ;;  %v9620_v10 = vmul.f32 %v15472_v13, %v9588_v42  ;;  %v9621_v24 = vmul.f32 %v15472_v13, %v9589_v36  ;;  %v9622_v25 = vmul.f32 %v15472_v13, %v9590_v5  ;;  %v9623_v35 = vmul.f32 %v15472_v13, %v9591_v19 }
 0x79a   : > { %v9624_v34 = vmul.f32 %v15472_v13, %v9592_v12  ;;  %v9625_v28 = vmul.f32 %v15472_v13, %v9593_v14  ;;  %v9626_v57 = vmul.f32 %v15472_v13, %v9594_v22  ;;  %v9627_v52 = vmul.f32 %v15472_v13, %v9595_v61 }
 0x79b   : > { %v9628_v62 = vmul.f32 %v15472_v13, %v9596_v63  ;;  %v9629_v38 = vmul.f32 %v15472_v13, %v9597_v6  ;;  %v9630_v51 = vmul.f32 %v15472_v13, %v9598_v26  ;;  %v9631_v8 = vmul.f32 %v15472_v13, %v9599_v2 }
 0x79c   : > { %v9632_v49 = vmul.f32 %v15472_v13, %v9600_v43  ;;  %v9633_v31 = vmul.f32 %v15472_v13, %v9601_v56  ;;  %v9634_v11 = vmul.f32 %v15472_v13, %v9602_v7  ;;  %v9635_v44 = vmul.f32 %v15472_v13, %v9603_v1 }
 0x79d   : > { %v9636_v15 = vmul.f32 %v15472_v13, %v9604_v45  ;;  %v9637_v48 = vmul.f32 %v15472_v13, %v9605_v41  ;;  %v9638_v9 = vmul.f32 %v15472_v13, %v9606_v40  ;;  %v9639_v32 = vmul.f32 %v15472_v13, %v9607_v0 }
 0x79e   : > { %v9640_v30 = vmul.f32 %v15472_v13, %v9608_v23  ;;  %v9641_v20 = vmul.f32 %v15472_v13, %v9609_v21  ;;  %v9642_v58 = vmul.f32 %v15472_v13, %v9610_v60  ;;  %v9643_v59 = vmul.f32 %v15472_v13, %v9611_v33 }
 0x79f   : > { %v9644_v53 = vmul.f32 %v15472_v13, %v9612_v37  ;;  %v9645_v42 = vmul.f32 %v15472_v13, %v9613_v47  ;;  %v9646_v36 = vmul.f32 %v15472_v13, %v9614_v17  ;;  %v9647_v5 = vmul.f32 %v15472_v13, %v9615_v29 }
 0x7a0   : > { %v9649_v19 = vmul.f32 %v15472_v13, %v9617_v4  ;;  %v9651_v12 = vadd.f32 %v15479_v39, %v9619_v3  ;;  %v9652_v46 = vadd.f32 %v15479_v39, %v9620_v10  ;;  %v9653_v27 = vadd.f32 %v15479_v39, %v9621_v24 }
 0x7a1   : > { %v9654_v14 = vadd.f32 %v15479_v39, %v9622_v25  ;;  %v9655_v22 = vadd.f32 %v15479_v39, %v9623_v35  ;;  %v9656_v61 = vadd.f32 %v15479_v39, %v9624_v34  ;;  %v9657_v63 = vadd.f32 %v15479_v39, %v9625_v28 }
 0x7a2   : > { %v9658_v6 = vadd.f32 %v15479_v39, %v9626_v57  ;;  %v9659_v26 = vadd.f32 %v15479_v39, %v9627_v52  ;;  %v9660_v13 = vadd.f32 %v15479_v39, %v9628_v62  ;;  %v9661_v18 = vadd.f32 %v15479_v39, %v9629_v38 }
 0x7a3   : > { %v9662_v50 = vadd.f32 %v15479_v39, %v9630_v51  ;;  %v9663_v2 = vadd.f32 %v15479_v39, %v9631_v8  ;;  %v9664_v43 = vadd.f32 %v15479_v39, %v9632_v49  ;;  %v9665_v56 = vadd.f32 %v15479_v39, %v9633_v31 }
 0x7a4   : > { %v9666_v7 = vadd.f32 %v15479_v39, %v9634_v11  ;;  %v9667_v1 = vadd.f32 %v15479_v39, %v9635_v44  ;;  %v9668_v45 = vadd.f32 %v15479_v39, %v9636_v15  ;;  %v9669_v54 = vadd.f32 %v15479_v39, %v9637_v48 }
 0x7a5   : > { %v9670_v16 = vadd.f32 %v15479_v39, %v9638_v9  ;;  %v9671_v41 = vadd.f32 %v15479_v39, %v9639_v32  ;;  %v9672_v40 = vadd.f32 %v15479_v39, %v9640_v30  ;;  %v9673_v0 = vadd.f32 %v15479_v39, %v9641_v20 }
 0x7a6   : > { %v9674_v23 = vadd.f32 %v15479_v39, %v9642_v58  ;;  %v9675_v21 = vadd.f32 %v15479_v39, %v9643_v59  ;;  %v9676_v60 = vadd.f32 %v15479_v39, %v9644_v53  ;;  %v9677_v55 = vadd.f32 %v15479_v39, %v9645_v42 }
 0x7a7   : > { %v9678_v33 = vadd.f32 %v15479_v39, %v9646_v36  ;;  %v9679_v37 = vadd.f32 %v15479_v39, %v9647_v5  ;;  %v9681_v47 = vadd.f32 %v15479_v39, %v9649_v19  ;;  %v9683_v17 = vmax.f32 %v9651_v12, 0.0 }
 0x7a8   : > { %v9684_v29 = vmax.f32 %v9652_v46, 0.0  ;;  %v9685_v4 = vmax.f32 %v9653_v27, 0.0  ;;  %v9686_v3 = vmax.f32 %v9654_v14, 0.0  ;;  %v9687_v10 = vmax.f32 %v9655_v22, 0.0 }
 0x7a9   : > { %v9688_v24 = vmax.f32 %v9656_v61, 0.0  ;;  %v9689_v25 = vmax.f32 %v9657_v63, 0.0  ;;  %v9690_v35 = vmax.f32 %v9658_v6, 0.0  ;;  %v9691_v34 = vmax.f32 %v9659_v26, 0.0 }
 0x7aa   : > { %v9692_v28 = vmax.f32 %v9660_v13, 0.0  ;;  %v9693_v57 = vmax.f32 %v9661_v18, 0.0  ;;  %v9694_v52 = vmax.f32 %v9662_v50, 0.0  ;;  %v9695_v62 = vmax.f32 %v9663_v2, 0.0 }
 0x7ab   : > { %v9696_v38 = vmax.f32 %v9664_v43, 0.0  ;;  %v9697_v51 = vmax.f32 %v9665_v56, 0.0  ;;  %v9698_v8 = vmax.f32 %v9666_v7, 0.0  ;;  %v9699_v49 = vmax.f32 %v9667_v1, 0.0 }
 0x7ac   : > { %v9700_v31 = vmax.f32 %v9668_v45, 0.0  ;;  %v9701_v11 = vmax.f32 %v9669_v54, 0.0  ;;  %v9702_v39 = vmax.f32 %v9670_v16, 0.0  ;;  %v9703_v44 = vmax.f32 %v9671_v41, 0.0 }
 0x7ad   : > { %v9704_v15 = vmax.f32 %v9672_v40, 0.0  ;;  %v9705_v48 = vmax.f32 %v9673_v0, 0.0  ;;  %v9706_v9 = vmax.f32 %v9674_v23, 0.0  ;;  %v9707_v32 = vmax.f32 %v9675_v21, 0.0 }
 0x7ae   : > { %v9708_v30 = vmax.f32 %v9676_v60, 0.0  ;;  %v9709_v20 = vmax.f32 %v9677_v55, 0.0  ;;  %v9710_v58 = vmax.f32 %v9678_v33, 0.0  ;;  %v9711_v59 = vmax.f32 %v9679_v37, 0.0 }
 0x7af   : > { %v9713_v53 = vmax.f32 %v9681_v47, 0.0  ;;  %v9715_v42 = vmax.f32 %v9683_v17, %v9685_v4  ;;  %v9716_v36 = vmax.f32 %v9684_v29, %v9686_v3  ;;  %v9717_v5 = vmax.f32 %v9687_v10, %v9689_v25 }
 0x7b0   : > { %v9718_v19 = vmax.f32 %v9688_v24, %v9690_v35  ;;  %v9719_v12 = vmax.f32 %v9691_v34, %v9693_v57  ;;  %v9720_v46 = vmax.f32 %v9692_v28, %v9694_v52  ;;  %v9721_v27 = vmax.f32 %v9695_v62, %v9697_v51 }
 0x7b1   : > { %v9722_v14 = vmax.f32 %v9696_v38, %v9698_v8  ;;  %v9723_v22 = vmax.f32 %v9699_v49, %v9701_v11  ;;  %v9724_v61 = vmax.f32 %v9700_v31, %v9702_v39  ;;  %v9725_v63 = vmax.f32 %v9703_v44, %v9705_v48  ;;  %9731 = vst [vmem:[#allocation3] sm:$0xff] %v9715_v42 }
 0x7b2   : > { %v9726_v6 = vmax.f32 %v9704_v15, %v9706_v9  ;;  %v9727_v26 = vmax.f32 %v9707_v32, %v9709_v20  ;;  %v9728_v13 = vmax.f32 %v9708_v30, %v9710_v58  ;;  %v9729_v18 = vmax.f32 %v9711_v59, %v9713_v53  ;;  %9732 = vst [vmem:[#allocation3 + $0x8] sm:$0xff] %v9716_v36 }
 0x7b3   : > { %9733 = vst [vmem:[#allocation3 + $0x10] sm:$0xff] %v9717_v5 }
 0x7b4   : > { %9734 = vst [vmem:[#allocation3 + $0x18] sm:$0xff] %v9718_v19 }
 0x7b5   : > { %9735 = vst [vmem:[#allocation3 + $0x20] sm:$0xff] %v9719_v12 }
 0x7b6   : > { %9736 = vst [vmem:[#allocation3 + $0x28] sm:$0xff] %v9720_v46 }
 0x7b7   : > { %9737 = vst [vmem:[#allocation3 + $0x30] sm:$0xff] %v9721_v27 }
 0x7b8   : > { %9738 = vst [vmem:[#allocation3 + $0x38] sm:$0xff] %v9722_v14 }
 0x7b9   : > { %9739 = vst [vmem:[#allocation3 + $0x40] sm:$0xff] %v9723_v22  ;;  %v9747_v50 = vld [vmem:[#allocation3] ss:$2 sm:$0xff]  ;;  %v9763_v2 = vld [vmem:[#allocation3 + $0x1] ss:$2 sm:$0xff] }
 0x7ba   : > { %9740 = vst [vmem:[#allocation3 + $0x48] sm:$0xff] %v9724_v61  ;;  %v9778_v43 = vmax.f32 %v9747_v50, %v9763_v2 }
 0x7bb   : > { %9741 = vst [vmem:[#allocation3 + $0x50] sm:$0xff] %v9725_v63  ;;  %v9749_v56 = vld [vmem:[#allocation3 + $0x10] ss:$2 sm:$0xff]  ;;  %v9765_v7 = vld [vmem:[#allocation3 + $0x11] ss:$2 sm:$0xff] }
 0x7bc   : > { %9742 = vst [vmem:[#allocation3 + $0x58] sm:$0xff] %v9726_v6  ;;  %v9779_v1 = vmax.f32 %v9749_v56, %v9765_v7 }
 0x7bd   : > { %9743 = vst [vmem:[#allocation3 + $0x60] sm:$0xff] %v9727_v26  ;;  %v9751_v45 = vld [vmem:[#allocation3 + $0x20] ss:$2 sm:$0xff]  ;;  %v9767_v54 = vld [vmem:[#allocation3 + $0x21] ss:$2 sm:$0xff] }
 0x7be   : > { %9744 = vst [vmem:[#allocation3 + $0x68] sm:$0xff] %v9728_v13  ;;  %v9780_v16 = vmax.f32 %v9751_v45, %v9767_v54  ;;  %v11525_v41 = vpack.c.bf16 %v9779_v1, %v9778_v43 }
 0x7bf   : > { %9745 = vst [vmem:[#allocation3 + $0x70] sm:$0xff] %v9729_v18  ;;  %v9753_v40 = vld [vmem:[#allocation3 + $0x30] ss:$2 sm:$0xff]  ;;  %v9769_v0 = vld [vmem:[#allocation3 + $0x31] ss:$2 sm:$0xff] }
 0x7c0   : > { %v9781_v23 = vmax.f32 %v9753_v40, %v9769_v0  ;;  %11526 = vst [vmem:[%s234_s26] sm:$0xff] %v11525_v41  }
 0x7c1   : > { %v9755_v21 = vld [vmem:[#allocation3 + $0x40] ss:$2 sm:$0xff]  ;;  %v9771_v60 = vld [vmem:[#allocation3 + $0x41] ss:$2 sm:$0xff] }
 0x7c2   : > { %v9782_v55 = vmax.f32 %v9755_v21, %v9771_v60  ;;  %v11530_v33 = vpack.c.bf16 %v9781_v23, %v9780_v16 }
 0x7c3   : > { %v9757_v37 = vld [vmem:[#allocation3 + $0x50] ss:$2 sm:$0xff]  ;;  %v9773_v47 = vld [vmem:[#allocation3 + $0x51] ss:$2 sm:$0xff] }
 0x7c4   : > { %v9783_v17 = vmax.f32 %v9757_v37, %v9773_v47  ;;  %11542 = vst [vmem:[%s234_s26 + $0x8] sm:$0xff] %v11530_v33  }
 0x7c5   : > { %v9759_v29 = vld [vmem:[#allocation3 + $0x60] ss:$2 sm:$0xff]  ;;  %v9775_v4 = vld [vmem:[#allocation3 + $0x61] ss:$2 sm:$0xff] }
 0x7c6   : > { %v9761_v3 = vld [vmem:[#allocation3 + $0x70] ss:$2 sm:$0xff]  ;;  %v9777_v10 = vld [vmem:[#allocation3 + $0x71] ss:$2 sm:$0xff]  ;;  %v9784_v24 = vmax.f32 %v9759_v29, %v9775_v4  ;;  %v11535_v25 = vpack.c.bf16 %v9783_v17, %v9782_v55 }
 0x7c7   : > { %v9785_v35 = vmax.f32 %v9761_v3, %v9777_v10 }
 0x7c8   : > { %11543 = vst [vmem:[%s234_s26 + $0x10] sm:$0xff] %v11535_v25  }
 0x7c9   : > { %v11540_v34 = vpack.c.bf16 %v9785_v35, %v9784_v24 }
 0x7cb   : > { %11544 = vst [vmem:[%s234_s26 + $0x18] sm:$0xff] %v11540_v34  }
 0x7cc   : > { %11726 = shalt.err (!%p11723_p8)
}
 0x7cd   : > { %s11771_s17 = smov 64   ;;  %s11772_s23 = smov 4  }
 0x7ce   : > { %11566 = dma.vmem_to_hbm [thread:$0]  (%p11841_p5), %s9816_s9, 512, %s9818_s22, %s9803_s8, %s11771_s17, %s11771_s17, %s11772_s23  }
 0x7cf PF: > { %p11578_p9 = scmp.ge.s32.totalorder %s11765_s21, 2  ;;  %s9832_s25 = sand.u32 1, %s11753_s18  }
 0x7d0   : > { %s9833_s26 = scalar_lea.sflag [#allocation6], %s9832_s25 }
 0x7d1   : > { %p11573_p10 = pnand %p11578_p9, %p11845_p6 }
 0x7d3   : > { %p11574_p11 = pneg %p11573_p10 }
 0x7d5   : > { %11748 = dma.done.wait (%p11574_p11), %s9833_s26, 512  }
 0x7d6   : > { %11750 = vsyncadd (%p11574_p11), %s9833_s26, 4294966784  ;;  %p16_p12 = scmp.ge.s32.totalorder %s11828_s24, 4   ;;  %s15718_s18 = smov %s11757_s19 }
 0x7d7   : > { %s15719_s19 = smov %s11761_s20  ;;  %s15720_s20 = smov %s11839_s27 }
 0x7d8   : > { %s15721_s21 = smov %s11828_s24  ;;  %18 = sbr.rel (!%p16_p12) target bundleno = 4 (0x4), region = 116 }
 0x7dd   :  { %9839 = vsyncpa [#allocation5], 1 }
 0x7de   :  { %9841 = vsyncpa [#allocation5 + $0x1], 1 }
 0x7df   :  { %9842 = vsyncpa [#allocation6], 1 }
 0x7e0   :  { %9844 = vsyncpa [#allocation6 + $0x1], 1 }

</bundles_post_ra>
